<compile_context>
chip_gen: v7x
topology: tpu7x:2x2x1
jax: 0.10.0
libtpu: 0.0.40
codegen_flags: <defaults>
</compile_context>

<pallas_src>
import numpy as np
import jax
import jax.numpy as jnp
from jax import lax
from jax.experimental import pallas as pl
from jax.experimental.pallas import tpu as pltpu

# ------------------------- small DCCRN configuration -------------------------
WIN_LEN = 64
WIN_INC = 16
FFT_LEN = 64
RNN_LAYERS = 2
RNN_DIM = 32
KH, KW = 5, 2               # kernel_size=(5, 2)
KERNEL_NUM = [8, 8, 16]     # -> internal [2, 8, 8, 16]
KN = [2] + KERNEL_NUM
HIDDEN_DIM = FFT_LEN // (2 ** len(KN))   # 4


def _round_up(x, m):
    return ((x + m - 1) // m) * m


def _pick_bm(m):
    """Row tile (<=128, multiple of 8) that minimizes dead-row padding."""
    n_tiles = -(-m // 128)
    return _round_up(-(-m // n_tiles), 8)


def _pick_bn(n):
    """Prefer 256-wide lane tiles (fills a 256-wide MXU) unless they add pad."""
    return 256 if _round_up(n, 256) <= _round_up(n, 128) else 128


# ------------------------------ Pallas: matmul -------------------------------
def _matmul_kernel_single(a_ref, b_ref, o_ref):
    # Single K block: no accumulator scratch, no init/finalize branches.
    o_ref[...] = jnp.dot(a_ref[...], b_ref[...],
                         preferred_element_type=jnp.float32).astype(o_ref.dtype)


def _matmul_kernel_acc(a_ref, b_ref, o_ref, acc_ref):
    k = pl.program_id(2)

    @pl.when(k == 0)
    def _():
        acc_ref[...] = jnp.zeros_like(acc_ref)

    acc_ref[...] += jnp.dot(a_ref[...], b_ref[...],
                            preferred_element_type=jnp.float32)

    @pl.when(k == pl.num_programs(2) - 1)
    def _():
        # store the output tile only once per (i, j)
        o_ref[...] = acc_ref[...].astype(o_ref.dtype)


def pallas_matmul(a, b):
    """f32 (M,K) @ (K,N) -> (M,N) via a tiled Pallas MXU kernel."""
    a = a.astype(jnp.float32)
    b = b.astype(jnp.float32)
    M, K = a.shape
    K2, N = b.shape
    assert K == K2
    bm = _pick_bm(M)
    bn = _pick_bn(N)
    bk = min(512, _round_up(K, 128))
    Mp, Kp, Np = _round_up(M, bm), _round_up(K, bk), _round_up(N, bn)
    a_p = jnp.pad(a, ((0, Mp - M), (0, Kp - K)))
    b_p = jnp.pad(b, ((0, Kp - K), (0, Np - N)))
    nk = Kp // bk
    if nk == 1:
        out = pl.pallas_call(
            _matmul_kernel_single,
            out_shape=jax.ShapeDtypeStruct((Mp, Np), jnp.float32),
            grid_spec=pltpu.PrefetchScalarGridSpec(
                num_scalar_prefetch=0,
                grid=(Mp // bm, Np // bn),
                in_specs=[pl.BlockSpec((bm, bk), lambda i, j: (i, 0)),
                          pl.BlockSpec((bk, bn), lambda i, j: (0, j))],
                out_specs=pl.BlockSpec((bm, bn), lambda i, j: (i, j))),
            compiler_params=pltpu.CompilerParams(
                dimension_semantics=("parallel", "parallel")),
        )(a_p, b_p)
    else:
        out = pl.pallas_call(
            _matmul_kernel_acc,
            out_shape=jax.ShapeDtypeStruct((Mp, Np), jnp.float32),
            grid_spec=pltpu.PrefetchScalarGridSpec(
                num_scalar_prefetch=0,
                grid=(Mp // bm, Np // bn, nk),
                in_specs=[pl.BlockSpec((bm, bk), lambda i, j, k: (i, k)),
                          pl.BlockSpec((bk, bn), lambda i, j, k: (k, j))],
                out_specs=pl.BlockSpec((bm, bn), lambda i, j, k: (i, j)),
                scratch_shapes=[pltpu.VMEM((bm, bn), jnp.float32)]),
            compiler_params=pltpu.CompilerParams(
                dimension_semantics=("parallel", "parallel", "arbitrary")),
        )(a_p, b_p)
    return out[:M, :N]


# ------------------- Pallas: fused LSTM stack + projection --------------------
def _sigmoid(x):
    return 1.0 / (1.0 + jnp.exp(-x))


def fused_rnn_projection(x, lstm_params, proj_w, proj_b):
    """x: (T, B, In) -> (T, B, In).

    One pallas_call running: x @ W_ih0 for the whole sequence, the two LSTM
    recurrences with torch gate order (i, f, g, o), and the final Linear
    projection.  Everything stays in VMEM; h/c live in vregs across the
    (unrolled) time loop; batch padded to 8 sublanes.
    """
    T, B, In = x.shape
    H = RNN_DIM
    Bp = 8
    xp = jnp.pad(x.astype(jnp.float32), ((0, 0), (0, Bp - B), (0, 0)))
    xp2 = xp.reshape(T * Bp, In)

    wih0 = lstm_params[0]["w_ih"].T                                  # (In, 4H)
    whh0 = lstm_params[0]["w_hh"].T                                  # (H, 4H)
    b0 = (lstm_params[0]["b_ih"] + lstm_params[0]["b_hh"]).reshape(1, 4 * H)
    wih1 = lstm_params[1]["w_ih"].T                                  # (H, 4H)
    whh1 = lstm_params[1]["w_hh"].T                                  # (H, 4H)
    b1 = (lstm_params[1]["b_ih"] + lstm_params[1]["b_hh"]).reshape(1, 4 * H)
    pwt = proj_w.T                                                   # (H, In)
    pb = proj_b.reshape(1, In)

    def kernel(x_ref, wih0_ref, whh0_ref, b0_ref, wih1_ref, whh1_ref, b1_ref,
               pw_ref, pb_ref, o_ref, xg_s, h1_s):
        # Layer-0 input-to-gate matmul for the whole sequence at once.
        xg_s[...] = jnp.dot(x_ref[...], wih0_ref[...],
                            preferred_element_type=jnp.float32) + b0_ref[...]

        def gates(g, c_prev):
            i = _sigmoid(g[:, 0:H])
            f = _sigmoid(g[:, H:2 * H])
            gg = jnp.tanh(g[:, 2 * H:3 * H])
            o = _sigmoid(g[:, 3 * H:4 * H])
            c = f * c_prev + i * gg
            h = o * jnp.tanh(c)
            return h, c

        def step(t, carry):
            h0, c0, h1, c1 = carry
            row = pl.multiple_of(t * Bp, Bp)
            g0 = xg_s[pl.ds(row, Bp), :] + jnp.dot(
                h0, whh0_ref[...], preferred_element_type=jnp.float32)
            h0, c0 = gates(g0, c0)
            g1 = (jnp.dot(h0, wih1_ref[...], preferred_element_type=jnp.float32)
                  + b1_ref[...]
                  + jnp.dot(h1, whh1_ref[...], preferred_element_type=jnp.float32))
            h1, c1 = gates(g1, c1)
            h1_s[pl.ds(row, Bp), :] = h1
            return (h0, c0, h1, c1)

        z = jnp.zeros((Bp, H), jnp.float32)
        lax.fori_loop(0, T, step, (z, z, z, z), unroll=True)

        # Final Linear projection over the whole sequence at once.
        o_ref[...] = jnp.dot(h1_s[...], pw_ref[...],
                             preferred_element_type=jnp.float32) + pb_ref[...]

    out = pl.pallas_call(
        kernel,
        out_shape=jax.ShapeDtypeStruct((T * Bp, In), jnp.float32),
        scratch_shapes=[pltpu.VMEM((T * Bp, 4 * H), jnp.float32),
                        pltpu.VMEM((T * Bp, H), jnp.float32)],
    )(xp2, wih0, whh0, b0, wih1, whh1, b1, pwt, pb)
    return out.reshape(T, Bp, In)[:, :B]


# --------------------- Pallas: masking ('E' mode, trig-free) -----------------
def _mask_kernel(r_ref, i_ref, mr_ref, mi_ref, or_ref, oi_ref):
    r = r_ref[...]
    im = i_ref[...]
    mr = mr_ref[...]
    mi = mi_ref[...]
    mask_mag = jnp.sqrt(mr * mr + mi * mi)
    t = jnp.tanh(mask_mag)
    inv = 1.0 / (mask_mag + 1e-8)
    cos_mp = mr * inv
    sin_mp = mi * inv
    # est = tanh(|m|) * |spec| * exp(j*(spec_phase + mask_phase))
    or_ref[...] = t * (r * cos_mp - im * sin_mp)
    oi_ref[...] = t * (im * cos_mp + r * sin_mp)


def apply_mask_E(real, imag, mask_real, mask_imag):
    """Inputs (B, d, T), flattened to (B, d*T) so the kernel's last dim is
    lane-dense instead of T=13."""
    B, d, T = real.shape

    def flat(a):
        return a.astype(jnp.float32).reshape(B, d * T)

    sds = jax.ShapeDtypeStruct((B, d * T), jnp.float32)
    er, ei = pl.pallas_call(_mask_kernel, out_shape=(sds, sds))(
        flat(real), flat(imag), flat(mask_real), flat(mask_imag))
    return er.reshape(B, d, T), ei.reshape(B, d, T)


# --------------------------- STFT / iSTFT (Conv form) -------------------------
def init_stft_kernels(win_len, fft_len, invers=False):
    window = 0.5 * (1.0 - np.cos(2.0 * np.pi * np.arange(win_len) / win_len))  # periodic hann
    fourier_basis = np.fft.rfft(np.eye(fft_len))[:win_len]          # (win, fft//2+1) complex
    kernel = np.concatenate([np.real(fourier_basis),
                             np.imag(fourier_basis)], axis=1).T      # (fft+2, win)
    if invers:
        kernel = np.linalg.pinv(kernel).T
    kernel = kernel * window
    return kernel.astype(np.float32), window.astype(np.float32)


def conv_stft(x, stft_kernel):
    """x: (B, L) -> complex spec (B, FFT_LEN+2, T)."""
    B = x.shape[0]
    pad = WIN_LEN - WIN_INC
    xp = jnp.pad(x, ((0, 0), (pad, pad)))
    T = (xp.shape[1] - WIN_LEN) // WIN_INC + 1
    idx = jnp.arange(T)[:, None] * WIN_INC + jnp.arange(WIN_LEN)[None, :]
    frames = xp[:, idx]                              # (B, T, WIN)
    out = pallas_matmul(frames.reshape(B * T, WIN_LEN), stft_kernel.T)
    return out.reshape(B, T, -1).transpose(0, 2, 1)  # (B, FFT+2, T)


def conv_istft(spec, istft_kernel, window):
    """spec: (B, FFT_LEN+2, T) -> waveform (B, 1, L)."""
    B, Cd, T = spec.shape
    frames = pallas_matmul(spec.transpose(0, 2, 1).reshape(B * T, Cd), istft_kernel)
    frames = frames.reshape(B, T, WIN_LEN)
    L = (T - 1) * WIN_INC + WIN_LEN
    idx = (jnp.arange(T)[:, None] * WIN_INC + jnp.arange(WIN_LEN)[None, :]).reshape(-1)
    out = jnp.zeros((B, L), jnp.float32).at[:, idx].add(frames.reshape(B, -1))
    wsq = jnp.tile(window ** 2, (T,))
    coff = jnp.zeros((L,), jnp.float32).at[idx].add(wsq)
    out = out / (coff[None, :] + 1e-8)
    trim = WIN_LEN - WIN_INC
    return out[:, trim:L - trim][:, None, :]


# -------------------- complex conv building blocks (channel-major) ------------
def im2col_cm(x, kh, kw, sh, sw):
    """x: (C, B, H, W) already padded -> patches (C*kh*kw, B*Ho*Wo), Ho, Wo."""
    C, B, H, W = x.shape
    Ho = (H - kh) // sh + 1
    Wo = (W - kw) // sw + 1
    hi = (jnp.arange(Ho) * sh)[:, None] + jnp.arange(kh)[None, :]   # (Ho, kh)
    wi = (jnp.arange(Wo) * sw)[:, None] + jnp.arange(kw)[None, :]   # (Wo, kw)
    p = x[:, :, hi][:, :, :, :, wi]                                 # (C,B,Ho,kh,Wo,kw)
    p = p.transpose(0, 3, 5, 1, 2, 4).reshape(C * kh * kw, B * Ho * Wo)
    return p, Ho, Wo


def _complex_conv_matmul(p_r, p_i, wr, wi, br, bi, B, Fo, To):
    """Swapped orientation: (2Co2, 2K) @ (2K, M) so M = B*Fo*To is lane-dense.
    p_r/p_i: (K, M) patches; wr/wi: (Co2, K).  Returns (2*Co2, B, Fo, To)."""
    Co2, K = wr.shape
    P = jnp.concatenate([p_r, p_i], axis=0)                      # (2K, M)
    W = jnp.concatenate(
        [jnp.concatenate([wr, -wi], axis=1),
         jnp.concatenate([wi, wr], axis=1)], axis=0)             # (2Co2, 2K)
    out = pallas_matmul(W, P)                                    # (2Co2, M)
    bias = jnp.concatenate([br - bi, br + bi])[:, None]
    out = out + bias
    return out.reshape(2 * Co2, B, Fo, To)


def complex_conv2d(x, wr, wi, br, bi, sh=2, sw=1, pad_f=2, pad_t_causal=1):
    """cConv2d: causal time pad, symmetric freq pad.  x: (2c, B, F, T);
    wr/wi: (Co2, Ci2, KH, KW) torch layout."""
    c = x.shape[0] // 2
    B = x.shape[1]
    pad_cfg = ((0, 0), (0, 0), (pad_f, pad_f), (pad_t_causal, 0))
    xp = jnp.pad(x, pad_cfg)
    pr, Fo, To = im2col_cm(xp[:c], KH, KW, sh, sw)
    pi, _, _ = im2col_cm(xp[c:], KH, KW, sh, sw)
    K = c * KH * KW
    return _complex_conv_matmul(pr, pi, wr.reshape(-1, K), wi.reshape(-1, K),
                                br, bi, B, Fo, To)


def complex_conv_transpose2d(x, wr, wi, br, bi, sh=2, sw=1, pad=(2, 0), out_pad=(1, 0)):
    """cConvTranspose2d.  x: (2c, B, F, T); wr/wi torch layout (Ci2, Co2, KH, KW)."""
    c = x.shape[0] // 2
    B = x.shape[1]

    def prep(z):
        Cz, Bz, Fz, Tz = z.shape
        zd = jnp.zeros((Cz, Bz, (Fz - 1) * sh + 1, (Tz - 1) * sw + 1), z.dtype)
        zd = zd.at[:, :, ::sh, ::sw].set(z)
        pc = ((0, 0), (0, 0),
              (KH - 1 - pad[0], KH - 1 - pad[0] + out_pad[0]),
              (KW - 1 - pad[1], KW - 1 - pad[1] + out_pad[1]))
        return jnp.pad(zd, pc)

    pr, Fo, To = im2col_cm(prep(x[:c]), KH, KW, 1, 1)
    pi, _, _ = im2col_cm(prep(x[c:]), KH, KW, 1, 1)
    wr_c = jnp.flip(jnp.transpose(wr, (1, 0, 2, 3)), axis=(2, 3))    # (Co2, Ci2, KH, KW)
    wi_c = jnp.flip(jnp.transpose(wi, (1, 0, 2, 3)), axis=(2, 3))
    K = c * KH * KW
    return _complex_conv_matmul(pr, pi, wr_c.reshape(-1, K), wi_c.reshape(-1, K),
                                br, bi, B, Fo, To)


def complex_bn(x, p, eps=1e-5):
    """Complex (whitening) batch-norm with batch statistics, channel-major."""
    c = x.shape[0] // 2
    xr, xi = x[:c], x[c:]
    ax = (1, 2, 3)
    xr = xr - xr.mean(ax, keepdims=True)
    xi = xi - xi.mean(ax, keepdims=True)
    Vrr = (xr * xr).mean(ax, keepdims=True) + eps
    Vri = (xr * xi).mean(ax, keepdims=True)
    Vii = (xi * xi).mean(ax, keepdims=True) + eps
    tau = Vrr + Vii
    delta = Vrr * Vii - Vri * Vri
    s = jnp.sqrt(delta)
    t = jnp.sqrt(tau + 2.0 * s)
    rst = 1.0 / (s * t)
    Urr = (s + Vii) * rst
    Uii = (s + Vrr) * rst
    Uri = -Vri * rst

    def v(a):
        return a.reshape(c, 1, 1, 1)

    Wrr, Wri, Wii = v(p["Wrr"]), v(p["Wri"]), v(p["Wii"])
    Zrr = Wrr * Urr + Wri * Uri
    Zri = Wrr * Uri + Wri * Uii
    Zir = Wri * Urr + Wii * Uri
    Zii = Wri * Uri + Wii * Uii
    yr = Zrr * xr + Zri * xi + v(p["Br"])
    yi = Zir * xr + Zii * xi + v(p["Bi"])
    return jnp.concatenate([yr, yi], axis=0)


def prelu(x, alpha):
    return jnp.where(x >= 0, x, alpha * x)


def complex_cat(a, b):
    ca, cb = a.shape[0] // 2, b.shape[0] // 2
    return jnp.concatenate([a[:ca], b[:cb], a[ca:], b[cb:]], axis=0)


def encoder_block(x, p):
    y = complex_conv2d(x, p["wr"], p["wi"], p["br"], p["bi"])
    y = complex_bn(y, p["bn"])
    return prelu(y, p["alpha"])


def decoder_block(x, p):
    y = complex_conv_transpose2d(x, p["wr"], p["wi"], p["br"], p["bi"])
    y = complex_bn(y, p["bn"])
    return prelu(y, p["alpha"])


# ------------------------------- parameters ----------------------------------
def init_params(key):
    keys = iter(jax.random.split(key, 64))

    def nrm(shape, std=0.05):
        return (jax.random.normal(next(keys), shape) * std).astype(jnp.float32)

    def bn_params(c):
        return dict(Wrr=jnp.ones((c,), jnp.float32),
                    Wri=jnp.full((c,), 0.1, jnp.float32),
                    Wii=jnp.ones((c,), jnp.float32),
                    Br=jnp.zeros((c,), jnp.float32),
                    Bi=jnp.zeros((c,), jnp.float32))

    encoders = []
    for i in range(len(KN) - 1):
        ci2, co2 = KN[i] // 2, KN[i + 1] // 2
        encoders.append(dict(
            wr=nrm((co2, ci2, KH, KW)), wi=nrm((co2, ci2, KH, KW)),
            br=jnp.zeros((co2,), jnp.float32), bi=jnp.zeros((co2,), jnp.float32),
            bn=bn_params(co2), alpha=jnp.array(0.25, jnp.float32)))

    decoders = []
    for i in range(len(KN) - 1, 0, -1):
        ci2 = KN[i]             # (KN[i] * 2) // 2 after skip concat
        co2 = KN[i - 1] // 2
        decoders.append(dict(
            wr=nrm((ci2, co2, KH, KW)), wi=nrm((ci2, co2, KH, KW)),
            br=jnp.zeros((co2,), jnp.float32), bi=jnp.zeros((co2,), jnp.float32),
            bn=bn_params(co2), alpha=jnp.array(0.25, jnp.float32)))

    rnn_in = HIDDEN_DIM * KN[-1]
    lstm = []
    for l in range(RNN_LAYERS):
        isz = rnn_in if l == 0 else RNN_DIM
        lstm.append(dict(
            w_ih=nrm((4 * RNN_DIM, isz), 0.1), w_hh=nrm((4 * RNN_DIM, RNN_DIM), 0.1),
            b_ih=jnp.zeros((4 * RNN_DIM,), jnp.float32),
            b_hh=jnp.zeros((4 * RNN_DIM,), jnp.float32)))

    proj_w = nrm((rnn_in, RNN_DIM), 0.1)
    proj_b = jnp.zeros((rnn_in,), jnp.float32)

    stft_k, window = init_stft_kernels(WIN_LEN, FFT_LEN, invers=False)
    istft_k, _ = init_stft_kernels(WIN_LEN, FFT_LEN, invers=True)
    return dict(encoders=encoders, decoders=decoders, lstm=lstm,
                proj_w=proj_w, proj_b=proj_b,
                stft_kernel=jnp.asarray(stft_k),
                istft_kernel=jnp.asarray(istft_k),
                window=jnp.asarray(window))


# -------------------------------- DCCRN forward -------------------------------
def dccrn_forward(params, inputs):
    specs = conv_stft(inputs, params["stft_kernel"])       # (B, FFT+2, T)
    d = FFT_LEN // 2 + 1
    real = specs[:, :d]                                     # (B, d, T)
    imag = specs[:, d:]
    # channel-major (C, B, F, T) layout through the U-net
    out = jnp.stack([real, imag], axis=0)[:, :, 1:]         # (2, B, d-1, T)

    enc_outs = []
    for p in params["encoders"]:
        out = encoder_block(out, p)
        enc_outs.append(out)

    C, B, D, T = out.shape
    rnn_in = jnp.transpose(out, (3, 1, 0, 2)).reshape(T, B, C * D)   # (T,B,C*D)
    proj = fused_rnn_projection(rnn_in, params["lstm"],
                                params["proj_w"], params["proj_b"])  # (T,B,C*D)
    out = proj.reshape(T, B, C, D).transpose(2, 1, 3, 0)    # (C, B, D, T)

    for i, p in enumerate(params["decoders"]):
        out = complex_cat(out, enc_outs[-1 - i])
        out = decoder_block(out, p)
        out = out[..., 1:]

    mask_real = jnp.pad(out[0], ((0, 0), (1, 0), (0, 0)))   # (B, d, T)
    mask_imag = jnp.pad(out[1], ((0, 0), (1, 0), (0, 0)))
    est_real, est_imag = apply_mask_E(real, imag, mask_real, mask_imag)
    out_spec = jnp.concatenate([est_real, est_imag], axis=1)
    out_wav = conv_istft(out_spec, params["istft_kernel"], params["window"])
    out_wav = jnp.clip(out_wav, -1.0, 1.0)
    return out_spec, out_wav


# ------------------------------------ main ------------------------------------
if __name__ == "__main__":
    key = jax.random.PRNGKey(0)
    k_w, k_x = jax.random.split(key)
    params = init_params(k_w)
    # batch=2, 160 audio samples -> 13 STFT frames with win=64 / hop=16.
    inputs = (jax.random.normal(k_x, (2, 160)) * 0.1).astype(jnp.float32)

    fwd = jax.jit(dccrn_forward)
    out_spec, out_wav = fwd(params, inputs)
    jax.block_until_ready(out_spec)
    jax.block_until_ready(out_wav)

    assert out_spec.shape == (2, FFT_LEN + 2, 13)
    assert out_wav.shape == (2, 1, 160)
    assert bool(jnp.all(jnp.isfinite(out_spec))) and bool(jnp.all(jnp.isfinite(out_wav)))
    print("KERNEL_OK")
</pallas_src>

<mosaic_0001>
module attributes {stable_mosaic.version = 11 : i64} {
  func.func private @main(%arg0: i32) attributes {dimension_semantics = [#tpu.dimension_semantics<core_parallel>], iteration_bounds = array<i64: 2>, tpu.core_type = #tpu.core_type<sc_scalar_subcore>, window_params = []} {
    return
  }
}

module attributes {stable_mosaic.version = 11 : i64} {
  func.func private @main(%arg0: i32) attributes {dimension_semantics = [#tpu.dimension_semantics<core_parallel>], iteration_bounds = array<i64: 2>, tpu.core_type = #tpu.core_type<sc_scalar_subcore>, window_params = []} {
    return
  }
}

module attributes {stable_mosaic.version = 11 : i64} {
  func.func @_matmul_kernel_single(%arg0: i32, %arg1: i32, %arg2: memref<32x128xf32, #tpu.memory_space<vmem>>, %arg3: memref<128x128xf32, #tpu.memory_space<vmem>>, %arg4: memref<32x128xf32, #tpu.memory_space<vmem>>) attributes {dimension_semantics = [#tpu.dimension_semantics<parallel>, #tpu.dimension_semantics<parallel>], iteration_bounds = array<i64: 1, 1>, scalar_prefetch = 0 : i64, scratch_operands = 0 : i64, tpu.core_type = #tpu.core_type<tc>, window_params = [{transform_indices = @transform_0, window_bounds = array<i64: 32, 128>}, {transform_indices = @transform_1, window_bounds = array<i64: 128, 128>}, {transform_indices = @transform_2, window_bounds = array<i64: 32, 128>}]} {
    %c0 = arith.constant 0 : index
    %c0_0 = arith.constant 0 : index
    %0 = vector.load %arg2[%c0, %c0_0] : memref<32x128xf32, #tpu.memory_space<vmem>>, vector<32x128xf32>
    %c0_1 = arith.constant 0 : index
    %c0_2 = arith.constant 0 : index
    %1 = vector.load %arg3[%c0_1, %c0_2] : memref<128x128xf32, #tpu.memory_space<vmem>>, vector<128x128xf32>
    %cst = arith.constant dense<0.000000e+00> : vector<32x128xf32>
    %2 = tpu.matmul %0, %1, %cst {dimension_numbers = #tpu.dot_dimension_numbers<[1], [0], [0], [1], [0, 0, 1, 1], [], []>} : vector<32x128xf32>, vector<128x128xf32>, vector<32x128xf32> -> vector<32x128xf32>
    %c0_3 = arith.constant 0 : index
    %c0_4 = arith.constant 0 : index
    %3 = vector.load %arg4[%c0_3, %c0_4] : memref<32x128xf32, #tpu.memory_space<vmem>>, vector<32x128xf32>
    tpu.vector_store %arg4[%c0_3, %c0_4], %2 {strides = array<i32>} : memref<32x128xf32, #tpu.memory_space<vmem>>, vector<32x128xf32>,
    return
  }
  func.func @transform_0(%arg0: i32, %arg1: i32) -> (i32, i32) {
    %c0_i32 = arith.constant 0 : i32
    %c0_i32_0 = arith.constant 0 : i32
    return %arg0, %c0_i32 : i32, i32
  }
  func.func @transform_1(%arg0: i32, %arg1: i32) -> (i32, i32) {
    %c0_i32 = arith.constant 0 : i32
    %c0_i32_0 = arith.constant 0 : i32
    return %c0_i32, %arg1 : i32, i32
  }
  func.func @transform_2(%arg0: i32, %arg1: i32) -> (i32, i32) {
    %c0_i32 = arith.constant 0 : i32
    return %arg0, %arg1 : i32, i32
  }
}

module attributes {stable_mosaic.version = 11 : i64} {
  func.func @_matmul_kernel_single(%arg0: i32, %arg1: i32, %arg2: memref<8x128xf32, #tpu.memory_space<vmem>>, %arg3: memref<128x256xf32, #tpu.memory_space<vmem>>, %arg4: memref<8x256xf32, #tpu.memory_space<vmem>>) attributes {dimension_semantics = [#tpu.dimension_semantics<parallel>, #tpu.dimension_semantics<parallel>], iteration_bounds = array<i64: 1, 2>, scalar_prefetch = 0 : i64, scratch_operands = 0 : i64, tpu.core_type = #tpu.core_type<tc>, window_params = [{transform_indices = @transform_0, window_bounds = array<i64: 8, 128>}, {transform_indices = @transform_1, window_bounds = array<i64: 128, 256>}, {transform_indices = @transform_2, window_bounds = array<i64: 8, 256>}]} {
    %c0 = arith.constant 0 : index
    %c0_0 = arith.constant 0 : index
    %0 = vector.load %arg2[%c0, %c0_0] : memref<8x128xf32, #tpu.memory_space<vmem>>, vector<8x128xf32>
    %c0_1 = arith.constant 0 : index
    %c0_2 = arith.constant 0 : index
    %1 = vector.load %arg3[%c0_1, %c0_2] : memref<128x256xf32, #tpu.memory_space<vmem>>, vector<128x256xf32>
    %cst = arith.constant dense<0.000000e+00> : vector<8x256xf32>
    %2 = tpu.matmul %0, %1, %cst {dimension_numbers = #tpu.dot_dimension_numbers<[1], [0], [0], [1], [0, 0, 1, 1], [], []>} : vector<8x128xf32>, vector<128x256xf32>, vector<8x256xf32> -> vector<8x256xf32>
    %c0_3 = arith.constant 0 : index
    %c0_4 = arith.constant 0 : index
    %3 = vector.load %arg4[%c0_3, %c0_4] : memref<8x256xf32, #tpu.memory_space<vmem>>, vector<8x256xf32>
    tpu.vector_store %arg4[%c0_3, %c0_4], %2 {strides = array<i32>} : memref<8x256xf32, #tpu.memory_space<vmem>>, vector<8x256xf32>,
    return
  }
  func.func @transform_0(%arg0: i32, %arg1: i32) -> (i32, i32) {
    %c0_i32 = arith.constant 0 : i32
    %c0_i32_0 = arith.constant 0 : i32
    return %arg0, %c0_i32 : i32, i32
  }
  func.func @transform_1(%arg0: i32, %arg1: i32) -> (i32, i32) {
    %c0_i32 = arith.constant 0 : i32
    %c0_i32_0 = arith.constant 0 : i32
    return %c0_i32, %arg1 : i32, i32
  }
  func.func @transform_2(%arg0: i32, %arg1: i32) -> (i32, i32) {
    %c0_i32 = arith.constant 0 : i32
    return %arg0, %arg1 : i32, i32
  }
}

module attributes {stable_mosaic.version = 11 : i64} {
  func.func @_matmul_kernel_single(%arg0: i32, %arg1: i32, %arg2: memref<8x128xf32, #tpu.memory_space<vmem>>, %arg3: memref<128x256xf32, #tpu.memory_space<vmem>>, %arg4: memref<8x256xf32, #tpu.memory_space<vmem>>) attributes {dimension_semantics = [#tpu.dimension_semantics<parallel>, #tpu.dimension_semantics<parallel>], iteration_bounds = array<i64: 1, 1>, scalar_prefetch = 0 : i64, scratch_operands = 0 : i64, tpu.core_type = #tpu.core_type<tc>, window_params = [{transform_indices = @transform_0, window_bounds = array<i64: 8, 128>}, {transform_indices = @transform_1, window_bounds = array<i64: 128, 256>}, {transform_indices = @transform_2, window_bounds = array<i64: 8, 256>}]} {
    %c0 = arith.constant 0 : index
    %c0_0 = arith.constant 0 : index
    %0 = vector.load %arg2[%c0, %c0_0] : memref<8x128xf32, #tpu.memory_space<vmem>>, vector<8x128xf32>
    %c0_1 = arith.constant 0 : index
    %c0_2 = arith.constant 0 : index
    %1 = vector.load %arg3[%c0_1, %c0_2] : memref<128x256xf32, #tpu.memory_space<vmem>>, vector<128x256xf32>
    %cst = arith.constant dense<0.000000e+00> : vector<8x256xf32>
    %2 = tpu.matmul %0, %1, %cst {dimension_numbers = #tpu.dot_dimension_numbers<[1], [0], [0], [1], [0, 0, 1, 1], [], []>} : vector<8x128xf32>, vector<128x256xf32>, vector<8x256xf32> -> vector<8x256xf32>
    %c0_3 = arith.constant 0 : index
    %c0_4 = arith.constant 0 : index
    %3 = vector.load %arg4[%c0_3, %c0_4] : memref<8x256xf32, #tpu.memory_space<vmem>>, vector<8x256xf32>
    tpu.vector_store %arg4[%c0_3, %c0_4], %2 {strides = array<i32>} : memref<8x256xf32, #tpu.memory_space<vmem>>, vector<8x256xf32>,
    return
  }
  func.func @transform_0(%arg0: i32, %arg1: i32) -> (i32, i32) {
    %c0_i32 = arith.constant 0 : i32
    %c0_i32_0 = arith.constant 0 : i32
    return %arg0, %c0_i32 : i32, i32
  }
  func.func @transform_1(%arg0: i32, %arg1: i32) -> (i32, i32) {
    %c0_i32 = arith.constant 0 : i32
    %c0_i32_0 = arith.constant 0 : i32
    return %c0_i32, %arg1 : i32, i32
  }
  func.func @transform_2(%arg0: i32, %arg1: i32) -> (i32, i32) {
    %c0_i32 = arith.constant 0 : i32
    return %arg0, %arg1 : i32, i32
  }
}

module attributes {stable_mosaic.version = 11 : i64} {
  func.func @_matmul_kernel_single(%arg0: i32, %arg1: i32, %arg2: memref<16x128xf32, #tpu.memory_space<vmem>>, %arg3: memref<128x128xf32, #tpu.memory_space<vmem>>, %arg4: memref<16x128xf32, #tpu.memory_space<vmem>>) attributes {dimension_semantics = [#tpu.dimension_semantics<parallel>, #tpu.dimension_semantics<parallel>], iteration_bounds = array<i64: 1, 1>, scalar_prefetch = 0 : i64, scratch_operands = 0 : i64, tpu.core_type = #tpu.core_type<tc>, window_params = [{transform_indices = @transform_0, window_bounds = array<i64: 16, 128>}, {transform_indices = @transform_1, window_bounds = array<i64: 128, 128>}, {transform_indices = @transform_2, window_bounds = array<i64: 16, 128>}]} {
    %c0 = arith.constant 0 : index
    %c0_0 = arith.constant 0 : index
    %0 = vector.load %arg2[%c0, %c0_0] : memref<16x128xf32, #tpu.memory_space<vmem>>, vector<16x128xf32>
    %c0_1 = arith.constant 0 : index
    %c0_2 = arith.constant 0 : index
    %1 = vector.load %arg3[%c0_1, %c0_2] : memref<128x128xf32, #tpu.memory_space<vmem>>, vector<128x128xf32>
    %cst = arith.constant dense<0.000000e+00> : vector<16x128xf32>
    %2 = tpu.matmul %0, %1, %cst {dimension_numbers = #tpu.dot_dimension_numbers<[1], [0], [0], [1], [0, 0, 1, 1], [], []>} : vector<16x128xf32>, vector<128x128xf32>, vector<16x128xf32> -> vector<16x128xf32>
    %c0_3 = arith.constant 0 : index
    %c0_4 = arith.constant 0 : index
    %3 = vector.load %arg4[%c0_3, %c0_4] : memref<16x128xf32, #tpu.memory_space<vmem>>, vector<16x128xf32>
    tpu.vector_store %arg4[%c0_3, %c0_4], %2 {strides = array<i32>} : memref<16x128xf32, #tpu.memory_space<vmem>>, vector<16x128xf32>,
    return
  }
  func.func @transform_0(%arg0: i32, %arg1: i32) -> (i32, i32) {
    %c0_i32 = arith.constant 0 : i32
    %c0_i32_0 = arith.constant 0 : i32
    return %arg0, %c0_i32 : i32, i32
  }
  func.func @transform_1(%arg0: i32, %arg1: i32) -> (i32, i32) {
    %c0_i32 = arith.constant 0 : i32
    %c0_i32_0 = arith.constant 0 : i32
    return %c0_i32, %arg1 : i32, i32
  }
  func.func @transform_2(%arg0: i32, %arg1: i32) -> (i32, i32) {
    %c0_i32 = arith.constant 0 : i32
    return %arg0, %arg1 : i32, i32
  }
}

module attributes {stable_mosaic.version = 11 : i64} {
  func.func @kernel(%arg0: memref<104x64xf32, #tpu.memory_space<vmem>>, %arg1: memref<64x128xf32, #tpu.memory_space<vmem>>, %arg2: memref<32x128xf32, #tpu.memory_space<vmem>>, %arg3: memref<1x128xf32, #tpu.memory_space<vmem>>, %arg4: memref<32x128xf32, #tpu.memory_space<vmem>>, %arg5: memref<32x128xf32, #tpu.memory_space<vmem>>, %arg6: memref<1x128xf32, #tpu.memory_space<vmem>>, %arg7: memref<32x64xf32, #tpu.memory_space<vmem>>, %arg8: memref<1x64xf32, #tpu.memory_space<vmem>>, %arg9: memref<104x64xf32, #tpu.memory_space<vmem>>, %arg10: memref<104x128xf32, #tpu.memory_space<vmem>>, %arg11: memref<104x32xf32, #tpu.memory_space<vmem>>) attributes {dimension_semantics = [], scalar_prefetch = 0 : i64, scratch_operands = 2 : i64, tpu.core_type = #tpu.core_type<tc>} {
    %c0 = arith.constant 0 : index
    %c0_0 = arith.constant 0 : index
    %0 = vector.load %arg0[%c0, %c0_0] : memref<104x64xf32, #tpu.memory_space<vmem>>, vector<104x64xf32>
    %c0_1 = arith.constant 0 : index
    %c0_2 = arith.constant 0 : index
    %1 = vector.load %arg1[%c0_1, %c0_2] : memref<64x128xf32, #tpu.memory_space<vmem>>, vector<64x128xf32>
    %cst = arith.constant dense<0.000000e+00> : vector<104x128xf32>
    %2 = tpu.matmul %0, %1, %cst {dimension_numbers = #tpu.dot_dimension_numbers<[1], [0], [0], [1], [0, 0, 1, 1], [], []>} : vector<104x64xf32>, vector<64x128xf32>, vector<104x128xf32> -> vector<104x128xf32>
    %c0_3 = arith.constant 0 : index
    %c0_4 = arith.constant 0 : index
    %3 = vector.load %arg3[%c0_3, %c0_4] : memref<1x128xf32, #tpu.memory_space<vmem>>, vector<1x128xf32>
    %4 = vector.broadcast %3 : vector<1x128xf32> to vector<104x128xf32>
    %5 = arith.addf %2, %4 : vector<104x128xf32>
    %c0_5 = arith.constant 0 : index
    %c0_6 = arith.constant 0 : index
    %6 = vector.load %arg10[%c0_5, %c0_6] : memref<104x128xf32, #tpu.memory_space<vmem>>, vector<104x128xf32>
    tpu.vector_store %arg10[%c0_5, %c0_6], %5 {strides = array<i32>} : memref<104x128xf32, #tpu.memory_space<vmem>>, vector<104x128xf32>,
    %cst_7 = arith.constant 0.000000e+00 : f32
    %7 = vector.broadcast %cst_7 : f32 to vector<8x32xf32>
    %c0_i32 = arith.constant 0 : i32
    %c8_i32 = arith.constant 8 : i32
    %8 = arith.muli %c0_i32, %c8_i32 : i32
    %9 = tpu.assume_multiple %8, 8 : i32
    %10 = arith.index_cast %9 : i32 to index
    %c0_8 = arith.constant 0 : index
    %11 = vector.load %arg10[%10, %c0_8] : memref<104x128xf32, #tpu.memory_space<vmem>>, vector<8x128xf32>
    %c0_9 = arith.constant 0 : index
    %c0_10 = arith.constant 0 : index
    %12 = vector.load %arg2[%c0_9, %c0_10] : memref<32x128xf32, #tpu.memory_space<vmem>>, vector<32x128xf32>
    %cst_11 = arith.constant dense<0.000000e+00> : vector<8x128xf32>
    %13 = tpu.matmul %7, %12, %cst_11 {dimension_numbers = #tpu.dot_dimension_numbers<[1], [0], [0], [1], [0, 0, 1, 1], [], []>} : vector<8x32xf32>, vector<32x128xf32>, vector<8x128xf32> -> vector<8x128xf32>
    %14 = arith.addf %11, %13 : vector<8x128xf32>
    %15 = vector.extract_strided_slice %14 {offsets = [0, 0], sizes = [8, 32], strides = [1, 1]} : vector<8x128xf32> to vector<8x32xf32>
    %cst_12 = arith.constant 0.000000e+00 : f32
    %16 = vector.broadcast %cst_12 : f32 to vector<8x32xf32>
    %17 = arith.subf %16, %15 : vector<8x32xf32>
    %18 = math.exp %17 : vector<8x32xf32>
    %cst_13 = arith.constant 1.000000e+00 : f32
    %19 = vector.broadcast %cst_13 : f32 to vector<8x32xf32>
    %20 = arith.addf %19, %18 : vector<8x32xf32>
    %cst_14 = arith.constant 1.000000e+00 : f32
    %21 = vector.broadcast %cst_14 : f32 to vector<8x32xf32>
    %22 = arith.divf %21, %20 : vector<8x32xf32>
    %23 = vector.extract_strided_slice %14 {offsets = [0, 32], sizes = [8, 32], strides = [1, 1]} : vector<8x128xf32> to vector<8x32xf32>
    %cst_15 = arith.constant 0.000000e+00 : f32
    %24 = vector.broadcast %cst_15 : f32 to vector<8x32xf32>
    %25 = arith.subf %24, %23 : vector<8x32xf32>
    %26 = math.exp %25 : vector<8x32xf32>
    %cst_16 = arith.constant 1.000000e+00 : f32
    %27 = vector.broadcast %cst_16 : f32 to vector<8x32xf32>
    %28 = arith.addf %27, %26 : vector<8x32xf32>
    %cst_17 = arith.constant 1.000000e+00 : f32
    %29 = vector.broadcast %cst_17 : f32 to vector<8x32xf32>
    %30 = arith.divf %29, %28 : vector<8x32xf32>
    %31 = vector.extract_strided_slice %14 {offsets = [0, 64], sizes = [8, 32], strides = [1, 1]} : vector<8x128xf32> to vector<8x32xf32>
    %32 = math.tanh %31 : vector<8x32xf32>
    %33 = vector.extract_strided_slice %14 {offsets = [0, 96], sizes = [8, 32], strides = [1, 1]} : vector<8x128xf32> to vector<8x32xf32>
    %cst_18 = arith.constant 0.000000e+00 : f32
    %34 = vector.broadcast %cst_18 : f32 to vector<8x32xf32>
    %35 = arith.subf %34, %33 : vector<8x32xf32>
    %36 = math.exp %35 : vector<8x32xf32>
    %cst_19 = arith.constant 1.000000e+00 : f32
    %37 = vector.broadcast %cst_19 : f32 to vector<8x32xf32>
    %38 = arith.addf %37, %36 : vector<8x32xf32>
    %cst_20 = arith.constant 1.000000e+00 : f32
    %39 = vector.broadcast %cst_20 : f32 to vector<8x32xf32>
    %40 = arith.divf %39, %38 : vector<8x32xf32>
    %41 = arith.mulf %30, %7 : vector<8x32xf32>
    %42 = arith.mulf %22, %32 : vector<8x32xf32>
    %43 = arith.addf %41, %42 : vector<8x32xf32>
    %44 = math.tanh %43 : vector<8x32xf32>
    %45 = arith.mulf %40, %44 : vector<8x32xf32>
    %c0_21 = arith.constant 0 : index
    %c0_22 = arith.constant 0 : index
    %46 = vector.load %arg4[%c0_21, %c0_22] : memref<32x128xf32, #tpu.memory_space<vmem>>, vector<32x128xf32>
    %cst_23 = arith.constant dense<0.000000e+00> : vector<8x128xf32>
    %47 = tpu.matmul %45, %46, %cst_23 {dimension_numbers = #tpu.dot_dimension_numbers<[1], [0], [0], [1], [0, 0, 1, 1], [], []>} : vector<8x32xf32>, vector<32x128xf32>, vector<8x128xf32> -> vector<8x128xf32>
    %c0_24 = arith.constant 0 : index
    %c0_25 = arith.constant 0 : index
    %48 = vector.load %arg6[%c0_24, %c0_25] : memref<1x128xf32, #tpu.memory_space<vmem>>, vector<1x128xf32>
    %49 = vector.broadcast %48 : vector<1x128xf32> to vector<8x128xf32>
    %50 = arith.addf %47, %49 : vector<8x128xf32>
    %c0_26 = arith.constant 0 : index
    %c0_27 = arith.constant 0 : index
    %51 = vector.load %arg5[%c0_26, %c0_27] : memref<32x128xf32, #tpu.memory_space<vmem>>, vector<32x128xf32>
    %cst_28 = arith.constant dense<0.000000e+00> : vector<8x128xf32>
    %52 = tpu.matmul %7, %51, %cst_28 {dimension_numbers = #tpu.dot_dimension_numbers<[1], [0], [0], [1], [0, 0, 1, 1], [], []>} : vector<8x32xf32>, vector<32x128xf32>, vector<8x128xf32> -> vector<8x128xf32>
    %53 = arith.addf %50, %52 : vector<8x128xf32>
    %54 = vector.extract_strided_slice %53 {offsets = [0, 0], sizes = [8, 32], strides = [1, 1]} : vector<8x128xf32> to vector<8x32xf32>
    %cst_29 = arith.constant 0.000000e+00 : f32
    %55 = vector.broadcast %cst_29 : f32 to vector<8x32xf32>
    %56 = arith.subf %55, %54 : vector<8x32xf32>
    %57 = math.exp %56 : vector<8x32xf32>
    %cst_30 = arith.constant 1.000000e+00 : f32
    %58 = vector.broadcast %cst_30 : f32 to vector<8x32xf32>
    %59 = arith.addf %58, %57 : vector<8x32xf32>
    %cst_31 = arith.constant 1.000000e+00 : f32
    %60 = vector.broadcast %cst_31 : f32 to vector<8x32xf32>
    %61 = arith.divf %60, %59 : vector<8x32xf32>
    %62 = vector.extract_strided_slice %53 {offsets = [0, 32], sizes = [8, 32], strides = [1, 1]} : vector<8x128xf32> to vector<8x32xf32>
    %cst_32 = arith.constant 0.000000e+00 : f32
    %63 = vector.broadcast %cst_32 : f32 to vector<8x32xf32>
    %64 = arith.subf %63, %62 : vector<8x32xf32>
    %65 = math.exp %64 : vector<8x32xf32>
    %cst_33 = arith.constant 1.000000e+00 : f32
    %66 = vector.broadcast %cst_33 : f32 to vector<8x32xf32>
    %67 = arith.addf %66, %65 : vector<8x32xf32>
    %cst_34 = arith.constant 1.000000e+00 : f32
    %68 = vector.broadcast %cst_34 : f32 to vector<8x32xf32>
    %69 = arith.divf %68, %67 : vector<8x32xf32>
    %70 = vector.extract_strided_slice %53 {offsets = [0, 64], sizes = [8, 32], strides = [1, 1]} : vector<8x128xf32> to vector<8x32xf32>
    %71 = math.tanh %70 : vector<8x32xf32>
    %72 = vector.extract_strided_slice %53 {offsets = [0, 96], sizes = [8, 32], strides = [1, 1]} : vector<8x128xf32> to vector<8x32xf32>
    %cst_35 = arith.constant 0.000000e+00 : f32
    %73 = vector.broadcast %cst_35 : f32 to vector<8x32xf32>
    %74 = arith.subf %73, %72 : vector<8x32xf32>
    %75 = math.exp %74 : vector<8x32xf32>
    %cst_36 = arith.constant 1.000000e+00 : f32
    %76 = vector.broadcast %cst_36 : f32 to vector<8x32xf32>
    %77 = arith.addf %76, %75 : vector<8x32xf32>
    %cst_37 = arith.constant 1.000000e+00 : f32
    %78 = vector.broadcast %cst_37 : f32 to vector<8x32xf32>
    %79 = arith.divf %78, %77 : vector<8x32xf32>
    %80 = arith.mulf %69, %7 : vector<8x32xf32>
    %81 = arith.mulf %61, %71 : vector<8x32xf32>
    %82 = arith.addf %80, %81 : vector<8x32xf32>
    %83 = math.tanh %82 : vector<8x32xf32>
    %84 = arith.mulf %79, %83 : vector<8x32xf32>
    %85 = arith.index_cast %9 : i32 to index
    %c0_38 = arith.constant 0 : index
    %86 = vector.load %arg11[%85, %c0_38] : memref<104x32xf32, #tpu.memory_space<vmem>>, vector<8x32xf32>
    tpu.vector_store %arg11[%85, %c0_38], %84 {strides = array<i32>} : memref<104x32xf32, #tpu.memory_space<vmem>>, vector<8x32xf32>,
    %c1_i32 = arith.constant 1 : i32
    %c8_i32_39 = arith.constant 8 : i32
    %87 = arith.muli %c1_i32, %c8_i32_39 : i32
    %88 = tpu.assume_multiple %87, 8 : i32
    %89 = arith.index_cast %88 : i32 to index
    %c0_40 = arith.constant 0 : index
    %90 = vector.load %arg10[%89, %c0_40] : memref<104x128xf32, #tpu.memory_space<vmem>>, vector<8x128xf32>
    %c0_41 = arith.constant 0 : index
    %c0_42 = arith.constant 0 : index
    %91 = vector.load %arg2[%c0_41, %c0_42] : memref<32x128xf32, #tpu.memory_space<vmem>>, vector<32x128xf32>
    %cst_43 = arith.constant dense<0.000000e+00> : vector<8x128xf32>
    %92 = tpu.matmul %45, %91, %cst_43 {dimension_numbers = #tpu.dot_dimension_numbers<[1], [0], [0], [1], [0, 0, 1, 1], [], []>} : vector<8x32xf32>, vector<32x128xf32>, vector<8x128xf32> -> vector<8x128xf32>
    %93 = arith.addf %90, %92 : vector<8x128xf32>
    %94 = vector.extract_strided_slice %93 {offsets = [0, 0], sizes = [8, 32], strides = [1, 1]} : vector<8x128xf32> to vector<8x32xf32>
    %cst_44 = arith.constant 0.000000e+00 : f32
    %95 = vector.broadcast %cst_44 : f32 to vector<8x32xf32>
    %96 = arith.subf %95, %94 : vector<8x32xf32>
    %97 = math.exp %96 : vector<8x32xf32>
    %cst_45 = arith.constant 1.000000e+00 : f32
    %98 = vector.broadcast %cst_45 : f32 to vector<8x32xf32>
    %99 = arith.addf %98, %97 : vector<8x32xf32>
    %cst_46 = arith.constant 1.000000e+00 : f32
    %100 = vector.broadcast %cst_46 : f32 to vector<8x32xf32>
    %101 = arith.divf %100, %99 : vector<8x32xf32>
    %102 = vector.extract_strided_slice %93 {offsets = [0, 32], sizes = [8, 32], strides = [1, 1]} : vector<8x128xf32> to vector<8x32xf32>
    %cst_47 = arith.constant 0.000000e+00 : f32
    %103 = vector.broadcast %cst_47 : f32 to vector<8x32xf32>
    %104 = arith.subf %103, %102 : vector<8x32xf32>
    %105 = math.exp %104 : vector<8x32xf32>
    %cst_48 = arith.constant 1.000000e+00 : f32
    %106 = vector.broadcast %cst_48 : f32 to vector<8x32xf32>
    %107 = arith.addf %106, %105 : vector<8x32xf32>
    %cst_49 = arith.constant 1.000000e+00 : f32
    %108 = vector.broadcast %cst_49 : f32 to vector<8x32xf32>
    %109 = arith.divf %108, %107 : vector<8x32xf32>
    %110 = vector.extract_strided_slice %93 {offsets = [0, 64], sizes = [8, 32], strides = [1, 1]} : vector<8x128xf32> to vector<8x32xf32>
    %111 = math.tanh %110 : vector<8x32xf32>
    %112 = vector.extract_strided_slice %93 {offsets = [0, 96], sizes = [8, 32], strides = [1, 1]} : vector<8x128xf32> to vector<8x32xf32>
    %cst_50 = arith.constant 0.000000e+00 : f32
    %113 = vector.broadcast %cst_50 : f32 to vector<8x32xf32>
    %114 = arith.subf %113, %112 : vector<8x32xf32>
    %115 = math.exp %114 : vector<8x32xf32>
    %cst_51 = arith.constant 1.000000e+00 : f32
    %116 = vector.broadcast %cst_51 : f32 to vector<8x32xf32>
    %117 = arith.addf %116, %115 : vector<8x32xf32>
    %cst_52 = arith.constant 1.000000e+00 : f32
    %118 = vector.broadcast %cst_52 : f32 to vector<8x32xf32>
    %119 = arith.divf %118, %117 : vector<8x32xf32>
    %120 = arith.mulf %109, %43 : vector<8x32xf32>
    %121 = arith.mulf %101, %111 : vector<8x32xf32>
    %122 = arith.addf %120, %121 : vector<8x32xf32>
    %123 = math.tanh %122 : vector<8x32xf32>
    %124 = arith.mulf %119, %123 : vector<8x32xf32>
    %c0_53 = arith.constant 0 : index
    %c0_54 = arith.constant 0 : index
    %125 = vector.load %arg4[%c0_53, %c0_54] : memref<32x128xf32, #tpu.memory_space<vmem>>, vector<32x128xf32>
    %cst_55 = arith.constant dense<0.000000e+00> : vector<8x128xf32>
    %126 = tpu.matmul %124, %125, %cst_55 {dimension_numbers = #tpu.dot_dimension_numbers<[1], [0], [0], [1], [0, 0, 1, 1], [], []>} : vector<8x32xf32>, vector<32x128xf32>, vector<8x128xf32> -> vector<8x128xf32>
    %c0_56 = arith.constant 0 : index
    %c0_57 = arith.constant 0 : index
    %127 = vector.load %arg6[%c0_56, %c0_57] : memref<1x128xf32, #tpu.memory_space<vmem>>, vector<1x128xf32>
    %128 = vector.broadcast %127 : vector<1x128xf32> to vector<8x128xf32>
    %129 = arith.addf %126, %128 : vector<8x128xf32>
    %c0_58 = arith.constant 0 : index
    %c0_59 = arith.constant 0 : index
    %130 = vector.load %arg5[%c0_58, %c0_59] : memref<32x128xf32, #tpu.memory_space<vmem>>, vector<32x128xf32>
    %cst_60 = arith.constant dense<0.000000e+00> : vector<8x128xf32>
    %131 = tpu.matmul %84, %130, %cst_60 {dimension_numbers = #tpu.dot_dimension_numbers<[1], [0], [0], [1], [0, 0, 1, 1], [], []>} : vector<8x32xf32>, vector<32x128xf32>, vector<8x128xf32> -> vector<8x128xf32>
    %132 = arith.addf %129, %131 : vector<8x128xf32>
    %133 = vector.extract_strided_slice %132 {offsets = [0, 0], sizes = [8, 32], strides = [1, 1]} : vector<8x128xf32> to vector<8x32xf32>
    %cst_61 = arith.constant 0.000000e+00 : f32
    %134 = vector.broadcast %cst_61 : f32 to vector<8x32xf32>
    %135 = arith.subf %134, %133 : vector<8x32xf32>
    %136 = math.exp %135 : vector<8x32xf32>
    %cst_62 = arith.constant 1.000000e+00 : f32
    %137 = vector.broadcast %cst_62 : f32 to vector<8x32xf32>
    %138 = arith.addf %137, %136 : vector<8x32xf32>
    %cst_63 = arith.constant 1.000000e+00 : f32
    %139 = vector.broadcast %cst_63 : f32 to vector<8x32xf32>
    %140 = arith.divf %139, %138 : vector<8x32xf32>
    %141 = vector.extract_strided_slice %132 {offsets = [0, 32], sizes = [8, 32], strides = [1, 1]} : vector<8x128xf32> to vector<8x32xf32>
    %cst_64 = arith.constant 0.000000e+00 : f32
    %142 = vector.broadcast %cst_64 : f32 to vector<8x32xf32>
    %143 = arith.subf %142, %141 : vector<8x32xf32>
    %144 = math.exp %143 : vector<8x32xf32>
    %cst_65 = arith.constant 1.000000e+00 : f32
    %145 = vector.broadcast %cst_65 : f32 to vector<8x32xf32>
    %146 = arith.addf %145, %144 : vector<8x32xf32>
    %cst_66 = arith.constant 1.000000e+00 : f32
    %147 = vector.broadcast %cst_66 : f32 to vector<8x32xf32>
    %148 = arith.divf %147, %146 : vector<8x32xf32>
    %149 = vector.extract_strided_slice %132 {offsets = [0, 64], sizes = [8, 32], strides = [1, 1]} : vector<8x128xf32> to vector<8x32xf32>
    %150 = math.tanh %149 : vector<8x32xf32>
    %151 = vector.extract_strided_slice %132 {offsets = [0, 96], sizes = [8, 32], strides = [1, 1]} : vector<8x128xf32> to vector<8x32xf32>
    %cst_67 = arith.constant 0.000000e+00 : f32
    %152 = vector.broadcast %cst_67 : f32 to vector<8x32xf32>
    %153 = arith.subf %152, %151 : vector<8x32xf32>
    %154 = math.exp %153 : vector<8x32xf32>
    %cst_68 = arith.constant 1.000000e+00 : f32
    %155 = vector.broadcast %cst_68 : f32 to vector<8x32xf32>
    %156 = arith.addf %155, %154 : vector<8x32xf32>
    %cst_69 = arith.constant 1.000000e+00 : f32
    %157 = vector.broadcast %cst_69 : f32 to vector<8x32xf32>
    %158 = arith.divf %157, %156 : vector<8x32xf32>
    %159 = arith.mulf %148, %82 : vector<8x32xf32>
    %160 = arith.mulf %140, %150 : vector<8x32xf32>
    %161 = arith.addf %159, %160 : vector<8x32xf32>
    %162 = math.tanh %161 : vector<8x32xf32>
    %163 = arith.mulf %158, %162 : vector<8x32xf32>
    %164 = arith.index_cast %88 : i32 to index
    %c0_70 = arith.constant 0 : index
    %165 = vector.load %arg11[%164, %c0_70] : memref<104x32xf32, #tpu.memory_space<vmem>>, vector<8x32xf32>
    tpu.vector_store %arg11[%164, %c0_70], %163 {strides = array<i32>} : memref<104x32xf32, #tpu.memory_space<vmem>>, vector<8x32xf32>,
    %c2_i32 = arith.constant 2 : i32
    %c8_i32_71 = arith.constant 8 : i32
    %166 = arith.muli %c2_i32, %c8_i32_71 : i32
    %167 = tpu.assume_multiple %166, 8 : i32
    %168 = arith.index_cast %167 : i32 to index
    %c0_72 = arith.constant 0 : index
    %169 = vector.load %arg10[%168, %c0_72] : memref<104x128xf32, #tpu.memory_space<vmem>>, vector<8x128xf32>
    %c0_73 = arith.constant 0 : index
    %c0_74 = arith.constant 0 : index
    %170 = vector.load %arg2[%c0_73, %c0_74] : memref<32x128xf32, #tpu.memory_space<vmem>>, vector<32x128xf32>
    %cst_75 = arith.constant dense<0.000000e+00> : vector<8x128xf32>
    %171 = tpu.matmul %124, %170, %cst_75 {dimension_numbers = #tpu.dot_dimension_numbers<[1], [0], [0], [1], [0, 0, 1, 1], [], []>} : vector<8x32xf32>, vector<32x128xf32>, vector<8x128xf32> -> vector<8x128xf32>
    %172 = arith.addf %169, %171 : vector<8x128xf32>
    %173 = vector.extract_strided_slice %172 {offsets = [0, 0], sizes = [8, 32], strides = [1, 1]} : vector<8x128xf32> to vector<8x32xf32>
    %cst_76 = arith.constant 0.000000e+00 : f32
    %174 = vector.broadcast %cst_76 : f32 to vector<8x32xf32>
    %175 = arith.subf %174, %173 : vector<8x32xf32>
    %176 = math.exp %175 : vector<8x32xf32>
    %cst_77 = arith.constant 1.000000e+00 : f32
    %177 = vector.broadcast %cst_77 : f32 to vector<8x32xf32>
    %178 = arith.addf %177, %176 : vector<8x32xf32>
    %cst_78 = arith.constant 1.000000e+00 : f32
    %179 = vector.broadcast %cst_78 : f32 to vector<8x32xf32>
    %180 = arith.divf %179, %178 : vector<8x32xf32>
    %181 = vector.extract_strided_slice %172 {offsets = [0, 32], sizes = [8, 32], strides = [1, 1]} : vector<8x128xf32> to vector<8x32xf32>
    %cst_79 = arith.constant 0.000000e+00 : f32
    %182 = vector.broadcast %cst_79 : f32 to vector<8x32xf32>
    %183 = arith.subf %182, %181 : vector<8x32xf32>
    %184 = math.exp %183 : vector<8x32xf32>
    %cst_80 = arith.constant 1.000000e+00 : f32
    %185 = vector.broadcast %cst_80 : f32 to vector<8x32xf32>
    %186 = arith.addf %185, %184 : vector<8x32xf32>
    %cst_81 = arith.constant 1.000000e+00 : f32
    %187 = vector.broadcast %cst_81 : f32 to vector<8x32xf32>
    %188 = arith.divf %187, %186 : vector<8x32xf32>
    %189 = vector.extract_strided_slice %172 {offsets = [0, 64], sizes = [8, 32], strides = [1, 1]} : vector<8x128xf32> to vector<8x32xf32>
    %190 = math.tanh %189 : vector<8x32xf32>
    %191 = vector.extract_strided_slice %172 {offsets = [0, 96], sizes = [8, 32], strides = [1, 1]} : vector<8x128xf32> to vector<8x32xf32>
    %cst_82 = arith.constant 0.000000e+00 : f32
    %192 = vector.broadcast %cst_82 : f32 to vector<8x32xf32>
    %193 = arith.subf %192, %191 : vector<8x32xf32>
    %194 = math.exp %193 : vector<8x32xf32>
    %cst_83 = arith.constant 1.000000e+00 : f32
    %195 = vector.broadcast %cst_83 : f32 to vector<8x32xf32>
    %196 = arith.addf %195, %194 : vector<8x32xf32>
    %cst_84 = arith.constant 1.000000e+00 : f32
    %197 = vector.broadcast %cst_84 : f32 to vector<8x32xf32>
    %198 = arith.divf %197, %196 : vector<8x32xf32>
    %199 = arith.mulf %188, %122 : vector<8x32xf32>
    %200 = arith.mulf %180, %190 : vector<8x32xf32>
    %201 = arith.addf %199, %200 : vector<8x32xf32>
    %202 = math.tanh %201 : vector<8x32xf32>
    %203 = arith.mulf %198, %202 : vector<8x32xf32>
    %c0_85 = arith.constant 0 : index
    %c0_86 = arith.constant 0 : index
    %204 = vector.load %arg4[%c0_85, %c0_86] : memref<32x128xf32, #tpu.memory_space<vmem>>, vector<32x128xf32>
    %cst_87 = arith.constant dense<0.000000e+00> : vector<8x128xf32>
    %205 = tpu.matmul %203, %204, %cst_87 {dimension_numbers = #tpu.dot_dimension_numbers<[1], [0], [0], [1], [0, 0, 1, 1], [], []>} : vector<8x32xf32>, vector<32x128xf32>, vector<8x128xf32> -> vector<8x128xf32>
    %c0_88 = arith.constant 0 : index
    %c0_89 = arith.constant 0 : index
    %206 = vector.load %arg6[%c0_88, %c0_89] : memref<1x128xf32, #tpu.memory_space<vmem>>, vector<1x128xf32>
    %207 = vector.broadcast %206 : vector<1x128xf32> to vector<8x128xf32>
    %208 = arith.addf %205, %207 : vector<8x128xf32>
    %c0_90 = arith.constant 0 : index
    %c0_91 = arith.constant 0 : index
    %209 = vector.load %arg5[%c0_90, %c0_91] : memref<32x128xf32, #tpu.memory_space<vmem>>, vector<32x128xf32>
    %cst_92 = arith.constant dense<0.000000e+00> : vector<8x128xf32>
    %210 = tpu.matmul %163, %209, %cst_92 {dimension_numbers = #tpu.dot_dimension_numbers<[1], [0], [0], [1], [0, 0, 1, 1], [], []>} : vector<8x32xf32>, vector<32x128xf32>, vector<8x128xf32> -> vector<8x128xf32>
    %211 = arith.addf %208, %210 : vector<8x128xf32>
    %212 = vector.extract_strided_slice %211 {offsets = [0, 0], sizes = [8, 32], strides = [1, 1]} : vector<8x128xf32> to vector<8x32xf32>
    %cst_93 = arith.constant 0.000000e+00 : f32
    %213 = vector.broadcast %cst_93 : f32 to vector<8x32xf32>
    %214 = arith.subf %213, %212 : vector<8x32xf32>
    %215 = math.exp %214 : vector<8x32xf32>
    %cst_94 = arith.constant 1.000000e+00 : f32
    %216 = vector.broadcast %cst_94 : f32 to vector<8x32xf32>
    %217 = arith.addf %216, %215 : vector<8x32xf32>
    %cst_95 = arith.constant 1.000000e+00 : f32
    %218 = vector.broadcast %cst_95 : f32 to vector<8x32xf32>
    %219 = arith.divf %218, %217 : vector<8x32xf32>
    %220 = vector.extract_strided_slice %211 {offsets = [0, 32], sizes = [8, 32], strides = [1, 1]} : vector<8x128xf32> to vector<8x32xf32>
    %cst_96 = arith.constant 0.000000e+00 : f32
    %221 = vector.broadcast %cst_96 : f32 to vector<8x32xf32>
    %222 = arith.subf %221, %220 : vector<8x32xf32>
    %223 = math.exp %222 : vector<8x32xf32>
    %cst_97 = arith.constant 1.000000e+00 : f32
    %224 = vector.broadcast %cst_97 : f32 to vector<8x32xf32>
    %225 = arith.addf %224, %223 : vector<8x32xf32>
    %cst_98 = arith.constant 1.000000e+00 : f32
    %226 = vector.broadcast %cst_98 : f32 to vector<8x32xf32>
    %227 = arith.divf %226, %225 : vector<8x32xf32>
    %228 = vector.extract_strided_slice %211 {offsets = [0, 64], sizes = [8, 32], strides = [1, 1]} : vector<8x128xf32> to vector<8x32xf32>
    %229 = math.tanh %228 : vector<8x32xf32>
    %230 = vector.extract_strided_slice %211 {offsets = [0, 96], sizes = [8, 32], strides = [1, 1]} : vector<8x128xf32> to vector<8x32xf32>
    %cst_99 = arith.constant 0.000000e+00 : f32
    %231 = vector.broadcast %cst_99 : f32 to vector<8x32xf32>
    %232 = arith.subf %231, %230 : vector<8x32xf32>
    %233 = math.exp %232 : vector<8x32xf32>
    %cst_100 = arith.constant 1.000000e+00 : f32
    %234 = vector.broadcast %cst_100 : f32 to vector<8x32xf32>
    %235 = arith.addf %234, %233 : vector<8x32xf32>
    %cst_101 = arith.constant 1.000000e+00 : f32
    %236 = vector.broadcast %cst_101 : f32 to vector<8x32xf32>
    %237 = arith.divf %236, %235 : vector<8x32xf32>
    %238 = arith.mulf %227, %161 : vector<8x32xf32>
    %239 = arith.mulf %219, %229 : vector<8x32xf32>
    %240 = arith.addf %238, %239 : vector<8x32xf32>
    %241 = math.tanh %240 : vector<8x32xf32>
    %242 = arith.mulf %237, %241 : vector<8x32xf32>
    %243 = arith.index_cast %167 : i32 to index
    %c0_102 = arith.constant 0 : index
    %244 = vector.load %arg11[%243, %c0_102] : memref<104x32xf32, #tpu.memory_space<vmem>>, vector<8x32xf32>
    tpu.vector_store %arg11[%243, %c0_102], %242 {strides = array<i32>} : memref<104x32xf32, #tpu.memory_space<vmem>>, vector<8x32xf32>,
    %c3_i32 = arith.constant 3 : i32
    %c8_i32_103 = arith.constant 8 : i32
    %245 = arith.muli %c3_i32, %c8_i32_103 : i32
    %246 = tpu.assume_multiple %245, 8 : i32
    %247 = arith.index_cast %246 : i32 to index
    %c0_104 = arith.constant 0 : index
    %248 = vector.load %arg10[%247, %c0_104] : memref<104x128xf32, #tpu.memory_space<vmem>>, vector<8x128xf32>
    %c0_105 = arith.constant 0 : index
    %c0_106 = arith.constant 0 : index
    %249 = vector.load %arg2[%c0_105, %c0_106] : memref<32x128xf32, #tpu.memory_space<vmem>>, vector<32x128xf32>
    %cst_107 = arith.constant dense<0.000000e+00> : vector<8x128xf32>
    %250 = tpu.matmul %203, %249, %cst_107 {dimension_numbers = #tpu.dot_dimension_numbers<[1], [0], [0], [1], [0, 0, 1, 1], [], []>} : vector<8x32xf32>, vector<32x128xf32>, vector<8x128xf32> -> vector<8x128xf32>
    %251 = arith.addf %248, %250 : vector<8x128xf32>
    %252 = vector.extract_strided_slice %251 {offsets = [0, 0], sizes = [8, 32], strides = [1, 1]} : vector<8x128xf32> to vector<8x32xf32>
    %cst_108 = arith.constant 0.000000e+00 : f32
    %253 = vector.broadcast %cst_108 : f32 to vector<8x32xf32>
    %254 = arith.subf %253, %252 : vector<8x32xf32>
    %255 = math.exp %254 : vector<8x32xf32>
    %cst_109 = arith.constant 1.000000e+00 : f32
    %256 = vector.broadcast %cst_109 : f32 to vector<8x32xf32>
    %257 = arith.addf %256, %255 : vector<8x32xf32>
    %cst_110 = arith.constant 1.000000e+00 : f32
    %258 = vector.broadcast %cst_110 : f32 to vector<8x32xf32>
    %259 = arith.divf %258, %257 : vector<8x32xf32>
    %260 = vector.extract_strided_slice %251 {offsets = [0, 32], sizes = [8, 32], strides = [1, 1]} : vector<8x128xf32> to vector<8x32xf32>
    %cst_111 = arith.constant 0.000000e+00 : f32
    %261 = vector.broadcast %cst_111 : f32 to vector<8x32xf32>
    %262 = arith.subf %261, %260 : vector<8x32xf32>
    %263 = math.exp %262 : vector<8x32xf32>
    %cst_112 = arith.constant 1.000000e+00 : f32
    %264 = vector.broadcast %cst_112 : f32 to vector<8x32xf32>
    %265 = arith.addf %264, %263 : vector<8x32xf32>
    %cst_113 = arith.constant 1.000000e+00 : f32
    %266 = vector.broadcast %cst_113 : f32 to vector<8x32xf32>
    %267 = arith.divf %266, %265 : vector<8x32xf32>
    %268 = vector.extract_strided_slice %251 {offsets = [0, 64], sizes = [8, 32], strides = [1, 1]} : vector<8x128xf32> to vector<8x32xf32>
    %269 = math.tanh %268 : vector<8x32xf32>
    %270 = vector.extract_strided_slice %251 {offsets = [0, 96], sizes = [8, 32], strides = [1, 1]} : vector<8x128xf32> to vector<8x32xf32>
    %cst_114 = arith.constant 0.000000e+00 : f32
    %271 = vector.broadcast %cst_114 : f32 to vector<8x32xf32>
    %272 = arith.subf %271, %270 : vector<8x32xf32>
    %273 = math.exp %272 : vector<8x32xf32>
    %cst_115 = arith.constant 1.000000e+00 : f32
    %274 = vector.broadcast %cst_115 : f32 to vector<8x32xf32>
    %275 = arith.addf %274, %273 : vector<8x32xf32>
    %cst_116 = arith.constant 1.000000e+00 : f32
    %276 = vector.broadcast %cst_116 : f32 to vector<8x32xf32>
    %277 = arith.divf %276, %275 : vector<8x32xf32>
    %278 = arith.mulf %267, %201 : vector<8x32xf32>
    %279 = arith.mulf %259, %269 : vector<8x32xf32>
    %280 = arith.addf %278, %279 : vector<8x32xf32>
    %281 = math.tanh %280 : vector<8x32xf32>
    %282 = arith.mulf %277, %281 : vector<8x32xf32>
    %c0_117 = arith.constant 0 : index
    %c0_118 = arith.constant 0 : index
    %283 = vector.load %arg4[%c0_117, %c0_118] : memref<32x128xf32, #tpu.memory_space<vmem>>, vector<32x128xf32>
    %cst_119 = arith.constant dense<0.000000e+00> : vector<8x128xf32>
    %284 = tpu.matmul %282, %283, %cst_119 {dimension_numbers = #tpu.dot_dimension_numbers<[1], [0], [0], [1], [0, 0, 1, 1], [], []>} : vector<8x32xf32>, vector<32x128xf32>, vector<8x128xf32> -> vector<8x128xf32>
    %c0_120 = arith.constant 0 : index
    %c0_121 = arith.constant 0 : index
    %285 = vector.load %arg6[%c0_120, %c0_121] : memref<1x128xf32, #tpu.memory_space<vmem>>, vector<1x128xf32>
    %286 = vector.broadcast %285 : vector<1x128xf32> to vector<8x128xf32>
    %287 = arith.addf %284, %286 : vector<8x128xf32>
    %c0_122 = arith.constant 0 : index
    %c0_123 = arith.constant 0 : index
    %288 = vector.load %arg5[%c0_122, %c0_123] : memref<32x128xf32, #tpu.memory_space<vmem>>, vector<32x128xf32>
    %cst_124 = arith.constant dense<0.000000e+00> : vector<8x128xf32>
    %289 = tpu.matmul %242, %288, %cst_124 {dimension_numbers = #tpu.dot_dimension_numbers<[1], [0], [0], [1], [0, 0, 1, 1], [], []>} : vector<8x32xf32>, vector<32x128xf32>, vector<8x128xf32> -> vector<8x128xf32>
    %290 = arith.addf %287, %289 : vector<8x128xf32>
    %291 = vector.extract_strided_slice %290 {offsets = [0, 0], sizes = [8, 32], strides = [1, 1]} : vector<8x128xf32> to vector<8x32xf32>
    %cst_125 = arith.constant 0.000000e+00 : f32
    %292 = vector.broadcast %cst_125 : f32 to vector<8x32xf32>
    %293 = arith.subf %292, %291 : vector<8x32xf32>
    %294 = math.exp %293 : vector<8x32xf32>
    %cst_126 = arith.constant 1.000000e+00 : f32
    %295 = vector.broadcast %cst_126 : f32 to vector<8x32xf32>
    %296 = arith.addf %295, %294 : vector<8x32xf32>
    %cst_127 = arith.constant 1.000000e+00 : f32
    %297 = vector.broadcast %cst_127 : f32 to vector<8x32xf32>
    %298 = arith.divf %297, %296 : vector<8x32xf32>
    %299 = vector.extract_strided_slice %290 {offsets = [0, 32], sizes = [8, 32], strides = [1, 1]} : vector<8x128xf32> to vector<8x32xf32>
    %cst_128 = arith.constant 0.000000e+00 : f32
    %300 = vector.broadcast %cst_128 : f32 to vector<8x32xf32>
    %301 = arith.subf %300, %299 : vector<8x32xf32>
    %302 = math.exp %301 : vector<8x32xf32>
    %cst_129 = arith.constant 1.000000e+00 : f32
    %303 = vector.broadcast %cst_129 : f32 to vector<8x32xf32>
    %304 = arith.addf %303, %302 : vector<8x32xf32>
    %cst_130 = arith.constant 1.000000e+00 : f32
    %305 = vector.broadcast %cst_130 : f32 to vector<8x32xf32>
    %306 = arith.divf %305, %304 : vector<8x32xf32>
    %307 = vector.extract_strided_slice %290 {offsets = [0, 64], sizes = [8, 32], strides = [1, 1]} : vector<8x128xf32> to vector<8x32xf32>
    %308 = math.tanh %307 : vector<8x32xf32>
    %309 = vector.extract_strided_slice %290 {offsets = [0, 96], sizes = [8, 32], strides = [1, 1]} : vector<8x128xf32> to vector<8x32xf32>
    %cst_131 = arith.constant 0.000000e+00 : f32
    %310 = vector.broadcast %cst_131 : f32 to vector<8x32xf32>
    %311 = arith.subf %310, %309 : vector<8x32xf32>
    %312 = math.exp %311 : vector<8x32xf32>
    %cst_132 = arith.constant 1.000000e+00 : f32
    %313 = vector.broadcast %cst_132 : f32 to vector<8x32xf32>
    %314 = arith.addf %313, %312 : vector<8x32xf32>
    %cst_133 = arith.constant 1.000000e+00 : f32
    %315 = vector.broadcast %cst_133 : f32 to vector<8x32xf32>
    %316 = arith.divf %315, %314 : vector<8x32xf32>
    %317 = arith.mulf %306, %240 : vector<8x32xf32>
    %318 = arith.mulf %298, %308 : vector<8x32xf32>
    %319 = arith.addf %317, %318 : vector<8x32xf32>
    %320 = math.tanh %319 : vector<8x32xf32>
    %321 = arith.mulf %316, %320 : vector<8x32xf32>
    %322 = arith.index_cast %246 : i32 to index
    %c0_134 = arith.constant 0 : index
    %323 = vector.load %arg11[%322, %c0_134] : memref<104x32xf32, #tpu.memory_space<vmem>>, vector<8x32xf32>
    tpu.vector_store %arg11[%322, %c0_134], %321 {strides = array<i32>} : memref<104x32xf32, #tpu.memory_space<vmem>>, vector<8x32xf32>,
    %c4_i32 = arith.constant 4 : i32
    %c8_i32_135 = arith.constant 8 : i32
    %324 = arith.muli %c4_i32, %c8_i32_135 : i32
    %325 = tpu.assume_multiple %324, 8 : i32
    %326 = arith.index_cast %325 : i32 to index
    %c0_136 = arith.constant 0 : index
    %327 = vector.load %arg10[%326, %c0_136] : memref<104x128xf32, #tpu.memory_space<vmem>>, vector<8x128xf32>
    %c0_137 = arith.constant 0 : index
    %c0_138 = arith.constant 0 : index
    %328 = vector.load %arg2[%c0_137, %c0_138] : memref<32x128xf32, #tpu.memory_space<vmem>>, vector<32x128xf32>
    %cst_139 = arith.constant dense<0.000000e+00> : vector<8x128xf32>
    %329 = tpu.matmul %282, %328, %cst_139 {dimension_numbers = #tpu.dot_dimension_numbers<[1], [0], [0], [1], [0, 0, 1, 1], [], []>} : vector<8x32xf32>, vector<32x128xf32>, vector<8x128xf32> -> vector<8x128xf32>
    %330 = arith.addf %327, %329 : vector<8x128xf32>
    %331 = vector.extract_strided_slice %330 {offsets = [0, 0], sizes = [8, 32], strides = [1, 1]} : vector<8x128xf32> to vector<8x32xf32>
    %cst_140 = arith.constant 0.000000e+00 : f32
    %332 = vector.broadcast %cst_140 : f32 to vector<8x32xf32>
    %333 = arith.subf %332, %331 : vector<8x32xf32>
    %334 = math.exp %333 : vector<8x32xf32>
    %cst_141 = arith.constant 1.000000e+00 : f32
    %335 = vector.broadcast %cst_141 : f32 to vector<8x32xf32>
    %336 = arith.addf %335, %334 : vector<8x32xf32>
    %cst_142 = arith.constant 1.000000e+00 : f32
    %337 = vector.broadcast %cst_142 : f32 to vector<8x32xf32>
    %338 = arith.divf %337, %336 : vector<8x32xf32>
    %339 = vector.extract_strided_slice %330 {offsets = [0, 32], sizes = [8, 32], strides = [1, 1]} : vector<8x128xf32> to vector<8x32xf32>
    %cst_143 = arith.constant 0.000000e+00 : f32
    %340 = vector.broadcast %cst_143 : f32 to vector<8x32xf32>
    %341 = arith.subf %340, %339 : vector<8x32xf32>
    %342 = math.exp %341 : vector<8x32xf32>
    %cst_144 = arith.constant 1.000000e+00 : f32
    %343 = vector.broadcast %cst_144 : f32 to vector<8x32xf32>
    %344 = arith.addf %343, %342 : vector<8x32xf32>
    %cst_145 = arith.constant 1.000000e+00 : f32
    %345 = vector.broadcast %cst_145 : f32 to vector<8x32xf32>
    %346 = arith.divf %345, %344 : vector<8x32xf32>
    %347 = vector.extract_strided_slice %330 {offsets = [0, 64], sizes = [8, 32], strides = [1, 1]} : vector<8x128xf32> to vector<8x32xf32>
    %348 = math.tanh %347 : vector<8x32xf32>
    %349 = vector.extract_strided_slice %330 {offsets = [0, 96], sizes = [8, 32], strides = [1, 1]} : vector<8x128xf32> to vector<8x32xf32>
    %cst_146 = arith.constant 0.000000e+00 : f32
    %350 = vector.broadcast %cst_146 : f32 to vector<8x32xf32>
    %351 = arith.subf %350, %349 : vector<8x32xf32>
    %352 = math.exp %351 : vector<8x32xf32>
    %cst_147 = arith.constant 1.000000e+00 : f32
    %353 = vector.broadcast %cst_147 : f32 to vector<8x32xf32>
    %354 = arith.addf %353, %352 : vector<8x32xf32>
    %cst_148 = arith.constant 1.000000e+00 : f32
    %355 = vector.broadcast %cst_148 : f32 to vector<8x32xf32>
    %356 = arith.divf %355, %354 : vector<8x32xf32>
    %357 = arith.mulf %346, %280 : vector<8x32xf32>
    %358 = arith.mulf %338, %348 : vector<8x32xf32>
    %359 = arith.addf %357, %358 : vector<8x32xf32>
    %360 = math.tanh %359 : vector<8x32xf32>
    %361 = arith.mulf %356, %360 : vector<8x32xf32>
    %c0_149 = arith.constant 0 : index
    %c0_150 = arith.constant 0 : index
    %362 = vector.load %arg4[%c0_149, %c0_150] : memref<32x128xf32, #tpu.memory_space<vmem>>, vector<32x128xf32>
    %cst_151 = arith.constant dense<0.000000e+00> : vector<8x128xf32>
    %363 = tpu.matmul %361, %362, %cst_151 {dimension_numbers = #tpu.dot_dimension_numbers<[1], [0], [0], [1], [0, 0, 1, 1], [], []>} : vector<8x32xf32>, vector<32x128xf32>, vector<8x128xf32> -> vector<8x128xf32>
    %c0_152 = arith.constant 0 : index
    %c0_153 = arith.constant 0 : index
    %364 = vector.load %arg6[%c0_152, %c0_153] : memref<1x128xf32, #tpu.memory_space<vmem>>, vector<1x128xf32>
    %365 = vector.broadcast %364 : vector<1x128xf32> to vector<8x128xf32>
    %366 = arith.addf %363, %365 : vector<8x128xf32>
    %c0_154 = arith.constant 0 : index
    %c0_155 = arith.constant 0 : index
    %367 = vector.load %arg5[%c0_154, %c0_155] : memref<32x128xf32, #tpu.memory_space<vmem>>, vector<32x128xf32>
    %cst_156 = arith.constant dense<0.000000e+00> : vector<8x128xf32>
    %368 = tpu.matmul %321, %367, %cst_156 {dimension_numbers = #tpu.dot_dimension_numbers<[1], [0], [0], [1], [0, 0, 1, 1], [], []>} : vector<8x32xf32>, vector<32x128xf32>, vector<8x128xf32> -> vector<8x128xf32>
    %369 = arith.addf %366, %368 : vector<8x128xf32>
    %370 = vector.extract_strided_slice %369 {offsets = [0, 0], sizes = [8, 32], strides = [1, 1]} : vector<8x128xf32> to vector<8x32xf32>
    %cst_157 = arith.constant 0.000000e+00 : f32
    %371 = vector.broadcast %cst_157 : f32 to vector<8x32xf32>
    %372 = arith.subf %371, %370 : vector<8x32xf32>
    %373 = math.exp %372 : vector<8x32xf32>
    %cst_158 = arith.constant 1.000000e+00 : f32
    %374 = vector.broadcast %cst_158 : f32 to vector<8x32xf32>
    %375 = arith.addf %374, %373 : vector<8x32xf32>
    %cst_159 = arith.constant 1.000000e+00 : f32
    %376 = vector.broadcast %cst_159 : f32 to vector<8x32xf32>
    %377 = arith.divf %376, %375 : vector<8x32xf32>
    %378 = vector.extract_strided_slice %369 {offsets = [0, 32], sizes = [8, 32], strides = [1, 1]} : vector<8x128xf32> to vector<8x32xf32>
    %cst_160 = arith.constant 0.000000e+00 : f32
    %379 = vector.broadcast %cst_160 : f32 to vector<8x32xf32>
    %380 = arith.subf %379, %378 : vector<8x32xf32>
    %381 = math.exp %380 : vector<8x32xf32>
    %cst_161 = arith.constant 1.000000e+00 : f32
    %382 = vector.broadcast %cst_161 : f32 to vector<8x32xf32>
    %383 = arith.addf %382, %381 : vector<8x32xf32>
    %cst_162 = arith.constant 1.000000e+00 : f32
    %384 = vector.broadcast %cst_162 : f32 to vector<8x32xf32>
    %385 = arith.divf %384, %383 : vector<8x32xf32>
    %386 = vector.extract_strided_slice %369 {offsets = [0, 64], sizes = [8, 32], strides = [1, 1]} : vector<8x128xf32> to vector<8x32xf32>
    %387 = math.tanh %386 : vector<8x32xf32>
    %388 = vector.extract_strided_slice %369 {offsets = [0, 96], sizes = [8, 32], strides = [1, 1]} : vector<8x128xf32> to vector<8x32xf32>
    %cst_163 = arith.constant 0.000000e+00 : f32
    %389 = vector.broadcast %cst_163 : f32 to vector<8x32xf32>
    %390 = arith.subf %389, %388 : vector<8x32xf32>
    %391 = math.exp %390 : vector<8x32xf32>
    %cst_164 = arith.constant 1.000000e+00 : f32
    %392 = vector.broadcast %cst_164 : f32 to vector<8x32xf32>
    %393 = arith.addf %392, %391 : vector<8x32xf32>
    %cst_165 = arith.constant 1.000000e+00 : f32
    %394 = vector.broadcast %cst_165 : f32 to vector<8x32xf32>
    %395 = arith.divf %394, %393 : vector<8x32xf32>
    %396 = arith.mulf %385, %319 : vector<8x32xf32>
    %397 = arith.mulf %377, %387 : vector<8x32xf32>
    %398 = arith.addf %396, %397 : vector<8x32xf32>
    %399 = math.tanh %398 : vector<8x32xf32>
    %400 = arith.mulf %395, %399 : vector<8x32xf32>
    %401 = arith.index_cast %325 : i32 to index
    %c0_166 = arith.constant 0 : index
    %402 = vector.load %arg11[%401, %c0_166] : memref<104x32xf32, #tpu.memory_space<vmem>>, vector<8x32xf32>
    tpu.vector_store %arg11[%401, %c0_166], %400 {strides = array<i32>} : memref<104x32xf32, #tpu.memory_space<vmem>>, vector<8x32xf32>,
    %c5_i32 = arith.constant 5 : i32
    %c8_i32_167 = arith.constant 8 : i32
    %403 = arith.muli %c5_i32, %c8_i32_167 : i32
    %404 = tpu.assume_multiple %403, 8 : i32
    %405 = arith.index_cast %404 : i32 to index
    %c0_168 = arith.constant 0 : index
    %406 = vector.load %arg10[%405, %c0_168] : memref<104x128xf32, #tpu.memory_space<vmem>>, vector<8x128xf32>
    %c0_169 = arith.constant 0 : index
    %c0_170 = arith.constant 0 : index
    %407 = vector.load %arg2[%c0_169, %c0_170] : memref<32x128xf32, #tpu.memory_space<vmem>>, vector<32x128xf32>
    %cst_171 = arith.constant dense<0.000000e+00> : vector<8x128xf32>
    %408 = tpu.matmul %361, %407, %cst_171 {dimension_numbers = #tpu.dot_dimension_numbers<[1], [0], [0], [1], [0, 0, 1, 1], [], []>} : vector<8x32xf32>, vector<32x128xf32>, vector<8x128xf32> -> vector<8x128xf32>
    %409 = arith.addf %406, %408 : vector<8x128xf32>
    %410 = vector.extract_strided_slice %409 {offsets = [0, 0], sizes = [8, 32], strides = [1, 1]} : vector<8x128xf32> to vector<8x32xf32>
    %cst_172 = arith.constant 0.000000e+00 : f32
    %411 = vector.broadcast %cst_172 : f32 to vector<8x32xf32>
    %412 = arith.subf %411, %410 : vector<8x32xf32>
    %413 = math.exp %412 : vector<8x32xf32>
    %cst_173 = arith.constant 1.000000e+00 : f32
    %414 = vector.broadcast %cst_173 : f32 to vector<8x32xf32>
    %415 = arith.addf %414, %413 : vector<8x32xf32>
    %cst_174 = arith.constant 1.000000e+00 : f32
    %416 = vector.broadcast %cst_174 : f32 to vector<8x32xf32>
    %417 = arith.divf %416, %415 : vector<8x32xf32>
    %418 = vector.extract_strided_slice %409 {offsets = [0, 32], sizes = [8, 32], strides = [1, 1]} : vector<8x128xf32> to vector<8x32xf32>
    %cst_175 = arith.constant 0.000000e+00 : f32
    %419 = vector.broadcast %cst_175 : f32 to vector<8x32xf32>
    %420 = arith.subf %419, %418 : vector<8x32xf32>
    %421 = math.exp %420 : vector<8x32xf32>
    %cst_176 = arith.constant 1.000000e+00 : f32
    %422 = vector.broadcast %cst_176 : f32 to vector<8x32xf32>
    %423 = arith.addf %422, %421 : vector<8x32xf32>
    %cst_177 = arith.constant 1.000000e+00 : f32
    %424 = vector.broadcast %cst_177 : f32 to vector<8x32xf32>
    %425 = arith.divf %424, %423 : vector<8x32xf32>
    %426 = vector.extract_strided_slice %409 {offsets = [0, 64], sizes = [8, 32], strides = [1, 1]} : vector<8x128xf32> to vector<8x32xf32>
    %427 = math.tanh %426 : vector<8x32xf32>
    %428 = vector.extract_strided_slice %409 {offsets = [0, 96], sizes = [8, 32], strides = [1, 1]} : vector<8x128xf32> to vector<8x32xf32>
    %cst_178 = arith.constant 0.000000e+00 : f32
    %429 = vector.broadcast %cst_178 : f32 to vector<8x32xf32>
    %430 = arith.subf %429, %428 : vector<8x32xf32>
    %431 = math.exp %430 : vector<8x32xf32>
    %cst_179 = arith.constant 1.000000e+00 : f32
    %432 = vector.broadcast %cst_179 : f32 to vector<8x32xf32>
    %433 = arith.addf %432, %431 : vector<8x32xf32>
    %cst_180 = arith.constant 1.000000e+00 : f32
    %434 = vector.broadcast %cst_180 : f32 to vector<8x32xf32>
    %435 = arith.divf %434, %433 : vector<8x32xf32>
    %436 = arith.mulf %425, %359 : vector<8x32xf32>
    %437 = arith.mulf %417, %427 : vector<8x32xf32>
    %438 = arith.addf %436, %437 : vector<8x32xf32>
    %439 = math.tanh %438 : vector<8x32xf32>
    %440 = arith.mulf %435, %439 : vector<8x32xf32>
    %c0_181 = arith.constant 0 : index
    %c0_182 = arith.constant 0 : index
    %441 = vector.load %arg4[%c0_181, %c0_182] : memref<32x128xf32, #tpu.memory_space<vmem>>, vector<32x128xf32>
    %cst_183 = arith.constant dense<0.000000e+00> : vector<8x128xf32>
    %442 = tpu.matmul %440, %441, %cst_183 {dimension_numbers = #tpu.dot_dimension_numbers<[1], [0], [0], [1], [0, 0, 1, 1], [], []>} : vector<8x32xf32>, vector<32x128xf32>, vector<8x128xf32> -> vector<8x128xf32>
    %c0_184 = arith.constant 0 : index
    %c0_185 = arith.constant 0 : index
    %443 = vector.load %arg6[%c0_184, %c0_185] : memref<1x128xf32, #tpu.memory_space<vmem>>, vector<1x128xf32>
    %444 = vector.broadcast %443 : vector<1x128xf32> to vector<8x128xf32>
    %445 = arith.addf %442, %444 : vector<8x128xf32>
    %c0_186 = arith.constant 0 : index
    %c0_187 = arith.constant 0 : index
    %446 = vector.load %arg5[%c0_186, %c0_187] : memref<32x128xf32, #tpu.memory_space<vmem>>, vector<32x128xf32>
    %cst_188 = arith.constant dense<0.000000e+00> : vector<8x128xf32>
    %447 = tpu.matmul %400, %446, %cst_188 {dimension_numbers = #tpu.dot_dimension_numbers<[1], [0], [0], [1], [0, 0, 1, 1], [], []>} : vector<8x32xf32>, vector<32x128xf32>, vector<8x128xf32> -> vector<8x128xf32>
    %448 = arith.addf %445, %447 : vector<8x128xf32>
    %449 = vector.extract_strided_slice %448 {offsets = [0, 0], sizes = [8, 32], strides = [1, 1]} : vector<8x128xf32> to vector<8x32xf32>
    %cst_189 = arith.constant 0.000000e+00 : f32
    %450 = vector.broadcast %cst_189 : f32 to vector<8x32xf32>
    %451 = arith.subf %450, %449 : vector<8x32xf32>
    %452 = math.exp %451 : vector<8x32xf32>
    %cst_190 = arith.constant 1.000000e+00 : f32
    %453 = vector.broadcast %cst_190 : f32 to vector<8x32xf32>
    %454 = arith.addf %453, %452 : vector<8x32xf32>
    %cst_191 = arith.constant 1.000000e+00 : f32
    %455 = vector.broadcast %cst_191 : f32 to vector<8x32xf32>
    %456 = arith.divf %455, %454 : vector<8x32xf32>
    %457 = vector.extract_strided_slice %448 {offsets = [0, 32], sizes = [8, 32], strides = [1, 1]} : vector<8x128xf32> to vector<8x32xf32>
    %cst_192 = arith.constant 0.000000e+00 : f32
    %458 = vector.broadcast %cst_192 : f32 to vector<8x32xf32>
    %459 = arith.subf %458, %457 : vector<8x32xf32>
    %460 = math.exp %459 : vector<8x32xf32>
    %cst_193 = arith.constant 1.000000e+00 : f32
    %461 = vector.broadcast %cst_193 : f32 to vector<8x32xf32>
    %462 = arith.addf %461, %460 : vector<8x32xf32>
    %cst_194 = arith.constant 1.000000e+00 : f32
    %463 = vector.broadcast %cst_194 : f32 to vector<8x32xf32>
    %464 = arith.divf %463, %462 : vector<8x32xf32>
    %465 = vector.extract_strided_slice %448 {offsets = [0, 64], sizes = [8, 32], strides = [1, 1]} : vector<8x128xf32> to vector<8x32xf32>
    %466 = math.tanh %465 : vector<8x32xf32>
    %467 = vector.extract_strided_slice %448 {offsets = [0, 96], sizes = [8, 32], strides = [1, 1]} : vector<8x128xf32> to vector<8x32xf32>
    %cst_195 = arith.constant 0.000000e+00 : f32
    %468 = vector.broadcast %cst_195 : f32 to vector<8x32xf32>
    %469 = arith.subf %468, %467 : vector<8x32xf32>
    %470 = math.exp %469 : vector<8x32xf32>
    %cst_196 = arith.constant 1.000000e+00 : f32
    %471 = vector.broadcast %cst_196 : f32 to vector<8x32xf32>
    %472 = arith.addf %471, %470 : vector<8x32xf32>
    %cst_197 = arith.constant 1.000000e+00 : f32
    %473 = vector.broadcast %cst_197 : f32 to vector<8x32xf32>
    %474 = arith.divf %473, %472 : vector<8x32xf32>
    %475 = arith.mulf %464, %398 : vector<8x32xf32>
    %476 = arith.mulf %456, %466 : vector<8x32xf32>
    %477 = arith.addf %475, %476 : vector<8x32xf32>
    %478 = math.tanh %477 : vector<8x32xf32>
    %479 = arith.mulf %474, %478 : vector<8x32xf32>
    %480 = arith.index_cast %404 : i32 to index
    %c0_198 = arith.constant 0 : index
    %481 = vector.load %arg11[%480, %c0_198] : memref<104x32xf32, #tpu.memory_space<vmem>>, vector<8x32xf32>
    tpu.vector_store %arg11[%480, %c0_198], %479 {strides = array<i32>} : memref<104x32xf32, #tpu.memory_space<vmem>>, vector<8x32xf32>,
    %c6_i32 = arith.constant 6 : i32
    %c8_i32_199 = arith.constant 8 : i32
    %482 = arith.muli %c6_i32, %c8_i32_199 : i32
    %483 = tpu.assume_multiple %482, 8 : i32
    %484 = arith.index_cast %483 : i32 to index
    %c0_200 = arith.constant 0 : index
    %485 = vector.load %arg10[%484, %c0_200] : memref<104x128xf32, #tpu.memory_space<vmem>>, vector<8x128xf32>
    %c0_201 = arith.constant 0 : index
    %c0_202 = arith.constant 0 : index
    %486 = vector.load %arg2[%c0_201, %c0_202] : memref<32x128xf32, #tpu.memory_space<vmem>>, vector<32x128xf32>
    %cst_203 = arith.constant dense<0.000000e+00> : vector<8x128xf32>
    %487 = tpu.matmul %440, %486, %cst_203 {dimension_numbers = #tpu.dot_dimension_numbers<[1], [0], [0], [1], [0, 0, 1, 1], [], []>} : vector<8x32xf32>, vector<32x128xf32>, vector<8x128xf32> -> vector<8x128xf32>
    %488 = arith.addf %485, %487 : vector<8x128xf32>
    %489 = vector.extract_strided_slice %488 {offsets = [0, 0], sizes = [8, 32], strides = [1, 1]} : vector<8x128xf32> to vector<8x32xf32>
    %cst_204 = arith.constant 0.000000e+00 : f32
    %490 = vector.broadcast %cst_204 : f32 to vector<8x32xf32>
    %491 = arith.subf %490, %489 : vector<8x32xf32>
    %492 = math.exp %491 : vector<8x32xf32>
    %cst_205 = arith.constant 1.000000e+00 : f32
    %493 = vector.broadcast %cst_205 : f32 to vector<8x32xf32>
    %494 = arith.addf %493, %492 : vector<8x32xf32>
    %cst_206 = arith.constant 1.000000e+00 : f32
    %495 = vector.broadcast %cst_206 : f32 to vector<8x32xf32>
    %496 = arith.divf %495, %494 : vector<8x32xf32>
    %497 = vector.extract_strided_slice %488 {offsets = [0, 32], sizes = [8, 32], strides = [1, 1]} : vector<8x128xf32> to vector<8x32xf32>
    %cst_207 = arith.constant 0.000000e+00 : f32
    %498 = vector.broadcast %cst_207 : f32 to vector<8x32xf32>
    %499 = arith.subf %498, %497 : vector<8x32xf32>
    %500 = math.exp %499 : vector<8x32xf32>
    %cst_208 = arith.constant 1.000000e+00 : f32
    %501 = vector.broadcast %cst_208 : f32 to vector<8x32xf32>
    %502 = arith.addf %501, %500 : vector<8x32xf32>
    %cst_209 = arith.constant 1.000000e+00 : f32
    %503 = vector.broadcast %cst_209 : f32 to vector<8x32xf32>
    %504 = arith.divf %503, %502 : vector<8x32xf32>
    %505 = vector.extract_strided_slice %488 {offsets = [0, 64], sizes = [8, 32], strides = [1, 1]} : vector<8x128xf32> to vector<8x32xf32>
    %506 = math.tanh %505 : vector<8x32xf32>
    %507 = vector.extract_strided_slice %488 {offsets = [0, 96], sizes = [8, 32], strides = [1, 1]} : vector<8x128xf32> to vector<8x32xf32>
    %cst_210 = arith.constant 0.000000e+00 : f32
    %508 = vector.broadcast %cst_210 : f32 to vector<8x32xf32>
    %509 = arith.subf %508, %507 : vector<8x32xf32>
    %510 = math.exp %509 : vector<8x32xf32>
    %cst_211 = arith.constant 1.000000e+00 : f32
    %511 = vector.broadcast %cst_211 : f32 to vector<8x32xf32>
    %512 = arith.addf %511, %510 : vector<8x32xf32>
    %cst_212 = arith.constant 1.000000e+00 : f32
    %513 = vector.broadcast %cst_212 : f32 to vector<8x32xf32>
    %514 = arith.divf %513, %512 : vector<8x32xf32>
    %515 = arith.mulf %504, %438 : vector<8x32xf32>
    %516 = arith.mulf %496, %506 : vector<8x32xf32>
    %517 = arith.addf %515, %516 : vector<8x32xf32>
    %518 = math.tanh %517 : vector<8x32xf32>
    %519 = arith.mulf %514, %518 : vector<8x32xf32>
    %c0_213 = arith.constant 0 : index
    %c0_214 = arith.constant 0 : index
    %520 = vector.load %arg4[%c0_213, %c0_214] : memref<32x128xf32, #tpu.memory_space<vmem>>, vector<32x128xf32>
    %cst_215 = arith.constant dense<0.000000e+00> : vector<8x128xf32>
    %521 = tpu.matmul %519, %520, %cst_215 {dimension_numbers = #tpu.dot_dimension_numbers<[1], [0], [0], [1], [0, 0, 1, 1], [], []>} : vector<8x32xf32>, vector<32x128xf32>, vector<8x128xf32> -> vector<8x128xf32>
    %c0_216 = arith.constant 0 : index
    %c0_217 = arith.constant 0 : index
    %522 = vector.load %arg6[%c0_216, %c0_217] : memref<1x128xf32, #tpu.memory_space<vmem>>, vector<1x128xf32>
    %523 = vector.broadcast %522 : vector<1x128xf32> to vector<8x128xf32>
    %524 = arith.addf %521, %523 : vector<8x128xf32>
    %c0_218 = arith.constant 0 : index
    %c0_219 = arith.constant 0 : index
    %525 = vector.load %arg5[%c0_218, %c0_219] : memref<32x128xf32, #tpu.memory_space<vmem>>, vector<32x128xf32>
    %cst_220 = arith.constant dense<0.000000e+00> : vector<8x128xf32>
    %526 = tpu.matmul %479, %525, %cst_220 {dimension_numbers = #tpu.dot_dimension_numbers<[1], [0], [0], [1], [0, 0, 1, 1], [], []>} : vector<8x32xf32>, vector<32x128xf32>, vector<8x128xf32> -> vector<8x128xf32>
    %527 = arith.addf %524, %526 : vector<8x128xf32>
    %528 = vector.extract_strided_slice %527 {offsets = [0, 0], sizes = [8, 32], strides = [1, 1]} : vector<8x128xf32> to vector<8x32xf32>
    %cst_221 = arith.constant 0.000000e+00 : f32
    %529 = vector.broadcast %cst_221 : f32 to vector<8x32xf32>
    %530 = arith.subf %529, %528 : vector<8x32xf32>
    %531 = math.exp %530 : vector<8x32xf32>
    %cst_222 = arith.constant 1.000000e+00 : f32
    %532 = vector.broadcast %cst_222 : f32 to vector<8x32xf32>
    %533 = arith.addf %532, %531 : vector<8x32xf32>
    %cst_223 = arith.constant 1.000000e+00 : f32
    %534 = vector.broadcast %cst_223 : f32 to vector<8x32xf32>
    %535 = arith.divf %534, %533 : vector<8x32xf32>
    %536 = vector.extract_strided_slice %527 {offsets = [0, 32], sizes = [8, 32], strides = [1, 1]} : vector<8x128xf32> to vector<8x32xf32>
    %cst_224 = arith.constant 0.000000e+00 : f32
    %537 = vector.broadcast %cst_224 : f32 to vector<8x32xf32>
    %538 = arith.subf %537, %536 : vector<8x32xf32>
    %539 = math.exp %538 : vector<8x32xf32>
    %cst_225 = arith.constant 1.000000e+00 : f32
    %540 = vector.broadcast %cst_225 : f32 to vector<8x32xf32>
    %541 = arith.addf %540, %539 : vector<8x32xf32>
    %cst_226 = arith.constant 1.000000e+00 : f32
    %542 = vector.broadcast %cst_226 : f32 to vector<8x32xf32>
    %543 = arith.divf %542, %541 : vector<8x32xf32>
    %544 = vector.extract_strided_slice %527 {offsets = [0, 64], sizes = [8, 32], strides = [1, 1]} : vector<8x128xf32> to vector<8x32xf32>
    %545 = math.tanh %544 : vector<8x32xf32>
    %546 = vector.extract_strided_slice %527 {offsets = [0, 96], sizes = [8, 32], strides = [1, 1]} : vector<8x128xf32> to vector<8x32xf32>
    %cst_227 = arith.constant 0.000000e+00 : f32
    %547 = vector.broadcast %cst_227 : f32 to vector<8x32xf32>
    %548 = arith.subf %547, %546 : vector<8x32xf32>
    %549 = math.exp %548 : vector<8x32xf32>
    %cst_228 = arith.constant 1.000000e+00 : f32
    %550 = vector.broadcast %cst_228 : f32 to vector<8x32xf32>
    %551 = arith.addf %550, %549 : vector<8x32xf32>
    %cst_229 = arith.constant 1.000000e+00 : f32
    %552 = vector.broadcast %cst_229 : f32 to vector<8x32xf32>
    %553 = arith.divf %552, %551 : vector<8x32xf32>
    %554 = arith.mulf %543, %477 : vector<8x32xf32>
    %555 = arith.mulf %535, %545 : vector<8x32xf32>
    %556 = arith.addf %554, %555 : vector<8x32xf32>
    %557 = math.tanh %556 : vector<8x32xf32>
    %558 = arith.mulf %553, %557 : vector<8x32xf32>
    %559 = arith.index_cast %483 : i32 to index
    %c0_230 = arith.constant 0 : index
    %560 = vector.load %arg11[%559, %c0_230] : memref<104x32xf32, #tpu.memory_space<vmem>>, vector<8x32xf32>
    tpu.vector_store %arg11[%559, %c0_230], %558 {strides = array<i32>} : memref<104x32xf32, #tpu.memory_space<vmem>>, vector<8x32xf32>,
    %c7_i32 = arith.constant 7 : i32
    %c8_i32_231 = arith.constant 8 : i32
    %561 = arith.muli %c7_i32, %c8_i32_231 : i32
    %562 = tpu.assume_multiple %561, 8 : i32
    %563 = arith.index_cast %562 : i32 to index
    %c0_232 = arith.constant 0 : index
    %564 = vector.load %arg10[%563, %c0_232] : memref<104x128xf32, #tpu.memory_space<vmem>>, vector<8x128xf32>
    %c0_233 = arith.constant 0 : index
    %c0_234 = arith.constant 0 : index
    %565 = vector.load %arg2[%c0_233, %c0_234] : memref<32x128xf32, #tpu.memory_space<vmem>>, vector<32x128xf32>
    %cst_235 = arith.constant dense<0.000000e+00> : vector<8x128xf32>
    %566 = tpu.matmul %519, %565, %cst_235 {dimension_numbers = #tpu.dot_dimension_numbers<[1], [0], [0], [1], [0, 0, 1, 1], [], []>} : vector<8x32xf32>, vector<32x128xf32>, vector<8x128xf32> -> vector<8x128xf32>
    %567 = arith.addf %564, %566 : vector<8x128xf32>
    %568 = vector.extract_strided_slice %567 {offsets = [0, 0], sizes = [8, 32], strides = [1, 1]} : vector<8x128xf32> to vector<8x32xf32>
    %cst_236 = arith.constant 0.000000e+00 : f32
    %569 = vector.broadcast %cst_236 : f32 to vector<8x32xf32>
    %570 = arith.subf %569, %568 : vector<8x32xf32>
    %571 = math.exp %570 : vector<8x32xf32>
    %cst_237 = arith.constant 1.000000e+00 : f32
    %572 = vector.broadcast %cst_237 : f32 to vector<8x32xf32>
    %573 = arith.addf %572, %571 : vector<8x32xf32>
    %cst_238 = arith.constant 1.000000e+00 : f32
    %574 = vector.broadcast %cst_238 : f32 to vector<8x32xf32>
    %575 = arith.divf %574, %573 : vector<8x32xf32>
    %576 = vector.extract_strided_slice %567 {offsets = [0, 32], sizes = [8, 32], strides = [1, 1]} : vector<8x128xf32> to vector<8x32xf32>
    %cst_239 = arith.constant 0.000000e+00 : f32
    %577 = vector.broadcast %cst_239 : f32 to vector<8x32xf32>
    %578 = arith.subf %577, %576 : vector<8x32xf32>
    %579 = math.exp %578 : vector<8x32xf32>
    %cst_240 = arith.constant 1.000000e+00 : f32
    %580 = vector.broadcast %cst_240 : f32 to vector<8x32xf32>
    %581 = arith.addf %580, %579 : vector<8x32xf32>
    %cst_241 = arith.constant 1.000000e+00 : f32
    %582 = vector.broadcast %cst_241 : f32 to vector<8x32xf32>
    %583 = arith.divf %582, %581 : vector<8x32xf32>
    %584 = vector.extract_strided_slice %567 {offsets = [0, 64], sizes = [8, 32], strides = [1, 1]} : vector<8x128xf32> to vector<8x32xf32>
    %585 = math.tanh %584 : vector<8x32xf32>
    %586 = vector.extract_strided_slice %567 {offsets = [0, 96], sizes = [8, 32], strides = [1, 1]} : vector<8x128xf32> to vector<8x32xf32>
    %cst_242 = arith.constant 0.000000e+00 : f32
    %587 = vector.broadcast %cst_242 : f32 to vector<8x32xf32>
    %588 = arith.subf %587, %586 : vector<8x32xf32>
    %589 = math.exp %588 : vector<8x32xf32>
    %cst_243 = arith.constant 1.000000e+00 : f32
    %590 = vector.broadcast %cst_243 : f32 to vector<8x32xf32>
    %591 = arith.addf %590, %589 : vector<8x32xf32>
    %cst_244 = arith.constant 1.000000e+00 : f32
    %592 = vector.broadcast %cst_244 : f32 to vector<8x32xf32>
    %593 = arith.divf %592, %591 : vector<8x32xf32>
    %594 = arith.mulf %583, %517 : vector<8x32xf32>
    %595 = arith.mulf %575, %585 : vector<8x32xf32>
    %596 = arith.addf %594, %595 : vector<8x32xf32>
    %597 = math.tanh %596 : vector<8x32xf32>
    %598 = arith.mulf %593, %597 : vector<8x32xf32>
    %c0_245 = arith.constant 0 : index
    %c0_246 = arith.constant 0 : index
    %599 = vector.load %arg4[%c0_245, %c0_246] : memref<32x128xf32, #tpu.memory_space<vmem>>, vector<32x128xf32>
    %cst_247 = arith.constant dense<0.000000e+00> : vector<8x128xf32>
    %600 = tpu.matmul %598, %599, %cst_247 {dimension_numbers = #tpu.dot_dimension_numbers<[1], [0], [0], [1], [0, 0, 1, 1], [], []>} : vector<8x32xf32>, vector<32x128xf32>, vector<8x128xf32> -> vector<8x128xf32>
    %c0_248 = arith.constant 0 : index
    %c0_249 = arith.constant 0 : index
    %601 = vector.load %arg6[%c0_248, %c0_249] : memref<1x128xf32, #tpu.memory_space<vmem>>, vector<1x128xf32>
    %602 = vector.broadcast %601 : vector<1x128xf32> to vector<8x128xf32>
    %603 = arith.addf %600, %602 : vector<8x128xf32>
    %c0_250 = arith.constant 0 : index
    %c0_251 = arith.constant 0 : index
    %604 = vector.load %arg5[%c0_250, %c0_251] : memref<32x128xf32, #tpu.memory_space<vmem>>, vector<32x128xf32>
    %cst_252 = arith.constant dense<0.000000e+00> : vector<8x128xf32>
    %605 = tpu.matmul %558, %604, %cst_252 {dimension_numbers = #tpu.dot_dimension_numbers<[1], [0], [0], [1], [0, 0, 1, 1], [], []>} : vector<8x32xf32>, vector<32x128xf32>, vector<8x128xf32> -> vector<8x128xf32>
    %606 = arith.addf %603, %605 : vector<8x128xf32>
    %607 = vector.extract_strided_slice %606 {offsets = [0, 0], sizes = [8, 32], strides = [1, 1]} : vector<8x128xf32> to vector<8x32xf32>
    %cst_253 = arith.constant 0.000000e+00 : f32
    %608 = vector.broadcast %cst_253 : f32 to vector<8x32xf32>
    %609 = arith.subf %608, %607 : vector<8x32xf32>
    %610 = math.exp %609 : vector<8x32xf32>
    %cst_254 = arith.constant 1.000000e+00 : f32
    %611 = vector.broadcast %cst_254 : f32 to vector<8x32xf32>
    %612 = arith.addf %611, %610 : vector<8x32xf32>
    %cst_255 = arith.constant 1.000000e+00 : f32
    %613 = vector.broadcast %cst_255 : f32 to vector<8x32xf32>
    %614 = arith.divf %613, %612 : vector<8x32xf32>
    %615 = vector.extract_strided_slice %606 {offsets = [0, 32], sizes = [8, 32], strides = [1, 1]} : vector<8x128xf32> to vector<8x32xf32>
    %cst_256 = arith.constant 0.000000e+00 : f32
    %616 = vector.broadcast %cst_256 : f32 to vector<8x32xf32>
    %617 = arith.subf %616, %615 : vector<8x32xf32>
    %618 = math.exp %617 : vector<8x32xf32>
    %cst_257 = arith.constant 1.000000e+00 : f32
    %619 = vector.broadcast %cst_257 : f32 to vector<8x32xf32>
    %620 = arith.addf %619, %618 : vector<8x32xf32>
    %cst_258 = arith.constant 1.000000e+00 : f32
    %621 = vector.broadcast %cst_258 : f32 to vector<8x32xf32>
    %622 = arith.divf %621, %620 : vector<8x32xf32>
    %623 = vector.extract_strided_slice %606 {offsets = [0, 64], sizes = [8, 32], strides = [1, 1]} : vector<8x128xf32> to vector<8x32xf32>
    %624 = math.tanh %623 : vector<8x32xf32>
    %625 = vector.extract_strided_slice %606 {offsets = [0, 96], sizes = [8, 32], strides = [1, 1]} : vector<8x128xf32> to vector<8x32xf32>
    %cst_259 = arith.constant 0.000000e+00 : f32
    %626 = vector.broadcast %cst_259 : f32 to vector<8x32xf32>
    %627 = arith.subf %626, %625 : vector<8x32xf32>
    %628 = math.exp %627 : vector<8x32xf32>
    %cst_260 = arith.constant 1.000000e+00 : f32
    %629 = vector.broadcast %cst_260 : f32 to vector<8x32xf32>
    %630 = arith.addf %629, %628 : vector<8x32xf32>
    %cst_261 = arith.constant 1.000000e+00 : f32
    %631 = vector.broadcast %cst_261 : f32 to vector<8x32xf32>
    %632 = arith.divf %631, %630 : vector<8x32xf32>
    %633 = arith.mulf %622, %556 : vector<8x32xf32>
    %634 = arith.mulf %614, %624 : vector<8x32xf32>
    %635 = arith.addf %633, %634 : vector<8x32xf32>
    %636 = math.tanh %635 : vector<8x32xf32>
    %637 = arith.mulf %632, %636 : vector<8x32xf32>
    %638 = arith.index_cast %562 : i32 to index
    %c0_262 = arith.constant 0 : index
    %639 = vector.load %arg11[%638, %c0_262] : memref<104x32xf32, #tpu.memory_space<vmem>>, vector<8x32xf32>
    tpu.vector_store %arg11[%638, %c0_262], %637 {strides = array<i32>} : memref<104x32xf32, #tpu.memory_space<vmem>>, vector<8x32xf32>,
    %c8_i32_263 = arith.constant 8 : i32
    %c8_i32_264 = arith.constant 8 : i32
    %640 = arith.muli %c8_i32_263, %c8_i32_264 : i32
    %641 = tpu.assume_multiple %640, 8 : i32
    %642 = arith.index_cast %641 : i32 to index
    %c0_265 = arith.constant 0 : index
    %643 = vector.load %arg10[%642, %c0_265] : memref<104x128xf32, #tpu.memory_space<vmem>>, vector<8x128xf32>
    %c0_266 = arith.constant 0 : index
    %c0_267 = arith.constant 0 : index
    %644 = vector.load %arg2[%c0_266, %c0_267] : memref<32x128xf32, #tpu.memory_space<vmem>>, vector<32x128xf32>
    %cst_268 = arith.constant dense<0.000000e+00> : vector<8x128xf32>
    %645 = tpu.matmul %598, %644, %cst_268 {dimension_numbers = #tpu.dot_dimension_numbers<[1], [0], [0], [1], [0, 0, 1, 1], [], []>} : vector<8x32xf32>, vector<32x128xf32>, vector<8x128xf32> -> vector<8x128xf32>
    %646 = arith.addf %643, %645 : vector<8x128xf32>
    %647 = vector.extract_strided_slice %646 {offsets = [0, 0], sizes = [8, 32], strides = [1, 1]} : vector<8x128xf32> to vector<8x32xf32>
    %cst_269 = arith.constant 0.000000e+00 : f32
    %648 = vector.broadcast %cst_269 : f32 to vector<8x32xf32>
    %649 = arith.subf %648, %647 : vector<8x32xf32>
    %650 = math.exp %649 : vector<8x32xf32>
    %cst_270 = arith.constant 1.000000e+00 : f32
    %651 = vector.broadcast %cst_270 : f32 to vector<8x32xf32>
    %652 = arith.addf %651, %650 : vector<8x32xf32>
    %cst_271 = arith.constant 1.000000e+00 : f32
    %653 = vector.broadcast %cst_271 : f32 to vector<8x32xf32>
    %654 = arith.divf %653, %652 : vector<8x32xf32>
    %655 = vector.extract_strided_slice %646 {offsets = [0, 32], sizes = [8, 32], strides = [1, 1]} : vector<8x128xf32> to vector<8x32xf32>
    %cst_272 = arith.constant 0.000000e+00 : f32
    %656 = vector.broadcast %cst_272 : f32 to vector<8x32xf32>
    %657 = arith.subf %656, %655 : vector<8x32xf32>
    %658 = math.exp %657 : vector<8x32xf32>
    %cst_273 = arith.constant 1.000000e+00 : f32
    %659 = vector.broadcast %cst_273 : f32 to vector<8x32xf32>
    %660 = arith.addf %659, %658 : vector<8x32xf32>
    %cst_274 = arith.constant 1.000000e+00 : f32
    %661 = vector.broadcast %cst_274 : f32 to vector<8x32xf32>
    %662 = arith.divf %661, %660 : vector<8x32xf32>
    %663 = vector.extract_strided_slice %646 {offsets = [0, 64], sizes = [8, 32], strides = [1, 1]} : vector<8x128xf32> to vector<8x32xf32>
    %664 = math.tanh %663 : vector<8x32xf32>
    %665 = vector.extract_strided_slice %646 {offsets = [0, 96], sizes = [8, 32], strides = [1, 1]} : vector<8x128xf32> to vector<8x32xf32>
    %cst_275 = arith.constant 0.000000e+00 : f32
    %666 = vector.broadcast %cst_275 : f32 to vector<8x32xf32>
    %667 = arith.subf %666, %665 : vector<8x32xf32>
    %668 = math.exp %667 : vector<8x32xf32>
    %cst_276 = arith.constant 1.000000e+00 : f32
    %669 = vector.broadcast %cst_276 : f32 to vector<8x32xf32>
    %670 = arith.addf %669, %668 : vector<8x32xf32>
    %cst_277 = arith.constant 1.000000e+00 : f32
    %671 = vector.broadcast %cst_277 : f32 to vector<8x32xf32>
    %672 = arith.divf %671, %670 : vector<8x32xf32>
    %673 = arith.mulf %662, %596 : vector<8x32xf32>
    %674 = arith.mulf %654, %664 : vector<8x32xf32>
    %675 = arith.addf %673, %674 : vector<8x32xf32>
    %676 = math.tanh %675 : vector<8x32xf32>
    %677 = arith.mulf %672, %676 : vector<8x32xf32>
    %c0_278 = arith.constant 0 : index
    %c0_279 = arith.constant 0 : index
    %678 = vector.load %arg4[%c0_278, %c0_279] : memref<32x128xf32, #tpu.memory_space<vmem>>, vector<32x128xf32>
    %cst_280 = arith.constant dense<0.000000e+00> : vector<8x128xf32>
    %679 = tpu.matmul %677, %678, %cst_280 {dimension_numbers = #tpu.dot_dimension_numbers<[1], [0], [0], [1], [0, 0, 1, 1], [], []>} : vector<8x32xf32>, vector<32x128xf32>, vector<8x128xf32> -> vector<8x128xf32>
    %c0_281 = arith.constant 0 : index
    %c0_282 = arith.constant 0 : index
    %680 = vector.load %arg6[%c0_281, %c0_282] : memref<1x128xf32, #tpu.memory_space<vmem>>, vector<1x128xf32>
    %681 = vector.broadcast %680 : vector<1x128xf32> to vector<8x128xf32>
    %682 = arith.addf %679, %681 : vector<8x128xf32>
    %c0_283 = arith.constant 0 : index
    %c0_284 = arith.constant 0 : index
    %683 = vector.load %arg5[%c0_283, %c0_284] : memref<32x128xf32, #tpu.memory_space<vmem>>, vector<32x128xf32>
    %cst_285 = arith.constant dense<0.000000e+00> : vector<8x128xf32>
    %684 = tpu.matmul %637, %683, %cst_285 {dimension_numbers = #tpu.dot_dimension_numbers<[1], [0], [0], [1], [0, 0, 1, 1], [], []>} : vector<8x32xf32>, vector<32x128xf32>, vector<8x128xf32> -> vector<8x128xf32>
    %685 = arith.addf %682, %684 : vector<8x128xf32>
    %686 = vector.extract_strided_slice %685 {offsets = [0, 0], sizes = [8, 32], strides = [1, 1]} : vector<8x128xf32> to vector<8x32xf32>
    %cst_286 = arith.constant 0.000000e+00 : f32
    %687 = vector.broadcast %cst_286 : f32 to vector<8x32xf32>
    %688 = arith.subf %687, %686 : vector<8x32xf32>
    %689 = math.exp %688 : vector<8x32xf32>
    %cst_287 = arith.constant 1.000000e+00 : f32
    %690 = vector.broadcast %cst_287 : f32 to vector<8x32xf32>
    %691 = arith.addf %690, %689 : vector<8x32xf32>
    %cst_288 = arith.constant 1.000000e+00 : f32
    %692 = vector.broadcast %cst_288 : f32 to vector<8x32xf32>
    %693 = arith.divf %692, %691 : vector<8x32xf32>
    %694 = vector.extract_strided_slice %685 {offsets = [0, 32], sizes = [8, 32], strides = [1, 1]} : vector<8x128xf32> to vector<8x32xf32>
    %cst_289 = arith.constant 0.000000e+00 : f32
    %695 = vector.broadcast %cst_289 : f32 to vector<8x32xf32>
    %696 = arith.subf %695, %694 : vector<8x32xf32>
    %697 = math.exp %696 : vector<8x32xf32>
    %cst_290 = arith.constant 1.000000e+00 : f32
    %698 = vector.broadcast %cst_290 : f32 to vector<8x32xf32>
    %699 = arith.addf %698, %697 : vector<8x32xf32>
    %cst_291 = arith.constant 1.000000e+00 : f32
    %700 = vector.broadcast %cst_291 : f32 to vector<8x32xf32>
    %701 = arith.divf %700, %699 : vector<8x32xf32>
    %702 = vector.extract_strided_slice %685 {offsets = [0, 64], sizes = [8, 32], strides = [1, 1]} : vector<8x128xf32> to vector<8x32xf32>
    %703 = math.tanh %702 : vector<8x32xf32>
    %704 = vector.extract_strided_slice %685 {offsets = [0, 96], sizes = [8, 32], strides = [1, 1]} : vector<8x128xf32> to vector<8x32xf32>
    %cst_292 = arith.constant 0.000000e+00 : f32
    %705 = vector.broadcast %cst_292 : f32 to vector<8x32xf32>
    %706 = arith.subf %705, %704 : vector<8x32xf32>
    %707 = math.exp %706 : vector<8x32xf32>
    %cst_293 = arith.constant 1.000000e+00 : f32
    %708 = vector.broadcast %cst_293 : f32 to vector<8x32xf32>
    %709 = arith.addf %708, %707 : vector<8x32xf32>
    %cst_294 = arith.constant 1.000000e+00 : f32
    %710 = vector.broadcast %cst_294 : f32 to vector<8x32xf32>
    %711 = arith.divf %710, %709 : vector<8x32xf32>
    %712 = arith.mulf %701, %635 : vector<8x32xf32>
    %713 = arith.mulf %693, %703 : vector<8x32xf32>
    %714 = arith.addf %712, %713 : vector<8x32xf32>
    %715 = math.tanh %714 : vector<8x32xf32>
    %716 = arith.mulf %711, %715 : vector<8x32xf32>
    %717 = arith.index_cast %641 : i32 to index
    %c0_295 = arith.constant 0 : index
    %718 = vector.load %arg11[%717, %c0_295] : memref<104x32xf32, #tpu.memory_space<vmem>>, vector<8x32xf32>
    tpu.vector_store %arg11[%717, %c0_295], %716 {strides = array<i32>} : memref<104x32xf32, #tpu.memory_space<vmem>>, vector<8x32xf32>,
    %c9_i32 = arith.constant 9 : i32
    %c8_i32_296 = arith.constant 8 : i32
    %719 = arith.muli %c9_i32, %c8_i32_296 : i32
    %720 = tpu.assume_multiple %719, 8 : i32
    %721 = arith.index_cast %720 : i32 to index
    %c0_297 = arith.constant 0 : index
    %722 = vector.load %arg10[%721, %c0_297] : memref<104x128xf32, #tpu.memory_space<vmem>>, vector<8x128xf32>
    %c0_298 = arith.constant 0 : index
    %c0_299 = arith.constant 0 : index
    %723 = vector.load %arg2[%c0_298, %c0_299] : memref<32x128xf32, #tpu.memory_space<vmem>>, vector<32x128xf32>
    %cst_300 = arith.constant dense<0.000000e+00> : vector<8x128xf32>
    %724 = tpu.matmul %677, %723, %cst_300 {dimension_numbers = #tpu.dot_dimension_numbers<[1], [0], [0], [1], [0, 0, 1, 1], [], []>} : vector<8x32xf32>, vector<32x128xf32>, vector<8x128xf32> -> vector<8x128xf32>
    %725 = arith.addf %722, %724 : vector<8x128xf32>
    %726 = vector.extract_strided_slice %725 {offsets = [0, 0], sizes = [8, 32], strides = [1, 1]} : vector<8x128xf32> to vector<8x32xf32>
    %cst_301 = arith.constant 0.000000e+00 : f32
    %727 = vector.broadcast %cst_301 : f32 to vector<8x32xf32>
    %728 = arith.subf %727, %726 : vector<8x32xf32>
    %729 = math.exp %728 : vector<8x32xf32>
    %cst_302 = arith.constant 1.000000e+00 : f32
    %730 = vector.broadcast %cst_302 : f32 to vector<8x32xf32>
    %731 = arith.addf %730, %729 : vector<8x32xf32>
    %cst_303 = arith.constant 1.000000e+00 : f32
    %732 = vector.broadcast %cst_303 : f32 to vector<8x32xf32>
    %733 = arith.divf %732, %731 : vector<8x32xf32>
    %734 = vector.extract_strided_slice %725 {offsets = [0, 32], sizes = [8, 32], strides = [1, 1]} : vector<8x128xf32> to vector<8x32xf32>
    %cst_304 = arith.constant 0.000000e+00 : f32
    %735 = vector.broadcast %cst_304 : f32 to vector<8x32xf32>
    %736 = arith.subf %735, %734 : vector<8x32xf32>
    %737 = math.exp %736 : vector<8x32xf32>
    %cst_305 = arith.constant 1.000000e+00 : f32
    %738 = vector.broadcast %cst_305 : f32 to vector<8x32xf32>
    %739 = arith.addf %738, %737 : vector<8x32xf32>
    %cst_306 = arith.constant 1.000000e+00 : f32
    %740 = vector.broadcast %cst_306 : f32 to vector<8x32xf32>
    %741 = arith.divf %740, %739 : vector<8x32xf32>
    %742 = vector.extract_strided_slice %725 {offsets = [0, 64], sizes = [8, 32], strides = [1, 1]} : vector<8x128xf32> to vector<8x32xf32>
    %743 = math.tanh %742 : vector<8x32xf32>
    %744 = vector.extract_strided_slice %725 {offsets = [0, 96], sizes = [8, 32], strides = [1, 1]} : vector<8x128xf32> to vector<8x32xf32>
    %cst_307 = arith.constant 0.000000e+00 : f32
    %745 = vector.broadcast %cst_307 : f32 to vector<8x32xf32>
    %746 = arith.subf %745, %744 : vector<8x32xf32>
    %747 = math.exp %746 : vector<8x32xf32>
    %cst_308 = arith.constant 1.000000e+00 : f32
    %748 = vector.broadcast %cst_308 : f32 to vector<8x32xf32>
    %749 = arith.addf %748, %747 : vector<8x32xf32>
    %cst_309 = arith.constant 1.000000e+00 : f32
    %750 = vector.broadcast %cst_309 : f32 to vector<8x32xf32>
    %751 = arith.divf %750, %749 : vector<8x32xf32>
    %752 = arith.mulf %741, %675 : vector<8x32xf32>
    %753 = arith.mulf %733, %743 : vector<8x32xf32>
    %754 = arith.addf %752, %753 : vector<8x32xf32>
    %755 = math.tanh %754 : vector<8x32xf32>
    %756 = arith.mulf %751, %755 : vector<8x32xf32>
    %c0_310 = arith.constant 0 : index
    %c0_311 = arith.constant 0 : index
    %757 = vector.load %arg4[%c0_310, %c0_311] : memref<32x128xf32, #tpu.memory_space<vmem>>, vector<32x128xf32>
    %cst_312 = arith.constant dense<0.000000e+00> : vector<8x128xf32>
    %758 = tpu.matmul %756, %757, %cst_312 {dimension_numbers = #tpu.dot_dimension_numbers<[1], [0], [0], [1], [0, 0, 1, 1], [], []>} : vector<8x32xf32>, vector<32x128xf32>, vector<8x128xf32> -> vector<8x128xf32>
    %c0_313 = arith.constant 0 : index
    %c0_314 = arith.constant 0 : index
    %759 = vector.load %arg6[%c0_313, %c0_314] : memref<1x128xf32, #tpu.memory_space<vmem>>, vector<1x128xf32>
    %760 = vector.broadcast %759 : vector<1x128xf32> to vector<8x128xf32>
    %761 = arith.addf %758, %760 : vector<8x128xf32>
    %c0_315 = arith.constant 0 : index
    %c0_316 = arith.constant 0 : index
    %762 = vector.load %arg5[%c0_315, %c0_316] : memref<32x128xf32, #tpu.memory_space<vmem>>, vector<32x128xf32>
    %cst_317 = arith.constant dense<0.000000e+00> : vector<8x128xf32>
    %763 = tpu.matmul %716, %762, %cst_317 {dimension_numbers = #tpu.dot_dimension_numbers<[1], [0], [0], [1], [0, 0, 1, 1], [], []>} : vector<8x32xf32>, vector<32x128xf32>, vector<8x128xf32> -> vector<8x128xf32>
    %764 = arith.addf %761, %763 : vector<8x128xf32>
    %765 = vector.extract_strided_slice %764 {offsets = [0, 0], sizes = [8, 32], strides = [1, 1]} : vector<8x128xf32> to vector<8x32xf32>
    %cst_318 = arith.constant 0.000000e+00 : f32
    %766 = vector.broadcast %cst_318 : f32 to vector<8x32xf32>
    %767 = arith.subf %766, %765 : vector<8x32xf32>
    %768 = math.exp %767 : vector<8x32xf32>
    %cst_319 = arith.constant 1.000000e+00 : f32
    %769 = vector.broadcast %cst_319 : f32 to vector<8x32xf32>
    %770 = arith.addf %769, %768 : vector<8x32xf32>
    %cst_320 = arith.constant 1.000000e+00 : f32
    %771 = vector.broadcast %cst_320 : f32 to vector<8x32xf32>
    %772 = arith.divf %771, %770 : vector<8x32xf32>
    %773 = vector.extract_strided_slice %764 {offsets = [0, 32], sizes = [8, 32], strides = [1, 1]} : vector<8x128xf32> to vector<8x32xf32>
    %cst_321 = arith.constant 0.000000e+00 : f32
    %774 = vector.broadcast %cst_321 : f32 to vector<8x32xf32>
    %775 = arith.subf %774, %773 : vector<8x32xf32>
    %776 = math.exp %775 : vector<8x32xf32>
    %cst_322 = arith.constant 1.000000e+00 : f32
    %777 = vector.broadcast %cst_322 : f32 to vector<8x32xf32>
    %778 = arith.addf %777, %776 : vector<8x32xf32>
    %cst_323 = arith.constant 1.000000e+00 : f32
    %779 = vector.broadcast %cst_323 : f32 to vector<8x32xf32>
    %780 = arith.divf %779, %778 : vector<8x32xf32>
    %781 = vector.extract_strided_slice %764 {offsets = [0, 64], sizes = [8, 32], strides = [1, 1]} : vector<8x128xf32> to vector<8x32xf32>
    %782 = math.tanh %781 : vector<8x32xf32>
    %783 = vector.extract_strided_slice %764 {offsets = [0, 96], sizes = [8, 32], strides = [1, 1]} : vector<8x128xf32> to vector<8x32xf32>
    %cst_324 = arith.constant 0.000000e+00 : f32
    %784 = vector.broadcast %cst_324 : f32 to vector<8x32xf32>
    %785 = arith.subf %784, %783 : vector<8x32xf32>
    %786 = math.exp %785 : vector<8x32xf32>
    %cst_325 = arith.constant 1.000000e+00 : f32
    %787 = vector.broadcast %cst_325 : f32 to vector<8x32xf32>
    %788 = arith.addf %787, %786 : vector<8x32xf32>
    %cst_326 = arith.constant 1.000000e+00 : f32
    %789 = vector.broadcast %cst_326 : f32 to vector<8x32xf32>
    %790 = arith.divf %789, %788 : vector<8x32xf32>
    %791 = arith.mulf %780, %714 : vector<8x32xf32>
    %792 = arith.mulf %772, %782 : vector<8x32xf32>
    %793 = arith.addf %791, %792 : vector<8x32xf32>
    %794 = math.tanh %793 : vector<8x32xf32>
    %795 = arith.mulf %790, %794 : vector<8x32xf32>
    %796 = arith.index_cast %720 : i32 to index
    %c0_327 = arith.constant 0 : index
    %797 = vector.load %arg11[%796, %c0_327] : memref<104x32xf32, #tpu.memory_space<vmem>>, vector<8x32xf32>
    tpu.vector_store %arg11[%796, %c0_327], %795 {strides = array<i32>} : memref<104x32xf32, #tpu.memory_space<vmem>>, vector<8x32xf32>,
    %c10_i32 = arith.constant 10 : i32
    %c8_i32_328 = arith.constant 8 : i32
    %798 = arith.muli %c10_i32, %c8_i32_328 : i32
    %799 = tpu.assume_multiple %798, 8 : i32
    %800 = arith.index_cast %799 : i32 to index
    %c0_329 = arith.constant 0 : index
    %801 = vector.load %arg10[%800, %c0_329] : memref<104x128xf32, #tpu.memory_space<vmem>>, vector<8x128xf32>
    %c0_330 = arith.constant 0 : index
    %c0_331 = arith.constant 0 : index
    %802 = vector.load %arg2[%c0_330, %c0_331] : memref<32x128xf32, #tpu.memory_space<vmem>>, vector<32x128xf32>
    %cst_332 = arith.constant dense<0.000000e+00> : vector<8x128xf32>
    %803 = tpu.matmul %756, %802, %cst_332 {dimension_numbers = #tpu.dot_dimension_numbers<[1], [0], [0], [1], [0, 0, 1, 1], [], []>} : vector<8x32xf32>, vector<32x128xf32>, vector<8x128xf32> -> vector<8x128xf32>
    %804 = arith.addf %801, %803 : vector<8x128xf32>
    %805 = vector.extract_strided_slice %804 {offsets = [0, 0], sizes = [8, 32], strides = [1, 1]} : vector<8x128xf32> to vector<8x32xf32>
    %cst_333 = arith.constant 0.000000e+00 : f32
    %806 = vector.broadcast %cst_333 : f32 to vector<8x32xf32>
    %807 = arith.subf %806, %805 : vector<8x32xf32>
    %808 = math.exp %807 : vector<8x32xf32>
    %cst_334 = arith.constant 1.000000e+00 : f32
    %809 = vector.broadcast %cst_334 : f32 to vector<8x32xf32>
    %810 = arith.addf %809, %808 : vector<8x32xf32>
    %cst_335 = arith.constant 1.000000e+00 : f32
    %811 = vector.broadcast %cst_335 : f32 to vector<8x32xf32>
    %812 = arith.divf %811, %810 : vector<8x32xf32>
    %813 = vector.extract_strided_slice %804 {offsets = [0, 32], sizes = [8, 32], strides = [1, 1]} : vector<8x128xf32> to vector<8x32xf32>
    %cst_336 = arith.constant 0.000000e+00 : f32
    %814 = vector.broadcast %cst_336 : f32 to vector<8x32xf32>
    %815 = arith.subf %814, %813 : vector<8x32xf32>
    %816 = math.exp %815 : vector<8x32xf32>
    %cst_337 = arith.constant 1.000000e+00 : f32
    %817 = vector.broadcast %cst_337 : f32 to vector<8x32xf32>
    %818 = arith.addf %817, %816 : vector<8x32xf32>
    %cst_338 = arith.constant 1.000000e+00 : f32
    %819 = vector.broadcast %cst_338 : f32 to vector<8x32xf32>
    %820 = arith.divf %819, %818 : vector<8x32xf32>
    %821 = vector.extract_strided_slice %804 {offsets = [0, 64], sizes = [8, 32], strides = [1, 1]} : vector<8x128xf32> to vector<8x32xf32>
    %822 = math.tanh %821 : vector<8x32xf32>
    %823 = vector.extract_strided_slice %804 {offsets = [0, 96], sizes = [8, 32], strides = [1, 1]} : vector<8x128xf32> to vector<8x32xf32>
    %cst_339 = arith.constant 0.000000e+00 : f32
    %824 = vector.broadcast %cst_339 : f32 to vector<8x32xf32>
    %825 = arith.subf %824, %823 : vector<8x32xf32>
    %826 = math.exp %825 : vector<8x32xf32>
    %cst_340 = arith.constant 1.000000e+00 : f32
    %827 = vector.broadcast %cst_340 : f32 to vector<8x32xf32>
    %828 = arith.addf %827, %826 : vector<8x32xf32>
    %cst_341 = arith.constant 1.000000e+00 : f32
    %829 = vector.broadcast %cst_341 : f32 to vector<8x32xf32>
    %830 = arith.divf %829, %828 : vector<8x32xf32>
    %831 = arith.mulf %820, %754 : vector<8x32xf32>
    %832 = arith.mulf %812, %822 : vector<8x32xf32>
    %833 = arith.addf %831, %832 : vector<8x32xf32>
    %834 = math.tanh %833 : vector<8x32xf32>
    %835 = arith.mulf %830, %834 : vector<8x32xf32>
    %c0_342 = arith.constant 0 : index
    %c0_343 = arith.constant 0 : index
    %836 = vector.load %arg4[%c0_342, %c0_343] : memref<32x128xf32, #tpu.memory_space<vmem>>, vector<32x128xf32>
    %cst_344 = arith.constant dense<0.000000e+00> : vector<8x128xf32>
    %837 = tpu.matmul %835, %836, %cst_344 {dimension_numbers = #tpu.dot_dimension_numbers<[1], [0], [0], [1], [0, 0, 1, 1], [], []>} : vector<8x32xf32>, vector<32x128xf32>, vector<8x128xf32> -> vector<8x128xf32>
    %c0_345 = arith.constant 0 : index
    %c0_346 = arith.constant 0 : index
    %838 = vector.load %arg6[%c0_345, %c0_346] : memref<1x128xf32, #tpu.memory_space<vmem>>, vector<1x128xf32>
    %839 = vector.broadcast %838 : vector<1x128xf32> to vector<8x128xf32>
    %840 = arith.addf %837, %839 : vector<8x128xf32>
    %c0_347 = arith.constant 0 : index
    %c0_348 = arith.constant 0 : index
    %841 = vector.load %arg5[%c0_347, %c0_348] : memref<32x128xf32, #tpu.memory_space<vmem>>, vector<32x128xf32>
    %cst_349 = arith.constant dense<0.000000e+00> : vector<8x128xf32>
    %842 = tpu.matmul %795, %841, %cst_349 {dimension_numbers = #tpu.dot_dimension_numbers<[1], [0], [0], [1], [0, 0, 1, 1], [], []>} : vector<8x32xf32>, vector<32x128xf32>, vector<8x128xf32> -> vector<8x128xf32>
    %843 = arith.addf %840, %842 : vector<8x128xf32>
    %844 = vector.extract_strided_slice %843 {offsets = [0, 0], sizes = [8, 32], strides = [1, 1]} : vector<8x128xf32> to vector<8x32xf32>
    %cst_350 = arith.constant 0.000000e+00 : f32
    %845 = vector.broadcast %cst_350 : f32 to vector<8x32xf32>
    %846 = arith.subf %845, %844 : vector<8x32xf32>
    %847 = math.exp %846 : vector<8x32xf32>
    %cst_351 = arith.constant 1.000000e+00 : f32
    %848 = vector.broadcast %cst_351 : f32 to vector<8x32xf32>
    %849 = arith.addf %848, %847 : vector<8x32xf32>
    %cst_352 = arith.constant 1.000000e+00 : f32
    %850 = vector.broadcast %cst_352 : f32 to vector<8x32xf32>
    %851 = arith.divf %850, %849 : vector<8x32xf32>
    %852 = vector.extract_strided_slice %843 {offsets = [0, 32], sizes = [8, 32], strides = [1, 1]} : vector<8x128xf32> to vector<8x32xf32>
    %cst_353 = arith.constant 0.000000e+00 : f32
    %853 = vector.broadcast %cst_353 : f32 to vector<8x32xf32>
    %854 = arith.subf %853, %852 : vector<8x32xf32>
    %855 = math.exp %854 : vector<8x32xf32>
    %cst_354 = arith.constant 1.000000e+00 : f32
    %856 = vector.broadcast %cst_354 : f32 to vector<8x32xf32>
    %857 = arith.addf %856, %855 : vector<8x32xf32>
    %cst_355 = arith.constant 1.000000e+00 : f32
    %858 = vector.broadcast %cst_355 : f32 to vector<8x32xf32>
    %859 = arith.divf %858, %857 : vector<8x32xf32>
    %860 = vector.extract_strided_slice %843 {offsets = [0, 64], sizes = [8, 32], strides = [1, 1]} : vector<8x128xf32> to vector<8x32xf32>
    %861 = math.tanh %860 : vector<8x32xf32>
    %862 = vector.extract_strided_slice %843 {offsets = [0, 96], sizes = [8, 32], strides = [1, 1]} : vector<8x128xf32> to vector<8x32xf32>
    %cst_356 = arith.constant 0.000000e+00 : f32
    %863 = vector.broadcast %cst_356 : f32 to vector<8x32xf32>
    %864 = arith.subf %863, %862 : vector<8x32xf32>
    %865 = math.exp %864 : vector<8x32xf32>
    %cst_357 = arith.constant 1.000000e+00 : f32
    %866 = vector.broadcast %cst_357 : f32 to vector<8x32xf32>
    %867 = arith.addf %866, %865 : vector<8x32xf32>
    %cst_358 = arith.constant 1.000000e+00 : f32
    %868 = vector.broadcast %cst_358 : f32 to vector<8x32xf32>
    %869 = arith.divf %868, %867 : vector<8x32xf32>
    %870 = arith.mulf %859, %793 : vector<8x32xf32>
    %871 = arith.mulf %851, %861 : vector<8x32xf32>
    %872 = arith.addf %870, %871 : vector<8x32xf32>
    %873 = math.tanh %872 : vector<8x32xf32>
    %874 = arith.mulf %869, %873 : vector<8x32xf32>
    %875 = arith.index_cast %799 : i32 to index
    %c0_359 = arith.constant 0 : index
    %876 = vector.load %arg11[%875, %c0_359] : memref<104x32xf32, #tpu.memory_space<vmem>>, vector<8x32xf32>
    tpu.vector_store %arg11[%875, %c0_359], %874 {strides = array<i32>} : memref<104x32xf32, #tpu.memory_space<vmem>>, vector<8x32xf32>,
    %c11_i32 = arith.constant 11 : i32
    %c8_i32_360 = arith.constant 8 : i32
    %877 = arith.muli %c11_i32, %c8_i32_360 : i32
    %878 = tpu.assume_multiple %877, 8 : i32
    %879 = arith.index_cast %878 : i32 to index
    %c0_361 = arith.constant 0 : index
    %880 = vector.load %arg10[%879, %c0_361] : memref<104x128xf32, #tpu.memory_space<vmem>>, vector<8x128xf32>
    %c0_362 = arith.constant 0 : index
    %c0_363 = arith.constant 0 : index
    %881 = vector.load %arg2[%c0_362, %c0_363] : memref<32x128xf32, #tpu.memory_space<vmem>>, vector<32x128xf32>
    %cst_364 = arith.constant dense<0.000000e+00> : vector<8x128xf32>
    %882 = tpu.matmul %835, %881, %cst_364 {dimension_numbers = #tpu.dot_dimension_numbers<[1], [0], [0], [1], [0, 0, 1, 1], [], []>} : vector<8x32xf32>, vector<32x128xf32>, vector<8x128xf32> -> vector<8x128xf32>
    %883 = arith.addf %880, %882 : vector<8x128xf32>
    %884 = vector.extract_strided_slice %883 {offsets = [0, 0], sizes = [8, 32], strides = [1, 1]} : vector<8x128xf32> to vector<8x32xf32>
    %cst_365 = arith.constant 0.000000e+00 : f32
    %885 = vector.broadcast %cst_365 : f32 to vector<8x32xf32>
    %886 = arith.subf %885, %884 : vector<8x32xf32>
    %887 = math.exp %886 : vector<8x32xf32>
    %cst_366 = arith.constant 1.000000e+00 : f32
    %888 = vector.broadcast %cst_366 : f32 to vector<8x32xf32>
    %889 = arith.addf %888, %887 : vector<8x32xf32>
    %cst_367 = arith.constant 1.000000e+00 : f32
    %890 = vector.broadcast %cst_367 : f32 to vector<8x32xf32>
    %891 = arith.divf %890, %889 : vector<8x32xf32>
    %892 = vector.extract_strided_slice %883 {offsets = [0, 32], sizes = [8, 32], strides = [1, 1]} : vector<8x128xf32> to vector<8x32xf32>
    %cst_368 = arith.constant 0.000000e+00 : f32
    %893 = vector.broadcast %cst_368 : f32 to vector<8x32xf32>
    %894 = arith.subf %893, %892 : vector<8x32xf32>
    %895 = math.exp %894 : vector<8x32xf32>
    %cst_369 = arith.constant 1.000000e+00 : f32
    %896 = vector.broadcast %cst_369 : f32 to vector<8x32xf32>
    %897 = arith.addf %896, %895 : vector<8x32xf32>
    %cst_370 = arith.constant 1.000000e+00 : f32
    %898 = vector.broadcast %cst_370 : f32 to vector<8x32xf32>
    %899 = arith.divf %898, %897 : vector<8x32xf32>
    %900 = vector.extract_strided_slice %883 {offsets = [0, 64], sizes = [8, 32], strides = [1, 1]} : vector<8x128xf32> to vector<8x32xf32>
    %901 = math.tanh %900 : vector<8x32xf32>
    %902 = vector.extract_strided_slice %883 {offsets = [0, 96], sizes = [8, 32], strides = [1, 1]} : vector<8x128xf32> to vector<8x32xf32>
    %cst_371 = arith.constant 0.000000e+00 : f32
    %903 = vector.broadcast %cst_371 : f32 to vector<8x32xf32>
    %904 = arith.subf %903, %902 : vector<8x32xf32>
    %905 = math.exp %904 : vector<8x32xf32>
    %cst_372 = arith.constant 1.000000e+00 : f32
    %906 = vector.broadcast %cst_372 : f32 to vector<8x32xf32>
    %907 = arith.addf %906, %905 : vector<8x32xf32>
    %cst_373 = arith.constant 1.000000e+00 : f32
    %908 = vector.broadcast %cst_373 : f32 to vector<8x32xf32>
    %909 = arith.divf %908, %907 : vector<8x32xf32>
    %910 = arith.mulf %899, %833 : vector<8x32xf32>
    %911 = arith.mulf %891, %901 : vector<8x32xf32>
    %912 = arith.addf %910, %911 : vector<8x32xf32>
    %913 = math.tanh %912 : vector<8x32xf32>
    %914 = arith.mulf %909, %913 : vector<8x32xf32>
    %c0_374 = arith.constant 0 : index
    %c0_375 = arith.constant 0 : index
    %915 = vector.load %arg4[%c0_374, %c0_375] : memref<32x128xf32, #tpu.memory_space<vmem>>, vector<32x128xf32>
    %cst_376 = arith.constant dense<0.000000e+00> : vector<8x128xf32>
    %916 = tpu.matmul %914, %915, %cst_376 {dimension_numbers = #tpu.dot_dimension_numbers<[1], [0], [0], [1], [0, 0, 1, 1], [], []>} : vector<8x32xf32>, vector<32x128xf32>, vector<8x128xf32> -> vector<8x128xf32>
    %c0_377 = arith.constant 0 : index
    %c0_378 = arith.constant 0 : index
    %917 = vector.load %arg6[%c0_377, %c0_378] : memref<1x128xf32, #tpu.memory_space<vmem>>, vector<1x128xf32>
    %918 = vector.broadcast %917 : vector<1x128xf32> to vector<8x128xf32>
    %919 = arith.addf %916, %918 : vector<8x128xf32>
    %c0_379 = arith.constant 0 : index
    %c0_380 = arith.constant 0 : index
    %920 = vector.load %arg5[%c0_379, %c0_380] : memref<32x128xf32, #tpu.memory_space<vmem>>, vector<32x128xf32>
    %cst_381 = arith.constant dense<0.000000e+00> : vector<8x128xf32>
    %921 = tpu.matmul %874, %920, %cst_381 {dimension_numbers = #tpu.dot_dimension_numbers<[1], [0], [0], [1], [0, 0, 1, 1], [], []>} : vector<8x32xf32>, vector<32x128xf32>, vector<8x128xf32> -> vector<8x128xf32>
    %922 = arith.addf %919, %921 : vector<8x128xf32>
    %923 = vector.extract_strided_slice %922 {offsets = [0, 0], sizes = [8, 32], strides = [1, 1]} : vector<8x128xf32> to vector<8x32xf32>
    %cst_382 = arith.constant 0.000000e+00 : f32
    %924 = vector.broadcast %cst_382 : f32 to vector<8x32xf32>
    %925 = arith.subf %924, %923 : vector<8x32xf32>
    %926 = math.exp %925 : vector<8x32xf32>
    %cst_383 = arith.constant 1.000000e+00 : f32
    %927 = vector.broadcast %cst_383 : f32 to vector<8x32xf32>
    %928 = arith.addf %927, %926 : vector<8x32xf32>
    %cst_384 = arith.constant 1.000000e+00 : f32
    %929 = vector.broadcast %cst_384 : f32 to vector<8x32xf32>
    %930 = arith.divf %929, %928 : vector<8x32xf32>
    %931 = vector.extract_strided_slice %922 {offsets = [0, 32], sizes = [8, 32], strides = [1, 1]} : vector<8x128xf32> to vector<8x32xf32>
    %cst_385 = arith.constant 0.000000e+00 : f32
    %932 = vector.broadcast %cst_385 : f32 to vector<8x32xf32>
    %933 = arith.subf %932, %931 : vector<8x32xf32>
    %934 = math.exp %933 : vector<8x32xf32>
    %cst_386 = arith.constant 1.000000e+00 : f32
    %935 = vector.broadcast %cst_386 : f32 to vector<8x32xf32>
    %936 = arith.addf %935, %934 : vector<8x32xf32>
    %cst_387 = arith.constant 1.000000e+00 : f32
    %937 = vector.broadcast %cst_387 : f32 to vector<8x32xf32>
    %938 = arith.divf %937, %936 : vector<8x32xf32>
    %939 = vector.extract_strided_slice %922 {offsets = [0, 64], sizes = [8, 32], strides = [1, 1]} : vector<8x128xf32> to vector<8x32xf32>
    %940 = math.tanh %939 : vector<8x32xf32>
    %941 = vector.extract_strided_slice %922 {offsets = [0, 96], sizes = [8, 32], strides = [1, 1]} : vector<8x128xf32> to vector<8x32xf32>
    %cst_388 = arith.constant 0.000000e+00 : f32
    %942 = vector.broadcast %cst_388 : f32 to vector<8x32xf32>
    %943 = arith.subf %942, %941 : vector<8x32xf32>
    %944 = math.exp %943 : vector<8x32xf32>
    %cst_389 = arith.constant 1.000000e+00 : f32
    %945 = vector.broadcast %cst_389 : f32 to vector<8x32xf32>
    %946 = arith.addf %945, %944 : vector<8x32xf32>
    %cst_390 = arith.constant 1.000000e+00 : f32
    %947 = vector.broadcast %cst_390 : f32 to vector<8x32xf32>
    %948 = arith.divf %947, %946 : vector<8x32xf32>
    %949 = arith.mulf %938, %872 : vector<8x32xf32>
    %950 = arith.mulf %930, %940 : vector<8x32xf32>
    %951 = arith.addf %949, %950 : vector<8x32xf32>
    %952 = math.tanh %951 : vector<8x32xf32>
    %953 = arith.mulf %948, %952 : vector<8x32xf32>
    %954 = arith.index_cast %878 : i32 to index
    %c0_391 = arith.constant 0 : index
    %955 = vector.load %arg11[%954, %c0_391] : memref<104x32xf32, #tpu.memory_space<vmem>>, vector<8x32xf32>
    tpu.vector_store %arg11[%954, %c0_391], %953 {strides = array<i32>} : memref<104x32xf32, #tpu.memory_space<vmem>>, vector<8x32xf32>,
    %c12_i32 = arith.constant 12 : i32
    %c8_i32_392 = arith.constant 8 : i32
    %956 = arith.muli %c12_i32, %c8_i32_392 : i32
    %957 = tpu.assume_multiple %956, 8 : i32
    %958 = arith.index_cast %957 : i32 to index
    %c0_393 = arith.constant 0 : index
    %959 = vector.load %arg10[%958, %c0_393] : memref<104x128xf32, #tpu.memory_space<vmem>>, vector<8x128xf32>
    %c0_394 = arith.constant 0 : index
    %c0_395 = arith.constant 0 : index
    %960 = vector.load %arg2[%c0_394, %c0_395] : memref<32x128xf32, #tpu.memory_space<vmem>>, vector<32x128xf32>
    %cst_396 = arith.constant dense<0.000000e+00> : vector<8x128xf32>
    %961 = tpu.matmul %914, %960, %cst_396 {dimension_numbers = #tpu.dot_dimension_numbers<[1], [0], [0], [1], [0, 0, 1, 1], [], []>} : vector<8x32xf32>, vector<32x128xf32>, vector<8x128xf32> -> vector<8x128xf32>
    %962 = arith.addf %959, %961 : vector<8x128xf32>
    %963 = vector.extract_strided_slice %962 {offsets = [0, 0], sizes = [8, 32], strides = [1, 1]} : vector<8x128xf32> to vector<8x32xf32>
    %cst_397 = arith.constant 0.000000e+00 : f32
    %964 = vector.broadcast %cst_397 : f32 to vector<8x32xf32>
    %965 = arith.subf %964, %963 : vector<8x32xf32>
    %966 = math.exp %965 : vector<8x32xf32>
    %cst_398 = arith.constant 1.000000e+00 : f32
    %967 = vector.broadcast %cst_398 : f32 to vector<8x32xf32>
    %968 = arith.addf %967, %966 : vector<8x32xf32>
    %cst_399 = arith.constant 1.000000e+00 : f32
    %969 = vector.broadcast %cst_399 : f32 to vector<8x32xf32>
    %970 = arith.divf %969, %968 : vector<8x32xf32>
    %971 = vector.extract_strided_slice %962 {offsets = [0, 32], sizes = [8, 32], strides = [1, 1]} : vector<8x128xf32> to vector<8x32xf32>
    %cst_400 = arith.constant 0.000000e+00 : f32
    %972 = vector.broadcast %cst_400 : f32 to vector<8x32xf32>
    %973 = arith.subf %972, %971 : vector<8x32xf32>
    %974 = math.exp %973 : vector<8x32xf32>
    %cst_401 = arith.constant 1.000000e+00 : f32
    %975 = vector.broadcast %cst_401 : f32 to vector<8x32xf32>
    %976 = arith.addf %975, %974 : vector<8x32xf32>
    %cst_402 = arith.constant 1.000000e+00 : f32
    %977 = vector.broadcast %cst_402 : f32 to vector<8x32xf32>
    %978 = arith.divf %977, %976 : vector<8x32xf32>
    %979 = vector.extract_strided_slice %962 {offsets = [0, 64], sizes = [8, 32], strides = [1, 1]} : vector<8x128xf32> to vector<8x32xf32>
    %980 = math.tanh %979 : vector<8x32xf32>
    %981 = vector.extract_strided_slice %962 {offsets = [0, 96], sizes = [8, 32], strides = [1, 1]} : vector<8x128xf32> to vector<8x32xf32>
    %cst_403 = arith.constant 0.000000e+00 : f32
    %982 = vector.broadcast %cst_403 : f32 to vector<8x32xf32>
    %983 = arith.subf %982, %981 : vector<8x32xf32>
    %984 = math.exp %983 : vector<8x32xf32>
    %cst_404 = arith.constant 1.000000e+00 : f32
    %985 = vector.broadcast %cst_404 : f32 to vector<8x32xf32>
    %986 = arith.addf %985, %984 : vector<8x32xf32>
    %cst_405 = arith.constant 1.000000e+00 : f32
    %987 = vector.broadcast %cst_405 : f32 to vector<8x32xf32>
    %988 = arith.divf %987, %986 : vector<8x32xf32>
    %989 = arith.mulf %978, %912 : vector<8x32xf32>
    %990 = arith.mulf %970, %980 : vector<8x32xf32>
    %991 = arith.addf %989, %990 : vector<8x32xf32>
    %992 = math.tanh %991 : vector<8x32xf32>
    %993 = arith.mulf %988, %992 : vector<8x32xf32>
    %c0_406 = arith.constant 0 : index
    %c0_407 = arith.constant 0 : index
    %994 = vector.load %arg4[%c0_406, %c0_407] : memref<32x128xf32, #tpu.memory_space<vmem>>, vector<32x128xf32>
    %cst_408 = arith.constant dense<0.000000e+00> : vector<8x128xf32>
    %995 = tpu.matmul %993, %994, %cst_408 {dimension_numbers = #tpu.dot_dimension_numbers<[1], [0], [0], [1], [0, 0, 1, 1], [], []>} : vector<8x32xf32>, vector<32x128xf32>, vector<8x128xf32> -> vector<8x128xf32>
    %c0_409 = arith.constant 0 : index
    %c0_410 = arith.constant 0 : index
    %996 = vector.load %arg6[%c0_409, %c0_410] : memref<1x128xf32, #tpu.memory_space<vmem>>, vector<1x128xf32>
    %997 = vector.broadcast %996 : vector<1x128xf32> to vector<8x128xf32>
    %998 = arith.addf %995, %997 : vector<8x128xf32>
    %c0_411 = arith.constant 0 : index
    %c0_412 = arith.constant 0 : index
    %999 = vector.load %arg5[%c0_411, %c0_412] : memref<32x128xf32, #tpu.memory_space<vmem>>, vector<32x128xf32>
    %cst_413 = arith.constant dense<0.000000e+00> : vector<8x128xf32>
    %1000 = tpu.matmul %953, %999, %cst_413 {dimension_numbers = #tpu.dot_dimension_numbers<[1], [0], [0], [1], [0, 0, 1, 1], [], []>} : vector<8x32xf32>, vector<32x128xf32>, vector<8x128xf32> -> vector<8x128xf32>
    %1001 = arith.addf %998, %1000 : vector<8x128xf32>
    %1002 = vector.extract_strided_slice %1001 {offsets = [0, 0], sizes = [8, 32], strides = [1, 1]} : vector<8x128xf32> to vector<8x32xf32>
    %cst_414 = arith.constant 0.000000e+00 : f32
    %1003 = vector.broadcast %cst_414 : f32 to vector<8x32xf32>
    %1004 = arith.subf %1003, %1002 : vector<8x32xf32>
    %1005 = math.exp %1004 : vector<8x32xf32>
    %cst_415 = arith.constant 1.000000e+00 : f32
    %1006 = vector.broadcast %cst_415 : f32 to vector<8x32xf32>
    %1007 = arith.addf %1006, %1005 : vector<8x32xf32>
    %cst_416 = arith.constant 1.000000e+00 : f32
    %1008 = vector.broadcast %cst_416 : f32 to vector<8x32xf32>
    %1009 = arith.divf %1008, %1007 : vector<8x32xf32>
    %1010 = vector.extract_strided_slice %1001 {offsets = [0, 32], sizes = [8, 32], strides = [1, 1]} : vector<8x128xf32> to vector<8x32xf32>
    %cst_417 = arith.constant 0.000000e+00 : f32
    %1011 = vector.broadcast %cst_417 : f32 to vector<8x32xf32>
    %1012 = arith.subf %1011, %1010 : vector<8x32xf32>
    %1013 = math.exp %1012 : vector<8x32xf32>
    %cst_418 = arith.constant 1.000000e+00 : f32
    %1014 = vector.broadcast %cst_418 : f32 to vector<8x32xf32>
    %1015 = arith.addf %1014, %1013 : vector<8x32xf32>
    %cst_419 = arith.constant 1.000000e+00 : f32
    %1016 = vector.broadcast %cst_419 : f32 to vector<8x32xf32>
    %1017 = arith.divf %1016, %1015 : vector<8x32xf32>
    %1018 = vector.extract_strided_slice %1001 {offsets = [0, 64], sizes = [8, 32], strides = [1, 1]} : vector<8x128xf32> to vector<8x32xf32>
    %1019 = math.tanh %1018 : vector<8x32xf32>
    %1020 = vector.extract_strided_slice %1001 {offsets = [0, 96], sizes = [8, 32], strides = [1, 1]} : vector<8x128xf32> to vector<8x32xf32>
    %cst_420 = arith.constant 0.000000e+00 : f32
    %1021 = vector.broadcast %cst_420 : f32 to vector<8x32xf32>
    %1022 = arith.subf %1021, %1020 : vector<8x32xf32>
    %1023 = math.exp %1022 : vector<8x32xf32>
    %cst_421 = arith.constant 1.000000e+00 : f32
    %1024 = vector.broadcast %cst_421 : f32 to vector<8x32xf32>
    %1025 = arith.addf %1024, %1023 : vector<8x32xf32>
    %cst_422 = arith.constant 1.000000e+00 : f32
    %1026 = vector.broadcast %cst_422 : f32 to vector<8x32xf32>
    %1027 = arith.divf %1026, %1025 : vector<8x32xf32>
    %1028 = arith.mulf %1017, %951 : vector<8x32xf32>
    %1029 = arith.mulf %1009, %1019 : vector<8x32xf32>
    %1030 = arith.addf %1028, %1029 : vector<8x32xf32>
    %1031 = math.tanh %1030 : vector<8x32xf32>
    %1032 = arith.mulf %1027, %1031 : vector<8x32xf32>
    %1033 = arith.index_cast %957 : i32 to index
    %c0_423 = arith.constant 0 : index
    %1034 = vector.load %arg11[%1033, %c0_423] : memref<104x32xf32, #tpu.memory_space<vmem>>, vector<8x32xf32>
    tpu.vector_store %arg11[%1033, %c0_423], %1032 {strides = array<i32>} : memref<104x32xf32, #tpu.memory_space<vmem>>, vector<8x32xf32>,
    %c13_i32 = arith.constant 13 : i32
    %c0_424 = arith.constant 0 : index
    %c0_425 = arith.constant 0 : index
    %1035 = vector.load %arg11[%c0_424, %c0_425] : memref<104x32xf32, #tpu.memory_space<vmem>>, vector<104x32xf32>
    %c0_426 = arith.constant 0 : index
    %c0_427 = arith.constant 0 : index
    %1036 = vector.load %arg7[%c0_426, %c0_427] : memref<32x64xf32, #tpu.memory_space<vmem>>, vector<32x64xf32>
    %cst_428 = arith.constant dense<0.000000e+00> : vector<104x64xf32>
    %1037 = tpu.matmul %1035, %1036, %cst_428 {dimension_numbers = #tpu.dot_dimension_numbers<[1], [0], [0], [1], [0, 0, 1, 1], [], []>} : vector<104x32xf32>, vector<32x64xf32>, vector<104x64xf32> -> vector<104x64xf32>
    %c0_429 = arith.constant 0 : index
    %c0_430 = arith.constant 0 : index
    %1038 = vector.load %arg8[%c0_429, %c0_430] : memref<1x64xf32, #tpu.memory_space<vmem>>, vector<1x64xf32>
    %1039 = vector.broadcast %1038 : vector<1x64xf32> to vector<104x64xf32>
    %1040 = arith.addf %1037, %1039 : vector<104x64xf32>
    %c0_431 = arith.constant 0 : index
    %c0_432 = arith.constant 0 : index
    %1041 = vector.load %arg9[%c0_431, %c0_432] : memref<104x64xf32, #tpu.memory_space<vmem>>, vector<104x64xf32>
    tpu.vector_store %arg9[%c0_431, %c0_432], %1040 {strides = array<i32>} : memref<104x64xf32, #tpu.memory_space<vmem>>, vector<104x64xf32>,
    return
  }
}

module attributes {stable_mosaic.version = 11 : i64} {
  func.func @_matmul_kernel_single(%arg0: i32, %arg1: i32, %arg2: memref<8x384xf32, #tpu.memory_space<vmem>>, %arg3: memref<384x256xf32, #tpu.memory_space<vmem>>, %arg4: memref<8x256xf32, #tpu.memory_space<vmem>>) attributes {dimension_semantics = [#tpu.dimension_semantics<parallel>, #tpu.dimension_semantics<parallel>], iteration_bounds = array<i64: 1, 1>, scalar_prefetch = 0 : i64, scratch_operands = 0 : i64, tpu.core_type = #tpu.core_type<tc>, window_params = [{transform_indices = @transform_0, window_bounds = array<i64: 8, 384>}, {transform_indices = @transform_1, window_bounds = array<i64: 384, 256>}, {transform_indices = @transform_2, window_bounds = array<i64: 8, 256>}]} {
    %c0 = arith.constant 0 : index
    %c0_0 = arith.constant 0 : index
    %0 = vector.load %arg2[%c0, %c0_0] : memref<8x384xf32, #tpu.memory_space<vmem>>, vector<8x384xf32>
    %c0_1 = arith.constant 0 : index
    %c0_2 = arith.constant 0 : index
    %1 = vector.load %arg3[%c0_1, %c0_2] : memref<384x256xf32, #tpu.memory_space<vmem>>, vector<384x256xf32>
    %cst = arith.constant dense<0.000000e+00> : vector<8x256xf32>
    %2 = tpu.matmul %0, %1, %cst {dimension_numbers = #tpu.dot_dimension_numbers<[1], [0], [0], [1], [0, 0, 1, 1], [], []>} : vector<8x384xf32>, vector<384x256xf32>, vector<8x256xf32> -> vector<8x256xf32>
    %c0_3 = arith.constant 0 : index
    %c0_4 = arith.constant 0 : index
    %3 = vector.load %arg4[%c0_3, %c0_4] : memref<8x256xf32, #tpu.memory_space<vmem>>, vector<8x256xf32>
    tpu.vector_store %arg4[%c0_3, %c0_4], %2 {strides = array<i32>} : memref<8x256xf32, #tpu.memory_space<vmem>>, vector<8x256xf32>,
    return
  }
  func.func @transform_0(%arg0: i32, %arg1: i32) -> (i32, i32) {
    %c0_i32 = arith.constant 0 : i32
    %c0_i32_0 = arith.constant 0 : i32
    return %arg0, %c0_i32 : i32, i32
  }
  func.func @transform_1(%arg0: i32, %arg1: i32) -> (i32, i32) {
    %c0_i32 = arith.constant 0 : i32
    %c0_i32_0 = arith.constant 0 : i32
    return %c0_i32, %arg1 : i32, i32
  }
  func.func @transform_2(%arg0: i32, %arg1: i32) -> (i32, i32) {
    %c0_i32 = arith.constant 0 : i32
    return %arg0, %arg1 : i32, i32
  }
}

module attributes {stable_mosaic.version = 11 : i64} {
  func.func @_matmul_kernel_single(%arg0: i32, %arg1: i32, %arg2: memref<8x256xf32, #tpu.memory_space<vmem>>, %arg3: memref<256x256xf32, #tpu.memory_space<vmem>>, %arg4: memref<8x256xf32, #tpu.memory_space<vmem>>) attributes {dimension_semantics = [#tpu.dimension_semantics<parallel>, #tpu.dimension_semantics<parallel>], iteration_bounds = array<i64: 1, 2>, scalar_prefetch = 0 : i64, scratch_operands = 0 : i64, tpu.core_type = #tpu.core_type<tc>, window_params = [{transform_indices = @transform_0, window_bounds = array<i64: 8, 256>}, {transform_indices = @transform_1, window_bounds = array<i64: 256, 256>}, {transform_indices = @transform_2, window_bounds = array<i64: 8, 256>}]} {
    %c0 = arith.constant 0 : index
    %c0_0 = arith.constant 0 : index
    %0 = vector.load %arg2[%c0, %c0_0] : memref<8x256xf32, #tpu.memory_space<vmem>>, vector<8x256xf32>
    %c0_1 = arith.constant 0 : index
    %c0_2 = arith.constant 0 : index
    %1 = vector.load %arg3[%c0_1, %c0_2] : memref<256x256xf32, #tpu.memory_space<vmem>>, vector<256x256xf32>
    %cst = arith.constant dense<0.000000e+00> : vector<8x256xf32>
    %2 = tpu.matmul %0, %1, %cst {dimension_numbers = #tpu.dot_dimension_numbers<[1], [0], [0], [1], [0, 0, 1, 1], [], []>} : vector<8x256xf32>, vector<256x256xf32>, vector<8x256xf32> -> vector<8x256xf32>
    %c0_3 = arith.constant 0 : index
    %c0_4 = arith.constant 0 : index
    %3 = vector.load %arg4[%c0_3, %c0_4] : memref<8x256xf32, #tpu.memory_space<vmem>>, vector<8x256xf32>
    tpu.vector_store %arg4[%c0_3, %c0_4], %2 {strides = array<i32>} : memref<8x256xf32, #tpu.memory_space<vmem>>, vector<8x256xf32>,
    return
  }
  func.func @transform_0(%arg0: i32, %arg1: i32) -> (i32, i32) {
    %c0_i32 = arith.constant 0 : i32
    %c0_i32_0 = arith.constant 0 : i32
    return %arg0, %c0_i32 : i32, i32
  }
  func.func @transform_1(%arg0: i32, %arg1: i32) -> (i32, i32) {
    %c0_i32 = arith.constant 0 : i32
    %c0_i32_0 = arith.constant 0 : i32
    return %c0_i32, %arg1 : i32, i32
  }
  func.func @transform_2(%arg0: i32, %arg1: i32) -> (i32, i32) {
    %c0_i32 = arith.constant 0 : i32
    return %arg0, %arg1 : i32, i32
  }
}

module attributes {stable_mosaic.version = 11 : i64} {
  func.func @_matmul_kernel_single(%arg0: i32, %arg1: i32, %arg2: memref<8x256xf32, #tpu.memory_space<vmem>>, %arg3: memref<256x128xf32, #tpu.memory_space<vmem>>, %arg4: memref<8x128xf32, #tpu.memory_space<vmem>>) attributes {dimension_semantics = [#tpu.dimension_semantics<parallel>, #tpu.dimension_semantics<parallel>], iteration_bounds = array<i64: 1, 7>, scalar_prefetch = 0 : i64, scratch_operands = 0 : i64, tpu.core_type = #tpu.core_type<tc>, window_params = [{transform_indices = @transform_0, window_bounds = array<i64: 8, 256>}, {transform_indices = @transform_1, window_bounds = array<i64: 256, 128>}, {transform_indices = @transform_2, window_bounds = array<i64: 8, 128>}]} {
    %c0 = arith.constant 0 : index
    %c0_0 = arith.constant 0 : index
    %0 = vector.load %arg2[%c0, %c0_0] : memref<8x256xf32, #tpu.memory_space<vmem>>, vector<8x256xf32>
    %c0_1 = arith.constant 0 : index
    %c0_2 = arith.constant 0 : index
    %1 = vector.load %arg3[%c0_1, %c0_2] : memref<256x128xf32, #tpu.memory_space<vmem>>, vector<256x128xf32>
    %cst = arith.constant dense<0.000000e+00> : vector<8x128xf32>
    %2 = tpu.matmul %0, %1, %cst {dimension_numbers = #tpu.dot_dimension_numbers<[1], [0], [0], [1], [0, 0, 1, 1], [], []>} : vector<8x256xf32>, vector<256x128xf32>, vector<8x128xf32> -> vector<8x128xf32>
    %c0_3 = arith.constant 0 : index
    %c0_4 = arith.constant 0 : index
    %3 = vector.load %arg4[%c0_3, %c0_4] : memref<8x128xf32, #tpu.memory_space<vmem>>, vector<8x128xf32>
    tpu.vector_store %arg4[%c0_3, %c0_4], %2 {strides = array<i32>} : memref<8x128xf32, #tpu.memory_space<vmem>>, vector<8x128xf32>,
    return
  }
  func.func @transform_0(%arg0: i32, %arg1: i32) -> (i32, i32) {
    %c0_i32 = arith.constant 0 : i32
    %c0_i32_0 = arith.constant 0 : i32
    return %arg0, %c0_i32 : i32, i32
  }
  func.func @transform_1(%arg0: i32, %arg1: i32) -> (i32, i32) {
    %c0_i32 = arith.constant 0 : i32
    %c0_i32_0 = arith.constant 0 : i32
    return %c0_i32, %arg1 : i32, i32
  }
  func.func @transform_2(%arg0: i32, %arg1: i32) -> (i32, i32) {
    %c0_i32 = arith.constant 0 : i32
    return %arg0, %arg1 : i32, i32
  }
}

module attributes {stable_mosaic.version = 11 : i64} {
  func.func @_mask_kernel(%arg0: memref<2x429xf32, #tpu.memory_space<vmem>>, %arg1: memref<2x429xf32, #tpu.memory_space<vmem>>, %arg2: memref<2x429xf32, #tpu.memory_space<vmem>>, %arg3: memref<2x429xf32, #tpu.memory_space<vmem>>, %arg4: memref<2x429xf32, #tpu.memory_space<vmem>>, %arg5: memref<2x429xf32, #tpu.memory_space<vmem>>) attributes {dimension_semantics = [], scalar_prefetch = 0 : i64, scratch_operands = 0 : i64, tpu.core_type = #tpu.core_type<tc>} {
    %c0 = arith.constant 0 : index
    %c0_0 = arith.constant 0 : index
    %0 = vector.load %arg0[%c0, %c0_0] : memref<2x429xf32, #tpu.memory_space<vmem>>, vector<2x429xf32>
    %c0_1 = arith.constant 0 : index
    %c0_2 = arith.constant 0 : index
    %1 = vector.load %arg1[%c0_1, %c0_2] : memref<2x429xf32, #tpu.memory_space<vmem>>, vector<2x429xf32>
    %c0_3 = arith.constant 0 : index
    %c0_4 = arith.constant 0 : index
    %2 = vector.load %arg2[%c0_3, %c0_4] : memref<2x429xf32, #tpu.memory_space<vmem>>, vector<2x429xf32>
    %c0_5 = arith.constant 0 : index
    %c0_6 = arith.constant 0 : index
    %3 = vector.load %arg3[%c0_5, %c0_6] : memref<2x429xf32, #tpu.memory_space<vmem>>, vector<2x429xf32>
    %4 = arith.mulf %2, %2 : vector<2x429xf32>
    %5 = arith.mulf %3, %3 : vector<2x429xf32>
    %6 = arith.addf %4, %5 : vector<2x429xf32>
    %7 = math.sqrt %6 : vector<2x429xf32>
    %8 = math.tanh %7 : vector<2x429xf32>
    %cst = arith.constant 9.99999993E-9 : f32
    %9 = vector.broadcast %cst : f32 to vector<2x429xf32>
    %10 = arith.addf %7, %9 : vector<2x429xf32>
    %cst_7 = arith.constant 1.000000e+00 : f32
    %11 = vector.broadcast %cst_7 : f32 to vector<2x429xf32>
    %12 = arith.divf %11, %10 : vector<2x429xf32>
    %13 = arith.mulf %2, %12 : vector<2x429xf32>
    %14 = arith.mulf %3, %12 : vector<2x429xf32>
    %15 = arith.mulf %0, %13 : vector<2x429xf32>
    %16 = arith.mulf %1, %14 : vector<2x429xf32>
    %17 = arith.subf %15, %16 : vector<2x429xf32>
    %18 = arith.mulf %8, %17 : vector<2x429xf32>
    %c0_8 = arith.constant 0 : index
    %c0_9 = arith.constant 0 : index
    %19 = vector.load %arg4[%c0_8, %c0_9] : memref<2x429xf32, #tpu.memory_space<vmem>>, vector<2x429xf32>
    tpu.vector_store %arg4[%c0_8, %c0_9], %18 {strides = array<i32>} : memref<2x429xf32, #tpu.memory_space<vmem>>, vector<2x429xf32>,
    %20 = arith.mulf %1, %13 : vector<2x429xf32>
    %21 = arith.mulf %0, %14 : vector<2x429xf32>
    %22 = arith.addf %20, %21 : vector<2x429xf32>
    %23 = arith.mulf %8, %22 : vector<2x429xf32>
    %c0_10 = arith.constant 0 : index
    %c0_11 = arith.constant 0 : index
    %24 = vector.load %arg5[%c0_10, %c0_11] : memref<2x429xf32, #tpu.memory_space<vmem>>, vector<2x429xf32>
    tpu.vector_store %arg5[%c0_10, %c0_11], %23 {strides = array<i32>} : memref<2x429xf32, #tpu.memory_space<vmem>>, vector<2x429xf32>,
    return
  }
}

</mosaic_0001>

<bundles_post_ra>
// kernel: neg.12
= control target key start
LH: loop header
LB: loop body
LE: loop exit
PB: predicated region body
PF: predicated region fallthrough
CT: control target
= control target key end

     0   :  { %s24_s0 = inlined_call_operand.vmem [shape: f32[4,10], index: 0, kind: input, shape index: {}]   ;;  %s25_s1 = inlined_call_operand.vmem [shape: f32[4,10], index: 1, kind: output, shape index: {}]  }
   0x1   :  { %v2_v0 = vld [vmem:[%s24_s0] sm:$0xf] }
   0x2   :  { %v5_v1 = vxor.u32 2147483648, %v2_v0 }
   0x4   :  { %7 = vst [vmem:[%s25_s1] sm:$0xf] %v5_v1 }

// kernel: dccrn_forward.10
= control target key start
LH: loop header
LB: loop body
LE: loop exit
PB: predicated region body
PF: predicated region fallthrough
CT: control target
= control target key end

     0   :  { %s317_s1 = inlined_call_operand.vmem [shape: f32[128,128], index: 1, kind: input, shape index: {}]   ;;  %s318_s0 = inlined_call_operand.vmem [shape: f32[32,128], index: 0, kind: input, shape index: {}]   ;;  %s319_s2 = inlined_call_operand.vmem [shape: f32[32,128], index: 2, kind: output, shape index: {}]  }
   0x1   :  { %v15_v0 = vld [vmem:[%s317_s1] sm:$0xff]  ;;  %v16_v1 = vld [vmem:[%s317_s1 + $0x8] sm:$0xff]  ;;  %v17_v2 = vld [vmem:[%s317_s1 + $0x10] sm:$0xff] }
   0x2   :  { %v182_v3 = vpack.c.bf16 %v16_v1, %v15_v0  ;;  %v18_v4 = vld [vmem:[%s317_s1 + $0x18] sm:$0xff]  ;;  %v19_v6 = vld [vmem:[%s317_s1 + $0x20] sm:$0xff]  ;;  %v20_v7 = vld [vmem:[%s317_s1 + $0x28] sm:$0xff] }
   0x3   :  { %v186_v5 = vpack.c.bf16 %v18_v4, %v17_v2  ;;  %v190_v8 = vpack.c.bf16 %v20_v7, %v19_v6  ;;  %v11_v9 = vld [vmem:[%s318_s0] sm:$0xff]  ;;  %v13_v10 = vld [vmem:[%s318_s0 + $0x10] sm:$0xff]  ;;  %v22_v12 = vld [vmem:[%s317_s1 + $0x38] sm:$0xff] }
   0x4   :  { %183 = vmatprep.subr.bf16.mxu0 %v182_v3  ;;  %214 = vmatprep.subr.bf16.mxu1 %v182_v3  ;;  %v21_v11 = vld [vmem:[%s317_s1 + $0x30] sm:$0xff]  ;;  %v23_v14 = vld [vmem:[%s317_s1 + $0x40] sm:$0xff]  ;;  %v24_v15 = vld [vmem:[%s317_s1 + $0x48] sm:$0xff] }
   0x5   :  { %185 = vmatpush3.bf16.msra.mxu0 %v182_v3  ;;  %222 = vmatpush3.bf16.msra.mxu1 %v182_v3  ;;  %v194_v13 = vpack.c.bf16 %v22_v12, %v21_v11  ;;  %v198_v16 = vpack.c.bf16 %v24_v15, %v23_v14  ;;  %v25_v17 = vld [vmem:[%s317_s1 + $0x50] sm:$0xff]  ;;  %v26_v18 = vld [vmem:[%s317_s1 + $0x58] sm:$0xff]  ;;  %v27_v20 = vld [vmem:[%s317_s1 + $0x60] sm:$0xff] }
   0x6   :  { %187 = vmatprep.subr.bf16.mxu0 %v186_v5  ;;  %215 = vmatprep.subr.bf16.mxu1 %v186_v5  ;;  %v202_v19 = vpack.c.bf16 %v26_v18, %v25_v17  ;;  %v28_v21 = vld [vmem:[%s317_s1 + $0x68] sm:$0xff]  ;;  %v29_v23 = vld [vmem:[%s317_s1 + $0x70] sm:$0xff]  ;;  %v30_v24 = vld [vmem:[%s317_s1 + $0x78] sm:$0xff] }
   0x7   :  { %176 = vmatprep.mubr.f32.mxu0 %v11_v9  ;;  %179 = vmatprep.mubr.f32.mxu1 %v13_v10  ;;  %v206_v22 = vpack.c.bf16 %v28_v21, %v27_v20  ;;  %v210_v25 = vpack.c.bf16 %v30_v24, %v29_v23  ;;  %v12_v26 = vld [vmem:[%s318_s0 + $0x8] sm:$0xff]  ;;  %v14_v27 = vld [vmem:[%s318_s0 + $0x18] sm:$0xff] }
   0x9   :  { %189 = vmatpush3.bf16.msra.mxu0 %v186_v5  ;;  %223 = vmatpush3.bf16.msra.mxu1 %v186_v5 }
   0xa   :  { %191 = vmatprep.subr.bf16.mxu0 %v190_v8  ;;  %216 = vmatprep.subr.bf16.mxu1 %v190_v8 }
   0xd   :  { %193 = vmatpush3.bf16.msra.mxu0 %v190_v8  ;;  %224 = vmatpush3.bf16.msra.mxu1 %v190_v8 }
   0xe   :  { %195 = vmatprep.subr.bf16.mxu0 %v194_v13  ;;  %217 = vmatprep.subr.bf16.mxu1 %v194_v13 }
  0x11   :  { %197 = vmatpush3.bf16.msra.mxu0 %v194_v13  ;;  %225 = vmatpush3.bf16.msra.mxu1 %v194_v13 }
  0x12   :  { %199 = vmatprep.subr.bf16.mxu0 %v198_v16  ;;  %218 = vmatprep.subr.bf16.mxu1 %v198_v16 }
  0x15   :  { %201 = vmatpush3.bf16.msra.mxu0 %v198_v16  ;;  %226 = vmatpush3.bf16.msra.mxu1 %v198_v16 }
  0x16   :  { %203 = vmatprep.subr.bf16.mxu0 %v202_v19  ;;  %219 = vmatprep.subr.bf16.mxu1 %v202_v19 }
  0x19   :  { %205 = vmatpush3.bf16.msra.mxu0 %v202_v19  ;;  %227 = vmatpush3.bf16.msra.mxu1 %v202_v19 }
  0x1a   :  { %207 = vmatprep.subr.bf16.mxu0 %v206_v22  ;;  %220 = vmatprep.subr.bf16.mxu1 %v206_v22 }
  0x1d   :  { %209 = vmatpush3.bf16.msra.mxu0 %v206_v22  ;;  %228 = vmatpush3.bf16.msra.mxu1 %v206_v22 }
  0x1e   :  { %211 = vmatprep.subr.bf16.mxu0 %v210_v25  ;;  %221 = vmatprep.subr.bf16.mxu1 %v210_v25 }
  0x21   :  { %213 = vmatpush3.bf16.msra.mxu0 %v210_v25  ;;  %229 = vmatpush3.bf16.msra.mxu1 %v210_v25 }
  0x24   :  { %177 = vmatmul.mubr.f32.vlgmr.msra.gmra.mrb[0].mxu0 %v12_v26  ;;  %180 = vmatmul.mubr.f32.vlgmr.msra.gmra.mrb[0].mxu1 %v14_v27 }
  0xf7   :  { %v178_v28 = vpop.f32.mrb[0].mxu0  ;;  %v181_v29 = vpop.f32.mrb[0].mxu1 }
  0xf8   :  { %117 = vst [vmem:[%s319_s2 + $0x8] sm:$0xff] %v178_v28  ;;  %119 = vst [vmem:[%s319_s2 + $0x18] sm:$0xff] %v181_v29  ;;  %v97_v30 = vpop.f32.mrb[1].mxu0  ;;  %v107_v31 = vpop.f32.mrb[1].mxu1 }
  0xf9   :  { %116 = vst [vmem:[%s319_s2] sm:$0xff] %v97_v30  ;;  %118 = vst [vmem:[%s319_s2 + $0x10] sm:$0xff] %v107_v31 }

// kernel: dccrn_forward.11
= control target key start
LH: loop header
LB: loop body
LE: loop exit
PB: predicated region body
PF: predicated region fallthrough
CT: control target
= control target key end

     0   :  { %s619_s9 = smov 0   ;;  %s621_s10 = smov 0   ;;  %s789_s0 = inlined_call_operand.vmem [shape: f32[8,128], index: 0, kind: input, shape index: {}]   ;;  %s790_s1 = inlined_call_operand.vmem [shape: f32[128,512], index: 1, kind: input, shape index: {}]   ;;  %s791_s2 = inlined_call_operand.vmem [shape: f32[8,512], index: 2, kind: output, shape index: {}]  }
   0x1   :  { %s623_s11 = smov 0   ;;  %s625_s12 = smov 0  }
   0x2   :  { %s627_s13 = smov 0  }
   0x3 LB: > { %s21_s14 = sadd.s32 1, %s597_s12  ;;  %p64_p1 = scmp.ne.s32.totalorder %s589_s10, %s585_s9  ;;  %s601_s13 = sphi %s627_s13, %s12_s13   ;;  %s597_s12 = sphi %s625_s12, %s795_s12   ;;  %s593_s11 = sphi %s623_s11, %s794_s11   ;;  %s589_s10 = sphi %s621_s10, %s793_s10   ;;  %s585_s9 = sphi %s619_s9, %s792_s9  }
   0x4   : > { %p22_p0 = scmp.ge.s32.totalorder %s21_s14, 2  ;;  %p65_p2 = scmp.eq.s32.totalorder %s601_s13, 0 }
   0x5   : > { %s57_s16 = sadd.s32 1, %s589_s10  ;;  %p479_p5 = scmp.ge.s32.totalorder %s601_s13, 2 }
   0x6   : > { %s797_s14 = smov (%p22_p0, %s21_s14), 0  ;;  %p66_p3 = por %p65_p2, %p64_p1 }
   0x7   : > { %s54_s15 = ssub.s32 %s597_s12, %s797_s14  ;;  %125 = sbr.rel (%p479_p5) target bundleno = 34 (0x22), region = 20 }
   0x8   : > { %p55_p4 = scmp.eq.s32.totalorder %s54_s15, 0 }
   0xa   : > { %s654_s17 = scalar_select %p55_p4, %s589_s10, %s57_s16  }
   0xe   : > { %128 = sbr.rel (!%p66_p3) target bundleno = 34 (0x22), region = 24  ;;  %s130_s18 = sand.u32 (%p66_p3), 1, %s589_s10  }
   0xf   : > { %s489_s19 = sshll.u32 (%p66_p3), %s597_s12, 4  ;;  %s480_s20 = sshll.u32 (%p66_p3), %s130_s18, 8 }
  0x10   : > { %s662_s23 = scalar_lea.vmem (%p66_p3), %s790_s1, %s489_s19  ;;  %s667_s24 = scalar_lea.vmem (%p66_p3), [#allocation2], %s480_s20 }
  0x11   : > { %v148_v0 = vld [vmem:[%s662_s23] sm:$0xff] (%p66_p3)  ;;  %v150_v1 = vld [vmem:[%s662_s23 + $0x8] sm:$0xff] (%p66_p3) }
  0x12   : > { %v152_v2 = vld [vmem:[%s662_s23 + $0x20] sm:$0xff] (%p66_p3)  ;;  %149 = vst [vmem:[%s667_s24] sm:$0xff] (%p66_p3), %v148_v0  ;;  %151 = vst [vmem:[%s667_s24 + $0x8] sm:$0xff] (%p66_p3), %v150_v1  ;;  %v154_v3 = vld [vmem:[%s662_s23 + $0x28] sm:$0xff] (%p66_p3) }
  0x13   : > { %153 = vst [vmem:[%s667_s24 + $0x10] sm:$0xff] (%p66_p3), %v152_v2  ;;  %v156_v4 = vld [vmem:[%s662_s23 + $0x40] sm:$0xff] (%p66_p3)  ;;  %v158_v5 = vld [vmem:[%s662_s23 + $0x48] sm:$0xff] (%p66_p3)  ;;  %155 = vst [vmem:[%s667_s24 + $0x18] sm:$0xff] (%p66_p3), %v154_v3 }
  0x14   : > { %157 = vst [vmem:[%s667_s24 + $0x20] sm:$0xff] (%p66_p3), %v156_v4  ;;  %159 = vst [vmem:[%s667_s24 + $0x28] sm:$0xff] (%p66_p3), %v158_v5  ;;  %v160_v6 = vld [vmem:[%s662_s23 + $0x60] sm:$0xff] (%p66_p3)  ;;  %v162_v7 = vld [vmem:[%s662_s23 + $0x68] sm:$0xff] (%p66_p3) }
  0x15   : > { %v164_v8 = vld [vmem:[%s662_s23 + $0x80] sm:$0xff]  ;;  %161 = vst [vmem:[%s667_s24 + $0x30] sm:$0xff] %v160_v6  ;;  %163 = vst [vmem:[%s667_s24 + $0x38] sm:$0xff] %v162_v7  ;;  %v166_v9 = vld [vmem:[%s662_s23 + $0x88] sm:$0xff] }
  0x16   : > { %165 = vst [vmem:[%s667_s24 + $0x40] sm:$0xff] %v164_v8  ;;  %v168_v10 = vld [vmem:[%s662_s23 + $0xa0] sm:$0xff]  ;;  %v170_v11 = vld [vmem:[%s662_s23 + $0xa8] sm:$0xff]  ;;  %167 = vst [vmem:[%s667_s24 + $0x48] sm:$0xff] %v166_v9 }
  0x17   : > { %169 = vst [vmem:[%s667_s24 + $0x50] sm:$0xff] %v168_v10  ;;  %171 = vst [vmem:[%s667_s24 + $0x58] sm:$0xff] %v170_v11  ;;  %v172_v12 = vld [vmem:[%s662_s23 + $0xc0] sm:$0xff]  ;;  %v174_v13 = vld [vmem:[%s662_s23 + $0xc8] sm:$0xff] }
  0x18   : > { %v176_v14 = vld [vmem:[%s662_s23 + $0xe0] sm:$0xff]  ;;  %173 = vst [vmem:[%s667_s24 + $0x60] sm:$0xff] %v172_v12  ;;  %175 = vst [vmem:[%s667_s24 + $0x68] sm:$0xff] %v174_v13  ;;  %v178_v15 = vld [vmem:[%s662_s23 + $0xe8] sm:$0xff] }
  0x19   : > { %177 = vst [vmem:[%s667_s24 + $0x70] sm:$0xff] %v176_v14  ;;  %v180_v16 = vld [vmem:[%s662_s23 + $0x100] sm:$0xff]  ;;  %v182_v17 = vld [vmem:[%s662_s23 + $0x108] sm:$0xff]  ;;  %179 = vst [vmem:[%s667_s24 + $0x78] sm:$0xff] %v178_v15 }
  0x1a   : > { %181 = vst [vmem:[%s667_s24 + $0x80] sm:$0xff] %v180_v16  ;;  %183 = vst [vmem:[%s667_s24 + $0x88] sm:$0xff] %v182_v17  ;;  %v184_v18 = vld [vmem:[%s662_s23 + $0x120] sm:$0xff]  ;;  %v186_v19 = vld [vmem:[%s662_s23 + $0x128] sm:$0xff] }
  0x1b   : > { %v188_v20 = vld [vmem:[%s662_s23 + $0x140] sm:$0xff]  ;;  %185 = vst [vmem:[%s667_s24 + $0x90] sm:$0xff] %v184_v18  ;;  %187 = vst [vmem:[%s667_s24 + $0x98] sm:$0xff] %v186_v19  ;;  %v190_v21 = vld [vmem:[%s662_s23 + $0x148] sm:$0xff] }
  0x1c   : > { %189 = vst [vmem:[%s667_s24 + $0xa0] sm:$0xff] %v188_v20  ;;  %v192_v22 = vld [vmem:[%s662_s23 + $0x160] sm:$0xff]  ;;  %v194_v23 = vld [vmem:[%s662_s23 + $0x168] sm:$0xff]  ;;  %191 = vst [vmem:[%s667_s24 + $0xa8] sm:$0xff] %v190_v21 }
  0x1d   : > { %193 = vst [vmem:[%s667_s24 + $0xb0] sm:$0xff] %v192_v22  ;;  %195 = vst [vmem:[%s667_s24 + $0xb8] sm:$0xff] %v194_v23  ;;  %v196_v24 = vld [vmem:[%s662_s23 + $0x180] sm:$0xff]  ;;  %v198_v25 = vld [vmem:[%s662_s23 + $0x188] sm:$0xff] }
  0x1e   : > { %v200_v26 = vld [vmem:[%s662_s23 + $0x1a0] sm:$0xff]  ;;  %197 = vst [vmem:[%s667_s24 + $0xc0] sm:$0xff] %v196_v24  ;;  %199 = vst [vmem:[%s667_s24 + $0xc8] sm:$0xff] %v198_v25  ;;  %v202_v27 = vld [vmem:[%s662_s23 + $0x1a8] sm:$0xff] }
  0x1f   : > { %201 = vst [vmem:[%s667_s24 + $0xd0] sm:$0xff] %v200_v26  ;;  %v204_v28 = vld [vmem:[%s662_s23 + $0x1c0] sm:$0xff]  ;;  %v206_v29 = vld [vmem:[%s662_s23 + $0x1c8] sm:$0xff]  ;;  %203 = vst [vmem:[%s667_s24 + $0xd8] sm:$0xff] %v202_v27 }
  0x20   : > { %205 = vst [vmem:[%s667_s24 + $0xe0] sm:$0xff] %v204_v28  ;;  %207 = vst [vmem:[%s667_s24 + $0xe8] sm:$0xff] %v206_v29  ;;  %v208_v30 = vld [vmem:[%s662_s23 + $0x1e0] sm:$0xff]  ;;  %v210_v31 = vld [vmem:[%s662_s23 + $0x1e8] sm:$0xff] }
  0x21   : > { %209 = vst [vmem:[%s667_s24 + $0xf0] sm:$0xff] %v208_v30  ;;  %211 = vst [vmem:[%s667_s24 + $0xf8] sm:$0xff] %v210_v31 }
  0x22 PF: > { %p483_p6 = scmp.ge.s32.totalorder %s601_s13, 1  ;;  %p216_p7 = scmp.lt.s32.totalorder %s601_s13, 3 }
  0x24   : > { %p217_p8 = pnand %p483_p6, %p216_p7 }
  0x25   : > { %s223_s25 = sand.u32 (!%p217_p8), 1, %s585_s9   ;;  %v603_v32 = vmov (!%p217_p8), 0.0   ;;  %v267_v17 = vld [vmem:[%s789_s0] sm:$0xff] (!%p217_p8)  ;;  %s485_s30 = sshll.u32 (!%p217_p8), %s593_s11, 1 }
  0x26   : > { %220 = sbr.rel (%p217_p8) target bundleno = 289 (0x121), region = 47  ;;  %s484_s26 = sshll.u32 (!%p217_p8), %s223_s25, 8  ;;  %364 = vmatprep.mubr.f32.mxu0 (!%p217_p8), %v603_v32 }
  0x27   : > { %s733_s27 = scalar_lea.vmem (!%p217_p8), [#allocation2], %s484_s26  ;;  %p260_p9 = scmp.lt.s32.totalorder (!%p217_p8), %s485_s30, 3 }
  0x28   : > { %v269_v33 = vld [vmem:[%s733_s27 + $0x8] sm:$0xff] (!%p217_p8)  ;;  %v271_v34 = vld [vmem:[%s733_s27 + $0x18] sm:$0xff] (!%p217_p8)  ;;  %v268_v35 = vld [vmem:[%s733_s27] sm:$0xff] (!%p217_p8) }
  0x29   : > { %v490_v36 = vpack.c.bf16 (!%p217_p8), %v271_v34, %v269_v33  ;;  %v270_v37 = vld [vmem:[%s733_s27 + $0x10] sm:$0xff] (!%p217_p8)  ;;  %v273_v38 = vld [vmem:[%s733_s27 + $0x28] sm:$0xff] (!%p217_p8)  ;;  %v275_v39 = vld [vmem:[%s733_s27 + $0x38] sm:$0xff] (!%p217_p8) }
  0x2a   : > { %v492_v40 = vpack.c.bf16 (!%p217_p8), %v270_v37, %v268_v35  ;;  %v494_v41 = vpack.c.bf16 (!%p217_p8), %v275_v39, %v273_v38  ;;  %v272_v42 = vld [vmem:[%s733_s27 + $0x20] sm:$0xff] (!%p217_p8)  ;;  %v274_v43 = vld [vmem:[%s733_s27 + $0x30] sm:$0xff] (!%p217_p8)  ;;  %v277_v44 = vld [vmem:[%s733_s27 + $0x48] sm:$0xff] (!%p217_p8) }
  0x2b   : > { %491 = vmatprep.subr.bf16.mxu0 (!%p217_p8), %v490_v36  ;;  %v279_v45 = vld [vmem:[%s733_s27 + $0x58] sm:$0xff] (!%p217_p8)  ;;  %v496_v46 = vpack.c.bf16 (!%p217_p8), %v274_v43, %v272_v42  ;;  %v276_v48 = vld [vmem:[%s733_s27 + $0x40] sm:$0xff] (!%p217_p8)  ;;  %v278_v49 = vld [vmem:[%s733_s27 + $0x50] sm:$0xff] (!%p217_p8) }
  0x2c   : > { %493 = vmatpush1.bf16.msra.mxu0 (!%p217_p8), %v492_v40  ;;  %v498_v47 = vpack.c.bf16 (!%p217_p8), %v279_v45, %v277_v44  ;;  %v281_v50 = vld [vmem:[%s733_s27 + $0x68] sm:$0xff] (!%p217_p8)  ;;  %v283_v51 = vld [vmem:[%s733_s27 + $0x78] sm:$0xff] (!%p217_p8)  ;;  %v500_v52 = vpack.c.bf16 (!%p217_p8), %v278_v49, %v276_v48  ;;  %v280_v54 = vld [vmem:[%s733_s27 + $0x60] sm:$0xff] (!%p217_p8) }
  0x2d   : > { %495 = vmatprep.subr.bf16.mxu0 %v494_v41  ;;  %v502_v53 = vpack.c.bf16 %v283_v51, %v281_v50  ;;  %v282_v55 = vld [vmem:[%s733_s27 + $0x70] sm:$0xff]  ;;  %v285_v56 = vld [vmem:[%s733_s27 + $0x88] sm:$0xff]  ;;  %v287_v57 = vld [vmem:[%s733_s27 + $0x98] sm:$0xff]  ;;  %s799_s30 = smov (!%p260_p9, %s485_s30), 3 }
  0x2e   : > { %v504_v58 = vpack.c.bf16 %v282_v55, %v280_v54  ;;  %v506_v59 = vpack.c.bf16 %v287_v57, %v285_v56  ;;  %v284_v60 = vld [vmem:[%s733_s27 + $0x80] sm:$0xff]  ;;  %v286_v61 = vld [vmem:[%s733_s27 + $0x90] sm:$0xff]  ;;  %v289_v62 = vld [vmem:[%s733_s27 + $0xa8] sm:$0xff]  ;;  %s486_s3 = sshll.u32 %s799_s30, 3 }
  0x2f   : > { %v291_v63 = vld [vmem:[%s733_s27 + $0xb8] sm:$0xff]  ;;  %v508_v0 = vpack.c.bf16 %v286_v61, %v284_v60  ;;  %v288_v2 = vld [vmem:[%s733_s27 + $0xa0] sm:$0xff]  ;;  %v290_v3 = vld [vmem:[%s733_s27 + $0xb0] sm:$0xff]  ;;  %s265_s6 = scalar_lea.vmem %s791_s2, %s486_s3 }
  0x30   : > { %497 = vmatpush1.bf16.msra.mxu0 %v496_v46  ;;  %v510_v1 = vpack.c.bf16 %v291_v63, %v289_v62  ;;  %v293_v4 = vld [vmem:[%s733_s27 + $0xc8] sm:$0xff]  ;;  %v295_v5 = vld [vmem:[%s733_s27 + $0xd8] sm:$0xff]  ;;  %v512_v6 = vpack.c.bf16 %v290_v3, %v288_v2  ;;  %v292_v8 = vld [vmem:[%s733_s27 + $0xc0] sm:$0xff] }
  0x31   : > { %499 = vmatprep.subr.bf16.mxu0 %v498_v47  ;;  %v514_v7 = vpack.c.bf16 %v295_v5, %v293_v4  ;;  %v294_v9 = vld [vmem:[%s733_s27 + $0xd0] sm:$0xff]  ;;  %v297_v10 = vld [vmem:[%s733_s27 + $0xe8] sm:$0xff]  ;;  %v299_v11 = vld [vmem:[%s733_s27 + $0xf8] sm:$0xff] }
  0x32   : > { %v516_v12 = vpack.c.bf16 %v294_v9, %v292_v8  ;;  %v518_v13 = vpack.c.bf16 %v299_v11, %v297_v10  ;;  %v296_v14 = vld [vmem:[%s733_s27 + $0xe0] sm:$0xff]  ;;  %v298_v15 = vld [vmem:[%s733_s27 + $0xf0] sm:$0xff] }
  0x33   : > { %v520_v16 = vpack.c.bf16 %v298_v15, %v296_v14 }
  0x34   : > { %501 = vmatpush1.bf16.msra.mxu0 %v500_v52 }
  0x35   : > { %503 = vmatprep.subr.bf16.mxu0 %v502_v53 }
  0x38   : > { %505 = vmatpush1.bf16.msra.mxu0 %v504_v58 }
  0x39   : > { %507 = vmatprep.subr.bf16.mxu0 %v506_v59 }
  0x3c   : > { %509 = vmatpush1.bf16.msra.mxu0 %v508_v0 }
  0x3d   : > { %511 = vmatprep.subr.bf16.mxu0 %v510_v1 }
  0x40   : > { %513 = vmatpush1.bf16.msra.mxu0 %v512_v6 }
  0x41   : > { %515 = vmatprep.subr.bf16.mxu0 %v514_v7 }
  0x44   : > { %517 = vmatpush1.bf16.msra.mxu0 %v516_v12 }
  0x45   : > { %519 = vmatprep.subr.bf16.mxu0 %v518_v13 }
  0x48   : > { %521 = vmatpush1.bf16.msra.mxu0 %v520_v16 }
  0x4b   : > { %365 = vmatmul.mubr.f32.vlgmr.msra.gmra.mrb[0].mxu0 %v267_v17 }
 0x11e   : > { %v366_v18 = vpop.f32.mrb[0].mxu0 }
 0x11f   : > { %371 = vst [vmem:[%s265_s6] sm:$0xff] %v366_v18  ;;  %v368_v19 = vpop.f32.mrb[1].mxu0 }
 0x120   : > { %372 = vst [vmem:[%s265_s6 + $0x8] sm:$0xff] %v368_v19 }
 0x121 PF: > { %s12_s13 = sadd.s32 1, %s601_s13   ;;  %s792_s9 = smov %s589_s10 }
 0x122   : > { %p9_p10 = scmp.ge.s32.totalorder %s12_s13, 4   ;;  %s793_s10 = smov %s654_s17 }
 0x123   : > { %s794_s11 = smov %s597_s12  ;;  %s795_s12 = smov %s797_s14 }
 0x124   :  { %11 = sbr.rel (!%p9_p10) target bundleno = 3 (0x3), region = 89 }

// kernel: neg.14
= control target key start
LH: loop header
LB: loop body
LE: loop exit
PB: predicated region body
PF: predicated region fallthrough
CT: control target
= control target key end

     0   :  { %s24_s0 = inlined_call_operand.vmem [shape: f32[4,40], index: 0, kind: input, shape index: {}]   ;;  %s25_s1 = inlined_call_operand.vmem [shape: f32[4,40], index: 1, kind: output, shape index: {}]  }
   0x1   :  { %v2_v0 = vld [vmem:[%s24_s0] sm:$0xf] }
   0x2   :  { %v5_v1 = vxor.u32 2147483648, %v2_v0 }
   0x4   :  { %7 = vst [vmem:[%s25_s1] sm:$0xf] %v5_v1 }

// kernel: dccrn_forward.12
= control target key start
LH: loop header
LB: loop body
LE: loop exit
PB: predicated region body
PF: predicated region fallthrough
CT: control target
= control target key end

     0   :  { %v154_v3 = vmov 0.0   ;;  %s275_s1 = inlined_call_operand.vmem [shape: f32[128,256], index: 1, kind: input, shape index: {}]   ;;  %s276_s0 = inlined_call_operand.vmem [shape: f32[8,128], index: 0, kind: input, shape index: {}]   ;;  %s277_s2 = inlined_call_operand.vmem [shape: f32[8,256], index: 2, kind: output, shape index: {}]  }
   0x1   :  { %v13_v0 = vld [vmem:[%s275_s1 + $0x8] sm:$0xff]  ;;  %v15_v1 = vld [vmem:[%s275_s1 + $0x18] sm:$0xff]  ;;  %v12_v2 = vld [vmem:[%s275_s1] sm:$0xff]  ;;  %108 = vmatprep.mubr.f32.mxu0 %v154_v3 }
   0x2   :  { %v121_v4 = vpack.c.bf16 %v15_v1, %v13_v0  ;;  %v14_v5 = vld [vmem:[%s275_s1 + $0x10] sm:$0xff]  ;;  %v17_v6 = vld [vmem:[%s275_s1 + $0x28] sm:$0xff]  ;;  %v19_v7 = vld [vmem:[%s275_s1 + $0x38] sm:$0xff] }
   0x3   :  { %v123_v8 = vpack.c.bf16 %v14_v5, %v12_v2  ;;  %v125_v9 = vpack.c.bf16 %v19_v7, %v17_v6  ;;  %v16_v10 = vld [vmem:[%s275_s1 + $0x20] sm:$0xff]  ;;  %v18_v11 = vld [vmem:[%s275_s1 + $0x30] sm:$0xff]  ;;  %v21_v12 = vld [vmem:[%s275_s1 + $0x48] sm:$0xff] }
   0x4   :  { %122 = vmatprep.subr.bf16.mxu0 %v121_v4  ;;  %v23_v13 = vld [vmem:[%s275_s1 + $0x58] sm:$0xff]  ;;  %v127_v14 = vpack.c.bf16 %v18_v11, %v16_v10  ;;  %v20_v16 = vld [vmem:[%s275_s1 + $0x40] sm:$0xff]  ;;  %v22_v17 = vld [vmem:[%s275_s1 + $0x50] sm:$0xff] }
   0x5   :  { %124 = vmatpush1.bf16.msra.mxu0 %v123_v8  ;;  %v129_v15 = vpack.c.bf16 %v23_v13, %v21_v12  ;;  %v25_v18 = vld [vmem:[%s275_s1 + $0x68] sm:$0xff]  ;;  %v27_v19 = vld [vmem:[%s275_s1 + $0x78] sm:$0xff]  ;;  %v131_v20 = vpack.c.bf16 %v22_v17, %v20_v16  ;;  %v24_v22 = vld [vmem:[%s275_s1 + $0x60] sm:$0xff] }
   0x6   :  { %126 = vmatprep.subr.bf16.mxu0 %v125_v9  ;;  %v133_v21 = vpack.c.bf16 %v27_v19, %v25_v18  ;;  %v26_v23 = vld [vmem:[%s275_s1 + $0x70] sm:$0xff]  ;;  %v29_v24 = vld [vmem:[%s275_s1 + $0x88] sm:$0xff]  ;;  %v31_v25 = vld [vmem:[%s275_s1 + $0x98] sm:$0xff] }
   0x7   :  { %v135_v26 = vpack.c.bf16 %v26_v23, %v24_v22  ;;  %v137_v27 = vpack.c.bf16 %v31_v25, %v29_v24  ;;  %v28_v28 = vld [vmem:[%s275_s1 + $0x80] sm:$0xff]  ;;  %v30_v29 = vld [vmem:[%s275_s1 + $0x90] sm:$0xff]  ;;  %v33_v30 = vld [vmem:[%s275_s1 + $0xa8] sm:$0xff] }
   0x8   :  { %v35_v31 = vld [vmem:[%s275_s1 + $0xb8] sm:$0xff]  ;;  %v139_v32 = vpack.c.bf16 %v30_v29, %v28_v28  ;;  %v32_v34 = vld [vmem:[%s275_s1 + $0xa0] sm:$0xff]  ;;  %v34_v35 = vld [vmem:[%s275_s1 + $0xb0] sm:$0xff] }
   0x9   :  { %128 = vmatpush1.bf16.msra.mxu0 %v127_v14  ;;  %v141_v33 = vpack.c.bf16 %v35_v31, %v33_v30  ;;  %v37_v36 = vld [vmem:[%s275_s1 + $0xc8] sm:$0xff]  ;;  %v39_v37 = vld [vmem:[%s275_s1 + $0xd8] sm:$0xff]  ;;  %v143_v38 = vpack.c.bf16 %v34_v35, %v32_v34  ;;  %v36_v40 = vld [vmem:[%s275_s1 + $0xc0] sm:$0xff] }
   0xa   :  { %130 = vmatprep.subr.bf16.mxu0 %v129_v15  ;;  %v145_v39 = vpack.c.bf16 %v39_v37, %v37_v36  ;;  %v38_v41 = vld [vmem:[%s275_s1 + $0xd0] sm:$0xff]  ;;  %v41_v42 = vld [vmem:[%s275_s1 + $0xe8] sm:$0xff]  ;;  %v43_v43 = vld [vmem:[%s275_s1 + $0xf8] sm:$0xff] }
   0xb   :  { %v147_v44 = vpack.c.bf16 %v38_v41, %v36_v40  ;;  %v149_v45 = vpack.c.bf16 %v43_v43, %v41_v42  ;;  %v40_v46 = vld [vmem:[%s275_s1 + $0xe0] sm:$0xff]  ;;  %v42_v47 = vld [vmem:[%s275_s1 + $0xf0] sm:$0xff] }
   0xc   :  { %v151_v48 = vpack.c.bf16 %v42_v47, %v40_v46  ;;  %v11_v49 = vld [vmem:[%s276_s0] sm:$0xff] }
   0xd   :  { %132 = vmatpush1.bf16.msra.mxu0 %v131_v20 }
   0xe   :  { %134 = vmatprep.subr.bf16.mxu0 %v133_v21 }
  0x11   :  { %136 = vmatpush1.bf16.msra.mxu0 %v135_v26 }
  0x12   :  { %138 = vmatprep.subr.bf16.mxu0 %v137_v27 }
  0x15   :  { %140 = vmatpush1.bf16.msra.mxu0 %v139_v32 }
  0x16   :  { %142 = vmatprep.subr.bf16.mxu0 %v141_v33 }
  0x19   :  { %144 = vmatpush1.bf16.msra.mxu0 %v143_v38 }
  0x1a   :  { %146 = vmatprep.subr.bf16.mxu0 %v145_v39 }
  0x1d   :  { %148 = vmatpush1.bf16.msra.mxu0 %v147_v44 }
  0x1e   :  { %150 = vmatprep.subr.bf16.mxu0 %v149_v45 }
  0x21   :  { %152 = vmatpush1.bf16.msra.mxu0 %v151_v48 }
  0x24   :  { %109 = vmatmul.mubr.f32.vlgmr.msra.gmra.mrb[0].mxu0 %v11_v49 }
  0xf7   :  { %v110_v50 = vpop.f32.mrb[0].mxu0 }
  0xf8   :  { %115 = vst [vmem:[%s277_s2] sm:$0xff] %v110_v50  ;;  %v112_v51 = vpop.f32.mrb[1].mxu0 }
  0xf9   :  { %116 = vst [vmem:[%s277_s2 + $0x8] sm:$0xff] %v112_v51 }

// kernel: neg.16
= control target key start
LH: loop header
LB: loop body
LE: loop exit
PB: predicated region body
PF: predicated region fallthrough
CT: control target
= control target key end

     0   :  { %s24_s0 = inlined_call_operand.vmem [shape: f32[8,40], index: 0, kind: input, shape index: {}]   ;;  %s25_s1 = inlined_call_operand.vmem [shape: f32[8,40], index: 1, kind: output, shape index: {}]  }
   0x1   :  { %v2_v0 = vld [vmem:[%s24_s0] sm:$0xff] }
   0x2   :  { %v5_v1 = vxor.u32 2147483648, %v2_v0 }
   0x4   :  { %7 = vst [vmem:[%s25_s1] sm:$0xff] %v5_v1 }

// kernel: dccrn_forward.13
= control target key start
LH: loop header
LB: loop body
LE: loop exit
PB: predicated region body
PF: predicated region fallthrough
CT: control target
= control target key end

     0   :  { %s270_s1 = inlined_call_operand.vmem [shape: f32[128,128], index: 1, kind: input, shape index: {}]   ;;  %s271_s0 = inlined_call_operand.vmem [shape: f32[16,128], index: 0, kind: input, shape index: {}]   ;;  %s272_s2 = inlined_call_operand.vmem [shape: f32[16,128], index: 2, kind: output, shape index: {}]  }
   0x1   :  { %v13_v0 = vld [vmem:[%s270_s1] sm:$0xff]  ;;  %v14_v1 = vld [vmem:[%s270_s1 + $0x8] sm:$0xff]  ;;  %v15_v2 = vld [vmem:[%s270_s1 + $0x10] sm:$0xff] }
   0x2   :  { %v163_v3 = vpack.c.bf16 %v14_v1, %v13_v0  ;;  %v16_v4 = vld [vmem:[%s270_s1 + $0x18] sm:$0xff]  ;;  %v17_v6 = vld [vmem:[%s270_s1 + $0x20] sm:$0xff]  ;;  %v18_v7 = vld [vmem:[%s270_s1 + $0x28] sm:$0xff] }
   0x3   :  { %v167_v5 = vpack.c.bf16 %v16_v4, %v15_v2  ;;  %v171_v8 = vpack.c.bf16 %v18_v7, %v17_v6  ;;  %v11_v9 = vld [vmem:[%s271_s0] sm:$0xff]  ;;  %v19_v10 = vld [vmem:[%s270_s1 + $0x30] sm:$0xff]  ;;  %v20_v11 = vld [vmem:[%s270_s1 + $0x38] sm:$0xff] }
   0x4   :  { %164 = vmatprep.subr.bf16.mxu0 %v163_v3  ;;  %160 = vmatprep.mubr.f32.mxu0 %v11_v9  ;;  %v175_v12 = vpack.c.bf16 %v20_v11, %v19_v10  ;;  %v21_v13 = vld [vmem:[%s270_s1 + $0x40] sm:$0xff]  ;;  %v22_v14 = vld [vmem:[%s270_s1 + $0x48] sm:$0xff]  ;;  %v23_v16 = vld [vmem:[%s270_s1 + $0x50] sm:$0xff] }
   0x5   :  { %166 = vmatpush3.bf16.msra.mxu0 %v163_v3  ;;  %v179_v15 = vpack.c.bf16 %v22_v14, %v21_v13  ;;  %v24_v17 = vld [vmem:[%s270_s1 + $0x58] sm:$0xff]  ;;  %v25_v19 = vld [vmem:[%s270_s1 + $0x60] sm:$0xff]  ;;  %v26_v20 = vld [vmem:[%s270_s1 + $0x68] sm:$0xff] }
   0x6   :  { %168 = vmatprep.subr.bf16.mxu0 %v167_v5  ;;  %v183_v18 = vpack.c.bf16 %v24_v17, %v23_v16  ;;  %v187_v21 = vpack.c.bf16 %v26_v20, %v25_v19  ;;  %v27_v22 = vld [vmem:[%s270_s1 + $0x70] sm:$0xff]  ;;  %v28_v23 = vld [vmem:[%s270_s1 + $0x78] sm:$0xff]  ;;  %v12_v25 = vld [vmem:[%s271_s0 + $0x8] sm:$0xff] }
   0x7   :  { %v191_v24 = vpack.c.bf16 %v28_v23, %v27_v22 }
   0x9   :  { %170 = vmatpush3.bf16.msra.mxu0 %v167_v5 }
   0xa   :  { %172 = vmatprep.subr.bf16.mxu0 %v171_v8 }
   0xd   :  { %174 = vmatpush3.bf16.msra.mxu0 %v171_v8 }
   0xe   :  { %176 = vmatprep.subr.bf16.mxu0 %v175_v12 }
  0x11   :  { %178 = vmatpush3.bf16.msra.mxu0 %v175_v12 }
  0x12   :  { %180 = vmatprep.subr.bf16.mxu0 %v179_v15 }
  0x15   :  { %182 = vmatpush3.bf16.msra.mxu0 %v179_v15 }
  0x16   :  { %184 = vmatprep.subr.bf16.mxu0 %v183_v18 }
  0x19   :  { %186 = vmatpush3.bf16.msra.mxu0 %v183_v18 }
  0x1a   :  { %188 = vmatprep.subr.bf16.mxu0 %v187_v21 }
  0x1d   :  { %190 = vmatpush3.bf16.msra.mxu0 %v187_v21 }
  0x1e   :  { %192 = vmatprep.subr.bf16.mxu0 %v191_v24 }
  0x21   :  { %194 = vmatpush3.bf16.msra.mxu0 %v191_v24 }
  0x24   :  { %161 = vmatmul.mubr.f32.vlgmr.msra.gmra.mrb[0].mxu0 %v12_v25 }
  0xf7   :  { %v162_v26 = vpop.f32.mrb[0].mxu0 }
  0xf8   :  { %105 = vst [vmem:[%s272_s2 + $0x8] sm:$0xff] %v162_v26  ;;  %v95_v27 = vpop.f32.mrb[1].mxu0 }
  0xf9   :  { %104 = vst [vmem:[%s272_s2] sm:$0xff] %v95_v27 }

// kernel: neg.18
= control target key start
LH: loop header
LB: loop body
LE: loop exit
PB: predicated region body
PF: predicated region fallthrough
CT: control target
= control target key end

     0   :  { %s40_s0 = inlined_call_operand.vmem [shape: f32[4,160], index: 0, kind: input, shape index: {}]   ;;  %s41_s1 = inlined_call_operand.vmem [shape: f32[4,160], index: 1, kind: output, shape index: {}]  }
   0x1   :  { %v2_v0 = vld [vmem:[%s40_s0] sm:$0xf]  ;;  %v16_v1 = vld [vmem:[%s40_s0 + $0x4] sm:$0xf] }
   0x2   :  { %v5_v2 = vxor.u32 2147483648, %v2_v0  ;;  %v12_v3 = vxor.u32 2147483648, %v16_v1 }
   0x4   :  { %7 = vst [vmem:[%s41_s1] sm:$0xf] %v5_v2  ;;  %17 = vst [vmem:[%s41_s1 + $0x4] sm:$0xf] %v12_v3 }

// kernel: dccrn_forward.14
= control target key start
LH: loop header
LB: loop body
LE: loop exit
PB: predicated region body
PF: predicated region fallthrough
CT: control target
= control target key end

     0   :  { %v5665_v0 = vmov 0.0|0.0   ;;  %vm5666_vm0 = vmmov 0   ;;  %v5667_v4 = vmov 0.0   ;;  %vm60_vm1 = vcmask 523264   ;;  %s5668_s16 = smov 64   ;;  %s5669_s17 = smov 32   ;;  %s6587_s1 = inlined_call_operand.vmem [shape: f32[64,128], index: 1, kind: input, shape index: {}]   ;;  %s6588_s2 = inlined_call_operand.vmem [shape: f32[32,128], index: 2, kind: input, shape index: {}]   ;;  %s6589_s0 = inlined_call_operand.vmem [shape: f32[104,64], index: 0, kind: input, shape index: {}]   ;;  %s6590_s3 = inlined_call_operand.vmem [shape: f32[1,128], index: 3, kind: input, shape index: {}]   ;;  %s6591_s4 = inlined_call_operand.vmem [shape: f32[32,128], index: 4, kind: input, shape index: {}]   ;;  %s6592_s5 = inlined_call_operand.vmem [shape: f32[32,128], index: 5, kind: input, shape index: {}]   ;;  %s6593_s6 = inlined_call_operand.vmem [shape: f32[1,128], index: 6, kind: input, shape index: {}]   ;;  %s6594_s7 = inlined_call_operand.vmem [shape: f32[32,64], index: 7, kind: input, shape index: {}]   ;;  %s6595_s8 = inlined_call_operand.vmem [shape: f32[1,64], index: 8, kind: input, shape index: {}]   ;;  %s6596_s9 = inlined_call_operand.vmem [shape: f32[104,64], index: 9, kind: output, shape index: {}]  }
   0x1   :  { %5117 = vmatprep.subr.bf16.mxu0 %v5665_v0  ;;  %v45_v1 = vld [vmem:[%s6587_s1] sm:$0xff]  ;;  %v46_v2 = vld [vmem:[%s6587_s1 + $0x8] sm:$0xff]  ;;  %v47_v3 = vld [vmem:[%s6587_s1 + $0x10] sm:$0xff]  ;;  %4602 = vmatprep.mubr.msk.f32.mxu0 %vm5666_vm0, %v5667_v4  ;;  %vm248_vm2 = vcmask 261120  }
   0x2   :  { %v5118_v5 = vpack.c.bf16 %v46_v2, %v45_v1  ;;  %v48_v6 = vld [vmem:[%s6587_s1 + $0x18] sm:$0xff]  ;;  %5135 = vmatprep.subr.bf16.mxu1 %v5665_v0  ;;  %4660 = vmatprep.mubr.msk.f32.mxu1 %vm5666_vm0, %v5667_v4  ;;  %v49_v8 = vld [vmem:[%s6587_s1 + $0x20] sm:$0xff]  ;;  %v50_v9 = vld [vmem:[%s6587_s1 + $0x28] sm:$0xff] }
   0x3   :  { %v5121_v7 = vpack.c.bf16 %v48_v6, %v47_v3  ;;  %v5124_v10 = vpack.c.bf16 %v50_v9, %v49_v8  ;;  %v51_v11 = vld [vmem:[%s6587_s1 + $0x30] sm:$0xff]  ;;  %v52_v12 = vld [vmem:[%s6587_s1 + $0x38] sm:$0xff]  ;;  %v244_v14 = vld [vmem:[%s6588_s2] sm:$0xff] }
   0x4   :  { %5119 = vmatpush3.bf16.msra.mxu0 %v5118_v5  ;;  %v5127_v13 = vpack.c.bf16 %v52_v12, %v51_v11  ;;  %v245_v15 = vld [vmem:[%s6588_s2 + $0x8] sm:$0xff]  ;;  %v32_v16 = vld [vmem:[%s6589_s0] sm:$0xff]  ;;  %v246_v18 = vld [vmem:[%s6588_s2 + $0x10] sm:$0xff] }
   0x5   :  { %5120 = vmatprep.subr.bf16.mxu0 %v5665_v0  ;;  %v5762_v17 = vpack.c.bf16 %v245_v15, %v244_v14  ;;  %v247_v19 = vld [vmem:[%s6588_s2 + $0x18] sm:$0xff]  ;;  %v33_v20 = vld [vmem:[%s6589_s0 + $0x8] sm:$0xff]  ;;  %v34_v22 = vld [vmem:[%s6589_s0 + $0x10] sm:$0xff] }
   0x6   :  { %v5778_v21 = vpack.c.bf16 %v247_v19, %v246_v18  ;;  %v35_v23 = vld [vmem:[%s6589_s0 + $0x18] sm:$0xff]  ;;  %v36_v24 = vld [vmem:[%s6589_s0 + $0x20] sm:$0xff]  ;;  %v37_v25 = vld [vmem:[%s6589_s0 + $0x28] sm:$0xff] }
   0x7   :  { %v38_v26 = vld [vmem:[%s6589_s0 + $0x30] sm:$0xff]  ;;  %v39_v27 = vld [vmem:[%s6589_s0 + $0x38] sm:$0xff]  ;;  %v40_v28 = vld [vmem:[%s6589_s0 + $0x40] sm:$0xff] }
   0x8   :  { %5122 = vmatpush3.bf16.msra.mxu0 %v5121_v7  ;;  %v41_v29 = vld [vmem:[%s6589_s0 + $0x48] sm:$0xff]  ;;  %v42_v30 = vld [vmem:[%s6589_s0 + $0x50] sm:$0xff]  ;;  %v43_v31 = vld [vmem:[%s6589_s0 + $0x58] sm:$0xff] }
   0x9   :  { %5123 = vmatprep.subr.bf16.mxu0 %v5665_v0  ;;  %v44_v32 = vld [vmem:[%s6589_s0 + $0x60] sm:$0xff]  ;;  %v348_v49 = vld [vmem:[%s6591_s4 + $0x8] sm:$0xff]  ;;  %v349_v50 = vld [vmem:[%s6591_s4 + $0x10] sm:$0xff] }
   0xa   :  { %v5862_v33 = vld [vmem:[%s6590_s3] ss:$0 sm:$0xff]  ;;  %v350_v52 = vld [vmem:[%s6591_s4 + $0x18] sm:$0xff]  ;;  %v434_v58 = vld [vmem:[%s6592_s5 + $0x8] sm:$0xff] }
   0xb   :  { %v347_v48 = vld [vmem:[%s6591_s4] sm:$0xff]  ;;  %v5885_v53 = vpack.c.bf16 %v350_v52, %v349_v50  ;;  %v435_v60 = vld [vmem:[%s6592_s5 + $0x10] sm:$0xff]  ;;  %v436_v61 = vld [vmem:[%s6592_s5 + $0x18] sm:$0xff] }
   0xc   :  { %5125 = vmatpush3.bf16.msra.mxu0 %v5124_v10  ;;  %v5879_v51 = vpack.c.bf16 %v348_v49, %v347_v48  ;;  %v433_v57 = vld [vmem:[%s6592_s5] sm:$0xff]  ;;  %v5909_v63 = vpack.c.bf16 %v436_v61, %v435_v60 }
   0xd   :  { %5126 = vmatprep.subr.bf16.mxu0 %v5665_v0  ;;  %v5898_v59 = vpack.c.bf16 %v434_v58, %v433_v57  ;;  %v5933_v5 = vld [vmem:[%s6593_s6] ss:$0 sm:$0xff] }
   0xe   :  { %5137 = vmatpush3.bf16.msra.mxu1 %v5879_v51 }
   0xf   :  { %5138 = vmatprep.subr.bf16.mxu1 %v5665_v0 }
  0x10   :  { %5128 = vmatpush3.bf16.msra.mxu0 %v5127_v13 }
  0x11   :  { %5129 = vmatprep.subr.bf16.mxu0 %v5665_v0 }
  0x12   :  { %5140 = vmatpush3.bf16.msra.mxu1 %v5885_v53 }
  0x13   :  { %4603 = vmatmul.mubr.msk.f32.vlgmr.msra.gmra.mrb[0].mxu0 %vm60_vm1, %v32_v16  ;;  %5141 = vmatprep.subr.bf16.mxu1 %v5665_v0 }
  0x14   :  { %5131 = vmatpush3.bf16.msra.mxu0 %v5762_v17  ;;  %4605 = vmatprep.mubr.msk.f32.mxu0 %vm5666_vm0, %v5667_v4 }
  0x15   :  { %5132 = vmatprep.subr.bf16.mxu0 %v5665_v0 }
  0x17   :  { %4606 = vmatmul.mubr.msk.f32.gmra.mrb[2].mxu0 %vm60_vm1, %v33_v20 }
  0x18   :  { %4608 = vmatprep.mubr.msk.f32.mxu0 %vm5666_vm0, %v5667_v4  ;;  %5134 = vmatpush3.bf16.msra.mxu0 %v5778_v21 }
  0x19   :  { %5147 = vmatprep.subr.bf16.mxu0 %v5665_v0 }
  0x1b   :  { %4609 = vmatmul.mubr.msk.f32.gmra.mrb[4].mxu0 %vm60_vm1, %v34_v22 }
  0x1c   :  { %4611 = vmatprep.mubr.msk.f32.mxu0 %vm5666_vm0, %v5667_v4 }
  0x1f   :  { %4612 = vmatmul.mubr.msk.f32.gmra.mrb[6].mxu0 %vm60_vm1, %v35_v23 }
  0x20   :  { %4614 = vmatprep.mubr.msk.f32.mxu0 %vm5666_vm0, %v5667_v4 }
  0x23   :  { %4615 = vmatmul.mubr.msk.f32.gmra.mrb[8].mxu0 %vm60_vm1, %v36_v24 }
  0x24   :  { %4617 = vmatprep.mubr.msk.f32.mxu0 %vm5666_vm0, %v5667_v4 }
  0x27   :  { %4618 = vmatmul.mubr.msk.f32.gmra.mrb[10].mxu0 %vm60_vm1, %v37_v25 }
  0x28   :  { %4620 = vmatprep.mubr.msk.f32.mxu0 %vm5666_vm0, %v5667_v4 }
  0x2b   :  { %4621 = vmatmul.mubr.msk.f32.gmra.mrb[12].mxu0 %vm60_vm1, %v38_v26 }
  0x2c   :  { %4623 = vmatprep.mubr.msk.f32.mxu0 %vm5666_vm0, %v5667_v4 }
  0x2f   :  { %4624 = vmatmul.mubr.msk.f32.gmra.mrb[14].mxu0 %vm60_vm1, %v39_v27 }
  0x30   :  { %4626 = vmatprep.mubr.msk.f32.mxu0 %vm5666_vm0, %v5667_v4 }
  0x33   :  { %4627 = vmatmul.mubr.msk.f32.gmra.mrb[16].mxu0 %vm60_vm1, %v40_v28 }
  0x34   :  { %4629 = vmatprep.mubr.msk.f32.mxu0 %vm5666_vm0, %v5667_v4 }
  0x37   :  { %4630 = vmatmul.mubr.msk.f32.gmra.mrb[18].mxu0 %vm60_vm1, %v41_v29 }
  0x38   :  { %4632 = vmatprep.mubr.msk.f32.mxu0 %vm5666_vm0, %v5667_v4 }
  0x3b   :  { %4633 = vmatmul.mubr.msk.f32.gmra.mrb[20].mxu0 %vm60_vm1, %v42_v30 }
  0x3c   :  { %4635 = vmatprep.mubr.msk.f32.mxu0 %vm5666_vm0, %v5667_v4 }
  0x3f   :  { %4636 = vmatmul.mubr.msk.f32.gmra.mrb[22].mxu0 %vm60_vm1, %v43_v31 }
  0x40   :  { %4638 = vmatprep.mubr.msk.f32.mxu0 %vm5666_vm0, %v5667_v4 }
  0x43   :  { %4639 = vmatmul.mubr.msk.f32.gmra.mrb[24].mxu0 %vm60_vm1, %v44_v32 }
  0x44   :  { %4649 = vmatprep.mubr.msk.f32.mxu0 %vm5666_vm0, %v5667_v4 }
  0x47   :  { %4650 = vmatmul.mubr.f32.vlgmr.msra.gmra.mrb[0].mxu0 %v5667_v4 }
  0x48   :  { %5149 = vmatpush3.bf16.msra.mxu0 %v5762_v17  ;;  %4682 = vmatprep.mubr.msk.f32.mxu0 %vm5666_vm0, %v5667_v4 }
  0x49   :  { %5150 = vmatprep.subr.bf16.mxu0 %v5665_v0 }
  0x4c   :  { %5152 = vmatpush3.bf16.msra.mxu0 %v5778_v21 }
  0x4d   :  { %5165 = vmatprep.subr.bf16.mxu0 %v5665_v0 }
 0x11a   :  { %v318_v34 = vpop.f32.mrb[0].mxu0 }
 0x11b   :  { %v5373_v35 = vadd.f32 %v5862_v33, %v318_v34  ;;  %v4651_v36 = vpop.f32.mrb[1].mxu0 }
 0x11d   :  { %5456 = vtanh.f32 %v5373_v35  ;;  %v323_v38 = vsub.f32 0.0, %v5373_v35 }
 0x11f   :  { %v324_v39 = vmul.f32 1.442695, %v323_v38 }
 0x121   :  { %5458 = vpow2.f32 %v324_v39 }
 0x127   :  { %v5457_v37 = vpop.eup %5456 }
 0x128   :  { %332 = vrot.lane.b32.xlu0 %v5457_v37, %s5668_s16 }
 0x12b   :  { %v5459_v40 = vpop.eup %5458 }
 0x12c   :  { %v326_v41 = vadd.f32 1.0, %v5459_v40 }
 0x12e   :  { %5460 = vrcp.f32 %v326_v41 }
 0x138   :  { %v5461_v42 = vpop.eup %5460 }
 0x139   :  { %v330_v45 = vmul.f32 0.0, %v5461_v42 }
 0x19a   :  { %v333_v43 = vpop.permute.xlu0 %332 }
 0x19b   :  { %v335_v44 = vmul.f32 %v5461_v42, %v333_v43 }
 0x19d   :  { %337 = vrot.lane.b32.xlu0 %v335_v44, %s5669_s17 }
 0x20f   :  { %v338_v46 = vpop.permute.xlu0 %337 }
 0x210   :  { %v5867_v47 = vadd.f32 %v338_v46, %v330_v45 }
 0x212   :  { %5462 = vtanh.f32 %v5867_v47 }
 0x21c   :  { %v5463_v54 = vpop.eup %5462 }
 0x21d   :  { %343 = vrot.lane.b32.xlu1 %v5463_v54, %s5668_s16 }
 0x28f   :  { %v344_v55 = vpop.permute.xlu1 %343 }
 0x290   :  { %v346_v56 = vmul.f32 %v5461_v42, %v344_v55 }
 0x292   :  { %359 = vrot.lane.b32.xlu1 %v346_v56, %s5669_s17 }
 0x304   :  { %v360_v62 = vpop.permute.xlu1 %359 }
 0x305   :  { %4661 = vmatmul.mubr.msk.f32.vlgmr.msra.gmra.mrb[0].mxu1 %vm248_vm2, %v360_v62  ;;  %4683 = vmatmul.mubr.msk.f32.vlgmr.msra.gmra.mrb[2].mxu0 %vm248_vm2, %v360_v62 }
 0x306   :  { %5143 = vmatpush3.bf16.msra.mxu1 %v5898_v59  ;;  %4671 = vmatprep.mubr.msk.f32.mxu1 %vm5666_vm0, %v5667_v4 }
 0x307   :  { %5144 = vmatprep.subr.bf16.mxu1 %v5665_v0  ;;  %5167 = vmatpush3.bf16.msra.mxu0 %v5762_v17 }
 0x308   :  { %5168 = vmatprep.subr.bf16.mxu0 %v5665_v0  ;;  %4715 = vmatprep.mubr.msk.f32.mxu0 %vm5666_vm0, %v5667_v4 }
 0x30a   :  { %5146 = vmatpush3.bf16.msra.mxu1 %v5909_v63 }
 0x30b   :  { %5153 = vmatprep.subr.bf16.mxu1 %v5665_v0  ;;  %5170 = vmatpush3.bf16.msra.mxu0 %v5778_v21 }
 0x30c   :  { %5183 = vmatprep.subr.bf16.mxu0 %v5665_v0 }
 0x30d   :  { %4672 = vmatmul.mubr.f32.vlgmr.msra.gmra.mrb[0].mxu1 %v5667_v4 }
 0x30e   :  { %5155 = vmatpush3.bf16.msra.mxu1 %v5879_v51  ;;  %4693 = vmatprep.mubr.msk.f32.mxu1 %vm5666_vm0, %v5667_v4 }
 0x30f   :  { %5156 = vmatprep.subr.bf16.mxu1 %v5665_v0 }
 0x312   :  { %5158 = vmatpush3.bf16.msra.mxu1 %v5885_v53 }
 0x313   :  { %5159 = vmatprep.subr.bf16.mxu1 %v5665_v0 }
 0x3d8   :  { %v609_v1 = vpop.f32.mrb[2].mxu0 }
 0x3d9   :  { %v5374_v2 = vadd.f32 %v5862_v33, %v609_v1  ;;  %v4684_v3 = vpop.f32.mrb[3].mxu0 }
 0x3db   :  { %5464 = vtanh.f32 %v5374_v2  ;;  %v614_v11 = vsub.f32 0.0, %v5374_v2 }
 0x3dd   :  { %v615_v12 = vmul.f32 1.442695, %v614_v11 }
 0x3e0   :  { %v503_v6 = vpop.f32.mrb[0].mxu1 }
 0x3e1   :  { %v5386_v7 = vadd.f32 %v5933_v5, %v503_v6  ;;  %v4673_v8 = vpop.f32.mrb[1].mxu1 }
 0x3e3   :  { %5466 = vtanh.f32 %v5386_v7  ;;  %v508_v13 = vsub.f32 0.0, %v5386_v7 }
 0x3e4   :  { %5468 = vpow2.f32 %v615_v12 }
 0x3e5   :  { %v5465_v9 = vpop.eup %5464  ;;  %v509_v14 = vmul.f32 1.442695, %v508_v13 }
 0x3e6   :  { %623 = vrot.lane.b32.xlu0 %v5465_v9, %s5668_s16 }
 0x3e7   :  { %5470 = vpow2.f32 %v509_v14 }
 0x3ed   :  { %v5467_v10 = vpop.eup %5466 }
 0x3ee   :  { %517 = vrot.lane.b32.xlu1 %v5467_v10, %s5668_s16  ;;  %v5469_v15 = vpop.eup %5468 }
 0x3ef   :  { %v617_v16 = vadd.f32 1.0, %v5469_v15 }
 0x3f1   :  { %5472 = vrcp.f32 %v617_v16  ;;  %v5471_v18 = vpop.eup %5470 }
 0x3f2   :  { %v511_v19 = vadd.f32 1.0, %v5471_v18 }
 0x3f4   :  { %5474 = vrcp.f32 %v511_v19 }
 0x3fb   :  { %v5473_v20 = vpop.eup %5472 }
 0x3fc   :  { %v621_v27 = vmul.f32 %v5473_v20, %v5867_v47 }
 0x3fe   :  { %v5475_v24 = vpop.eup %5474 }
 0x3ff   :  { %v515_v30 = vmul.f32 0.0, %v5475_v24 }
 0x458   :  { %v624_v22 = vpop.permute.xlu0 %623 }
 0x459   :  { %v626_v23 = vmul.f32 %v5473_v20, %v624_v22 }
 0x45b   :  { %628 = vrot.lane.b32.xlu0 %v626_v23, %s5669_s17 }
 0x460   :  { %v518_v25 = vpop.permute.xlu1 %517 }
 0x461   :  { %v520_v26 = vmul.f32 %v5475_v24, %v518_v25 }
 0x463   :  { %522 = vrot.lane.b32.xlu1 %v520_v26, %s5669_s17 }
 0x4cd   :  { %v629_v28 = vpop.permute.xlu0 %628 }
 0x4ce   :  { %v5941_v29 = vadd.f32 %v629_v28, %v621_v27 }
 0x4d0   :  { %5476 = vtanh.f32 %v5941_v29 }
 0x4d5   :  { %v523_v31 = vpop.permute.xlu1 %522 }
 0x4d6   :  { %v5944_v32 = vadd.f32 %v523_v31, %v515_v30 }
 0x4d8   :  { %5478 = vtanh.f32 %v5944_v32 }
 0x4da   :  { %v5477_v34 = vpop.eup %5476 }
 0x4db   :  { %634 = vrot.lane.b32.xlu0 %v5477_v34, %s5668_s16 }
 0x4e2   :  { %v5479_v35 = vpop.eup %5478 }
 0x4e3   :  { %528 = vrot.lane.b32.xlu1 %v5479_v35, %s5668_s16 }
 0x54d   :  { %v635_v36 = vpop.permute.xlu0 %634 }
 0x54e   :  { %v637_v37 = vmul.f32 %v5473_v20, %v635_v36 }
 0x550   :  { %650 = vrot.lane.b32.xlu0 %v637_v37, %s5669_s17 }
 0x555   :  { %v529_v38 = vpop.permute.xlu1 %528 }
 0x556   :  { %v531_v39 = vmul.f32 %v5475_v24, %v529_v38 }
 0x558   :  { %533 = vrot.lane.b32.xlu1 %v531_v39, %s5669_s17 }
 0x5c2   :  { %v651_v40 = vpop.permute.xlu0 %650 }
 0x5c3   :  { %4694 = vmatmul.mubr.msk.f32.vlgmr.msra.gmra.mrb[2].mxu1 %vm248_vm2, %v651_v40  ;;  %4716 = vmatmul.mubr.msk.f32.vlgmr.msra.gmra.mrb[4].mxu0 %vm248_vm2, %v651_v40 }
 0x5c4   :  { %5161 = vmatpush3.bf16.msra.mxu1 %v5898_v59  ;;  %4704 = vmatprep.mubr.msk.f32.mxu1 %vm5666_vm0, %v5667_v4 }
 0x5c5   :  { %5162 = vmatprep.subr.bf16.mxu1 %v5665_v0  ;;  %5185 = vmatpush3.bf16.msra.mxu0 %v5762_v17 }
 0x5c6   :  { %5186 = vmatprep.subr.bf16.mxu0 %v5665_v0  ;;  %4748 = vmatprep.mubr.msk.f32.mxu0 %vm5666_vm0, %v5667_v4 }
 0x5c8   :  { %5164 = vmatpush3.bf16.msra.mxu1 %v5909_v63 }
 0x5c9   :  { %5171 = vmatprep.subr.bf16.mxu1 %v5665_v0  ;;  %5188 = vmatpush3.bf16.msra.mxu0 %v5778_v21 }
 0x5ca   :  { %v534_v41 = vpop.permute.xlu1 %533  ;;  %5201 = vmatprep.subr.bf16.mxu0 %v5665_v0 }
 0x5cb   :  { %536 = vst.msk [vmem:[#allocation3] sm:$0xff] %vm248_vm2, %v534_v41  ;;  %4705 = vmatmul.mubr.msk.f32.vlgmr.msra.gmra.mrb[2].mxu1 %vm248_vm2, %v534_v41 }
 0x5cc   :  { %5173 = vmatpush3.bf16.msra.mxu1 %v5879_v51  ;;  %4726 = vmatprep.mubr.msk.f32.mxu1 %vm5666_vm0, %v5667_v4 }
 0x5cd   :  { %5174 = vmatprep.subr.bf16.mxu1 %v5665_v0 }
 0x5d0   :  { %5176 = vmatpush3.bf16.msra.mxu1 %v5885_v53 }
 0x5d1   :  { %5177 = vmatprep.subr.bf16.mxu1 %v5665_v0 }
 0x696   :  { %v903_v42 = vpop.f32.mrb[4].mxu0 }
 0x697   :  { %v5375_v43 = vadd.f32 %v5862_v33, %v903_v42  ;;  %v4717_v44 = vpop.f32.mrb[5].mxu0 }
 0x699   :  { %5480 = vtanh.f32 %v5375_v43  ;;  %v908_v50 = vsub.f32 0.0, %v5375_v43 }
 0x69b   :  { %v909_v52 = vmul.f32 1.442695, %v908_v50 }
 0x69e   :  { %v796_v45 = vpop.f32.mrb[2].mxu1 }
 0x69f   :  { %v5387_v46 = vadd.f32 %v5933_v5, %v796_v45  ;;  %v4706_v47 = vpop.f32.mrb[3].mxu1 }
 0x6a1   :  { %5482 = vtanh.f32 %v5387_v46  ;;  %v801_v54 = vsub.f32 0.0, %v5387_v46 }
 0x6a2   :  { %5484 = vpow2.f32 %v909_v52 }
 0x6a3   :  { %v5481_v48 = vpop.eup %5480  ;;  %v802_v55 = vmul.f32 1.442695, %v801_v54 }
 0x6a4   :  { %917 = vrot.lane.b32.xlu0 %v5481_v48, %s5668_s16 }
 0x6a5   :  { %5486 = vpow2.f32 %v802_v55 }
 0x6ab   :  { %v5483_v49 = vpop.eup %5482 }
 0x6ac   :  { %810 = vrot.lane.b32.xlu1 %v5483_v49, %s5668_s16  ;;  %v5485_v56 = vpop.eup %5484 }
 0x6ad   :  { %v911_v57 = vadd.f32 1.0, %v5485_v56 }
 0x6af   :  { %5488 = vrcp.f32 %v911_v57  ;;  %v5487_v58 = vpop.eup %5486 }
 0x6b0   :  { %v804_v60 = vadd.f32 1.0, %v5487_v58 }
 0x6b2   :  { %5490 = vrcp.f32 %v804_v60 }
 0x6b9   :  { %v5489_v61 = vpop.eup %5488 }
 0x6ba   :  { %v915_v7 = vmul.f32 %v5489_v61, %v5941_v29 }
 0x6bc   :  { %v5491_v2 = vpop.eup %5490 }
 0x6bd   :  { %v808_v10 = vmul.f32 %v5491_v2, %v5944_v32 }
 0x716   :  { %v918_v62 = vpop.permute.xlu0 %917 }
 0x717   :  { %v920_v1 = vmul.f32 %v5489_v61, %v918_v62 }
 0x719   :  { %922 = vrot.lane.b32.xlu0 %v920_v1, %s5669_s17 }
 0x71e   :  { %v811_v3 = vpop.permute.xlu1 %810 }
 0x71f   :  { %v813_v6 = vmul.f32 %v5491_v2, %v811_v3 }
 0x721   :  { %815 = vrot.lane.b32.xlu1 %v813_v6, %s5669_s17 }
 0x78b   :  { %v923_v8 = vpop.permute.xlu0 %922 }
 0x78c   :  { %v5980_v9 = vadd.f32 %v923_v8, %v915_v7 }
 0x78e   :  { %5492 = vtanh.f32 %v5980_v9 }
 0x793   :  { %v816_v11 = vpop.permute.xlu1 %815 }
 0x794   :  { %v5984_v12 = vadd.f32 %v816_v11, %v808_v10 }
 0x796   :  { %5494 = vtanh.f32 %v5984_v12 }
 0x798   :  { %v5493_v13 = vpop.eup %5492 }
 0x799   :  { %928 = vrot.lane.b32.xlu0 %v5493_v13, %s5668_s16 }
 0x7a0   :  { %v5495_v14 = vpop.eup %5494 }
 0x7a1   :  { %821 = vrot.lane.b32.xlu1 %v5495_v14, %s5668_s16 }
 0x80b   :  { %v929_v15 = vpop.permute.xlu0 %928 }
 0x80c   :  { %v931_v16 = vmul.f32 %v5489_v61, %v929_v15 }
 0x80e   :  { %944 = vrot.lane.b32.xlu0 %v931_v16, %s5669_s17 }
 0x813   :  { %v822_v18 = vpop.permute.xlu1 %821 }
 0x814   :  { %v824_v19 = vmul.f32 %v5491_v2, %v822_v18 }
 0x816   :  { %826 = vrot.lane.b32.xlu1 %v824_v19, %s5669_s17 }
 0x880   :  { %v945_v20 = vpop.permute.xlu0 %944 }
 0x881   :  { %4727 = vmatmul.mubr.msk.f32.vlgmr.msra.gmra.mrb[4].mxu1 %vm248_vm2, %v945_v20  ;;  %4749 = vmatmul.mubr.msk.f32.vlgmr.msra.gmra.mrb[6].mxu0 %vm248_vm2, %v945_v20 }
 0x882   :  { %5179 = vmatpush3.bf16.msra.mxu1 %v5898_v59  ;;  %4737 = vmatprep.mubr.msk.f32.mxu1 %vm5666_vm0, %v5667_v4 }
 0x883   :  { %5180 = vmatprep.subr.bf16.mxu1 %v5665_v0  ;;  %5203 = vmatpush3.bf16.msra.mxu0 %v5762_v17 }
 0x884   :  { %5204 = vmatprep.subr.bf16.mxu0 %v5665_v0  ;;  %4781 = vmatprep.mubr.msk.f32.mxu0 %vm5666_vm0, %v5667_v4 }
 0x886   :  { %5182 = vmatpush3.bf16.msra.mxu1 %v5909_v63 }
 0x887   :  { %5189 = vmatprep.subr.bf16.mxu1 %v5665_v0  ;;  %5206 = vmatpush3.bf16.msra.mxu0 %v5778_v21 }
 0x888   :  { %v827_v22 = vpop.permute.xlu1 %826  ;;  %5219 = vmatprep.subr.bf16.mxu0 %v5665_v0 }
 0x889   :  { %830 = vst.msk [vmem:[#allocation3 + $0x8] sm:$0xff] %vm248_vm2, %v827_v22  ;;  %4738 = vmatmul.mubr.msk.f32.vlgmr.msra.gmra.mrb[4].mxu1 %vm248_vm2, %v827_v22 }
 0x88a   :  { %5191 = vmatpush3.bf16.msra.mxu1 %v5879_v51  ;;  %4759 = vmatprep.mubr.msk.f32.mxu1 %vm5666_vm0, %v5667_v4 }
 0x88b   :  { %5192 = vmatprep.subr.bf16.mxu1 %v5665_v0 }
 0x88e   :  { %5194 = vmatpush3.bf16.msra.mxu1 %v5885_v53 }
 0x88f   :  { %5195 = vmatprep.subr.bf16.mxu1 %v5665_v0 }
 0x954   :  { %v1197_v23 = vpop.f32.mrb[6].mxu0 }
 0x955   :  { %v5376_v24 = vadd.f32 %v5862_v33, %v1197_v23  ;;  %v4750_v25 = vpop.f32.mrb[7].mxu0 }
 0x957   :  { %5496 = vtanh.f32 %v5376_v24  ;;  %v1202_v31 = vsub.f32 0.0, %v5376_v24 }
 0x959   :  { %v1203_v32 = vmul.f32 1.442695, %v1202_v31 }
 0x95c   :  { %v1090_v26 = vpop.f32.mrb[4].mxu1 }
 0x95d   :  { %v5388_v27 = vadd.f32 %v5933_v5, %v1090_v26  ;;  %v4739_v28 = vpop.f32.mrb[5].mxu1 }
 0x95f   :  { %5498 = vtanh.f32 %v5388_v27  ;;  %v1095_v34 = vsub.f32 0.0, %v5388_v27 }
 0x960   :  { %5500 = vpow2.f32 %v1203_v32 }
 0x961   :  { %v5497_v29 = vpop.eup %5496  ;;  %v1096_v35 = vmul.f32 1.442695, %v1095_v34 }
 0x962   :  { %1211 = vrot.lane.b32.xlu0 %v5497_v29, %s5668_s16 }
 0x963   :  { %5502 = vpow2.f32 %v1096_v35 }
 0x969   :  { %v5499_v30 = vpop.eup %5498 }
 0x96a   :  { %1104 = vrot.lane.b32.xlu1 %v5499_v30, %s5668_s16  ;;  %v5501_v36 = vpop.eup %5500 }
 0x96b   :  { %v1205_v37 = vadd.f32 1.0, %v5501_v36 }
 0x96d   :  { %5504 = vrcp.f32 %v1205_v37  ;;  %v5503_v38 = vpop.eup %5502 }
 0x96e   :  { %v1098_v39 = vadd.f32 1.0, %v5503_v38 }
 0x970   :  { %5506 = vrcp.f32 %v1098_v39 }
 0x977   :  { %v5505_v40 = vpop.eup %5504 }
 0x978   :  { %v1209_v46 = vmul.f32 %v5505_v40, %v5980_v9 }
 0x97a   :  { %v5507_v43 = vpop.eup %5506 }
 0x97b   :  { %v1102_v49 = vmul.f32 %v5507_v43, %v5984_v12 }
 0x9d4   :  { %v1212_v41 = vpop.permute.xlu0 %1211 }
 0x9d5   :  { %v1214_v42 = vmul.f32 %v5505_v40, %v1212_v41 }
 0x9d7   :  { %1216 = vrot.lane.b32.xlu0 %v1214_v42, %s5669_s17 }
 0x9dc   :  { %v1105_v44 = vpop.permute.xlu1 %1104 }
 0x9dd   :  { %v1107_v45 = vmul.f32 %v5507_v43, %v1105_v44 }
 0x9df   :  { %1109 = vrot.lane.b32.xlu1 %v1107_v45, %s5669_s17 }
 0xa49   :  { %v1217_v47 = vpop.permute.xlu0 %1216 }
 0xa4a   :  { %v6020_v48 = vadd.f32 %v1217_v47, %v1209_v46 }
 0xa4c   :  { %5508 = vtanh.f32 %v6020_v48 }
 0xa51   :  { %v1110_v50 = vpop.permute.xlu1 %1109 }
 0xa52   :  { %v6024_v52 = vadd.f32 %v1110_v50, %v1102_v49 }
 0xa54   :  { %5510 = vtanh.f32 %v6024_v52 }
 0xa56   :  { %v5509_v54 = vpop.eup %5508 }
 0xa57   :  { %1222 = vrot.lane.b32.xlu0 %v5509_v54, %s5668_s16 }
 0xa5e   :  { %v5511_v55 = vpop.eup %5510 }
 0xa5f   :  { %1115 = vrot.lane.b32.xlu1 %v5511_v55, %s5668_s16 }
 0xac9   :  { %v1223_v56 = vpop.permute.xlu0 %1222 }
 0xaca   :  { %v1225_v57 = vmul.f32 %v5505_v40, %v1223_v56 }
 0xacc   :  { %1238 = vrot.lane.b32.xlu0 %v1225_v57, %s5669_s17 }
 0xad1   :  { %v1116_v58 = vpop.permute.xlu1 %1115 }
 0xad2   :  { %v1118_v60 = vmul.f32 %v5507_v43, %v1116_v58 }
 0xad4   :  { %1120 = vrot.lane.b32.xlu1 %v1118_v60, %s5669_s17 }
 0xb3e   :  { %v1239_v61 = vpop.permute.xlu0 %1238 }
 0xb3f   :  { %4760 = vmatmul.mubr.msk.f32.vlgmr.msra.gmra.mrb[6].mxu1 %vm248_vm2, %v1239_v61  ;;  %4782 = vmatmul.mubr.msk.f32.vlgmr.msra.gmra.mrb[8].mxu0 %vm248_vm2, %v1239_v61 }
 0xb40   :  { %5197 = vmatpush3.bf16.msra.mxu1 %v5898_v59  ;;  %4770 = vmatprep.mubr.msk.f32.mxu1 %vm5666_vm0, %v5667_v4 }
 0xb41   :  { %5198 = vmatprep.subr.bf16.mxu1 %v5665_v0  ;;  %5221 = vmatpush3.bf16.msra.mxu0 %v5762_v17 }
 0xb42   :  { %5222 = vmatprep.subr.bf16.mxu0 %v5665_v0  ;;  %4814 = vmatprep.mubr.msk.f32.mxu0 %vm5666_vm0, %v5667_v4 }
 0xb44   :  { %5200 = vmatpush3.bf16.msra.mxu1 %v5909_v63 }
 0xb45   :  { %5207 = vmatprep.subr.bf16.mxu1 %v5665_v0  ;;  %5224 = vmatpush3.bf16.msra.mxu0 %v5778_v21 }
 0xb46   :  { %v1121_v62 = vpop.permute.xlu1 %1120  ;;  %5237 = vmatprep.subr.bf16.mxu0 %v5665_v0 }
 0xb47   :  { %1124 = vst.msk [vmem:[#allocation3 + $0x10] sm:$0xff] %vm248_vm2, %v1121_v62  ;;  %4771 = vmatmul.mubr.msk.f32.vlgmr.msra.gmra.mrb[6].mxu1 %vm248_vm2, %v1121_v62 }
 0xb48   :  { %5209 = vmatpush3.bf16.msra.mxu1 %v5879_v51  ;;  %4792 = vmatprep.mubr.msk.f32.mxu1 %vm5666_vm0, %v5667_v4 }
 0xb49   :  { %5210 = vmatprep.subr.bf16.mxu1 %v5665_v0 }
 0xb4c   :  { %5212 = vmatpush3.bf16.msra.mxu1 %v5885_v53 }
 0xb4d   :  { %5213 = vmatprep.subr.bf16.mxu1 %v5665_v0 }
 0xc12   :  { %v1491_v1 = vpop.f32.mrb[8].mxu0 }
 0xc13   :  { %v5377_v2 = vadd.f32 %v5862_v33, %v1491_v1  ;;  %v4783_v3 = vpop.f32.mrb[9].mxu0 }
 0xc15   :  { %5512 = vtanh.f32 %v5377_v2  ;;  %v1496_v11 = vsub.f32 0.0, %v5377_v2 }
 0xc17   :  { %v1497_v12 = vmul.f32 1.442695, %v1496_v11 }
 0xc1a   :  { %v1384_v6 = vpop.f32.mrb[6].mxu1 }
 0xc1b   :  { %v5389_v7 = vadd.f32 %v5933_v5, %v1384_v6  ;;  %v4772_v8 = vpop.f32.mrb[7].mxu1 }
 0xc1d   :  { %5514 = vtanh.f32 %v5389_v7  ;;  %v1389_v13 = vsub.f32 0.0, %v5389_v7 }
 0xc1e   :  { %5516 = vpow2.f32 %v1497_v12 }
 0xc1f   :  { %v5513_v9 = vpop.eup %5512  ;;  %v1390_v14 = vmul.f32 1.442695, %v1389_v13 }
 0xc20   :  { %1505 = vrot.lane.b32.xlu0 %v5513_v9, %s5668_s16 }
 0xc21   :  { %5518 = vpow2.f32 %v1390_v14 }
 0xc27   :  { %v5515_v10 = vpop.eup %5514 }
 0xc28   :  { %1398 = vrot.lane.b32.xlu1 %v5515_v10, %s5668_s16  ;;  %v5517_v15 = vpop.eup %5516 }
 0xc29   :  { %v1499_v16 = vadd.f32 1.0, %v5517_v15 }
 0xc2b   :  { %5520 = vrcp.f32 %v1499_v16  ;;  %v5519_v18 = vpop.eup %5518 }
 0xc2c   :  { %v1392_v19 = vadd.f32 1.0, %v5519_v18 }
 0xc2e   :  { %5522 = vrcp.f32 %v1392_v19 }
 0xc35   :  { %v5521_v20 = vpop.eup %5520 }
 0xc36   :  { %v1503_v27 = vmul.f32 %v5521_v20, %v6020_v48 }
 0xc38   :  { %v5523_v24 = vpop.eup %5522 }
 0xc39   :  { %v1396_v30 = vmul.f32 %v5523_v24, %v6024_v52 }
 0xc92   :  { %v1506_v22 = vpop.permute.xlu0 %1505 }
 0xc93   :  { %v1508_v23 = vmul.f32 %v5521_v20, %v1506_v22 }
 0xc95   :  { %1510 = vrot.lane.b32.xlu0 %v1508_v23, %s5669_s17 }
 0xc9a   :  { %v1399_v25 = vpop.permute.xlu1 %1398 }
 0xc9b   :  { %v1401_v26 = vmul.f32 %v5523_v24, %v1399_v25 }
 0xc9d   :  { %1403 = vrot.lane.b32.xlu1 %v1401_v26, %s5669_s17 }
 0xd07   :  { %v1511_v28 = vpop.permute.xlu0 %1510 }
 0xd08   :  { %v6060_v29 = vadd.f32 %v1511_v28, %v1503_v27 }
 0xd0a   :  { %5524 = vtanh.f32 %v6060_v29 }
 0xd0f   :  { %v1404_v31 = vpop.permute.xlu1 %1403 }
 0xd10   :  { %v6064_v32 = vadd.f32 %v1404_v31, %v1396_v30 }
 0xd12   :  { %5526 = vtanh.f32 %v6064_v32 }
 0xd14   :  { %v5525_v34 = vpop.eup %5524 }
 0xd15   :  { %1516 = vrot.lane.b32.xlu0 %v5525_v34, %s5668_s16 }
 0xd1c   :  { %v5527_v35 = vpop.eup %5526 }
 0xd1d   :  { %1409 = vrot.lane.b32.xlu1 %v5527_v35, %s5668_s16 }
 0xd87   :  { %v1517_v36 = vpop.permute.xlu0 %1516 }
 0xd88   :  { %v1519_v37 = vmul.f32 %v5521_v20, %v1517_v36 }
 0xd8a   :  { %1532 = vrot.lane.b32.xlu0 %v1519_v37, %s5669_s17 }
 0xd8f   :  { %v1410_v38 = vpop.permute.xlu1 %1409 }
 0xd90   :  { %v1412_v39 = vmul.f32 %v5523_v24, %v1410_v38 }
 0xd92   :  { %1414 = vrot.lane.b32.xlu1 %v1412_v39, %s5669_s17 }
 0xdfc   :  { %v1533_v40 = vpop.permute.xlu0 %1532 }
 0xdfd   :  { %4793 = vmatmul.mubr.msk.f32.vlgmr.msra.gmra.mrb[8].mxu1 %vm248_vm2, %v1533_v40  ;;  %4815 = vmatmul.mubr.msk.f32.vlgmr.msra.gmra.mrb[10].mxu0 %vm248_vm2, %v1533_v40 }
 0xdfe   :  { %5215 = vmatpush3.bf16.msra.mxu1 %v5898_v59  ;;  %4803 = vmatprep.mubr.msk.f32.mxu1 %vm5666_vm0, %v5667_v4 }
 0xdff   :  { %5216 = vmatprep.subr.bf16.mxu1 %v5665_v0  ;;  %5239 = vmatpush3.bf16.msra.mxu0 %v5762_v17 }
 0xe00   :  { %5240 = vmatprep.subr.bf16.mxu0 %v5665_v0  ;;  %4847 = vmatprep.mubr.msk.f32.mxu0 %vm5666_vm0, %v5667_v4 }
 0xe02   :  { %5218 = vmatpush3.bf16.msra.mxu1 %v5909_v63 }
 0xe03   :  { %5225 = vmatprep.subr.bf16.mxu1 %v5665_v0  ;;  %5242 = vmatpush3.bf16.msra.mxu0 %v5778_v21 }
 0xe04   :  { %v1415_v41 = vpop.permute.xlu1 %1414  ;;  %5255 = vmatprep.subr.bf16.mxu0 %v5665_v0 }
 0xe05   :  { %1418 = vst.msk [vmem:[#allocation3 + $0x18] sm:$0xff] %vm248_vm2, %v1415_v41  ;;  %4804 = vmatmul.mubr.msk.f32.vlgmr.msra.gmra.mrb[8].mxu1 %vm248_vm2, %v1415_v41 }
 0xe06   :  { %5227 = vmatpush3.bf16.msra.mxu1 %v5879_v51  ;;  %4825 = vmatprep.mubr.msk.f32.mxu1 %vm5666_vm0, %v5667_v4 }
 0xe07   :  { %5228 = vmatprep.subr.bf16.mxu1 %v5665_v0 }
 0xe0a   :  { %5230 = vmatpush3.bf16.msra.mxu1 %v5885_v53 }
 0xe0b   :  { %5231 = vmatprep.subr.bf16.mxu1 %v5665_v0 }
 0xed0   :  { %v1785_v17 = vpop.f32.mrb[10].mxu0 }
 0xed1   :  { %v5378_v21 = vadd.f32 %v5862_v33, %v1785_v17  ;;  %v4816_v42 = vpop.f32.mrb[11].mxu0 }
 0xed3   :  { %5528 = vtanh.f32 %v5378_v21  ;;  %v1790_v48 = vsub.f32 0.0, %v5378_v21 }
 0xed5   :  { %v1791_v49 = vmul.f32 1.442695, %v1790_v48  ;;  %v2305_v48 = vld [vmem:[%s6588_s2 + $0x10] sm:$0xff] }
 0xed8   :  { %v1678_v43 = vpop.f32.mrb[8].mxu1 }
 0xed9   :  { %v5390_v44 = vadd.f32 %v5933_v5, %v1678_v43  ;;  %v4805_v45 = vpop.f32.mrb[9].mxu1 }
 0xedb   :  { %5530 = vtanh.f32 %v5390_v44  ;;  %v1683_v50 = vsub.f32 0.0, %v5390_v44 }
 0xedc   :  { %5532 = vpow2.f32 %v1791_v49 }
 0xedd   :  { %v5529_v46 = vpop.eup %5528  ;;  %v1684_v52 = vmul.f32 1.442695, %v1683_v50  ;;  %v2306_v50 = vld [vmem:[%s6588_s2 + $0x18] sm:$0xff] }
 0xede   :  { %1799 = vrot.lane.b32.xlu0 %v5529_v46, %s5668_s16  ;;  %v2303_v46 = vld [vmem:[%s6588_s2] sm:$0xff] }
 0xedf   :  { %5534 = vpow2.f32 %v1684_v52 }
 0xee5   :  { %v5531_v47 = vpop.eup %5530 }
 0xee6   :  { %1692 = vrot.lane.b32.xlu1 %v5531_v47, %s5668_s16  ;;  %v5533_v54 = vpop.eup %5532  ;;  %v2304_v47 = vld [vmem:[%s6588_s2 + $0x8] sm:$0xff] }
 0xee7   :  { %v1793_v55 = vadd.f32 1.0, %v5533_v54  ;;  %v6152_v49 = vpack.c.bf16 %v2304_v47, %v2303_v46  ;;  %v6159_v54 = vpack.c.bf16 %v2306_v50, %v2305_v48  ;;  %v6264_v47 = vld [vmem:[%s6590_s3] ss:$0 sm:$0xff] }
 0xee9   :  { %5536 = vrcp.f32 %v1793_v55  ;;  %v5535_v56 = vpop.eup %5534 }
 0xeea   :  { %v1686_v57 = vadd.f32 1.0, %v5535_v56 }
 0xeec   :  { %5538 = vrcp.f32 %v1686_v57 }
 0xef3   :  { %v5537_v58 = vpop.eup %5536 }
 0xef4   :  { %v1797_v3 = vmul.f32 %v5537_v58, %v6060_v29 }
 0xef6   :  { %v5539_v62 = vpop.eup %5538 }
 0xef7   :  { %v1690_v8 = vmul.f32 %v5539_v62, %v6064_v32 }
 0xf50   :  { %v1800_v60 = vpop.permute.xlu0 %1799 }
 0xf51   :  { %v1802_v61 = vmul.f32 %v5537_v58, %v1800_v60 }
 0xf53   :  { %1804 = vrot.lane.b32.xlu0 %v1802_v61, %s5669_s17 }
 0xf58   :  { %v1693_v1 = vpop.permute.xlu1 %1692 }
 0xf59   :  { %v1695_v2 = vmul.f32 %v5539_v62, %v1693_v1 }
 0xf5b   :  { %1697 = vrot.lane.b32.xlu1 %v1695_v2, %s5669_s17 }
 0xfc5   :  { %v1805_v6 = vpop.permute.xlu0 %1804 }
 0xfc6   :  { %v6100_v7 = vadd.f32 %v1805_v6, %v1797_v3 }
 0xfc8   :  { %5540 = vtanh.f32 %v6100_v7 }
 0xfcd   :  { %v1698_v9 = vpop.permute.xlu1 %1697 }
 0xfce   :  { %v6104_v10 = vadd.f32 %v1698_v9, %v1690_v8 }
 0xfd0   :  { %5542 = vtanh.f32 %v6104_v10 }
 0xfd2   :  { %v5541_v11 = vpop.eup %5540 }
 0xfd3   :  { %1810 = vrot.lane.b32.xlu0 %v5541_v11, %s5668_s16 }
 0xfda   :  { %v5543_v12 = vpop.eup %5542 }
 0xfdb   :  { %1703 = vrot.lane.b32.xlu1 %v5543_v12, %s5668_s16 }
0x1045   :  { %v1811_v13 = vpop.permute.xlu0 %1810 }
0x1046   :  { %v1813_v14 = vmul.f32 %v5537_v58, %v1811_v13 }
0x1048   :  { %1826 = vrot.lane.b32.xlu0 %v1813_v14, %s5669_s17 }
0x104d   :  { %v1704_v15 = vpop.permute.xlu1 %1703 }
0x104e   :  { %v1706_v16 = vmul.f32 %v5539_v62, %v1704_v15 }
0x1050   :  { %1708 = vrot.lane.b32.xlu1 %v1706_v16, %s5669_s17 }
0x10ba   :  { %v1827_v18 = vpop.permute.xlu0 %1826 }
0x10bb   :  { %4826 = vmatmul.mubr.msk.f32.vlgmr.msra.gmra.mrb[10].mxu1 %vm248_vm2, %v1827_v18  ;;  %4848 = vmatmul.mubr.msk.f32.vlgmr.msra.gmra.mrb[12].mxu0 %vm248_vm2, %v1827_v18 }
0x10bc   :  { %5233 = vmatpush3.bf16.msra.mxu1 %v5898_v59  ;;  %4836 = vmatprep.mubr.msk.f32.mxu1 %vm5666_vm0, %v5667_v4 }
0x10bd   :  { %5234 = vmatprep.subr.bf16.mxu1 %v5665_v0  ;;  %4880 = vmatprep.mubr.msk.f32.mxu0 %vm5666_vm0, %v5667_v4 }
0x10be   :  { %5257 = vmatpush3.bf16.msra.mxu0 %v6152_v49 }
0x10bf   :  { %5258 = vmatprep.subr.bf16.mxu0 %v5665_v0 }
0x10c0   :  { %5236 = vmatpush3.bf16.msra.mxu1 %v5909_v63 }
0x10c1   :  { %5243 = vmatprep.subr.bf16.mxu1 %v5665_v0 }
0x10c2   :  { %v1709_v19 = vpop.permute.xlu1 %1708  ;;  %5260 = vmatpush3.bf16.msra.mxu0 %v6159_v54 }
0x10c3   :  { %1712 = vst.msk [vmem:[#allocation3 + $0x20] sm:$0xff] %vm248_vm2, %v1709_v19  ;;  %4837 = vmatmul.mubr.msk.f32.vlgmr.msra.gmra.mrb[10].mxu1 %vm248_vm2, %v1709_v19  ;;  %5273 = vmatprep.subr.bf16.mxu0 %v5665_v0 }
0x10c4   :  { %5245 = vmatpush3.bf16.msra.mxu1 %v5879_v51  ;;  %4858 = vmatprep.mubr.msk.f32.mxu1 %vm5666_vm0, %v5667_v4 }
0x10c5   :  { %5246 = vmatprep.subr.bf16.mxu1 %v5665_v0 }
0x10c8   :  { %5248 = vmatpush3.bf16.msra.mxu1 %v5885_v53 }
0x10c9   :  { %5249 = vmatprep.subr.bf16.mxu1 %v5665_v0 }
0x118e   :  { %v2079_v20 = vpop.f32.mrb[12].mxu0 }
0x118f   :  { %v5379_v22 = vadd.f32 %v5862_v33, %v2079_v20  ;;  %v4849_v23 = vpop.f32.mrb[13].mxu0 }
0x1191   :  { %5544 = vtanh.f32 %v5379_v22  ;;  %v2084_v28 = vsub.f32 0.0, %v5379_v22 }
0x1193   :  { %v2085_v53 = vmul.f32 1.442695, %v2084_v28  ;;  %v2402_v28 = vld [vmem:[%s6591_s4] sm:$0xff] }
0x1196   :  { %v1972_v24 = vpop.f32.mrb[10].mxu1 }
0x1197   :  { %v5391_v25 = vadd.f32 %v5933_v5, %v1972_v24  ;;  %v4838_v26 = vpop.f32.mrb[11].mxu1 }
0x1199   :  { %5546 = vtanh.f32 %v5391_v25  ;;  %v1977_v29 = vsub.f32 0.0, %v5391_v25 }
0x119a   :  { %5548 = vpow2.f32 %v2085_v53  ;;  %v2403_v53 = vld [vmem:[%s6591_s4 + $0x8] sm:$0xff] }
0x119b   :  { %v5545_v51 = vpop.eup %5544  ;;  %v1978_v30 = vmul.f32 1.442695, %v1977_v29  ;;  %v2404_v29 = vld [vmem:[%s6591_s4 + $0x10] sm:$0xff] }
0x119c   :  { %2093 = vrot.lane.b32.xlu0 %v5545_v51, %s5668_s16 }
0x119d   :  { %5550 = vpow2.f32 %v1978_v30  ;;  %v6208_v30 = vpack.c.bf16 %v2403_v53, %v2402_v28 }
0x11a3   :  { %v5547_v27 = vpop.eup %5546 }
0x11a4   :  { %1986 = vrot.lane.b32.xlu1 %v5547_v27, %s5668_s16  ;;  %v5549_v31 = vpop.eup %5548 }
0x11a5   :  { %v2087_v32 = vadd.f32 1.0, %v5549_v31  ;;  %v2405_v31 = vld [vmem:[%s6591_s4 + $0x18] sm:$0xff] }
0x11a7   :  { %5552 = vrcp.f32 %v2087_v32  ;;  %v5551_v34 = vpop.eup %5550 }
0x11a8   :  { %v1980_v35 = vadd.f32 1.0, %v5551_v34  ;;  %v6215_v34 = vpack.c.bf16 %v2405_v31, %v2404_v29 }
0x11aa   :  { %5554 = vrcp.f32 %v1980_v35 }
0x11b1   :  { %v5553_v36 = vpop.eup %5552 }
0x11b2   :  { %v2091_v17 = vmul.f32 %v5553_v36, %v6100_v7 }
0x11b4   :  { %v5555_v39 = vpop.eup %5554 }
0x11b5   :  { %v1984_v43 = vmul.f32 %v5555_v39, %v6104_v10 }
0x120e   :  { %v2094_v37 = vpop.permute.xlu0 %2093 }
0x120f   :  { %v2096_v38 = vmul.f32 %v5553_v36, %v2094_v37 }
0x1211   :  { %2098 = vrot.lane.b32.xlu0 %v2096_v38, %s5669_s17 }
0x1216   :  { %v1987_v40 = vpop.permute.xlu1 %1986 }
0x1217   :  { %v1989_v41 = vmul.f32 %v5555_v39, %v1987_v40  ;;  %v2488_v40 = vld [vmem:[%s6592_s5] sm:$0xff] }
0x1219   :  { %1991 = vrot.lane.b32.xlu1 %v1989_v41, %s5669_s17  ;;  %v2489_v41 = vld [vmem:[%s6592_s5 + $0x8] sm:$0xff] }
0x1283   :  { %v2099_v21 = vpop.permute.xlu0 %2098 }
0x1284   :  { %v6136_v42 = vadd.f32 %v2099_v21, %v2091_v17  ;;  %v6229_v17 = vpack.c.bf16 %v2489_v41, %v2488_v40  ;;  %v2490_v21 = vld [vmem:[%s6592_s5 + $0x10] sm:$0xff] }
0x1286   :  { %5556 = vtanh.f32 %v6136_v42 }
0x128b   :  { %v1992_v44 = vpop.permute.xlu1 %1991 }
0x128c   :  { %v6140_v45 = vadd.f32 %v1992_v44, %v1984_v43 }
0x128e   :  { %5558 = vtanh.f32 %v6140_v45 }
0x1290   :  { %v5557_v52 = vpop.eup %5556 }
0x1291   :  { %2104 = vrot.lane.b32.xlu0 %v5557_v52, %s5668_s16  ;;  %v6270_v52 = vld [vmem:[%s6593_s6] ss:$0 sm:$0xff] }
0x1298   :  { %v5559_v55 = vpop.eup %5558 }
0x1299   :  { %1997 = vrot.lane.b32.xlu1 %v5559_v55, %s5668_s16 }
0x1303   :  { %v2105_v56 = vpop.permute.xlu0 %2104 }
0x1304   :  { %v2107_v57 = vmul.f32 %v5553_v36, %v2105_v56 }
0x1306   :  { %2120 = vrot.lane.b32.xlu0 %v2107_v57, %s5669_s17 }
0x130b   :  { %v1998_v58 = vpop.permute.xlu1 %1997 }
0x130c   :  { %v2000_v60 = vmul.f32 %v5555_v39, %v1998_v58 }
0x130e   :  { %2002 = vrot.lane.b32.xlu1 %v2000_v60, %s5669_s17 }
0x1378   :  { %v2121_v61 = vpop.permute.xlu0 %2120 }
0x1379   :  { %4859 = vmatmul.mubr.msk.f32.vlgmr.msra.gmra.mrb[12].mxu1 %vm248_vm2, %v2121_v61  ;;  %4881 = vmatmul.mubr.msk.f32.vlgmr.msra.gmra.mrb[14].mxu0 %vm248_vm2, %v2121_v61 }
0x137a   :  { %5251 = vmatpush3.bf16.msra.mxu1 %v5898_v59  ;;  %4869 = vmatprep.mubr.msk.f32.mxu1 %vm5666_vm0, %v5667_v4 }
0x137b   :  { %5252 = vmatprep.subr.bf16.mxu1 %v5665_v0  ;;  %5275 = vmatpush3.bf16.msra.mxu0 %v6152_v49 }
0x137c   :  { %5276 = vmatprep.subr.bf16.mxu0 %v5665_v0  ;;  %4913 = vmatprep.mubr.msk.f32.mxu0 %vm5666_vm0, %v5667_v4 }
0x137e   :  { %5254 = vmatpush3.bf16.msra.mxu1 %v5909_v63 }
0x137f   :  { %5261 = vmatprep.subr.bf16.mxu1 %v5665_v0  ;;  %5278 = vmatpush3.bf16.msra.mxu0 %v6159_v54 }
0x1380   :  { %v2003_v62 = vpop.permute.xlu1 %2002  ;;  %5291 = vmatprep.subr.bf16.mxu0 %v5665_v0 }
0x1381   :  { %2006 = vst.msk [vmem:[#allocation3 + $0x28] sm:$0xff] %vm248_vm2, %v2003_v62  ;;  %4870 = vmatmul.mubr.msk.f32.vlgmr.msra.gmra.mrb[12].mxu1 %vm248_vm2, %v2003_v62 }
0x1382   :  { %4891 = vmatprep.mubr.msk.f32.mxu1 %vm5666_vm0, %v5667_v4  ;;  %5263 = vmatpush3.bf16.msra.mxu1 %v6208_v30 }
0x1383   :  { %5264 = vmatprep.subr.bf16.mxu1 %v5665_v0 }
0x1386   :  { %5266 = vmatpush3.bf16.msra.mxu1 %v6215_v34 }
0x1387   :  { %5267 = vmatprep.subr.bf16.mxu1 %v5665_v0 }
0x144c   :  { %v2373_v59 = vpop.f32.mrb[14].mxu0 }
0x144d   :  { %v5380_v1 = vadd.f32 %v5862_v33, %v2373_v59  ;;  %v4882_v2 = vpop.f32.mrb[15].mxu0 }
0x144f   :  { %5560 = vtanh.f32 %v5380_v1  ;;  %v2378_v9 = vsub.f32 0.0, %v5380_v1 }
0x1451   :  { %v2379_v10 = vmul.f32 1.442695, %v2378_v9 }
0x1454   :  { %v2266_v63 = vpop.f32.mrb[12].mxu1 }
0x1455   :  { %v5392_v3 = vadd.f32 %v5933_v5, %v2266_v63  ;;  %v4871_v6 = vpop.f32.mrb[13].mxu1 }
0x1457   :  { %5562 = vtanh.f32 %v5392_v3  ;;  %v2271_v11 = vsub.f32 0.0, %v5392_v3 }
0x1458   :  { %5564 = vpow2.f32 %v2379_v10 }
0x1459   :  { %v5561_v7 = vpop.eup %5560  ;;  %v2272_v12 = vmul.f32 1.442695, %v2271_v11 }
0x145a   :  { %2387 = vrot.lane.b32.xlu0 %v5561_v7, %s5668_s16 }
0x145b   :  { %5566 = vpow2.f32 %v2272_v12 }
0x1461   :  { %v5563_v8 = vpop.eup %5562 }
0x1462   :  { %2280 = vrot.lane.b32.xlu1 %v5563_v8, %s5668_s16  ;;  %v5565_v33 = vpop.eup %5564 }
0x1463   :  { %v2381_v13 = vadd.f32 1.0, %v5565_v33 }
0x1465   :  { %5568 = vrcp.f32 %v2381_v13  ;;  %v5567_v14 = vpop.eup %5566 }
0x1466   :  { %v2274_v15 = vadd.f32 1.0, %v5567_v14 }
0x1468   :  { %5570 = vrcp.f32 %v2274_v15 }
0x146f   :  { %v5569_v5 = vpop.eup %5568 }
0x1470   :  { %v2385_v23 = vmul.f32 %v5569_v5, %v6136_v42  ;;  %v2491_v42 = vld [vmem:[%s6592_s5 + $0x18] sm:$0xff] }
0x1471   :  { %v6240_v44 = vpack.c.bf16 %v2491_v42, %v2490_v21 }
0x1472   :  { %v5571_v19 = vpop.eup %5570 }
0x1473   :  { %v2278_v26 = vmul.f32 %v5571_v19, %v6140_v45 }
0x14cc   :  { %v2388_v16 = vpop.permute.xlu0 %2387 }
0x14cd   :  { %v2390_v18 = vmul.f32 %v5569_v5, %v2388_v16 }
0x14cf   :  { %2392 = vrot.lane.b32.xlu0 %v2390_v18, %s5669_s17 }
0x14d4   :  { %v2281_v20 = vpop.permute.xlu1 %2280 }
0x14d5   :  { %v2283_v22 = vmul.f32 %v5571_v19, %v2281_v20 }
0x14d7   :  { %2285 = vrot.lane.b32.xlu1 %v2283_v22, %s5669_s17 }
0x1541   :  { %v2393_v24 = vpop.permute.xlu0 %2392 }
0x1542   :  { %v6192_v25 = vadd.f32 %v2393_v24, %v2385_v23 }
0x1544   :  { %5572 = vtanh.f32 %v6192_v25 }
0x1549   :  { %v2286_v51 = vpop.permute.xlu1 %2285 }
0x154a   :  { %v6196_v27 = vadd.f32 %v2286_v51, %v2278_v26 }
0x154c   :  { %5574 = vtanh.f32 %v6196_v27 }
0x154e   :  { %v5573_v32 = vpop.eup %5572 }
0x154f   :  { %2398 = vrot.lane.b32.xlu0 %v5573_v32, %s5668_s16 }
0x1556   :  { %v5575_v35 = vpop.eup %5574 }
0x1557   :  { %2291 = vrot.lane.b32.xlu1 %v5575_v35, %s5668_s16 }
0x15c1   :  { %v2399_v36 = vpop.permute.xlu0 %2398 }
0x15c2   :  { %v2401_v37 = vmul.f32 %v5569_v5, %v2399_v36 }
0x15c4   :  { %2414 = vrot.lane.b32.xlu0 %v2401_v37, %s5669_s17 }
0x15c9   :  { %v2292_v38 = vpop.permute.xlu1 %2291 }
0x15ca   :  { %v2294_v39 = vmul.f32 %v5571_v19, %v2292_v38 }
0x15cc   :  { %2296 = vrot.lane.b32.xlu1 %v2294_v39, %s5669_s17 }
0x1636   :  { %v2415_v43 = vpop.permute.xlu0 %2414 }
0x1637   :  { %4892 = vmatmul.mubr.msk.f32.vlgmr.msra.gmra.mrb[14].mxu1 %vm248_vm2, %v2415_v43  ;;  %4914 = vmatmul.mubr.msk.f32.vlgmr.msra.gmra.mrb[16].mxu0 %vm248_vm2, %v2415_v43 }
0x1638   :  { %5269 = vmatpush3.bf16.msra.mxu1 %v6229_v17  ;;  %4902 = vmatprep.mubr.msk.f32.mxu1 %vm5666_vm0, %v5667_v4 }
0x1639   :  { %5270 = vmatprep.subr.bf16.mxu1 %v5665_v0  ;;  %5293 = vmatpush3.bf16.msra.mxu0 %v6152_v49 }
0x163a   :  { %5294 = vmatprep.subr.bf16.mxu0 %v5665_v0  ;;  %4946 = vmatprep.mubr.msk.f32.mxu0 %vm5666_vm0, %v5667_v4 }
0x163c   :  { %5272 = vmatpush3.bf16.msra.mxu1 %v6240_v44 }
0x163d   :  { %5279 = vmatprep.subr.bf16.mxu1 %v5665_v0  ;;  %5296 = vmatpush3.bf16.msra.mxu0 %v6159_v54 }
0x163e   :  { %v2297_v45 = vpop.permute.xlu1 %2296  ;;  %5297 = vmatprep.subr.bf16.mxu0 %v5665_v0 }
0x163f   :  { %2300 = vst.msk [vmem:[#allocation3 + $0x30] sm:$0xff] %vm248_vm2, %v2297_v45  ;;  %4903 = vmatmul.mubr.msk.f32.vlgmr.msra.gmra.mrb[14].mxu1 %vm248_vm2, %v2297_v45 }
0x1640   :  { %5281 = vmatpush3.bf16.msra.mxu1 %v6208_v30  ;;  %4924 = vmatprep.mubr.msk.f32.mxu1 %vm5666_vm0, %v5667_v4 }
0x1641   :  { %5282 = vmatprep.subr.bf16.mxu1 %v5665_v0 }
0x1644   :  { %5284 = vmatpush3.bf16.msra.mxu1 %v6215_v34 }
0x1645   :  { %5285 = vmatprep.subr.bf16.mxu1 %v5665_v0 }
0x170a   :  { %v2667_v46 = vpop.f32.mrb[16].mxu0 }
0x170b   :  { %v5381_v48 = vadd.f32 %v6264_v47, %v2667_v46  ;;  %v4915_v50 = vpop.f32.mrb[17].mxu0 }
0x170d   :  { %5576 = vtanh.f32 %v5381_v48  ;;  %v2672_v61 = vsub.f32 0.0, %v5381_v48 }
0x170f   :  { %v2673_v62 = vmul.f32 1.442695, %v2672_v61 }
0x1712   :  { %v2560_v55 = vpop.f32.mrb[14].mxu1 }
0x1713   :  { %v5393_v56 = vadd.f32 %v6270_v52, %v2560_v55  ;;  %v4904_v57 = vpop.f32.mrb[15].mxu1 }
0x1715   :  { %5578 = vtanh.f32 %v5393_v56  ;;  %v2565_v59 = vsub.f32 0.0, %v5393_v56 }
0x1716   :  { %5580 = vpow2.f32 %v2673_v62 }
0x1717   :  { %v5577_v58 = vpop.eup %5576  ;;  %v2566_v1 = vmul.f32 1.442695, %v2565_v59 }
0x1718   :  { %2681 = vrot.lane.b32.xlu0 %v5577_v58, %s5668_s16 }
0x1719   :  { %5582 = vpow2.f32 %v2566_v1 }
0x171f   :  { %v5579_v60 = vpop.eup %5578 }
0x1720   :  { %2574 = vrot.lane.b32.xlu1 %v5579_v60, %s5668_s16  ;;  %v5581_v2 = vpop.eup %5580 }
0x1721   :  { %v2675_v63 = vadd.f32 1.0, %v5581_v2 }
0x1723   :  { %5584 = vrcp.f32 %v2675_v63  ;;  %v5583_v3 = vpop.eup %5582 }
0x1724   :  { %v2568_v6 = vadd.f32 1.0, %v5583_v3 }
0x1726   :  { %5586 = vrcp.f32 %v2568_v6 }
0x172d   :  { %v5585_v7 = vpop.eup %5584 }
0x172e   :  { %v2679_v33 = vmul.f32 %v5585_v7, %v6192_v25 }
0x1730   :  { %v5587_v10 = vpop.eup %5586 }
0x1731   :  { %v2572_v15 = vmul.f32 %v5587_v10, %v6196_v27 }
0x178a   :  { %v2682_v8 = vpop.permute.xlu0 %2681 }
0x178b   :  { %v2684_v9 = vmul.f32 %v5585_v7, %v2682_v8 }
0x178d   :  { %2686 = vrot.lane.b32.xlu0 %v2684_v9, %s5669_s17 }
0x1792   :  { %v2575_v11 = vpop.permute.xlu1 %2574 }
0x1793   :  { %v2577_v12 = vmul.f32 %v5587_v10, %v2575_v11 }
0x1795   :  { %2579 = vrot.lane.b32.xlu1 %v2577_v12, %s5669_s17 }
0x17ff   :  { %v2687_v13 = vpop.permute.xlu0 %2686 }
0x1800   :  { %v6278_v14 = vadd.f32 %v2687_v13, %v2679_v33 }
0x1802   :  { %5588 = vtanh.f32 %v6278_v14 }
0x1807   :  { %v2580_v5 = vpop.permute.xlu1 %2579 }
0x1808   :  { %v6282_v16 = vadd.f32 %v2580_v5, %v2572_v15 }
0x180a   :  { %5590 = vtanh.f32 %v6282_v16 }
0x180c   :  { %v5589_v18 = vpop.eup %5588 }
0x180d   :  { %2692 = vrot.lane.b32.xlu0 %v5589_v18, %s5668_s16 }
0x1814   :  { %v5591_v19 = vpop.eup %5590 }
0x1815   :  { %2585 = vrot.lane.b32.xlu1 %v5591_v19, %s5668_s16 }
0x187f   :  { %v2693_v20 = vpop.permute.xlu0 %2692 }
0x1880   :  { %v2695_v22 = vmul.f32 %v5585_v7, %v2693_v20 }
0x1882   :  { %2708 = vrot.lane.b32.xlu0 %v2695_v22, %s5669_s17 }
0x1887   :  { %v2586_v23 = vpop.permute.xlu1 %2585 }
0x1888   :  { %v2588_v24 = vmul.f32 %v5587_v10, %v2586_v23 }
0x188a   :  { %2590 = vrot.lane.b32.xlu1 %v2588_v24, %s5669_s17 }
0x18f4   :  { %v2709_v25 = vpop.permute.xlu0 %2708 }
0x18f5   :  { %4925 = vmatmul.mubr.msk.f32.vlgmr.msra.gmra.mrb[16].mxu1 %vm248_vm2, %v2709_v25  ;;  %4947 = vmatmul.mubr.msk.f32.vlgmr.msra.gmra.mrb[18].mxu0 %vm248_vm2, %v2709_v25 }
0x18f6   :  { %5287 = vmatpush3.bf16.msra.mxu1 %v6229_v17  ;;  %4935 = vmatprep.mubr.msk.f32.mxu1 %vm5666_vm0, %v5667_v4 }
0x18f7   :  { %5288 = vmatprep.subr.bf16.mxu1 %v5665_v0  ;;  %5299 = vmatpush3.bf16.msra.mxu0 %v6208_v30 }
0x18f8   :  { %5300 = vmatprep.subr.bf16.mxu0 %v5665_v0  ;;  %4957 = vmatprep.mubr.msk.f32.mxu0 %vm5666_vm0, %v5667_v4 }
0x18fa   :  { %5290 = vmatpush3.bf16.msra.mxu1 %v6240_v44 }
0x18fb   :  { %5302 = vmatpush3.bf16.msra.mxu0 %v6215_v34  ;;  %5315 = vmatprep.subr.bf16.mxu1 %v5665_v0 }
0x18fc   :  { %v2591_v26 = vpop.permute.xlu1 %2590  ;;  %5303 = vmatprep.subr.bf16.mxu0 %v5665_v0 }
0x18fd   :  { %2594 = vst.msk [vmem:[#allocation3 + $0x38] sm:$0xff] %vm248_vm2, %v2591_v26  ;;  %4936 = vmatmul.mubr.msk.f32.vlgmr.msra.gmra.mrb[16].mxu1 %vm248_vm2, %v2591_v26 }
0x18fe   :  { %5317 = vmatpush3.bf16.msra.mxu1 %v6208_v30  ;;  %4990 = vmatprep.mubr.msk.f32.mxu1 %vm5666_vm0, %v5667_v4 }
0x18ff   :  { %5318 = vmatprep.subr.bf16.mxu1 %v5665_v0 }
0x1902   :  { %5320 = vmatpush3.bf16.msra.mxu1 %v6215_v34 }
0x1903   :  { %5321 = vmatprep.subr.bf16.mxu1 %v5665_v0 }
0x19c8   :  { %v2961_v51 = vpop.f32.mrb[18].mxu0 }
0x19c9   :  { %v5382_v27 = vadd.f32 %v6264_v47, %v2961_v51  ;;  %v4948_v28 = vpop.f32.mrb[19].mxu0 }
0x19cb   :  { %5592 = vtanh.f32 %v5382_v27  ;;  %v2966_v36 = vsub.f32 0.0, %v5382_v27 }
0x19cd   :  { %v2967_v37 = vmul.f32 1.442695, %v2966_v36 }
0x19d0   :  { %v2854_v53 = vpop.f32.mrb[16].mxu1 }
0x19d1   :  { %v5394_v29 = vadd.f32 %v6270_v52, %v2854_v53  ;;  %v4937_v31 = vpop.f32.mrb[17].mxu1 }
0x19d3   :  { %5594 = vtanh.f32 %v5394_v29  ;;  %v2859_v38 = vsub.f32 0.0, %v5394_v29 }
0x19d4   :  { %5596 = vpow2.f32 %v2967_v37 }
0x19d5   :  { %v5593_v32 = vpop.eup %5592  ;;  %v2860_v39 = vmul.f32 1.442695, %v2859_v38 }
0x19d6   :  { %2975 = vrot.lane.b32.xlu0 %v5593_v32, %s5668_s16 }
0x19d7   :  { %5598 = vpow2.f32 %v2860_v39 }
0x19dd   :  { %v5595_v35 = vpop.eup %5594 }
0x19de   :  { %2868 = vrot.lane.b32.xlu1 %v5595_v35, %s5668_s16  ;;  %v5597_v40 = vpop.eup %5596 }
0x19df   :  { %v2969_v41 = vadd.f32 1.0, %v5597_v40 }
0x19e1   :  { %5600 = vrcp.f32 %v2969_v41  ;;  %v5599_v21 = vpop.eup %5598 }
0x19e2   :  { %v2862_v42 = vadd.f32 1.0, %v5599_v21 }
0x19e4   :  { %5602 = vrcp.f32 %v2862_v42 }
0x19eb   :  { %v5601_v43 = vpop.eup %5600 }
0x19ec   :  { %v2973_v56 = vmul.f32 %v5601_v43, %v6278_v14 }
0x19ee   :  { %v5603_v48 = vpop.eup %5602 }
0x19ef   :  { %v2866_v60 = vmul.f32 %v5603_v48, %v6282_v16 }
0x1a48   :  { %v2976_v45 = vpop.permute.xlu0 %2975 }
0x1a49   :  { %v2978_v46 = vmul.f32 %v5601_v43, %v2976_v45 }
0x1a4b   :  { %2980 = vrot.lane.b32.xlu0 %v2978_v46, %s5669_s17 }
0x1a50   :  { %v2869_v50 = vpop.permute.xlu1 %2868 }
0x1a51   :  { %v2871_v55 = vmul.f32 %v5603_v48, %v2869_v50 }
0x1a53   :  { %2873 = vrot.lane.b32.xlu1 %v2871_v55, %s5669_s17 }
0x1abd   :  { %v2981_v57 = vpop.permute.xlu0 %2980 }
0x1abe   :  { %v6318_v58 = vadd.f32 %v2981_v57, %v2973_v56 }
0x1ac0   :  { %5604 = vtanh.f32 %v6318_v58 }
0x1ac5   :  { %v2874_v61 = vpop.permute.xlu1 %2873 }
0x1ac6   :  { %v6322_v62 = vadd.f32 %v2874_v61, %v2866_v60 }
0x1ac8   :  { %5606 = vtanh.f32 %v6322_v62 }
0x1aca   :  { %v5605_v59 = vpop.eup %5604 }
0x1acb   :  { %2986 = vrot.lane.b32.xlu0 %v5605_v59, %s5668_s16 }
0x1ad2   :  { %v5607_v1 = vpop.eup %5606 }
0x1ad3   :  { %2879 = vrot.lane.b32.xlu1 %v5607_v1, %s5668_s16 }
0x1b3d   :  { %v2987_v2 = vpop.permute.xlu0 %2986 }
0x1b3e   :  { %v2989_v63 = vmul.f32 %v5601_v43, %v2987_v2 }
0x1b40   :  { %3002 = vrot.lane.b32.xlu0 %v2989_v63, %s5669_s17 }
0x1b45   :  { %v2880_v3 = vpop.permute.xlu1 %2879 }
0x1b46   :  { %v2882_v6 = vmul.f32 %v5603_v48, %v2880_v3 }
0x1b48   :  { %2884 = vrot.lane.b32.xlu1 %v2882_v6, %s5669_s17 }
0x1bb2   :  { %v3003_v7 = vpop.permute.xlu0 %3002 }
0x1bb3   :  { %4958 = vmatmul.mubr.msk.f32.vlgmr.msra.gmra.mrb[26].mxu0 %vm248_vm2, %v3003_v7 }
0x1bb4   :  { %5305 = vmatpush3.bf16.msra.mxu0 %v6229_v17  ;;  %4968 = vmatprep.mubr.msk.f32.mxu0 %vm5666_vm0, %v5667_v4 }
0x1bb5   :  { %5306 = vmatprep.subr.bf16.mxu0 %v5665_v0 }
0x1bb8   :  { %5308 = vmatpush3.bf16.msra.mxu0 %v6240_v44 }
0x1bb9   :  { %5309 = vmatprep.subr.bf16.mxu0 %v5665_v0 }
0x1bba   :  { %v2885_v8 = vpop.permute.xlu1 %2884 }
0x1bbb   :  { %2888 = vst.msk [vmem:[#allocation3 + $0x40] sm:$0xff] %vm248_vm2, %v2885_v8  ;;  %4969 = vmatmul.mubr.msk.f32.vlgmr.msra.gmra.mrb[26].mxu0 %vm248_vm2, %v2885_v8 }
0x1bbc   :  { %5311 = vmatpush3.bf16.msra.mxu0 %v6152_v49  ;;  %4979 = vmatprep.mubr.msk.f32.mxu0 %vm5666_vm0, %v5667_v4 }
0x1bbd   :  { %5312 = vmatprep.subr.bf16.mxu0 %v5665_v0 }
0x1bc0   :  { %5314 = vmatpush3.bf16.msra.mxu0 %v6159_v54 }
0x1bc1   :  { %5327 = vmatprep.subr.bf16.mxu0 %v5665_v0 }
0x1bc3   :  { %4980 = vmatmul.mubr.msk.f32.vlgmr.msra.gmra.mrb[20].mxu0 %vm248_vm2, %v3003_v7 }
0x1bc4   :  { %5329 = vmatpush3.bf16.msra.mxu0 %v6152_v49  ;;  %5012 = vmatprep.mubr.msk.f32.mxu0 %vm5666_vm0, %v5667_v4 }
0x1bc5   :  { %5330 = vmatprep.subr.bf16.mxu0 %v5665_v0 }
0x1bc8   :  { %5332 = vmatpush3.bf16.msra.mxu0 %v6159_v54 }
0x1bc9   :  { %5345 = vmatprep.subr.bf16.mxu0 %v5665_v0 }
0x1c8e   :  { %v3148_v9 = vpop.f32.mrb[26].mxu0 }
0x1c8f   :  { %v5395_v10 = vadd.f32 %v6270_v52, %v3148_v9  ;;  %v4970_v11 = vpop.f32.mrb[27].mxu0 }
0x1c91   :  { %5608 = vtanh.f32 %v5395_v10  ;;  %v3153_v5 = vsub.f32 0.0, %v5395_v10 }
0x1c93   :  { %v3154_v16 = vmul.f32 1.442695, %v3153_v5 }
0x1c96   :  { %v3255_v12 = vpop.f32.mrb[20].mxu0 }
0x1c97   :  { %v5383_v33 = vadd.f32 %v6264_v47, %v3255_v12  ;;  %v4981_v13 = vpop.f32.mrb[21].mxu0 }
0x1c99   :  { %5610 = vtanh.f32 %v5383_v33  ;;  %v3260_v18 = vsub.f32 0.0, %v5383_v33 }
0x1c9a   :  { %5612 = vpow2.f32 %v3154_v16 }
0x1c9b   :  { %v5609_v14 = vpop.eup %5608  ;;  %v3261_v19 = vmul.f32 1.442695, %v3260_v18 }
0x1c9c   :  { %3162 = vrot.lane.b32.xlu1 %v5609_v14, %s5668_s16 }
0x1c9d   :  { %5614 = vpow2.f32 %v3261_v19 }
0x1ca3   :  { %v5611_v15 = vpop.eup %5610 }
0x1ca4   :  { %3269 = vrot.lane.b32.xlu0 %v5611_v15, %s5668_s16  ;;  %v5613_v20 = vpop.eup %5612 }
0x1ca5   :  { %v3156_v22 = vadd.f32 1.0, %v5613_v20 }
0x1ca7   :  { %5616 = vrcp.f32 %v3156_v22  ;;  %v5615_v23 = vpop.eup %5614 }
0x1ca8   :  { %v3263_v24 = vadd.f32 1.0, %v5615_v23  ;;  %v4078_v23 = vld [vmem:[%s6594_s7] sm:$0xff] }
0x1caa   :  { %5618 = vrcp.f32 %v3263_v24  ;;  %v4079_v24 = vld [vmem:[%s6594_s7 + $0x8] sm:$0xff] }
0x1cb1   :  { %v5617_v25 = vpop.eup %5616 }
0x1cb2   :  { %v3160_v29 = vmul.f32 %v5617_v25, %v6322_v62 }
0x1cb4   :  { %v5619_v27 = vpop.eup %5618 }
0x1cb5   :  { %v3267_v35 = vmul.f32 %v5619_v27, %v6318_v58 }
0x1d0e   :  { %v3163_v26 = vpop.permute.xlu1 %3162 }
0x1d0f   :  { %v3165_v51 = vmul.f32 %v5617_v25, %v3163_v26  ;;  %v4080_v26 = vld [vmem:[%s6594_s7 + $0x10] sm:$0xff] }
0x1d11   :  { %3167 = vrot.lane.b32.xlu1 %v3165_v51, %s5669_s17  ;;  %v4081_v51 = vld [vmem:[%s6594_s7 + $0x18] sm:$0xff] }
0x1d16   :  { %v3270_v28 = vpop.permute.xlu0 %3269 }
0x1d17   :  { %v3272_v53 = vmul.f32 %v5619_v27, %v3270_v28  ;;  %v6427_v28 = vpack.c.bf16 %v4081_v51, %v4080_v26 }
0x1d19   :  { %3274 = vrot.lane.b32.xlu0 %v3272_v53, %s5669_s17 }
0x1d83   :  { %v3168_v31 = vpop.permute.xlu1 %3167 }
0x1d84   :  { %v6358_v32 = vadd.f32 %v3168_v31, %v3160_v29  ;;  %v4065_v29 = vld [vmem:[#allocation3] sm:$0xff]  ;;  %v4066_v31 = vld [vmem:[#allocation3 + $0x8] sm:$0xff] }
0x1d86   :  { %5620 = vtanh.f32 %v6358_v32 }
0x1d8b   :  { %v3275_v36 = vpop.permute.xlu0 %3274 }
0x1d8c   :  { %v6362_v37 = vadd.f32 %v3275_v36, %v3267_v35  ;;  %v4069_v35 = vld [vmem:[#allocation3 + $0x20] sm:$0xff]  ;;  %v4071_v36 = vld [vmem:[#allocation3 + $0x30] sm:$0xff] }
0x1d8e   :  { %5622 = vtanh.f32 %v6362_v37 }
0x1d90   :  { %v5621_v38 = vpop.eup %5620 }
0x1d91   :  { %3173 = vrot.lane.b32.xlu1 %v5621_v38, %s5668_s16 }
0x1d98   :  { %v5623_v39 = vpop.eup %5622 }
0x1d99   :  { %3280 = vrot.lane.b32.xlu0 %v5623_v39, %s5668_s16 }
0x1e03   :  { %v3174_v40 = vpop.permute.xlu1 %3173 }
0x1e04   :  { %v3176_v41 = vmul.f32 %v5617_v25, %v3174_v40  ;;  %v6415_v25 = vpack.c.bf16 %v4079_v24, %v4078_v23 }
0x1e06   :  { %3178 = vrot.lane.b32.xlu1 %v3176_v41, %s5669_s17  ;;  %v6472_v41 = vld [vmem:[%s6595_s8] ss:$0 sm:$0xff] }
0x1e0b   :  { %v3281_v21 = vpop.permute.xlu0 %3280 }
0x1e0c   :  { %v3283_v42 = vmul.f32 %v5619_v27, %v3281_v21 }
0x1e0e   :  { %3296 = vrot.lane.b32.xlu0 %v3283_v42, %s5669_s17 }
0x1e78   :  { %v3179_v43 = vpop.permute.xlu1 %3178 }
0x1e79   :  { %3182 = vst.msk [vmem:[#allocation3 + $0x48] sm:$0xff] %vm248_vm2, %v3179_v43 }
0x1e80   :  { %v3297_v45 = vpop.permute.xlu0 %3296 }
0x1e81   :  { %4991 = vmatmul.mubr.msk.f32.vlgmr.msra.gmra.mrb[18].mxu1 %vm248_vm2, %v3297_v45  ;;  %5013 = vmatmul.mubr.msk.f32.vlgmr.msra.gmra.mrb[22].mxu0 %vm248_vm2, %v3297_v45 }
0x1e82   :  { %5323 = vmatpush3.bf16.msra.mxu1 %v6229_v17  ;;  %5001 = vmatprep.mubr.msk.f32.mxu1 %vm5666_vm0, %v5667_v4 }
0x1e83   :  { %5324 = vmatprep.subr.bf16.mxu1 %v5665_v0  ;;  %5347 = vmatpush3.bf16.msra.mxu0 %v6152_v49 }
0x1e84   :  { %5348 = vmatprep.subr.bf16.mxu0 %v5665_v0  ;;  %5045 = vmatprep.mubr.msk.f32.mxu0 %vm5666_vm0, %v5667_v4 }
0x1e86   :  { %5326 = vmatpush3.bf16.msra.mxu1 %v6240_v44 }
0x1e87   :  { %5333 = vmatprep.subr.bf16.mxu1 %v5665_v0  ;;  %5350 = vmatpush3.bf16.msra.mxu0 %v6159_v54 }
0x1e88   :  { %5363 = vmatprep.subr.bf16.mxu0 %v5665_v0 }
0x1e89   :  { %5002 = vmatmul.mubr.msk.f32.vlgmr.msra.gmra.mrb[18].mxu1 %vm248_vm2, %v3179_v43 }
0x1e8a   :  { %5335 = vmatpush3.bf16.msra.mxu1 %v6208_v30  ;;  %5023 = vmatprep.mubr.msk.f32.mxu1 %vm5666_vm0, %v5667_v4 }
0x1e8b   :  { %5336 = vmatprep.subr.bf16.mxu1 %v5665_v0 }
0x1e8e   :  { %5338 = vmatpush3.bf16.msra.mxu1 %v6215_v34 }
0x1e8f   :  { %5339 = vmatprep.subr.bf16.mxu1 %v5665_v0 }
0x1f54   :  { %v3549_v49 = vpop.f32.mrb[22].mxu0 }
0x1f55   :  { %v5384_v46 = vadd.f32 %v6264_v47, %v3549_v49  ;;  %v5014_v48 = vpop.f32.mrb[23].mxu0 }
0x1f57   :  { %5624 = vtanh.f32 %v5384_v46  ;;  %v3554_v58 = vsub.f32 0.0, %v5384_v46 }
0x1f59   :  { %v3555_v60 = vmul.f32 1.442695, %v3554_v58 }
0x1f5c   :  { %v3442_v54 = vpop.f32.mrb[18].mxu1 }
0x1f5d   :  { %v5396_v50 = vadd.f32 %v6270_v52, %v3442_v54  ;;  %v5003_v55 = vpop.f32.mrb[19].mxu1 }
0x1f5f   :  { %5626 = vtanh.f32 %v5396_v50  ;;  %v3447_v61 = vsub.f32 0.0, %v5396_v50 }
0x1f60   :  { %5628 = vpow2.f32 %v3555_v60 }
0x1f61   :  { %v5625_v56 = vpop.eup %5624  ;;  %v3448_v62 = vmul.f32 1.442695, %v3447_v61 }
0x1f62   :  { %3563 = vrot.lane.b32.xlu0 %v5625_v56, %s5668_s16 }
0x1f63   :  { %5630 = vpow2.f32 %v3448_v62 }
0x1f69   :  { %v5627_v57 = vpop.eup %5626 }
0x1f6a   :  { %3456 = vrot.lane.b32.xlu1 %v5627_v57, %s5668_s16  ;;  %v5629_v59 = vpop.eup %5628 }
0x1f6b   :  { %v3557_v1 = vadd.f32 1.0, %v5629_v59 }
0x1f6d   :  { %5632 = vrcp.f32 %v3557_v1  ;;  %v5631_v2 = vpop.eup %5630 }
0x1f6e   :  { %v3450_v63 = vadd.f32 1.0, %v5631_v2 }
0x1f70   :  { %5634 = vrcp.f32 %v3450_v63 }
0x1f77   :  { %v5633_v3 = vpop.eup %5632 }
0x1f78   :  { %v3561_v11 = vmul.f32 %v5633_v3, %v6362_v37  ;;  %v4072_v37 = vld [vmem:[#allocation3 + $0x38] sm:$0xff] }
0x1f7a   :  { %v5635_v8 = vpop.eup %5634 }
0x1f7b   :  { %v3454_v13 = vmul.f32 %v5635_v8, %v6358_v32  ;;  %v4067_v32 = vld [vmem:[#allocation3 + $0x10] sm:$0xff] }
0x1fd4   :  { %v3564_v6 = vpop.permute.xlu0 %3563 }
0x1fd5   :  { %v3566_v7 = vmul.f32 %v5633_v3, %v3564_v6 }
0x1fd7   :  { %3568 = vrot.lane.b32.xlu0 %v3566_v7, %s5669_s17 }
0x1fdc   :  { %v3457_v9 = vpop.permute.xlu1 %3456 }
0x1fdd   :  { %v3459_v10 = vmul.f32 %v5635_v8, %v3457_v9 }
0x1fdf   :  { %3461 = vrot.lane.b32.xlu1 %v3459_v10, %s5669_s17 }
0x2049   :  { %v3569_v12 = vpop.permute.xlu0 %3568 }
0x204a   :  { %v6398_v33 = vadd.f32 %v3569_v12, %v3561_v11 }
0x204c   :  { %5636 = vtanh.f32 %v6398_v33 }
0x2051   :  { %v3462_v14 = vpop.permute.xlu1 %3461 }
0x2052   :  { %v6402_v15 = vadd.f32 %v3462_v14, %v3454_v13 }
0x2054   :  { %5638 = vtanh.f32 %v6402_v15 }
0x2056   :  { %v5637_v5 = vpop.eup %5636 }
0x2057   :  { %3574 = vrot.lane.b32.xlu0 %v5637_v5, %s5668_s16 }
0x205e   :  { %v5639_v16 = vpop.eup %5638 }
0x205f   :  { %3467 = vrot.lane.b32.xlu1 %v5639_v16, %s5668_s16 }
0x20c9   :  { %v3575_v18 = vpop.permute.xlu0 %3574 }
0x20ca   :  { %v3577_v19 = vmul.f32 %v5633_v3, %v3575_v18 }
0x20cc   :  { %3590 = vrot.lane.b32.xlu0 %v3577_v19, %s5669_s17 }
0x20d1   :  { %v3468_v20 = vpop.permute.xlu1 %3467 }
0x20d2   :  { %v3470_v22 = vmul.f32 %v5635_v8, %v3468_v20 }
0x20d4   :  { %3472 = vrot.lane.b32.xlu1 %v3470_v22, %s5669_s17 }
0x213e   :  { %v3591_v27 = vpop.permute.xlu0 %3590 }
0x213f   :  { %5024 = vmatmul.mubr.msk.f32.vlgmr.msra.gmra.mrb[20].mxu1 %vm248_vm2, %v3591_v27  ;;  %5046 = vmatmul.mubr.msk.f32.vlgmr.msra.gmra.mrb[24].mxu0 %vm248_vm2, %v3591_v27 }
0x2140   :  { %5365 = vmatpush3.bf16.msra.mxu0 %v6415_v25  ;;  %5341 = vmatpush3.bf16.msra.mxu1 %v6229_v17 }
0x2141   :  { %5366 = vmatprep.subr.bf16.mxu0 %v5665_v0  ;;  %5342 = vmatprep.subr.bf16.mxu1 %v5665_v0 }
0x2142   :  { %5078 = vmatprep.mubr.msk.f32.mxu0 %vm5666_vm0, %v5667_v4  ;;  %5034 = vmatprep.mubr.msk.f32.mxu1 %vm5666_vm0, %v5667_v4 }
0x2144   :  { %5368 = vmatpush3.bf16.msra.mxu0 %v6427_v28  ;;  %5344 = vmatpush3.bf16.msra.mxu1 %v6240_v44 }
0x2145   :  { %5351 = vmatprep.subr.bf16.mxu1 %v5665_v0 }
0x2146   :  { %v3473_v53 = vpop.permute.xlu1 %3472 }
0x2147   :  { %3476 = vst.msk [vmem:[#allocation3 + $0x50] sm:$0xff] %vm248_vm2, %v3473_v53  ;;  %5079 = vmatmul.mubr.msk.f32.vlgmr.msra.gmra.mrb[28].mxu0 %vm248_vm2, %v4065_v29  ;;  %5035 = vmatmul.mubr.msk.f32.vlgmr.msra.gmra.mrb[20].mxu1 %vm248_vm2, %v3473_v53 }
0x2148   :  { %5081 = vmatprep.mubr.msk.f32.mxu0 %vm5666_vm0, %v5667_v4  ;;  %5353 = vmatpush3.bf16.msra.mxu1 %v6208_v30  ;;  %v4068_v30 = vld [vmem:[#allocation3 + $0x18] sm:$0xff] }
0x2149   :  { %5354 = vmatprep.subr.bf16.mxu1 %v5665_v0  ;;  %5056 = vmatprep.mubr.msk.f32.mxu1 %vm5666_vm0, %v5667_v4 }
0x214b   :  { %5082 = vmatmul.mubr.msk.f32.gmra.mrb[30].mxu0 %vm248_vm2, %v4066_v31 }
0x214c   :  { %5084 = vmatprep.mubr.msk.f32.mxu0 %vm5666_vm0, %v5667_v4  ;;  %5356 = vmatpush3.bf16.msra.mxu1 %v6215_v34  ;;  %v4070_v34 = vld [vmem:[#allocation3 + $0x28] sm:$0xff] }
0x214d   :  { %5357 = vmatprep.subr.bf16.mxu1 %v5665_v0 }
0x214f   :  { %5085 = vmatmul.mubr.msk.f32.gmra.mrb[32].mxu0 %vm248_vm2, %v4067_v32 }
0x2150   :  { %5087 = vmatprep.mubr.msk.f32.mxu0 %vm5666_vm0, %v5667_v4 }
0x2153   :  { %5088 = vmatmul.mubr.msk.f32.gmra.mrb[34].mxu0 %vm248_vm2, %v4068_v30 }
0x2154   :  { %5090 = vmatprep.mubr.msk.f32.mxu0 %vm5666_vm0, %v5667_v4 }
0x2157   :  { %5091 = vmatmul.mubr.msk.f32.gmra.mrb[36].mxu0 %vm248_vm2, %v4069_v35 }
0x2158   :  { %5093 = vmatprep.mubr.msk.f32.mxu0 %vm5666_vm0, %v5667_v4 }
0x215b   :  { %5094 = vmatmul.mubr.msk.f32.gmra.mrb[38].mxu0 %vm248_vm2, %v4070_v34 }
0x215c   :  { %5096 = vmatprep.mubr.msk.f32.mxu0 %vm5666_vm0, %v5667_v4 }
0x215f   :  { %5097 = vmatmul.mubr.msk.f32.gmra.mrb[40].mxu0 %vm248_vm2, %v4071_v36 }
0x2160   :  { %5099 = vmatprep.mubr.msk.f32.mxu0 %vm5666_vm0, %v5667_v4 }
0x2163   :  { %5100 = vmatmul.mubr.msk.f32.gmra.mrb[42].mxu0 %vm248_vm2, %v4072_v37 }
0x2212   :  { %v3843_v38 = vpop.f32.mrb[24].mxu0 }
0x2213   :  { %v5385_v39 = vadd.f32 %v6264_v47, %v3843_v38  ;;  %v5047_v40 = vpop.f32.mrb[25].mxu0 }
0x2215   :  { %5640 = vtanh.f32 %v5385_v39  ;;  %v3848_v13 = vsub.f32 0.0, %v5385_v39 }
0x2217   :  { %v3849_v14 = vmul.f32 1.442695, %v3848_v13 }
0x221a   :  { %v4194_v21 = vpop.f32.mrb[28].mxu0  ;;  %v3736_v42 = vpop.f32.mrb[20].mxu1 }
0x221b   :  { %v4195_v43 = vadd.f32 %v6472_v41, %v4194_v21  ;;  %v5397_v45 = vadd.f32 %v6270_v52, %v3736_v42  ;;  %v5080_v49 = vpop.f32.mrb[29].mxu0  ;;  %v5036_v46 = vpop.f32.mrb[21].mxu1 }
0x221d   :  { %4258 = vst.msk [vmem:[%s6596_s9] sm:$0xff] %vm60_vm1, %v4195_v43  ;;  %5642 = vtanh.f32 %v5397_v45  ;;  %v3741_v5 = vsub.f32 0.0, %v5397_v45 }
0x221e   :  { %v4199_v47 = vpop.f32.mrb[30].mxu0  ;;  %5644 = vpow2.f32 %v3849_v14 }
0x221f   :  { %v5641_v48 = vpop.eup %5640  ;;  %v4200_v54 = vadd.f32 %v6472_v41, %v4199_v47  ;;  %v5083_v50 = vpop.f32.mrb[31].mxu0  ;;  %v3742_v16 = vmul.f32 1.442695, %v3741_v5 }
0x2220   :  { %3857 = vrot.lane.b32.xlu0 %v5641_v48, %s5668_s16 }
0x2221   :  { %4259 = vst.msk [vmem:[%s6596_s9 + $0x8] sm:$0xff] %vm60_vm1, %v4200_v54  ;;  %5646 = vpow2.f32 %v3742_v16 }
0x2222   :  { %v4204_v55 = vpop.f32.mrb[32].mxu0 }
0x2223   :  { %v4205_v56 = vadd.f32 %v6472_v41, %v4204_v55  ;;  %v5086_v57 = vpop.f32.mrb[33].mxu0 }
0x2225   :  { %4260 = vst.msk [vmem:[%s6596_s9 + $0x10] sm:$0xff] %vm60_vm1, %v4205_v56 }
0x2226   :  { %v4209_v58 = vpop.f32.mrb[34].mxu0 }
0x2227   :  { %v5643_v60 = vpop.eup %5642  ;;  %v4210_v61 = vadd.f32 %v6472_v41, %v4209_v58  ;;  %v5089_v62 = vpop.f32.mrb[35].mxu0 }
0x2228   :  { %3750 = vrot.lane.b32.xlu1 %v5643_v60, %s5668_s16  ;;  %v5645_v18 = vpop.eup %5644 }
0x2229   :  { %4261 = vst.msk [vmem:[%s6596_s9 + $0x18] sm:$0xff] %vm60_vm1, %v4210_v61  ;;  %v3851_v19 = vadd.f32 1.0, %v5645_v18 }
0x222a   :  { %v4214_v59 = vpop.f32.mrb[36].mxu0 }
0x222b   :  { %v4215_v1 = vadd.f32 %v6472_v41, %v4214_v59  ;;  %v5092_v2 = vpop.f32.mrb[37].mxu0  ;;  %5648 = vrcp.f32 %v3851_v19  ;;  %v5647_v20 = vpop.eup %5646 }
0x222c   :  { %v3744_v22 = vadd.f32 1.0, %v5647_v20 }
0x222d   :  { %4262 = vst.msk [vmem:[%s6596_s9 + $0x20] sm:$0xff] %vm60_vm1, %v4215_v1 }
0x222e   :  { %v4219_v63 = vpop.f32.mrb[38].mxu0  ;;  %5650 = vrcp.f32 %v3744_v22 }
0x222f   :  { %v4220_v3 = vadd.f32 %v6472_v41, %v4219_v63  ;;  %v5095_v6 = vpop.f32.mrb[39].mxu0 }
0x2231   :  { %4263 = vst.msk [vmem:[%s6596_s9 + $0x28] sm:$0xff] %vm60_vm1, %v4220_v3 }
0x2232   :  { %v4224_v7 = vpop.f32.mrb[40].mxu0 }
0x2233   :  { %v4225_v8 = vadd.f32 %v6472_v41, %v4224_v7  ;;  %v5098_v9 = vpop.f32.mrb[41].mxu0 }
0x2235   :  { %4264 = vst.msk [vmem:[%s6596_s9 + $0x30] sm:$0xff] %vm60_vm1, %v4225_v8  ;;  %v5649_v23 = vpop.eup %5648 }
0x2236   :  { %v4229_v10 = vpop.f32.mrb[42].mxu0  ;;  %v3855_v29 = vmul.f32 %v5649_v23, %v6398_v33 }
0x2237   :  { %v4230_v11 = vadd.f32 %v6472_v41, %v4229_v10  ;;  %v5101_v12 = vpop.f32.mrb[43].mxu0 }
0x2238   :  { %v5651_v51 = vpop.eup %5650 }
0x2239   :  { %4265 = vst.msk [vmem:[%s6596_s9 + $0x38] sm:$0xff] %vm60_vm1, %v4230_v11  ;;  %v3748_v30 = vmul.f32 %v5651_v51, %v6402_v15 }
0x2292   :  { %v3858_v24 = vpop.permute.xlu0 %3857 }
0x2293   :  { %v3860_v26 = vmul.f32 %v5649_v23, %v3858_v24 }
0x2295   :  { %3862 = vrot.lane.b32.xlu0 %v3860_v26, %s5669_s17 }
0x229a   :  { %v3751_v27 = vpop.permute.xlu1 %3750 }
0x229b   :  { %v3753_v53 = vmul.f32 %v5651_v51, %v3751_v27 }
0x229d   :  { %3755 = vrot.lane.b32.xlu1 %v3753_v53, %s5669_s17 }
0x2307   :  { %v3863_v31 = vpop.permute.xlu0 %3862 }
0x2308   :  { %v3865_v32 = vadd.f32 %v3863_v31, %v3855_v29 }
0x230a   :  { %5652 = vtanh.f32 %v3865_v32 }
0x230f   :  { %v3756_v35 = vpop.permute.xlu1 %3755 }
0x2310   :  { %v6521_v34 = vadd.f32 %v3756_v35, %v3748_v30 }
0x2312   :  { %5654 = vtanh.f32 %v6521_v34 }
0x2314   :  { %v5653_v36 = vpop.eup %5652 }
0x2315   :  { %3868 = vrot.lane.b32.xlu0 %v5653_v36, %s5668_s16 }
0x231c   :  { %v5655_v37 = vpop.eup %5654 }
0x231d   :  { %3761 = vrot.lane.b32.xlu1 %v5655_v37, %s5668_s16 }
0x2387   :  { %v3869_v38 = vpop.permute.xlu0 %3868 }
0x2388   :  { %v3871_v39 = vmul.f32 %v5649_v23, %v3869_v38 }
0x238a   :  { %3884 = vrot.lane.b32.xlu0 %v3871_v39, %s5669_s17 }
0x238f   :  { %v3762_v33 = vpop.permute.xlu1 %3761 }
0x2390   :  { %v3764_v40 = vmul.f32 %v5651_v51, %v3762_v33 }
0x2392   :  { %3766 = vrot.lane.b32.xlu1 %v3764_v40, %s5669_s17 }
0x23fc   :  { %v3885_v15 = vpop.permute.xlu0 %3884 }
0x23fd   :  { %5057 = vmatmul.mubr.msk.f32.vlgmr.msra.gmra.mrb[22].mxu1 %vm248_vm2, %v3885_v15 }
0x23fe   :  { %5359 = vmatpush3.bf16.msra.mxu1 %v6229_v17  ;;  %5067 = vmatprep.mubr.msk.f32.mxu1 %vm5666_vm0, %v5667_v4  ;;  %v4073_v17 = vld [vmem:[#allocation3 + $0x40] sm:$0xff] }
0x23ff   :  { %5360 = vmatprep.subr.bf16.mxu1 %v5665_v0 }
0x2402   :  { %5362 = vmatpush3.bf16.msra.mxu1 %v6240_v44  ;;  %v4074_v44 = vld [vmem:[#allocation3 + $0x48] sm:$0xff] }
0x2403   :  { %5369 = vmatprep.subr.bf16.mxu1 %v5665_v0 }
0x2404   :  { %v3767_v21 = vpop.permute.xlu1 %3766 }
0x2405   :  { %3770 = vst.msk [vmem:[#allocation3 + $0x58] sm:$0xff] %vm248_vm2, %v3767_v21  ;;  %5068 = vmatmul.mubr.msk.f32.vlgmr.msra.gmra.mrb[22].mxu1 %vm248_vm2, %v3767_v21 }
0x2406   :  { %5371 = vmatpush3.bf16.msra.mxu1 %v6415_v25  ;;  %5102 = vmatprep.mubr.msk.f32.mxu1 %vm5666_vm0, %v5667_v4  ;;  %v4075_v25 = vld [vmem:[#allocation3 + $0x50] sm:$0xff] }
0x2407   :  { %5370 = vmatprep.subr.bf16.mxu1 %v5665_v0 }
0x240a   :  { %5372 = vmatpush3.bf16.msra.mxu1 %v6427_v28 }
0x240c   :  { %v4076_v0 = vld [vmem:[#allocation3 + $0x58] sm:$0xff] }
0x240d   :  { %5103 = vmatmul.mubr.msk.f32.vlgmr.msra.gmra.mrb[24].mxu1 %vm248_vm2, %v4073_v17 }
0x240e   :  { %5105 = vmatprep.mubr.msk.f32.mxu1 %vm5666_vm0, %v5667_v4 }
0x2411   :  { %5106 = vmatmul.mubr.msk.f32.gmra.mrb[26].mxu1 %vm248_vm2, %v4074_v44 }
0x2412   :  { %5108 = vmatprep.mubr.msk.f32.mxu1 %vm5666_vm0, %v5667_v4 }
0x2415   :  { %5109 = vmatmul.mubr.msk.f32.gmra.mrb[28].mxu1 %vm248_vm2, %v4075_v25 }
0x2416   :  { %5111 = vmatprep.mubr.msk.f32.mxu1 %vm5666_vm0, %v5667_v4 }
0x2419   :  { %5112 = vmatmul.mubr.msk.f32.gmra.mrb[30].mxu1 %vm248_vm2, %v4076_v0 }
0x241a   :  { %5114 = vmatprep.mubr.msk.f32.mxu1 %vm5666_vm0, %v5667_v4 }
0x24d8   :  { %v4030_v28 = vpop.f32.mrb[22].mxu1 }
0x24d9   :  { %v5398_v42 = vadd.f32 %v6270_v52, %v4030_v28  ;;  %v5069_v43 = vpop.f32.mrb[23].mxu1 }
0x24db   :  { %5656 = vtanh.f32 %v5398_v42  ;;  %v4035_v60 = vsub.f32 0.0, %v5398_v42 }
0x24dd   :  { %v4036_v61 = vmul.f32 1.442695, %v4035_v60 }
0x24df   :  { %5658 = vpow2.f32 %v4036_v61 }
0x24e0   :  { %v4234_v45 = vpop.f32.mrb[24].mxu1 }
0x24e1   :  { %v4235_v49 = vadd.f32 %v6472_v41, %v4234_v45  ;;  %v5104_v46 = vpop.f32.mrb[25].mxu1 }
0x24e3   :  { %4266 = vst.msk [vmem:[%s6596_s9 + $0x40] sm:$0xff] %vm60_vm1, %v4235_v49 }
0x24e4   :  { %v4239_v47 = vpop.f32.mrb[26].mxu1 }
0x24e5   :  { %v5657_v48 = vpop.eup %5656  ;;  %v4240_v54 = vadd.f32 %v6472_v41, %v4239_v47  ;;  %v5107_v50 = vpop.f32.mrb[27].mxu1 }
0x24e6   :  { %4044 = vrot.lane.b32.xlu0 %v5657_v48, %s5668_s16 }
0x24e7   :  { %4267 = vst.msk [vmem:[%s6596_s9 + $0x48] sm:$0xff] %vm60_vm1, %v4240_v54 }
0x24e8   :  { %v4244_v4 = vpop.f32.mrb[28].mxu1 }
0x24e9   :  { %v4245_v52 = vadd.f32 %v6472_v41, %v4244_v4  ;;  %v5110_v55 = vpop.f32.mrb[29].mxu1  ;;  %v5659_v62 = vpop.eup %5658 }
0x24ea   :  { %v4038_v59 = vadd.f32 1.0, %v5659_v62 }
0x24eb   :  { %4268 = vst.msk [vmem:[%s6596_s9 + $0x50] sm:$0xff] %vm60_vm1, %v4245_v52 }
0x24ec   :  { %v4249_v56 = vpop.f32.mrb[30].mxu1  ;;  %5660 = vrcp.f32 %v4038_v59 }
0x24ed   :  { %v4250_v57 = vadd.f32 %v6472_v41, %v4249_v56  ;;  %v5113_v58 = vpop.f32.mrb[31].mxu1 }
0x24ef   :  { %4269 = vst.msk [vmem:[%s6596_s9 + $0x58] sm:$0xff] %vm60_vm1, %v4250_v57 }
0x24f6   :  { %v5661_v1 = vpop.eup %5660 }
0x24f7   :  { %v4042_v3 = vmul.f32 %v5661_v1, %v6521_v34 }
0x2558   :  { %v4045_v2 = vpop.permute.xlu0 %4044 }
0x2559   :  { %v4047_v63 = vmul.f32 %v5661_v1, %v4045_v2 }
0x255b   :  { %4049 = vrot.lane.b32.xlu1 %v4047_v63, %s5669_s17 }
0x25cd   :  { %v4050_v6 = vpop.permute.xlu1 %4049 }
0x25ce   :  { %v4052_v7 = vadd.f32 %v4050_v6, %v4042_v3 }
0x25d0   :  { %5662 = vtanh.f32 %v4052_v7 }
0x25da   :  { %v5663_v8 = vpop.eup %5662 }
0x25db   :  { %4055 = vrot.lane.b32.xlu0 %v5663_v8, %s5668_s16 }
0x264d   :  { %v4056_v9 = vpop.permute.xlu0 %4055 }
0x264e   :  { %v4058_v10 = vmul.f32 %v5661_v1, %v4056_v9 }
0x2650   :  { %4060 = vrot.lane.b32.xlu1 %v4058_v10, %s5669_s17 }
0x26c2   :  { %v4061_v11 = vpop.permute.xlu1 %4060 }
0x26c3   :  { %4064 = vst.msk [vmem:[#allocation3 + $0x60] sm:$0xff] %vm248_vm2, %v4061_v11 }
0x26ca   :  { %v4077_v12 = vld [vmem:[#allocation3 + $0x60] sm:$0xff] }
0x26cb   :  { %5115 = vmatmul.mubr.msk.f32.gmra.mrb[32].mxu1 %vm248_vm2, %v4077_v12 }
0x279e   :  { %v4254_v13 = vpop.f32.mrb[32].mxu1 }
0x279f   :  { %v4255_v14 = vadd.f32 %v6472_v41, %v4254_v13  ;;  %v5116_v5 = vpop.f32.mrb[33].mxu1 }
0x27a1   :  { %4270 = vst.msk [vmem:[%s6596_s9 + $0x60] sm:$0xff] %vm60_vm1, %v4255_v14 }

// kernel: dccrn_forward.15
= control target key start
LH: loop header
LB: loop body
LE: loop exit
PB: predicated region body
PF: predicated region fallthrough
CT: control target
= control target key end

     0   :  { %v357_v3 = vmov 0.0   ;;  %s676_s1 = inlined_call_operand.vmem [shape: f32[384,256], index: 1, kind: input, shape index: {}]   ;;  %s677_s0 = inlined_call_operand.vmem [shape: f32[8,384], index: 0, kind: input, shape index: {}]   ;;  %s678_s2 = inlined_call_operand.vmem [shape: f32[8,256], index: 2, kind: output, shape index: {}]  }
   0x1   :  { %v15_v0 = vld [vmem:[%s676_s1 + $0x8] sm:$0xff]  ;;  %v17_v1 = vld [vmem:[%s676_s1 + $0x18] sm:$0xff]  ;;  %v14_v2 = vld [vmem:[%s676_s1] sm:$0xff]  ;;  %245 = vmatprep.mubr.f32.mxu0 %v357_v3 }
   0x2   :  { %v258_v4 = vpack.c.bf16 %v17_v1, %v15_v0  ;;  %v16_v5 = vld [vmem:[%s676_s1 + $0x10] sm:$0xff]  ;;  %v19_v6 = vld [vmem:[%s676_s1 + $0x28] sm:$0xff]  ;;  %v21_v7 = vld [vmem:[%s676_s1 + $0x38] sm:$0xff] }
   0x3   :  { %v260_v8 = vpack.c.bf16 %v16_v5, %v14_v2  ;;  %v262_v9 = vpack.c.bf16 %v21_v7, %v19_v6  ;;  %v18_v10 = vld [vmem:[%s676_s1 + $0x20] sm:$0xff]  ;;  %v20_v11 = vld [vmem:[%s676_s1 + $0x30] sm:$0xff]  ;;  %v23_v12 = vld [vmem:[%s676_s1 + $0x48] sm:$0xff] }
   0x4   :  { %259 = vmatprep.subr.bf16.mxu1 %v258_v4  ;;  %v25_v13 = vld [vmem:[%s676_s1 + $0x58] sm:$0xff]  ;;  %v264_v14 = vpack.c.bf16 %v20_v11, %v18_v10  ;;  %v22_v16 = vld [vmem:[%s676_s1 + $0x40] sm:$0xff]  ;;  %v24_v17 = vld [vmem:[%s676_s1 + $0x50] sm:$0xff] }
   0x5   :  { %261 = vmatpush1.bf16.msra.mxu1 %v260_v8  ;;  %v266_v15 = vpack.c.bf16 %v25_v13, %v23_v12  ;;  %v27_v18 = vld [vmem:[%s676_s1 + $0x68] sm:$0xff]  ;;  %v29_v19 = vld [vmem:[%s676_s1 + $0x78] sm:$0xff]  ;;  %v268_v20 = vpack.c.bf16 %v24_v17, %v22_v16  ;;  %v26_v22 = vld [vmem:[%s676_s1 + $0x60] sm:$0xff] }
   0x6   :  { %263 = vmatprep.subr.bf16.mxu1 %v262_v9  ;;  %v270_v21 = vpack.c.bf16 %v29_v19, %v27_v18  ;;  %v28_v23 = vld [vmem:[%s676_s1 + $0x70] sm:$0xff]  ;;  %v31_v24 = vld [vmem:[%s676_s1 + $0x88] sm:$0xff]  ;;  %v33_v25 = vld [vmem:[%s676_s1 + $0x98] sm:$0xff] }
   0x7   :  { %v79_v26 = vld [vmem:[%s676_s1 + $0x208] sm:$0xff]  ;;  %v81_v27 = vld [vmem:[%s676_s1 + $0x218] sm:$0xff]  ;;  %v272_v28 = vpack.c.bf16 %v28_v23, %v26_v22  ;;  %v30_v29 = vld [vmem:[%s676_s1 + $0x80] sm:$0xff]  ;;  %v274_v33 = vpack.c.bf16 %v33_v25, %v31_v24 }
   0x8   :  { %v322_v30 = vpack.c.bf16 %v81_v27, %v79_v26  ;;  %v78_v31 = vld [vmem:[%s676_s1 + $0x200] sm:$0xff]  ;;  %v80_v32 = vld [vmem:[%s676_s1 + $0x210] sm:$0xff]  ;;  %v83_v36 = vld [vmem:[%s676_s1 + $0x228] sm:$0xff] }
   0x9   :  { %265 = vmatpush1.bf16.msra.mxu1 %v264_v14  ;;  %v32_v34 = vld [vmem:[%s676_s1 + $0x90] sm:$0xff]  ;;  %v324_v35 = vpack.c.bf16 %v80_v32, %v78_v31  ;;  %v85_v37 = vld [vmem:[%s676_s1 + $0x238] sm:$0xff]  ;;  %v35_v38 = vld [vmem:[%s676_s1 + $0xa8] sm:$0xff] }
   0xa   :  { %267 = vmatprep.subr.bf16.mxu1 %v266_v15  ;;  %v37_v39 = vld [vmem:[%s676_s1 + $0xb8] sm:$0xff]  ;;  %323 = vmatprep.subr.bf16.mxu0 %v322_v30  ;;  %v326_v40 = vpack.c.bf16 %v85_v37, %v83_v36  ;;  %v82_v41 = vld [vmem:[%s676_s1 + $0x220] sm:$0xff]  ;;  %v84_v42 = vld [vmem:[%s676_s1 + $0x230] sm:$0xff]  ;;  %v276_v43 = vpack.c.bf16 %v32_v34, %v30_v29 }
   0xb   :  { %325 = vmatpush1.bf16.msra.mxu0 %v324_v35  ;;  %v34_v44 = vld [vmem:[%s676_s1 + $0xa0] sm:$0xff]  ;;  %v328_v45 = vpack.c.bf16 %v84_v42, %v82_v41  ;;  %v87_v46 = vld [vmem:[%s676_s1 + $0x248] sm:$0xff]  ;;  %v89_v47 = vld [vmem:[%s676_s1 + $0x258] sm:$0xff]  ;;  %v278_v48 = vpack.c.bf16 %v37_v39, %v35_v38 }
   0xc   :  { %327 = vmatprep.subr.bf16.mxu0 %v326_v40  ;;  %v36_v49 = vld [vmem:[%s676_s1 + $0xb0] sm:$0xff]  ;;  %v330_v50 = vpack.c.bf16 %v89_v47, %v87_v46  ;;  %v86_v51 = vld [vmem:[%s676_s1 + $0x240] sm:$0xff]  ;;  %v39_v53 = vld [vmem:[%s676_s1 + $0xc8] sm:$0xff] }
   0xd   :  { %269 = vmatpush1.bf16.msra.mxu1 %v268_v20  ;;  %v88_v52 = vld [vmem:[%s676_s1 + $0x250] sm:$0xff]  ;;  %v41_v54 = vld [vmem:[%s676_s1 + $0xd8] sm:$0xff]  ;;  %v91_v55 = vld [vmem:[%s676_s1 + $0x268] sm:$0xff]  ;;  %v280_v58 = vpack.c.bf16 %v36_v49, %v34_v44 }
   0xe   :  { %271 = vmatprep.subr.bf16.mxu1 %v270_v21  ;;  %v332_v56 = vpack.c.bf16 %v88_v52, %v86_v51  ;;  %v93_v57 = vld [vmem:[%s676_s1 + $0x278] sm:$0xff]  ;;  %v38_v59 = vld [vmem:[%s676_s1 + $0xc0] sm:$0xff]  ;;  %v92_v62 = vld [vmem:[%s676_s1 + $0x270] sm:$0xff]  ;;  %v282_v63 = vpack.c.bf16 %v41_v54, %v39_v53 }
   0xf   :  { %329 = vmatpush1.bf16.msra.mxu0 %v328_v45  ;;  %v334_v60 = vpack.c.bf16 %v93_v57, %v91_v55  ;;  %v90_v61 = vld [vmem:[%s676_s1 + $0x260] sm:$0xff]  ;;  %v40_v0 = vld [vmem:[%s676_s1 + $0xd0] sm:$0xff]  ;;  %v95_v1 = vld [vmem:[%s676_s1 + $0x288] sm:$0xff] }
  0x10   :  { %331 = vmatprep.subr.bf16.mxu0 %v330_v50  ;;  %v97_v2 = vld [vmem:[%s676_s1 + $0x298] sm:$0xff]  ;;  %v43_v3 = vld [vmem:[%s676_s1 + $0xe8] sm:$0xff]  ;;  %v336_v5 = vpack.c.bf16 %v92_v62, %v90_v61  ;;  %v284_v6 = vpack.c.bf16 %v40_v0, %v38_v59  ;;  %v42_v7 = vld [vmem:[%s676_s1 + $0xe0] sm:$0xff] }
  0x11   :  { %273 = vmatpush1.bf16.msra.mxu1 %v272_v28  ;;  %v45_v4 = vld [vmem:[%s676_s1 + $0xf8] sm:$0xff]  ;;  %v338_v8 = vpack.c.bf16 %v97_v2, %v95_v1  ;;  %v94_v9 = vld [vmem:[%s676_s1 + $0x280] sm:$0xff]  ;;  %v96_v10 = vld [vmem:[%s676_s1 + $0x290] sm:$0xff] }
  0x12   :  { %275 = vmatprep.subr.bf16.mxu1 %v274_v33  ;;  %v286_v11 = vpack.c.bf16 %v45_v4, %v43_v3  ;;  %v44_v12 = vld [vmem:[%s676_s1 + $0xf0] sm:$0xff]  ;;  %v99_v13 = vld [vmem:[%s676_s1 + $0x2a8] sm:$0xff]  ;;  %v101_v14 = vld [vmem:[%s676_s1 + $0x2b8] sm:$0xff]  ;;  %v340_v17 = vpack.c.bf16 %v96_v10, %v94_v9 }
  0x13   :  { %333 = vmatpush1.bf16.msra.mxu0 %v332_v56  ;;  %v47_v15 = vld [vmem:[%s676_s1 + $0x108] sm:$0xff]  ;;  %v49_v16 = vld [vmem:[%s676_s1 + $0x118] sm:$0xff]  ;;  %v288_v18 = vpack.c.bf16 %v44_v12, %v42_v7  ;;  %v46_v19 = vld [vmem:[%s676_s1 + $0x100] sm:$0xff]  ;;  %v342_v20 = vpack.c.bf16 %v101_v14, %v99_v13 }
  0x14   :  { %335 = vmatprep.subr.bf16.mxu0 %v334_v60  ;;  %v98_v21 = vld [vmem:[%s676_s1 + $0x2a0] sm:$0xff]  ;;  %v100_v22 = vld [vmem:[%s676_s1 + $0x2b0] sm:$0xff]  ;;  %v290_v23 = vpack.c.bf16 %v49_v16, %v47_v15  ;;  %v103_v25 = vld [vmem:[%s676_s1 + $0x2c8] sm:$0xff] }
  0x15   :  { %277 = vmatpush1.bf16.msra.mxu1 %v276_v43  ;;  %v48_v24 = vld [vmem:[%s676_s1 + $0x110] sm:$0xff]  ;;  %v105_v26 = vld [vmem:[%s676_s1 + $0x2d8] sm:$0xff]  ;;  %v51_v27 = vld [vmem:[%s676_s1 + $0x128] sm:$0xff]  ;;  %v344_v30 = vpack.c.bf16 %v100_v22, %v98_v21 }
  0x16   :  { %279 = vmatprep.subr.bf16.mxu1 %v278_v48  ;;  %v53_v28 = vld [vmem:[%s676_s1 + $0x138] sm:$0xff]  ;;  %v50_v29 = vld [vmem:[%s676_s1 + $0x120] sm:$0xff]  ;;  %v292_v31 = vpack.c.bf16 %v48_v24, %v46_v19  ;;  %v346_v32 = vpack.c.bf16 %v105_v26, %v103_v25  ;;  %v104_v34 = vld [vmem:[%s676_s1 + $0x2d0] sm:$0xff] }
  0x17   :  { %337 = vmatpush1.bf16.msra.mxu0 %v336_v5  ;;  %v102_v33 = vld [vmem:[%s676_s1 + $0x2c0] sm:$0xff]  ;;  %v12_v35 = vld [vmem:[%s677_s0 + $0x8] sm:$0xff]  ;;  %v294_v36 = vpack.c.bf16 %v53_v28, %v51_v27  ;;  %v52_v37 = vld [vmem:[%s676_s1 + $0x130] sm:$0xff] }
  0x18   :  { %339 = vmatprep.subr.bf16.mxu0 %v338_v8  ;;  %v107_v38 = vld [vmem:[%s676_s1 + $0x2e8] sm:$0xff]  ;;  %v109_v39 = vld [vmem:[%s676_s1 + $0x2f8] sm:$0xff]  ;;  %174 = vmatprep.mubr.f32.mxu1 %v12_v35  ;;  %v348_v42 = vpack.c.bf16 %v104_v34, %v102_v33  ;;  %v296_v43 = vpack.c.bf16 %v52_v37, %v50_v29  ;;  %v106_v45 = vld [vmem:[%s676_s1 + $0x2e0] sm:$0xff] }
  0x19   :  { %281 = vmatpush1.bf16.msra.mxu1 %v280_v58  ;;  %v55_v40 = vld [vmem:[%s676_s1 + $0x148] sm:$0xff]  ;;  %v57_v41 = vld [vmem:[%s676_s1 + $0x158] sm:$0xff]  ;;  %v350_v44 = vpack.c.bf16 %v109_v39, %v107_v38  ;;  %v108_v46 = vld [vmem:[%s676_s1 + $0x2f0] sm:$0xff] }
  0x1a   :  { %283 = vmatprep.subr.bf16.mxu1 %v282_v63  ;;  %v298_v47 = vpack.c.bf16 %v57_v41, %v55_v40  ;;  %v54_v48 = vld [vmem:[%s676_s1 + $0x140] sm:$0xff]  ;;  %v56_v49 = vld [vmem:[%s676_s1 + $0x150] sm:$0xff]  ;;  %v59_v50 = vld [vmem:[%s676_s1 + $0x168] sm:$0xff]  ;;  %v352_v52 = vpack.c.bf16 %v108_v46, %v106_v45 }
  0x1b   :  { %341 = vmatpush1.bf16.msra.mxu0 %v340_v17  ;;  %v61_v51 = vld [vmem:[%s676_s1 + $0x178] sm:$0xff]  ;;  %v300_v53 = vpack.c.bf16 %v56_v49, %v54_v48  ;;  %v58_v55 = vld [vmem:[%s676_s1 + $0x160] sm:$0xff]  ;;  %v60_v56 = vld [vmem:[%s676_s1 + $0x170] sm:$0xff] }
  0x1c   :  { %343 = vmatprep.subr.bf16.mxu0 %v342_v20  ;;  %v302_v54 = vpack.c.bf16 %v61_v51, %v59_v50  ;;  %v63_v57 = vld [vmem:[%s676_s1 + $0x188] sm:$0xff]  ;;  %v65_v58 = vld [vmem:[%s676_s1 + $0x198] sm:$0xff]  ;;  %v13_v59 = vld [vmem:[%s677_s0 + $0x10] sm:$0xff]  ;;  %v304_v60 = vpack.c.bf16 %v60_v56, %v58_v55 }
  0x1d   :  { %285 = vmatpush1.bf16.msra.mxu1 %v284_v6  ;;  %v306_v61 = vpack.c.bf16 %v65_v58, %v63_v57  ;;  %v62_v62 = vld [vmem:[%s676_s1 + $0x180] sm:$0xff]  ;;  %v64_v63 = vld [vmem:[%s676_s1 + $0x190] sm:$0xff]  ;;  %v67_v0 = vld [vmem:[%s676_s1 + $0x1a8] sm:$0xff] }
  0x1e   :  { %287 = vmatprep.subr.bf16.mxu1 %v286_v11  ;;  %v69_v1 = vld [vmem:[%s676_s1 + $0x1b8] sm:$0xff]  ;;  %v308_v2 = vpack.c.bf16 %v64_v63, %v62_v62  ;;  %v66_v4 = vld [vmem:[%s676_s1 + $0x1a0] sm:$0xff]  ;;  %v68_v5 = vld [vmem:[%s676_s1 + $0x1b0] sm:$0xff] }
  0x1f   :  { %345 = vmatpush1.bf16.msra.mxu0 %v344_v30  ;;  %v310_v3 = vpack.c.bf16 %v69_v1, %v67_v0  ;;  %v71_v6 = vld [vmem:[%s676_s1 + $0x1c8] sm:$0xff]  ;;  %v73_v7 = vld [vmem:[%s676_s1 + $0x1d8] sm:$0xff]  ;;  %v312_v8 = vpack.c.bf16 %v68_v5, %v66_v4  ;;  %v70_v10 = vld [vmem:[%s676_s1 + $0x1c0] sm:$0xff] }
  0x20   :  { %347 = vmatprep.subr.bf16.mxu0 %v346_v32  ;;  %v314_v9 = vpack.c.bf16 %v73_v7, %v71_v6  ;;  %v72_v11 = vld [vmem:[%s676_s1 + $0x1d0] sm:$0xff]  ;;  %v75_v12 = vld [vmem:[%s676_s1 + $0x1e8] sm:$0xff]  ;;  %v77_v13 = vld [vmem:[%s676_s1 + $0x1f8] sm:$0xff] }
  0x21   :  { %289 = vmatpush1.bf16.msra.mxu1 %v288_v18  ;;  %v316_v14 = vpack.c.bf16 %v72_v11, %v70_v10  ;;  %v318_v15 = vpack.c.bf16 %v77_v13, %v75_v12  ;;  %v74_v16 = vld [vmem:[%s676_s1 + $0x1e0] sm:$0xff]  ;;  %v76_v17 = vld [vmem:[%s676_s1 + $0x1f0] sm:$0xff] }
  0x22   :  { %291 = vmatprep.subr.bf16.mxu1 %v290_v23  ;;  %v320_v18 = vpack.c.bf16 %v76_v17, %v74_v16  ;;  %v11_v19 = vld [vmem:[%s677_s0] sm:$0xff] }
  0x23   :  { %349 = vmatpush1.bf16.msra.mxu0 %v348_v42 }
  0x24   :  { %351 = vmatprep.subr.bf16.mxu0 %v350_v44 }
  0x25   :  { %293 = vmatpush1.bf16.msra.mxu1 %v292_v31 }
  0x26   :  { %295 = vmatprep.subr.bf16.mxu1 %v294_v36 }
  0x27   :  { %353 = vmatpush1.bf16.msra.mxu0 %v352_v52 }
  0x29   :  { %297 = vmatpush1.bf16.msra.mxu1 %v296_v43 }
  0x2a   :  { %299 = vmatprep.subr.bf16.mxu1 %v298_v47  ;;  %246 = vmatmul.mubr.f32.vlgmr.msra.gmra.mrb[0].mxu0 %v13_v59 }
  0x2d   :  { %301 = vmatpush1.bf16.msra.mxu1 %v300_v53 }
  0x2e   :  { %303 = vmatprep.subr.bf16.mxu1 %v302_v54 }
  0x31   :  { %305 = vmatpush1.bf16.msra.mxu1 %v304_v60 }
  0x32   :  { %307 = vmatprep.subr.bf16.mxu1 %v306_v61 }
  0x35   :  { %309 = vmatpush1.bf16.msra.mxu1 %v308_v2 }
  0x36   :  { %311 = vmatprep.subr.bf16.mxu1 %v310_v3 }
  0x39   :  { %313 = vmatpush1.bf16.msra.mxu1 %v312_v8 }
  0x3a   :  { %315 = vmatprep.subr.bf16.mxu1 %v314_v9 }
  0x3d   :  { %317 = vmatpush1.bf16.msra.mxu1 %v316_v14 }
  0x3e   :  { %319 = vmatprep.subr.bf16.mxu1 %v318_v15 }
  0x41   :  { %321 = vmatpush1.bf16.msra.mxu1 %v320_v18 }
  0x44   :  { %175 = vmatmul.mubr.f32.vlgmr.msra.gmra.mrb[0].mxu1 %v11_v19 }
  0xfd   :  { %v247_v20 = vpop.f32.mrb[0].mxu0 }
  0xfe   :  { %v249_v21 = vpop.f32.mrb[1].mxu0 }
 0x117   :  { %v176_v22 = vpop.f32.mrb[0].mxu1 }
 0x118   :  { %v248_v23 = vadd.f32 %v247_v20, %v176_v22  ;;  %v178_v24 = vpop.f32.mrb[1].mxu1 }
 0x119   :  { %v250_v25 = vadd.f32 %v249_v21, %v178_v24 }
 0x11a   :  { %252 = vst [vmem:[%s678_s2] sm:$0xff] %v248_v23 }
 0x11b   :  { %253 = vst [vmem:[%s678_s2 + $0x8] sm:$0xff] %v250_v25 }

// kernel: neg.20
= control target key start
LH: loop header
LB: loop body
LE: loop exit
PB: predicated region body
PF: predicated region fallthrough
CT: control target
= control target key end

     0   :  { %s24_s0 = inlined_call_operand.vmem [shape: f32[4,80], index: 0, kind: input, shape index: {}]   ;;  %s25_s1 = inlined_call_operand.vmem [shape: f32[4,80], index: 1, kind: output, shape index: {}]  }
   0x1   :  { %v2_v0 = vld [vmem:[%s24_s0] sm:$0xf] }
   0x2   :  { %v5_v1 = vxor.u32 2147483648, %v2_v0 }
   0x4   :  { %7 = vst [vmem:[%s25_s1] sm:$0xf] %v5_v1 }

// kernel: dccrn_forward.16
= control target key start
LH: loop header
LB: loop body
LE: loop exit
PB: predicated region body
PF: predicated region fallthrough
CT: control target
= control target key end

     0   :  { %s749_s9 = smov 0   ;;  %s751_s10 = smov 0   ;;  %s1018_s0 = inlined_call_operand.vmem [shape: f32[8,256], index: 0, kind: input, shape index: {}]   ;;  %s1019_s1 = inlined_call_operand.vmem [shape: f32[256,512], index: 1, kind: input, shape index: {}]   ;;  %s1020_s2 = inlined_call_operand.vmem [shape: f32[8,512], index: 2, kind: output, shape index: {}]  }
   0x1   :  { %s753_s11 = smov 0   ;;  %s755_s12 = smov 0  }
   0x2   :  { %s757_s13 = smov 0  }
   0x3 LB: > { %s21_s14 = sadd.s32 1, %s728_s12  ;;  %p64_p1 = scmp.ne.s32.totalorder %s720_s10, %s716_s9  ;;  %s732_s13 = sphi %s757_s13, %s12_s13   ;;  %s728_s12 = sphi %s755_s12, %s1024_s12   ;;  %s724_s11 = sphi %s753_s11, %s1023_s11   ;;  %s720_s10 = sphi %s751_s10, %s1022_s10   ;;  %s716_s9 = sphi %s749_s9, %s1021_s9  }
   0x4   : > { %p22_p0 = scmp.ge.s32.totalorder %s21_s14, 2  ;;  %p65_p2 = scmp.eq.s32.totalorder %s732_s13, 0 }
   0x5   : > { %s57_s16 = sadd.s32 1, %s720_s10  ;;  %p579_p5 = scmp.ge.s32.totalorder %s732_s13, 2 }
   0x6   : > { %s1026_s14 = smov (%p22_p0, %s21_s14), 0  ;;  %p66_p3 = por %p65_p2, %p64_p1 }
   0x7   : > { %s54_s15 = ssub.s32 %s728_s12, %s1026_s14  ;;  %126 = sbr.rel (%p579_p5) target bundleno = 50 (0x32), region = 20 }
   0x8   : > { %p55_p4 = scmp.eq.s32.totalorder %s54_s15, 0 }
   0xa   : > { %s784_s17 = scalar_select %p55_p4, %s720_s10, %s57_s16  }
   0xe   : > { %129 = sbr.rel (!%p66_p3) target bundleno = 50 (0x32), region = 24  ;;  %s131_s18 = sand.u32 (%p66_p3), 1, %s720_s10  }
   0xf   : > { %s589_s19 = sshll.u32 (%p66_p3), %s728_s12, 4  ;;  %s580_s20 = sshll.u32 (%p66_p3), %s131_s18, 9 }
  0x10   : > { %s792_s23 = scalar_lea.vmem (%p66_p3), %s1019_s1, %s589_s19  ;;  %s797_s24 = scalar_lea.vmem (%p66_p3), [#allocation2], %s580_s20 }
  0x11   : > { %v149_v0 = vld [vmem:[%s792_s23] sm:$0xff] (%p66_p3)  ;;  %v151_v1 = vld [vmem:[%s792_s23 + $0x8] sm:$0xff] (%p66_p3) }
  0x12   : > { %v153_v2 = vld [vmem:[%s792_s23 + $0x20] sm:$0xff] (%p66_p3)  ;;  %150 = vst [vmem:[%s797_s24] sm:$0xff] (%p66_p3), %v149_v0  ;;  %152 = vst [vmem:[%s797_s24 + $0x8] sm:$0xff] (%p66_p3), %v151_v1  ;;  %v155_v3 = vld [vmem:[%s792_s23 + $0x28] sm:$0xff] (%p66_p3) }
  0x13   : > { %154 = vst [vmem:[%s797_s24 + $0x10] sm:$0xff] (%p66_p3), %v153_v2  ;;  %v157_v4 = vld [vmem:[%s792_s23 + $0x40] sm:$0xff] (%p66_p3)  ;;  %v159_v5 = vld [vmem:[%s792_s23 + $0x48] sm:$0xff] (%p66_p3)  ;;  %156 = vst [vmem:[%s797_s24 + $0x18] sm:$0xff] (%p66_p3), %v155_v3 }
  0x14   : > { %158 = vst [vmem:[%s797_s24 + $0x20] sm:$0xff] (%p66_p3), %v157_v4  ;;  %160 = vst [vmem:[%s797_s24 + $0x28] sm:$0xff] (%p66_p3), %v159_v5  ;;  %v161_v6 = vld [vmem:[%s792_s23 + $0x60] sm:$0xff] (%p66_p3)  ;;  %v163_v7 = vld [vmem:[%s792_s23 + $0x68] sm:$0xff] (%p66_p3) }
  0x15   : > { %v165_v8 = vld [vmem:[%s792_s23 + $0x80] sm:$0xff]  ;;  %162 = vst [vmem:[%s797_s24 + $0x30] sm:$0xff] %v161_v6  ;;  %164 = vst [vmem:[%s797_s24 + $0x38] sm:$0xff] %v163_v7  ;;  %v167_v9 = vld [vmem:[%s792_s23 + $0x88] sm:$0xff] }
  0x16   : > { %166 = vst [vmem:[%s797_s24 + $0x40] sm:$0xff] %v165_v8  ;;  %v169_v10 = vld [vmem:[%s792_s23 + $0xa0] sm:$0xff]  ;;  %v171_v11 = vld [vmem:[%s792_s23 + $0xa8] sm:$0xff]  ;;  %168 = vst [vmem:[%s797_s24 + $0x48] sm:$0xff] %v167_v9 }
  0x17   : > { %170 = vst [vmem:[%s797_s24 + $0x50] sm:$0xff] %v169_v10  ;;  %172 = vst [vmem:[%s797_s24 + $0x58] sm:$0xff] %v171_v11  ;;  %v173_v12 = vld [vmem:[%s792_s23 + $0xc0] sm:$0xff]  ;;  %v175_v13 = vld [vmem:[%s792_s23 + $0xc8] sm:$0xff] }
  0x18   : > { %v177_v14 = vld [vmem:[%s792_s23 + $0xe0] sm:$0xff]  ;;  %174 = vst [vmem:[%s797_s24 + $0x60] sm:$0xff] %v173_v12  ;;  %176 = vst [vmem:[%s797_s24 + $0x68] sm:$0xff] %v175_v13  ;;  %v179_v15 = vld [vmem:[%s792_s23 + $0xe8] sm:$0xff] }
  0x19   : > { %178 = vst [vmem:[%s797_s24 + $0x70] sm:$0xff] %v177_v14  ;;  %v181_v16 = vld [vmem:[%s792_s23 + $0x100] sm:$0xff]  ;;  %v183_v17 = vld [vmem:[%s792_s23 + $0x108] sm:$0xff]  ;;  %180 = vst [vmem:[%s797_s24 + $0x78] sm:$0xff] %v179_v15 }
  0x1a   : > { %182 = vst [vmem:[%s797_s24 + $0x80] sm:$0xff] %v181_v16  ;;  %184 = vst [vmem:[%s797_s24 + $0x88] sm:$0xff] %v183_v17  ;;  %v185_v18 = vld [vmem:[%s792_s23 + $0x120] sm:$0xff]  ;;  %v187_v19 = vld [vmem:[%s792_s23 + $0x128] sm:$0xff] }
  0x1b   : > { %v189_v20 = vld [vmem:[%s792_s23 + $0x140] sm:$0xff]  ;;  %186 = vst [vmem:[%s797_s24 + $0x90] sm:$0xff] %v185_v18  ;;  %188 = vst [vmem:[%s797_s24 + $0x98] sm:$0xff] %v187_v19  ;;  %v191_v21 = vld [vmem:[%s792_s23 + $0x148] sm:$0xff] }
  0x1c   : > { %190 = vst [vmem:[%s797_s24 + $0xa0] sm:$0xff] %v189_v20  ;;  %v193_v22 = vld [vmem:[%s792_s23 + $0x160] sm:$0xff]  ;;  %v195_v23 = vld [vmem:[%s792_s23 + $0x168] sm:$0xff]  ;;  %192 = vst [vmem:[%s797_s24 + $0xa8] sm:$0xff] %v191_v21 }
  0x1d   : > { %194 = vst [vmem:[%s797_s24 + $0xb0] sm:$0xff] %v193_v22  ;;  %196 = vst [vmem:[%s797_s24 + $0xb8] sm:$0xff] %v195_v23  ;;  %v197_v24 = vld [vmem:[%s792_s23 + $0x180] sm:$0xff]  ;;  %v199_v25 = vld [vmem:[%s792_s23 + $0x188] sm:$0xff] }
  0x1e   : > { %v201_v26 = vld [vmem:[%s792_s23 + $0x1a0] sm:$0xff]  ;;  %198 = vst [vmem:[%s797_s24 + $0xc0] sm:$0xff] %v197_v24  ;;  %200 = vst [vmem:[%s797_s24 + $0xc8] sm:$0xff] %v199_v25  ;;  %v203_v27 = vld [vmem:[%s792_s23 + $0x1a8] sm:$0xff] }
  0x1f   : > { %202 = vst [vmem:[%s797_s24 + $0xd0] sm:$0xff] %v201_v26  ;;  %v205_v28 = vld [vmem:[%s792_s23 + $0x1c0] sm:$0xff]  ;;  %v207_v29 = vld [vmem:[%s792_s23 + $0x1c8] sm:$0xff]  ;;  %204 = vst [vmem:[%s797_s24 + $0xd8] sm:$0xff] %v203_v27 }
  0x20   : > { %206 = vst [vmem:[%s797_s24 + $0xe0] sm:$0xff] %v205_v28  ;;  %208 = vst [vmem:[%s797_s24 + $0xe8] sm:$0xff] %v207_v29  ;;  %v209_v30 = vld [vmem:[%s792_s23 + $0x1e0] sm:$0xff]  ;;  %v211_v31 = vld [vmem:[%s792_s23 + $0x1e8] sm:$0xff] }
  0x21   : > { %v213_v32 = vld [vmem:[%s792_s23 + $0x200] sm:$0xff]  ;;  %210 = vst [vmem:[%s797_s24 + $0xf0] sm:$0xff] %v209_v30  ;;  %212 = vst [vmem:[%s797_s24 + $0xf8] sm:$0xff] %v211_v31  ;;  %v215_v33 = vld [vmem:[%s792_s23 + $0x208] sm:$0xff] }
  0x22   : > { %214 = vst [vmem:[%s797_s24 + $0x100] sm:$0xff] %v213_v32  ;;  %v217_v34 = vld [vmem:[%s792_s23 + $0x220] sm:$0xff]  ;;  %v219_v35 = vld [vmem:[%s792_s23 + $0x228] sm:$0xff]  ;;  %216 = vst [vmem:[%s797_s24 + $0x108] sm:$0xff] %v215_v33 }
  0x23   : > { %218 = vst [vmem:[%s797_s24 + $0x110] sm:$0xff] %v217_v34  ;;  %220 = vst [vmem:[%s797_s24 + $0x118] sm:$0xff] %v219_v35  ;;  %v221_v36 = vld [vmem:[%s792_s23 + $0x240] sm:$0xff]  ;;  %v223_v37 = vld [vmem:[%s792_s23 + $0x248] sm:$0xff] }
  0x24   : > { %v225_v38 = vld [vmem:[%s792_s23 + $0x260] sm:$0xff]  ;;  %222 = vst [vmem:[%s797_s24 + $0x120] sm:$0xff] %v221_v36  ;;  %224 = vst [vmem:[%s797_s24 + $0x128] sm:$0xff] %v223_v37  ;;  %v227_v39 = vld [vmem:[%s792_s23 + $0x268] sm:$0xff] }
  0x25   : > { %226 = vst [vmem:[%s797_s24 + $0x130] sm:$0xff] %v225_v38  ;;  %v229_v40 = vld [vmem:[%s792_s23 + $0x280] sm:$0xff]  ;;  %v231_v41 = vld [vmem:[%s792_s23 + $0x288] sm:$0xff]  ;;  %228 = vst [vmem:[%s797_s24 + $0x138] sm:$0xff] %v227_v39 }
  0x26   : > { %230 = vst [vmem:[%s797_s24 + $0x140] sm:$0xff] %v229_v40  ;;  %232 = vst [vmem:[%s797_s24 + $0x148] sm:$0xff] %v231_v41  ;;  %v233_v42 = vld [vmem:[%s792_s23 + $0x2a0] sm:$0xff]  ;;  %v235_v43 = vld [vmem:[%s792_s23 + $0x2a8] sm:$0xff] }
  0x27   : > { %v237_v44 = vld [vmem:[%s792_s23 + $0x2c0] sm:$0xff]  ;;  %234 = vst [vmem:[%s797_s24 + $0x150] sm:$0xff] %v233_v42  ;;  %236 = vst [vmem:[%s797_s24 + $0x158] sm:$0xff] %v235_v43  ;;  %v239_v45 = vld [vmem:[%s792_s23 + $0x2c8] sm:$0xff] }
  0x28   : > { %238 = vst [vmem:[%s797_s24 + $0x160] sm:$0xff] %v237_v44  ;;  %v241_v46 = vld [vmem:[%s792_s23 + $0x2e0] sm:$0xff]  ;;  %v243_v47 = vld [vmem:[%s792_s23 + $0x2e8] sm:$0xff]  ;;  %240 = vst [vmem:[%s797_s24 + $0x168] sm:$0xff] %v239_v45 }
  0x29   : > { %242 = vst [vmem:[%s797_s24 + $0x170] sm:$0xff] %v241_v46  ;;  %244 = vst [vmem:[%s797_s24 + $0x178] sm:$0xff] %v243_v47  ;;  %v245_v48 = vld [vmem:[%s792_s23 + $0x300] sm:$0xff]  ;;  %v247_v49 = vld [vmem:[%s792_s23 + $0x308] sm:$0xff] }
  0x2a   : > { %v249_v50 = vld [vmem:[%s792_s23 + $0x320] sm:$0xff]  ;;  %246 = vst [vmem:[%s797_s24 + $0x180] sm:$0xff] %v245_v48  ;;  %248 = vst [vmem:[%s797_s24 + $0x188] sm:$0xff] %v247_v49  ;;  %v251_v51 = vld [vmem:[%s792_s23 + $0x328] sm:$0xff] }
  0x2b   : > { %250 = vst [vmem:[%s797_s24 + $0x190] sm:$0xff] %v249_v50  ;;  %v253_v52 = vld [vmem:[%s792_s23 + $0x340] sm:$0xff]  ;;  %v255_v53 = vld [vmem:[%s792_s23 + $0x348] sm:$0xff]  ;;  %252 = vst [vmem:[%s797_s24 + $0x198] sm:$0xff] %v251_v51 }
  0x2c   : > { %254 = vst [vmem:[%s797_s24 + $0x1a0] sm:$0xff] %v253_v52  ;;  %256 = vst [vmem:[%s797_s24 + $0x1a8] sm:$0xff] %v255_v53  ;;  %v257_v54 = vld [vmem:[%s792_s23 + $0x360] sm:$0xff]  ;;  %v259_v55 = vld [vmem:[%s792_s23 + $0x368] sm:$0xff] }
  0x2d   : > { %v261_v56 = vld [vmem:[%s792_s23 + $0x380] sm:$0xff]  ;;  %258 = vst [vmem:[%s797_s24 + $0x1b0] sm:$0xff] %v257_v54  ;;  %260 = vst [vmem:[%s797_s24 + $0x1b8] sm:$0xff] %v259_v55  ;;  %v263_v57 = vld [vmem:[%s792_s23 + $0x388] sm:$0xff] }
  0x2e   : > { %262 = vst [vmem:[%s797_s24 + $0x1c0] sm:$0xff] %v261_v56  ;;  %v265_v58 = vld [vmem:[%s792_s23 + $0x3a0] sm:$0xff]  ;;  %v267_v59 = vld [vmem:[%s792_s23 + $0x3a8] sm:$0xff]  ;;  %264 = vst [vmem:[%s797_s24 + $0x1c8] sm:$0xff] %v263_v57 }
  0x2f   : > { %266 = vst [vmem:[%s797_s24 + $0x1d0] sm:$0xff] %v265_v58  ;;  %268 = vst [vmem:[%s797_s24 + $0x1d8] sm:$0xff] %v267_v59  ;;  %v269_v60 = vld [vmem:[%s792_s23 + $0x3c0] sm:$0xff]  ;;  %v271_v61 = vld [vmem:[%s792_s23 + $0x3c8] sm:$0xff] }
  0x30   : > { %v273_v62 = vld [vmem:[%s792_s23 + $0x3e0] sm:$0xff]  ;;  %270 = vst [vmem:[%s797_s24 + $0x1e0] sm:$0xff] %v269_v60  ;;  %272 = vst [vmem:[%s797_s24 + $0x1e8] sm:$0xff] %v271_v61  ;;  %v275_v63 = vld [vmem:[%s792_s23 + $0x3e8] sm:$0xff] }
  0x31   : > { %274 = vst [vmem:[%s797_s24 + $0x1f0] sm:$0xff] %v273_v62  ;;  %276 = vst [vmem:[%s797_s24 + $0x1f8] sm:$0xff] %v275_v63 }
  0x32 PF: > { %p583_p6 = scmp.ge.s32.totalorder %s732_s13, 1  ;;  %p281_p7 = scmp.lt.s32.totalorder %s732_s13, 3 }
  0x34   : > { %p282_p8 = pnand %p583_p6, %p281_p7 }
  0x35   : > { %s288_s25 = sand.u32 (!%p282_p8), 1, %s716_s9   ;;  %v335_v0 = vld [vmem:[%s1018_s0 + $0x8] sm:$0xff] (!%p282_p8)  ;;  %s585_s4 = sshll.u32 (!%p282_p8), %s724_s11, 1 }
  0x36   : > { %285 = sbr.rel (%p282_p8) target bundleno = 337 (0x151), region = 47  ;;  %s584_s28 = sshll.u32 (!%p282_p8), %s288_s25, 9  ;;  %464 = vmatprep.mubr.f32.mxu0 (!%p282_p8), %v335_v0 }
  0x37   : > { %s930_s29 = scalar_lea.vmem (!%p282_p8), [#allocation2], %s584_s28  ;;  %p327_p9 = scmp.lt.s32.totalorder (!%p282_p8), %s585_s4, 3 }
  0x38   : > { %v337_v1 = vld [vmem:[%s930_s29 + $0x8] sm:$0xff] (!%p282_p8)  ;;  %v339_v2 = vld [vmem:[%s930_s29 + $0x18] sm:$0xff] (!%p282_p8)  ;;  %v336_v3 = vld [vmem:[%s930_s29] sm:$0xff] (!%p282_p8) }
  0x39   : > { %v590_v4 = vpack.c.bf16 (!%p282_p8), %v339_v2, %v337_v1  ;;  %v338_v5 = vld [vmem:[%s930_s29 + $0x10] sm:$0xff] (!%p282_p8)  ;;  %v341_v6 = vld [vmem:[%s930_s29 + $0x28] sm:$0xff] (!%p282_p8)  ;;  %v343_v7 = vld [vmem:[%s930_s29 + $0x38] sm:$0xff] (!%p282_p8) }
  0x3a   : > { %v592_v8 = vpack.c.bf16 (!%p282_p8), %v338_v5, %v336_v3  ;;  %v594_v9 = vpack.c.bf16 (!%p282_p8), %v343_v7, %v341_v6  ;;  %v340_v10 = vld [vmem:[%s930_s29 + $0x20] sm:$0xff] (!%p282_p8)  ;;  %v342_v11 = vld [vmem:[%s930_s29 + $0x30] sm:$0xff] (!%p282_p8)  ;;  %v345_v12 = vld [vmem:[%s930_s29 + $0x48] sm:$0xff] (!%p282_p8) }
  0x3b   : > { %591 = vmatprep.subr.bf16.mxu0 (!%p282_p8), %v590_v4  ;;  %v347_v13 = vld [vmem:[%s930_s29 + $0x58] sm:$0xff] (!%p282_p8)  ;;  %v596_v14 = vpack.c.bf16 (!%p282_p8), %v342_v11, %v340_v10  ;;  %v344_v16 = vld [vmem:[%s930_s29 + $0x40] sm:$0xff] (!%p282_p8)  ;;  %v346_v17 = vld [vmem:[%s930_s29 + $0x50] sm:$0xff] (!%p282_p8) }
  0x3c   : > { %593 = vmatpush1.bf16.msra.mxu0 (!%p282_p8), %v592_v8  ;;  %v598_v15 = vpack.c.bf16 (!%p282_p8), %v347_v13, %v345_v12  ;;  %v349_v18 = vld [vmem:[%s930_s29 + $0x68] sm:$0xff] (!%p282_p8)  ;;  %v351_v19 = vld [vmem:[%s930_s29 + $0x78] sm:$0xff] (!%p282_p8)  ;;  %v600_v20 = vpack.c.bf16 (!%p282_p8), %v346_v17, %v344_v16  ;;  %v348_v22 = vld [vmem:[%s930_s29 + $0x60] sm:$0xff] (!%p282_p8) }
  0x3d   : > { %595 = vmatprep.subr.bf16.mxu0 %v594_v9  ;;  %v602_v21 = vpack.c.bf16 %v351_v19, %v349_v18  ;;  %v350_v23 = vld [vmem:[%s930_s29 + $0x70] sm:$0xff]  ;;  %v353_v24 = vld [vmem:[%s930_s29 + $0x88] sm:$0xff]  ;;  %v355_v25 = vld [vmem:[%s930_s29 + $0x98] sm:$0xff]  ;;  %s1028_s4 = smov (!%p327_p9, %s585_s4), 3 }
  0x3e   : > { %v604_v26 = vpack.c.bf16 %v350_v23, %v348_v22  ;;  %v606_v27 = vpack.c.bf16 %v355_v25, %v353_v24  ;;  %v352_v28 = vld [vmem:[%s930_s29 + $0x80] sm:$0xff]  ;;  %v354_v29 = vld [vmem:[%s930_s29 + $0x90] sm:$0xff]  ;;  %v357_v30 = vld [vmem:[%s930_s29 + $0xa8] sm:$0xff]  ;;  %s586_s5 = sshll.u32 %s1028_s4, 3 }
  0x3f   : > { %v359_v31 = vld [vmem:[%s930_s29 + $0xb8] sm:$0xff]  ;;  %v608_v32 = vpack.c.bf16 %v354_v29, %v352_v28  ;;  %v356_v34 = vld [vmem:[%s930_s29 + $0xa0] sm:$0xff]  ;;  %v358_v35 = vld [vmem:[%s930_s29 + $0xb0] sm:$0xff]  ;;  %s332_s8 = scalar_lea.vmem %s1020_s2, %s586_s5 }
  0x40   : > { %597 = vmatpush1.bf16.msra.mxu0 %v596_v14  ;;  %v610_v33 = vpack.c.bf16 %v359_v31, %v357_v30  ;;  %v361_v36 = vld [vmem:[%s930_s29 + $0xc8] sm:$0xff]  ;;  %v363_v37 = vld [vmem:[%s930_s29 + $0xd8] sm:$0xff]  ;;  %v612_v38 = vpack.c.bf16 %v358_v35, %v356_v34  ;;  %v360_v40 = vld [vmem:[%s930_s29 + $0xc0] sm:$0xff] }
  0x41   : > { %599 = vmatprep.subr.bf16.mxu0 %v598_v15  ;;  %v614_v39 = vpack.c.bf16 %v363_v37, %v361_v36  ;;  %v362_v41 = vld [vmem:[%s930_s29 + $0xd0] sm:$0xff]  ;;  %v365_v42 = vld [vmem:[%s930_s29 + $0xe8] sm:$0xff]  ;;  %v367_v43 = vld [vmem:[%s930_s29 + $0xf8] sm:$0xff] }
  0x42   : > { %v616_v44 = vpack.c.bf16 %v362_v41, %v360_v40  ;;  %v618_v45 = vpack.c.bf16 %v367_v43, %v365_v42  ;;  %v364_v46 = vld [vmem:[%s930_s29 + $0xe0] sm:$0xff]  ;;  %v366_v47 = vld [vmem:[%s930_s29 + $0xf0] sm:$0xff]  ;;  %v369_v48 = vld [vmem:[%s930_s29 + $0x108] sm:$0xff] }
  0x43   : > { %v371_v49 = vld [vmem:[%s930_s29 + $0x118] sm:$0xff]  ;;  %v620_v50 = vpack.c.bf16 %v366_v47, %v364_v46  ;;  %v368_v52 = vld [vmem:[%s930_s29 + $0x100] sm:$0xff]  ;;  %v370_v53 = vld [vmem:[%s930_s29 + $0x110] sm:$0xff] }
  0x44   : > { %601 = vmatpush1.bf16.msra.mxu0 %v600_v20  ;;  %v622_v51 = vpack.c.bf16 %v371_v49, %v369_v48  ;;  %v373_v54 = vld [vmem:[%s930_s29 + $0x128] sm:$0xff]  ;;  %v375_v55 = vld [vmem:[%s930_s29 + $0x138] sm:$0xff]  ;;  %v624_v56 = vpack.c.bf16 %v370_v53, %v368_v52  ;;  %v372_v58 = vld [vmem:[%s930_s29 + $0x120] sm:$0xff] }
  0x45   : > { %603 = vmatprep.subr.bf16.mxu0 %v602_v21  ;;  %v626_v57 = vpack.c.bf16 %v375_v55, %v373_v54  ;;  %v374_v59 = vld [vmem:[%s930_s29 + $0x130] sm:$0xff]  ;;  %v377_v60 = vld [vmem:[%s930_s29 + $0x148] sm:$0xff]  ;;  %v379_v61 = vld [vmem:[%s930_s29 + $0x158] sm:$0xff] }
  0x46   : > { %v628_v62 = vpack.c.bf16 %v374_v59, %v372_v58  ;;  %v630_v63 = vpack.c.bf16 %v379_v61, %v377_v60  ;;  %v376_v0 = vld [vmem:[%s930_s29 + $0x140] sm:$0xff]  ;;  %v378_v1 = vld [vmem:[%s930_s29 + $0x150] sm:$0xff]  ;;  %v381_v2 = vld [vmem:[%s930_s29 + $0x168] sm:$0xff] }
  0x47   : > { %v383_v3 = vld [vmem:[%s930_s29 + $0x178] sm:$0xff]  ;;  %v632_v4 = vpack.c.bf16 %v378_v1, %v376_v0  ;;  %v380_v6 = vld [vmem:[%s930_s29 + $0x160] sm:$0xff]  ;;  %v382_v7 = vld [vmem:[%s930_s29 + $0x170] sm:$0xff] }
  0x48   : > { %605 = vmatpush1.bf16.msra.mxu0 %v604_v26  ;;  %v634_v5 = vpack.c.bf16 %v383_v3, %v381_v2  ;;  %v385_v8 = vld [vmem:[%s930_s29 + $0x188] sm:$0xff]  ;;  %v387_v9 = vld [vmem:[%s930_s29 + $0x198] sm:$0xff]  ;;  %v636_v10 = vpack.c.bf16 %v382_v7, %v380_v6  ;;  %v384_v12 = vld [vmem:[%s930_s29 + $0x180] sm:$0xff] }
  0x49   : > { %607 = vmatprep.subr.bf16.mxu0 %v606_v27  ;;  %v638_v11 = vpack.c.bf16 %v387_v9, %v385_v8  ;;  %v386_v13 = vld [vmem:[%s930_s29 + $0x190] sm:$0xff]  ;;  %v389_v14 = vld [vmem:[%s930_s29 + $0x1a8] sm:$0xff]  ;;  %v391_v15 = vld [vmem:[%s930_s29 + $0x1b8] sm:$0xff] }
  0x4a   : > { %v640_v16 = vpack.c.bf16 %v386_v13, %v384_v12  ;;  %v642_v17 = vpack.c.bf16 %v391_v15, %v389_v14  ;;  %v388_v18 = vld [vmem:[%s930_s29 + $0x1a0] sm:$0xff]  ;;  %v390_v19 = vld [vmem:[%s930_s29 + $0x1b0] sm:$0xff]  ;;  %v393_v20 = vld [vmem:[%s930_s29 + $0x1c8] sm:$0xff] }
  0x4b   : > { %v395_v21 = vld [vmem:[%s930_s29 + $0x1d8] sm:$0xff]  ;;  %v644_v22 = vpack.c.bf16 %v390_v19, %v388_v18  ;;  %v392_v24 = vld [vmem:[%s930_s29 + $0x1c0] sm:$0xff]  ;;  %v394_v25 = vld [vmem:[%s930_s29 + $0x1d0] sm:$0xff] }
  0x4c   : > { %609 = vmatpush1.bf16.msra.mxu0 %v608_v32  ;;  %v646_v23 = vpack.c.bf16 %v395_v21, %v393_v20  ;;  %v397_v26 = vld [vmem:[%s930_s29 + $0x1e8] sm:$0xff]  ;;  %v399_v27 = vld [vmem:[%s930_s29 + $0x1f8] sm:$0xff]  ;;  %v648_v28 = vpack.c.bf16 %v394_v25, %v392_v24  ;;  %v396_v30 = vld [vmem:[%s930_s29 + $0x1e0] sm:$0xff] }
  0x4d   : > { %611 = vmatprep.subr.bf16.mxu0 %v610_v33  ;;  %v650_v29 = vpack.c.bf16 %v399_v27, %v397_v26  ;;  %v398_v31 = vld [vmem:[%s930_s29 + $0x1f0] sm:$0xff]  ;;  %v334_v33 = vld [vmem:[%s1018_s0] sm:$0xff] }
  0x4e   : > { %v652_v32 = vpack.c.bf16 %v398_v31, %v396_v30 }
  0x50   : > { %613 = vmatpush1.bf16.msra.mxu0 %v612_v38 }
  0x51   : > { %615 = vmatprep.subr.bf16.mxu0 %v614_v39 }
  0x54   : > { %617 = vmatpush1.bf16.msra.mxu0 %v616_v44 }
  0x55   : > { %619 = vmatprep.subr.bf16.mxu0 %v618_v45 }
  0x58   : > { %621 = vmatpush1.bf16.msra.mxu0 %v620_v50 }
  0x59   : > { %623 = vmatprep.subr.bf16.mxu0 %v622_v51 }
  0x5c   : > { %625 = vmatpush1.bf16.msra.mxu0 %v624_v56 }
  0x5d   : > { %627 = vmatprep.subr.bf16.mxu0 %v626_v57 }
  0x60   : > { %629 = vmatpush1.bf16.msra.mxu0 %v628_v62 }
  0x61   : > { %631 = vmatprep.subr.bf16.mxu0 %v630_v63 }
  0x64   : > { %633 = vmatpush1.bf16.msra.mxu0 %v632_v4 }
  0x65   : > { %635 = vmatprep.subr.bf16.mxu0 %v634_v5 }
  0x68   : > { %637 = vmatpush1.bf16.msra.mxu0 %v636_v10 }
  0x69   : > { %639 = vmatprep.subr.bf16.mxu0 %v638_v11 }
  0x6c   : > { %641 = vmatpush1.bf16.msra.mxu0 %v640_v16 }
  0x6d   : > { %643 = vmatprep.subr.bf16.mxu0 %v642_v17 }
  0x70   : > { %645 = vmatpush1.bf16.msra.mxu0 %v644_v22 }
  0x71   : > { %647 = vmatprep.subr.bf16.mxu0 %v646_v23 }
  0x74   : > { %649 = vmatpush1.bf16.msra.mxu0 %v648_v28 }
  0x75   : > { %651 = vmatprep.subr.bf16.mxu0 %v650_v29 }
  0x78   : > { %653 = vmatpush1.bf16.msra.mxu0 %v652_v32 }
  0x7b   : > { %465 = vmatmul.mubr.f32.vlgmr.msra.gmra.mrb[0].mxu0 %v334_v33 }
 0x14e   : > { %v466_v34 = vpop.f32.mrb[0].mxu0 }
 0x14f   : > { %471 = vst [vmem:[%s332_s8] sm:$0xff] %v466_v34  ;;  %v468_v35 = vpop.f32.mrb[1].mxu0 }
 0x150   : > { %472 = vst [vmem:[%s332_s8 + $0x8] sm:$0xff] %v468_v35 }
 0x151 PF: > { %s12_s13 = sadd.s32 1, %s732_s13   ;;  %s1021_s9 = smov %s720_s10 }
 0x152   : > { %p9_p10 = scmp.ge.s32.totalorder %s12_s13, 4   ;;  %s1022_s10 = smov %s784_s17 }
 0x153   : > { %s1023_s11 = smov %s728_s12  ;;  %s1024_s12 = smov %s1026_s14 }
 0x154   :  { %11 = sbr.rel (!%p9_p10) target bundleno = 3 (0x3), region = 89 }

// kernel: neg.24
= control target key start
LH: loop header
LB: loop body
LE: loop exit
PB: predicated region body
PF: predicated region fallthrough
CT: control target
= control target key end

     0   :  { %s24_s0 = inlined_call_operand.vmem [shape: f32[1,80], index: 0, kind: input, shape index: {}]   ;;  %s25_s1 = inlined_call_operand.vmem [shape: f32[1,80], index: 1, kind: output, shape index: {}]  }
   0x1   :  { %v2_v0 = vld [vmem:[%s24_s0] sm:$0x1] }
   0x2   :  { %v5_v1 = vxor.u32 2147483648, %v2_v0 }
   0x4   :  { %7 = vst [vmem:[%s25_s1] sm:$0x1] %v5_v1 }

// kernel: dccrn_forward.17
= control target key start
LH: loop header
LB: loop body
LE: loop exit
PB: predicated region body
PF: predicated region fallthrough
CT: control target
= control target key end

     0   :  { %s720_s9 = smov 0   ;;  %s722_s10 = smov 0   ;;  %s894_s0 = inlined_call_operand.vmem [shape: f32[8,256], index: 0, kind: input, shape index: {}]   ;;  %s895_s1 = inlined_call_operand.vmem [shape: f32[256,896], index: 1, kind: input, shape index: {}]   ;;  %s896_s2 = inlined_call_operand.vmem [shape: f32[8,896], index: 2, kind: output, shape index: {}]  }
   0x1   :  { %s724_s11 = smov 0   ;;  %s726_s12 = smov 0  }
   0x2   :  { %s728_s13 = smov 0  }
   0x3 LB: > { %s21_s14 = sadd.s32 1, %s699_s12  ;;  %p64_p1 = scmp.ne.s32.totalorder %s691_s10, %s687_s9  ;;  %s703_s13 = sphi %s728_s13, %s12_s13   ;;  %s699_s12 = sphi %s726_s12, %s900_s12   ;;  %s695_s11 = sphi %s724_s11, %s899_s11   ;;  %s691_s10 = sphi %s722_s10, %s898_s10   ;;  %s687_s9 = sphi %s720_s9, %s897_s9  }
   0x4   : > { %p22_p0 = scmp.ge.s32.totalorder %s21_s14, 7  ;;  %p65_p2 = scmp.eq.s32.totalorder %s703_s13, 0 }
   0x5   : > { %s57_s16 = sadd.s32 1, %s691_s10  ;;  %p550_p5 = scmp.ge.s32.totalorder %s703_s13, 7 }
   0x6   : > { %s902_s14 = smov (%p22_p0, %s21_s14), 0  ;;  %p66_p3 = por %p65_p2, %p64_p1 }
   0x7   : > { %s54_s15 = ssub.s32 %s699_s12, %s902_s14  ;;  %126 = sbr.rel (%p550_p5) target bundleno = 34 (0x22), region = 20 }
   0x8   : > { %p55_p4 = scmp.eq.s32.totalorder %s54_s15, 0 }
   0xa   : > { %s755_s17 = scalar_select %p55_p4, %s691_s10, %s57_s16  }
   0xe   : > { %129 = sbr.rel (!%p66_p3) target bundleno = 34 (0x22), region = 24  ;;  %s131_s18 = sand.u32 (%p66_p3), 1, %s691_s10  }
   0xf   : > { %s552_s19 = sshll.u32 (%p66_p3), %s699_s12, 3  ;;  %s551_s20 = sshll.u32 (%p66_p3), %s131_s18, 8 }
  0x10   : > { %s763_s23 = scalar_lea.vmem (%p66_p3), %s895_s1, %s552_s19  ;;  %s768_s24 = scalar_lea.vmem (%p66_p3), [#allocation2], %s551_s20 }
  0x11   : > { %v225_v0 = vld [vmem:[%s763_s23] sm:$0xff] (%p66_p3)  ;;  %v227_v1 = vld [vmem:[%s763_s23 + $0x38] sm:$0xff] (%p66_p3)  ;;  %v229_v2 = vld [vmem:[%s763_s23 + $0x70] sm:$0xff] (%p66_p3) }
  0x12   : > { %226 = vst [vmem:[%s768_s24] sm:$0xff] (%p66_p3), %v225_v0  ;;  %228 = vst [vmem:[%s768_s24 + $0x8] sm:$0xff] (%p66_p3), %v227_v1  ;;  %v231_v3 = vld [vmem:[%s763_s23 + $0xa8] sm:$0xff] (%p66_p3)  ;;  %v233_v4 = vld [vmem:[%s763_s23 + $0xe0] sm:$0xff] (%p66_p3) }
  0x13   : > { %230 = vst [vmem:[%s768_s24 + $0x10] sm:$0xff] (%p66_p3), %v229_v2  ;;  %v235_v5 = vld [vmem:[%s763_s23 + $0x118] sm:$0xff] (%p66_p3)  ;;  %232 = vst [vmem:[%s768_s24 + $0x18] sm:$0xff] (%p66_p3), %v231_v3  ;;  %v237_v6 = vld [vmem:[%s763_s23 + $0x150] sm:$0xff] (%p66_p3) }
  0x14   : > { %234 = vst [vmem:[%s768_s24 + $0x20] sm:$0xff] (%p66_p3), %v233_v4  ;;  %236 = vst [vmem:[%s768_s24 + $0x28] sm:$0xff] (%p66_p3), %v235_v5  ;;  %v239_v7 = vld [vmem:[%s763_s23 + $0x188] sm:$0xff] (%p66_p3)  ;;  %v241_v8 = vld [vmem:[%s763_s23 + $0x1c0] sm:$0xff] (%p66_p3) }
  0x15   : > { %238 = vst [vmem:[%s768_s24 + $0x30] sm:$0xff] %v237_v6  ;;  %240 = vst [vmem:[%s768_s24 + $0x38] sm:$0xff] %v239_v7  ;;  %v243_v9 = vld [vmem:[%s763_s23 + $0x1f8] sm:$0xff]  ;;  %v245_v10 = vld [vmem:[%s763_s23 + $0x230] sm:$0xff] }
  0x16   : > { %242 = vst [vmem:[%s768_s24 + $0x40] sm:$0xff] %v241_v8  ;;  %v247_v11 = vld [vmem:[%s763_s23 + $0x268] sm:$0xff]  ;;  %244 = vst [vmem:[%s768_s24 + $0x48] sm:$0xff] %v243_v9  ;;  %v249_v12 = vld [vmem:[%s763_s23 + $0x2a0] sm:$0xff] }
  0x17   : > { %246 = vst [vmem:[%s768_s24 + $0x50] sm:$0xff] %v245_v10  ;;  %248 = vst [vmem:[%s768_s24 + $0x58] sm:$0xff] %v247_v11  ;;  %v251_v13 = vld [vmem:[%s763_s23 + $0x2d8] sm:$0xff]  ;;  %v253_v14 = vld [vmem:[%s763_s23 + $0x310] sm:$0xff] }
  0x18   : > { %250 = vst [vmem:[%s768_s24 + $0x60] sm:$0xff] %v249_v12  ;;  %252 = vst [vmem:[%s768_s24 + $0x68] sm:$0xff] %v251_v13  ;;  %v255_v15 = vld [vmem:[%s763_s23 + $0x348] sm:$0xff]  ;;  %v257_v16 = vld [vmem:[%s763_s23 + $0x380] sm:$0xff] }
  0x19   : > { %254 = vst [vmem:[%s768_s24 + $0x70] sm:$0xff] %v253_v14  ;;  %v259_v17 = vld [vmem:[%s763_s23 + $0x3b8] sm:$0xff]  ;;  %256 = vst [vmem:[%s768_s24 + $0x78] sm:$0xff] %v255_v15  ;;  %v261_v18 = vld [vmem:[%s763_s23 + $0x3f0] sm:$0xff] }
  0x1a   : > { %258 = vst [vmem:[%s768_s24 + $0x80] sm:$0xff] %v257_v16  ;;  %260 = vst [vmem:[%s768_s24 + $0x88] sm:$0xff] %v259_v17  ;;  %v263_v19 = vld [vmem:[%s763_s23 + $0x428] sm:$0xff]  ;;  %v265_v20 = vld [vmem:[%s763_s23 + $0x460] sm:$0xff] }
  0x1b   : > { %262 = vst [vmem:[%s768_s24 + $0x90] sm:$0xff] %v261_v18  ;;  %264 = vst [vmem:[%s768_s24 + $0x98] sm:$0xff] %v263_v19  ;;  %v267_v21 = vld [vmem:[%s763_s23 + $0x498] sm:$0xff]  ;;  %v269_v22 = vld [vmem:[%s763_s23 + $0x4d0] sm:$0xff] }
  0x1c   : > { %266 = vst [vmem:[%s768_s24 + $0xa0] sm:$0xff] %v265_v20  ;;  %v271_v23 = vld [vmem:[%s763_s23 + $0x508] sm:$0xff]  ;;  %268 = vst [vmem:[%s768_s24 + $0xa8] sm:$0xff] %v267_v21  ;;  %v273_v24 = vld [vmem:[%s763_s23 + $0x540] sm:$0xff] }
  0x1d   : > { %270 = vst [vmem:[%s768_s24 + $0xb0] sm:$0xff] %v269_v22  ;;  %272 = vst [vmem:[%s768_s24 + $0xb8] sm:$0xff] %v271_v23  ;;  %v275_v25 = vld [vmem:[%s763_s23 + $0x578] sm:$0xff]  ;;  %v277_v26 = vld [vmem:[%s763_s23 + $0x5b0] sm:$0xff] }
  0x1e   : > { %274 = vst [vmem:[%s768_s24 + $0xc0] sm:$0xff] %v273_v24  ;;  %276 = vst [vmem:[%s768_s24 + $0xc8] sm:$0xff] %v275_v25  ;;  %v279_v27 = vld [vmem:[%s763_s23 + $0x5e8] sm:$0xff]  ;;  %v281_v28 = vld [vmem:[%s763_s23 + $0x620] sm:$0xff] }
  0x1f   : > { %278 = vst [vmem:[%s768_s24 + $0xd0] sm:$0xff] %v277_v26  ;;  %v283_v29 = vld [vmem:[%s763_s23 + $0x658] sm:$0xff]  ;;  %280 = vst [vmem:[%s768_s24 + $0xd8] sm:$0xff] %v279_v27  ;;  %v285_v30 = vld [vmem:[%s763_s23 + $0x690] sm:$0xff] }
  0x20   : > { %282 = vst [vmem:[%s768_s24 + $0xe0] sm:$0xff] %v281_v28  ;;  %284 = vst [vmem:[%s768_s24 + $0xe8] sm:$0xff] %v283_v29  ;;  %v287_v31 = vld [vmem:[%s763_s23 + $0x6c8] sm:$0xff] }
  0x21   : > { %286 = vst [vmem:[%s768_s24 + $0xf0] sm:$0xff] %v285_v30  ;;  %288 = vst [vmem:[%s768_s24 + $0xf8] sm:$0xff] %v287_v31 }
  0x22 PF: > { %p553_p6 = scmp.ge.s32.totalorder %s703_s13, 1  ;;  %p293_p7 = scmp.lt.s32.totalorder %s703_s13, 8 }
  0x24   : > { %p294_p8 = pnand %p553_p6, %p293_p7 }
  0x25   : > { %s300_s25 = sand.u32 (!%p294_p8), 1, %s687_s9   ;;  %v343_v32 = vld [vmem:[%s894_s0 + $0x8] sm:$0xff] (!%p294_p8)  ;;  %v342_v17 = vld [vmem:[%s894_s0] sm:$0xff] (!%p294_p8)  ;;  %p336_p9 = scmp.lt.s32.totalorder (!%p294_p8), %s695_s11, 6 }
  0x26   : > { %297 = sbr.rel (%p294_p8) target bundleno = 291 (0x123), region = 62  ;;  %s554_s28 = sshll.u32 (!%p294_p8), %s300_s25, 8  ;;  %440 = vmatprep.mubr.f32.mxu0 (!%p294_p8), %v343_v32 }
  0x27   : > { %s837_s29 = scalar_lea.vmem (!%p294_p8), [#allocation2], %s554_s28 }
  0x28   : > { %v360_v33 = vld [vmem:[%s837_s29 + $0x80] sm:$0xff] (!%p294_p8)  ;;  %v361_v34 = vld [vmem:[%s837_s29 + $0x88] sm:$0xff] (!%p294_p8)  ;;  %v362_v38 = vld [vmem:[%s837_s29 + $0x90] sm:$0xff] (!%p294_p8) }
  0x29   : > { %v344_v35 = vld [vmem:[%s837_s29] sm:$0xff] (!%p294_p8)  ;;  %v593_v36 = vpack.c.bf16 (!%p294_p8), %v361_v34, %v360_v33  ;;  %v345_v37 = vld [vmem:[%s837_s29 + $0x8] sm:$0xff] (!%p294_p8)  ;;  %v363_v39 = vld [vmem:[%s837_s29 + $0x98] sm:$0xff] (!%p294_p8) }
  0x2a   : > { %v595_v40 = vpack.c.bf16 (!%p294_p8), %v345_v37, %v344_v35  ;;  %v597_v41 = vpack.c.bf16 (!%p294_p8), %v363_v39, %v362_v38  ;;  %v346_v42 = vld [vmem:[%s837_s29 + $0x10] sm:$0xff] (!%p294_p8)  ;;  %v347_v43 = vld [vmem:[%s837_s29 + $0x18] sm:$0xff] (!%p294_p8)  ;;  %v364_v44 = vld [vmem:[%s837_s29 + $0xa0] sm:$0xff] (!%p294_p8) }
  0x2b   : > { %594 = vmatprep.subr.bf16.mxu0 (!%p294_p8), %v593_v36  ;;  %v365_v45 = vld [vmem:[%s837_s29 + $0xa8] sm:$0xff] (!%p294_p8)  ;;  %v599_v46 = vpack.c.bf16 (!%p294_p8), %v347_v43, %v346_v42  ;;  %v348_v48 = vld [vmem:[%s837_s29 + $0x20] sm:$0xff] (!%p294_p8)  ;;  %v366_v50 = vld [vmem:[%s837_s29 + $0xb0] sm:$0xff] (!%p294_p8) }
  0x2c   : > { %596 = vmatpush3.bf16.msra.mxu0 (!%p294_p8), %v595_v40  ;;  %v601_v47 = vpack.c.bf16 (!%p294_p8), %v365_v45, %v364_v44  ;;  %v349_v49 = vld [vmem:[%s837_s29 + $0x28] sm:$0xff] (!%p294_p8)  ;;  %v367_v51 = vld [vmem:[%s837_s29 + $0xb8] sm:$0xff] (!%p294_p8)  ;;  %v350_v54 = vld [vmem:[%s837_s29 + $0x30] sm:$0xff] (!%p294_p8) }
  0x2d   : > { %598 = vmatprep.subr.bf16.mxu0 %v597_v41  ;;  %v603_v52 = vpack.c.bf16 %v349_v49, %v348_v48  ;;  %v605_v53 = vpack.c.bf16 %v367_v51, %v366_v50  ;;  %v351_v55 = vld [vmem:[%s837_s29 + $0x38] sm:$0xff]  ;;  %v368_v56 = vld [vmem:[%s837_s29 + $0xc0] sm:$0xff]  ;;  %v369_v57 = vld [vmem:[%s837_s29 + $0xc8] sm:$0xff]  ;;  %s904_s11 = smov (!%p336_p9, %s695_s11), 6 }
  0x2e   : > { %v607_v58 = vpack.c.bf16 %v351_v55, %v350_v54  ;;  %v609_v59 = vpack.c.bf16 %v369_v57, %v368_v56  ;;  %v352_v60 = vld [vmem:[%s837_s29 + $0x40] sm:$0xff]  ;;  %v353_v61 = vld [vmem:[%s837_s29 + $0x48] sm:$0xff]  ;;  %v370_v62 = vld [vmem:[%s837_s29 + $0xd0] sm:$0xff]  ;;  %s555_s4 = sshll.u32 %s904_s11, 3 }
  0x2f   : > { %v371_v63 = vld [vmem:[%s837_s29 + $0xd8] sm:$0xff]  ;;  %v611_v0 = vpack.c.bf16 %v353_v61, %v352_v60  ;;  %v354_v2 = vld [vmem:[%s837_s29 + $0x50] sm:$0xff]  ;;  %v372_v4 = vld [vmem:[%s837_s29 + $0xe0] sm:$0xff]  ;;  %s341_s7 = scalar_lea.vmem %s896_s2, %s555_s4 }
  0x30   : > { %600 = vmatpush3.bf16.msra.mxu0 %v599_v46  ;;  %v613_v1 = vpack.c.bf16 %v371_v63, %v370_v62  ;;  %v355_v3 = vld [vmem:[%s837_s29 + $0x58] sm:$0xff]  ;;  %v373_v5 = vld [vmem:[%s837_s29 + $0xe8] sm:$0xff]  ;;  %v356_v8 = vld [vmem:[%s837_s29 + $0x60] sm:$0xff] }
  0x31   : > { %602 = vmatprep.subr.bf16.mxu0 %v601_v47  ;;  %v615_v6 = vpack.c.bf16 %v355_v3, %v354_v2  ;;  %v617_v7 = vpack.c.bf16 %v373_v5, %v372_v4  ;;  %v357_v9 = vld [vmem:[%s837_s29 + $0x68] sm:$0xff]  ;;  %v374_v10 = vld [vmem:[%s837_s29 + $0xf0] sm:$0xff]  ;;  %v375_v11 = vld [vmem:[%s837_s29 + $0xf8] sm:$0xff] }
  0x32   : > { %v619_v12 = vpack.c.bf16 %v357_v9, %v356_v8  ;;  %v621_v13 = vpack.c.bf16 %v375_v11, %v374_v10  ;;  %v358_v14 = vld [vmem:[%s837_s29 + $0x70] sm:$0xff]  ;;  %v359_v15 = vld [vmem:[%s837_s29 + $0x78] sm:$0xff] }
  0x33   : > { %v623_v16 = vpack.c.bf16 %v359_v15, %v358_v14 }
  0x34   : > { %604 = vmatpush3.bf16.msra.mxu0 %v603_v52 }
  0x35   : > { %606 = vmatprep.subr.bf16.mxu0 %v605_v53 }
  0x38   : > { %608 = vmatpush3.bf16.msra.mxu0 %v607_v58 }
  0x39   : > { %610 = vmatprep.subr.bf16.mxu0 %v609_v59 }
  0x3c   : > { %612 = vmatpush3.bf16.msra.mxu0 %v611_v0 }
  0x3d   : > { %614 = vmatprep.subr.bf16.mxu0 %v613_v1 }
  0x40   : > { %616 = vmatpush3.bf16.msra.mxu0 %v615_v6 }
  0x41   : > { %618 = vmatprep.subr.bf16.mxu0 %v617_v7 }
  0x44   : > { %620 = vmatpush3.bf16.msra.mxu0 %v619_v12 }
  0x45   : > { %622 = vmatprep.subr.bf16.mxu0 %v621_v13 }
  0x48   : > { %624 = vmatpush3.bf16.msra.mxu0 %v623_v16 }
  0x4b   : > { %441 = vmatmul.mubr.f32.vlgmr.msra.gmra.mrb[0].mxu0 %v342_v17 }
 0x11e   : > { %v590_v18 = vpop.f32.mrb[0].mxu0 }
 0x11f   : > { %v591_v19 = vpop.f32.mrb[1].mxu0 }
 0x120   : > { %v592_v20 = vadd.f32 %v591_v19, %v590_v18 }
 0x122   : > { %446 = vst [vmem:[%s341_s7] sm:$0xff] %v592_v20 }
 0x123 PF: > { %s12_s13 = sadd.s32 1, %s703_s13   ;;  %s897_s9 = smov %s691_s10 }
 0x124   : > { %p9_p10 = scmp.ge.s32.totalorder %s12_s13, 9   ;;  %s898_s10 = smov %s755_s17 }
 0x125   : > { %s899_s11 = smov %s699_s12  ;;  %s900_s12 = smov %s902_s14 }
 0x126   :  { %11 = sbr.rel (!%p9_p10) target bundleno = 3 (0x3), region = 104 }

// kernel: dccrn_forward.18
= control target key start
LH: loop header
LB: loop body
LE: loop exit
PB: predicated region body
PF: predicated region fallthrough
CT: control target
= control target key end

     0   :  { %vm43_vm2 = vcmask 1041408   ;;  %vm44_vm3 = vcmask 1043458   ;;  %vm46_vm5 = vcmask 1045508   ;;  %vm48_vm6 = vcmask 367622   ;;  %s118_s2 = inlined_call_operand.vmem [shape: f32[2,429], index: 2, kind: input, shape index: {}]   ;;  %s119_s3 = inlined_call_operand.vmem [shape: f32[2,429], index: 3, kind: input, shape index: {}]   ;;  %s120_s0 = inlined_call_operand.vmem [shape: f32[2,429], index: 0, kind: input, shape index: {}]   ;;  %s121_s1 = inlined_call_operand.vmem [shape: f32[2,429], index: 1, kind: input, shape index: {}]   ;;  %s122_s4 = inlined_call_operand.vmem [shape: f32[2,429], index: 4, kind: output, shape index: {0}]   ;;  %s123_s5 = inlined_call_operand.vmem [shape: f32[2,429], index: 5, kind: output, shape index: {1}]  }
   0x1   :  { %v21_v0 = vld [vmem:[%s118_s2] sm:$0xff]  ;;  %vm45_vm4 = vmor %vm44_vm3, %vm43_vm2 }
   0x2   :  { %v22_v1 = vld [vmem:[%s119_s3] sm:$0xff]  ;;  %v23_v2 = vmul.f32 %v21_v0, %v21_v0  ;;  %vm47_vm7 = vmor %vm46_vm5, %vm45_vm4 }
   0x3   :  { %v24_v3 = vmul.f32 %v22_v1, %v22_v1  ;;  %v19_v12 = vld [vmem:[%s120_s0] sm:$0xff]  ;;  %vm49_vm8 = vmor %vm48_vm6, %vm47_vm7 }
   0x4   :  { %v20_v13 = vld [vmem:[%s121_s1] sm:$0xff] }
   0x5   :  { %v25_v4 = vadd.f32 %v24_v3, %v23_v2 }
   0x7   :  { %64 = vrsqrt.f32 %v25_v4  ;;  %vm28_vm0 = vcmp.eq.f32.partialorder %v25_v4, inf  ;;  %v31_v6 = vand.u32 2147483648, %v25_v4  ;;  %vm30_vm1 = vcmp.eq.f32.partialorder %v25_v4, 0.0 }
  0x11   :  { %v65_v5 = vpop.eup %64 }
  0x12   :  { %v27_v7 = vmul.f32 %v65_v5, %v25_v4 }
  0x14   :  { %v29_v8 = vsel %vm28_vm0, %v25_v4, %v27_v7 }
  0x15   :  { %v32_v9 = vsel %vm30_vm1, %v31_v6, %v29_v8 }
  0x16   :  { %v34_v10 = vadd.f32 1e-08, %v32_v9 }
  0x18   :  { %66 = vrcp.f32 %v34_v10 }
  0x19   :  { %68 = vtanh.f32 %v32_v9 }
  0x22   :  { %v67_v11 = vpop.eup %66 }
  0x23   :  { %v37_v14 = vmul.f32 %v67_v11, %v21_v0  ;;  %v38_v15 = vmul.f32 %v67_v11, %v22_v1  ;;  %v69_v20 = vpop.eup %68 }
  0x25   :  { %v39_v16 = vmul.f32 %v37_v14, %v19_v12  ;;  %v40_v17 = vmul.f32 %v38_v15, %v20_v13  ;;  %v51_v18 = vmul.f32 %v37_v14, %v20_v13  ;;  %v52_v19 = vmul.f32 %v38_v15, %v19_v12 }
  0x27   :  { %v41_v21 = vsub.f32 %v39_v16, %v40_v17  ;;  %v53_v22 = vadd.f32 %v52_v19, %v51_v18 }
  0x29   :  { %v42_v23 = vmul.f32 %v69_v20, %v41_v21  ;;  %v54_v24 = vmul.f32 %v69_v20, %v53_v22 }
  0x2b   :  { %50 = vst.msk [vmem:[%s122_s4] sm:$0xff] %vm49_vm8, %v42_v23  ;;  %55 = vst.msk [vmem:[%s123_s5] sm:$0xff] %vm49_vm8, %v54_v24 }

// kernel: integer_pow.1
= control target key start
LH: loop header
LB: loop body
LE: loop exit
PB: predicated region body
PF: predicated region fallthrough
CT: control target
= control target key end

     0   :  { %s34_s0 = inlined_call_operand.vmem [shape: f32[64], index: 0, kind: input, shape index: {}, may-alias: {0,1}]   ;;  %s35_s1 = inlined_call_operand.vmem [shape: f32[64], index: 1, kind: input, shape index: {}, may-alias: {0,1}]   ;;  %s36_s2 = inlined_call_operand.vmem [shape: f32[64], index: 2, kind: output, shape index: {}]  }
   0x1   :  { %v3_v0 = vld [vmem:[%s34_s0] sm:$0x1] }
   0x2   :  { %v4_v1 = vld [vmem:[%s35_s1] sm:$0x1] }
   0x3   :  { %v7_v2 = vmul.f32 %v4_v1, %v3_v0 }
   0x5   :  { %9 = vst [vmem:[%s36_s2] sm:$0x1] %v7_v2 }

// kernel: tile.8
= control target key start
LH: loop header
LB: loop body
LE: loop exit
PB: predicated region body
PF: predicated region fallthrough
CT: control target
= control target key end

     0   :  { %s28_s0 = inlined_call_operand.vmem [shape: f32[64], index: 0, kind: input, shape index: {}]   ;;  %s29_s1 = inlined_call_operand.vmem [shape: f32[13,64], index: 1, kind: output, shape index: {}]  }
   0x1   :  { %v4_v0 = vld [vmem:[%s28_s0] ss:$0 sm:$0xff] }
   0x2   :  { %5 = vst [vmem:[%s29_s1] sm:$0xff] %v4_v0  ;;  %8 = vst [vmem:[%s29_s1 + $0x8] sm:$0xff] %v4_v0 }

</bundles_post_ra>
